<compile_context>
chip_gen: v6e
topology: v6e:2x2x1
jax: 0.10.0
libtpu: 0.0.40
codegen_flags: <defaults>
</compile_context>

<pallas_src>
import math

import numpy as np

import jax
import jax.numpy as jnp
from jax.experimental import pallas as pl
from jax.experimental.pallas import tpu as pltpu

# ----------------------------- scaled-down config -----------------------------
BATCH = 2
N_SAMPLES = 1024             # exp.n_samples (2**15 originally)
STEP = 32                    # exp.step_size
WINDOW = 64                  # exp.window_size
N_FRAMES = N_SAMPLES // STEP  # 32
MODEL_DIM = 32               # exp.model_dim (128 originally)
N_BANDS = 32                 # exp.scale.n_bands
FB_KERNEL = 64               # exp.kernel_size (512 originally)
POS_FREQS = 16
POS_CH = 2 * POS_FREQS + 1   # 33
N_EVENTS = 4                 # n_events (16 originally)
N_ATOM_SAMPLES = 128         # n_atom_samples (2048 originally)
N_ROOMS = 4
DILATIONS = (1, 3, 9, 27, 1)
LEAK = 0.2
WEIGHT_INIT = 0.1

# ConvUpsample / atom-synth geometry
M_START = 8                                             # ConvUpsample start size
N_UP_TIME = int(math.log2(N_FRAMES // M_START))         # 2 transposed-conv layers
N_UP_NET = int(math.log2(N_ATOM_SAMPLES // M_START))    # 4 transposed-conv layers
P_TIME = N_FRAMES // M_START                            # 4  final phase count (time)
P_NET = N_ATOM_SAMPLES // M_START                       # 16 final phase count (atoms)
ROWS = M_START * N_EVENTS                               # 32 rows per phase array (u-major)
CTX_LAYERS = len(DILATIONS)

assert M_START * P_TIME == N_FRAMES and M_START * P_NET == N_ATOM_SAMPLES

BF = jnp.bfloat16
F32 = jnp.float32


# ----------------------------- in-kernel helpers -------------------------------
def _lrelu(v):
    return jnp.where(v > 0, v, LEAK * v)


def _shift_rows(v, rows):
    """out[r] = v[r + rows], zero-padded out of range. `rows` is static."""
    if rows == 0:
        return v
    z = jnp.zeros((abs(rows), v.shape[1]), v.dtype)
    if rows > 0:
        return jnp.concatenate([v[rows:, :], z], axis=0)
    return jnp.concatenate([z, v[:rows, :]], axis=0)


def _example_norm_2d(v, eps=1e-8):
    """Per-example normalization by std (ddof=1) over all elements of a 2D slab."""
    n = v.shape[0] * v.shape[1]
    s = jnp.sum(jnp.sum(v, axis=1, keepdims=True), axis=0, keepdims=True)
    mean = s * (1.0 / n)
    d = v - mean
    var = jnp.sum(jnp.sum(d * d, axis=1, keepdims=True), axis=0, keepdims=True) * (1.0 / (n - 1))
    return v * pl.reciprocal(jnp.sqrt(var) + eps, approx=True)


# ----------------------------- kernel 1: encoder --------------------------------
def _encoder_kernel(pp_ref, fbw_ref, wrs_ref, posp_ref, wd_ref, bd_ref, w1_ref, b1_ref,
                    out_ref):
    # One grid program per batch element ("parallel" -> both v7x TensorCores busy).
    pooled = pp_ref[0]                                                 # [F, K] f32 (pre-pooled)
    # filterbank conv + temporal pooling collapsed into one tiny bf16 matmul
    spec = jnp.dot(pooled.astype(BF), fbw_ref[...],
                   preferred_element_type=F32)                         # [F, NB]
    spec = _example_norm_2d(spec)
    # reduce 1x1 conv; positional-feature projection is a constant, precomputed outside
    h = jnp.dot(spec.astype(BF), wrs_ref[...],
                preferred_element_type=F32) + posp_ref[...]            # [F, D]
    # dilated residual stack: tap-fused [F, 3D] x [3D, D] bf16 matmuls, VMEM resident
    for l, d in enumerate(DILATIONS):
        cat = jnp.concatenate([_shift_rows(h, -d), h, _shift_rows(h, d)], axis=1)
        acc = jnp.dot(cat.astype(BF), wd_ref[l], preferred_element_type=F32) + bd_ref[l]
        y = jnp.dot(acc.astype(BF), w1_ref[l], preferred_element_type=F32) + b1_ref[l]
        h = _lrelu(y + h)                                              # residual + leaky
    out_ref[0] = _example_norm_2d(h)


def encoder_call(pk, pooled):
    return pl.pallas_call(
        _encoder_kernel,
        out_shape=jax.ShapeDtypeStruct((BATCH, N_FRAMES, MODEL_DIM), F32),
        grid=(BATCH,),
        in_specs=[
            pl.BlockSpec((1, N_FRAMES, FB_KERNEL), lambda i: (i, 0, 0)),
            pl.BlockSpec((FB_KERNEL, N_BANDS), lambda i: (0, 0)),
            pl.BlockSpec((N_BANDS, MODEL_DIM), lambda i: (0, 0)),
            pl.BlockSpec((N_FRAMES, MODEL_DIM), lambda i: (0, 0)),
            pl.BlockSpec((CTX_LAYERS, 3 * MODEL_DIM, MODEL_DIM), lambda i: (0, 0, 0)),
            pl.BlockSpec((CTX_LAYERS, 1, MODEL_DIM), lambda i: (0, 0, 0)),
            pl.BlockSpec((CTX_LAYERS, MODEL_DIM, MODEL_DIM), lambda i: (0, 0, 0)),
            pl.BlockSpec((CTX_LAYERS, 1, MODEL_DIM), lambda i: (0, 0, 0)),
        ],
        out_specs=pl.BlockSpec((1, N_FRAMES, MODEL_DIM), lambda i: (i, 0, 0)),
        compiler_params=pltpu.CompilerParams(dimension_semantics=("parallel",)),
    )(pooled, pk["fbw"], pk["wr_spec"], pk["pos_proj"],
      pk["ctx_wd"], pk["ctx_bd"], pk["ctx_w1"], pk["ctx_b1"])


# ------------------- kernel 2: fused heads + AtomSynth ---------------------------
# ConvTranspose1d(C, C, 4, 2, 1) in polyphase form: the length-(M_START * P) signal is
# carried as P phase arrays [ROWS, C] (row = u * N_EVENTS + event).  Each layer step is
# a single [ROWS, 3C] x [3C, 2C] bf16 matmul producing the even|odd output phases.
def _begin(x, wb_ref, bb_ref):
    # ConvUpsample 'begin' Linear(D -> C*start) as ONE wide matmul, then u-major reorder.
    C = MODEL_DIM
    y = jnp.dot(x.astype(BF), wb_ref[...], preferred_element_type=F32) + bb_ref[...]
    return jnp.concatenate([y[:, u * C:(u + 1) * C] for u in range(M_START)], axis=0)


def _up_layers(phases, w_ref, b_ref, n_layers):
    C = MODEL_DIM
    for l in range(n_layers):
        w = w_ref[l]                                                   # [3C, 2C] bf16
        b2 = b_ref[l]                                                  # [1, 2C]  f32
        p_cnt = len(phases)
        nxt = []
        for p in range(p_cnt):
            x0 = phases[p]
            xm1 = phases[p - 1] if p >= 1 else _shift_rows(phases[p_cnt - 1], -N_EVENTS)
            xp1 = phases[p + 1] if p + 1 < p_cnt else _shift_rows(phases[0], N_EVENTS)
            cat = jnp.concatenate([xm1, x0, xp1], axis=1)              # [ROWS, 3C]
            y = _lrelu(jnp.dot(cat.astype(BF), w, preferred_element_type=F32) + b2)
            nxt.append(y[:, :C])                                       # even phase
            nxt.append(y[:, C:])                                       # odd phase
        phases = nxt
    return phases


def _final_conv(phases, wf_ref, bf_ref):
    # Conv1d(C -> 1, k=3, pad=1): one row-stacked [P*ROWS, 3C] x [3C, 1] matmul, then a
    # static-slice reorder to the lane-dense [N_EVENTS, M_START*P] signal layout.
    p_cnt = len(phases)
    rows = []
    for p in range(p_cnt):
        x0 = phases[p]
        xm1 = phases[p - 1] if p >= 1 else _shift_rows(phases[p_cnt - 1], -N_EVENTS)
        xp1 = phases[p + 1] if p + 1 < p_cnt else _shift_rows(phases[0], N_EVENTS)
        rows.append(jnp.concatenate([xm1, x0, xp1], axis=1))
    big = jnp.concatenate(rows, axis=0)                                # [P*ROWS, 3C]
    y = jnp.dot(big.astype(BF), wf_ref[...], preferred_element_type=F32) + bf_ref[...]
    cols = jnp.concatenate([y[p * ROWS:(p + 1) * ROWS, :] for p in range(p_cnt)], axis=1)
    out = jnp.concatenate(
        [cols[u * N_EVENTS:(u + 1) * N_EVENTS, :] for u in range(M_START)], axis=1)
    return out                                                         # [E, M_START*P]


def _synth_kernel(ev_ref,
                  awh_ref, abh_ref, awo_ref, abo_ref,
                  mwh_ref, mbh_ref, mwo_ref, mbo_ref,
                  rwh_ref, rbh_ref, rwo_ref, rbo_ref,
                  tbw_ref, tbb_ref, tuw_ref, tub_ref, tfw_ref, tfb_ref,
                  nbw_ref, nbb_ref, nuw_ref, nub_ref, nfw_ref, nfb_ref,
                  t_ref, atom_ref, mix_ref, room_ref):
    ev = ev_ref[0]                                                     # [E, D] f32
    # VectorwiseSparsity unit-normalisation
    ssq = jnp.sum(ev * ev, axis=-1, keepdims=True)
    evn = ev * pl.reciprocal(jnp.sqrt(ssq) + 1e-8, approx=True)

    # ---- verb params + mix / room heads (folded in; no separate launch) ----
    verb = jnp.max(evn, axis=0, keepdims=True)                         # [1, D]
    hm = verb
    for l in range(2):
        hm = _lrelu(jnp.dot(hm.astype(BF), mwh_ref[l], preferred_element_type=F32)
                    + mbh_ref[l])
    mix_ref[0] = jax.nn.sigmoid(
        jnp.sum(hm * mwo_ref[...], axis=1, keepdims=True) + mbo_ref[...])   # VPU sum, N=1
    hr = verb
    for l in range(2):
        hr = _lrelu(jnp.dot(hr.astype(BF), rwh_ref[l], preferred_element_type=F32)
                    + rbh_ref[l])
    room_ref[0] = (jnp.dot(hr.astype(BF), rwo_ref[...], preferred_element_type=F32)
                   + rbo_ref[...])

    # ---- amp head: 3 hidden bf16 matmuls + VPU weighted sum, squared ----
    ha = evn
    for l in range(3):
        ha = _lrelu(jnp.dot(ha.astype(BF), awh_ref[l], preferred_element_type=F32)
                    + abh_ref[l])
    amp = jnp.sum(ha * awo_ref[...], axis=1, keepdims=True) + abo_ref[...]   # [E, 1]
    amp2 = amp * amp

    # ---- time branch: begin -> 2 up layers -> final conv (logits) ----
    ph = [_begin(evn, tbw_ref, tbb_ref)]
    ph = _up_layers(ph, tuw_ref, tub_ref, N_UP_TIME)
    t_ref[0] = _final_conv(ph, tfw_ref, tfb_ref)                       # [E, N_FRAMES]

    # ---- atom branch: begin -> 4 up layers -> final conv -> tanh * amp^2 ----
    ph = [_begin(evn, nbw_ref, nbb_ref)]
    ph = _up_layers(ph, nuw_ref, nub_ref, N_UP_NET)
    raw = _final_conv(ph, nfw_ref, nfb_ref)                            # [E, N_ATOM_SAMPLES]
    atom_ref[0] = jnp.tanh(raw) * amp2


def synth_call(pk, events):
    D = MODEL_DIM

    def full2(r, c):
        return pl.BlockSpec((r, c), lambda i: (0, 0))

    def full3(a, r, c):
        return pl.BlockSpec((a, r, c), lambda i: (0, 0, 0))

    return pl.pallas_call(
        _synth_kernel,
        out_shape=(jax.ShapeDtypeStruct((BATCH, N_EVENTS, N_FRAMES), F32),
                   jax.ShapeDtypeStruct((BATCH, N_EVENTS, N_ATOM_SAMPLES), F32),
                   jax.ShapeDtypeStruct((BATCH, 1, 1), F32),
                   jax.ShapeDtypeStruct((BATCH, 1, N_ROOMS), F32)),
        grid=(BATCH,),
        in_specs=[
            pl.BlockSpec((1, N_EVENTS, D), lambda i: (i, 0, 0)),
            full3(3, D, D), full3(3, 1, D), full2(1, D), full2(1, 1),            # amp
            full3(2, D, D), full3(2, 1, D), full2(1, D), full2(1, 1),            # mix
            full3(2, D, D), full3(2, 1, D), full2(D, N_ROOMS), full2(1, N_ROOMS),  # room
            full2(D, M_START * D), full2(1, M_START * D),                        # time begin
            full3(N_UP_TIME, 3 * D, 2 * D), full3(N_UP_TIME, 1, 2 * D),          # time up
            full2(3 * D, 1), full2(1, 1),                                        # time final
            full2(D, M_START * D), full2(1, M_START * D),                        # atom begin
            full3(N_UP_NET, 3 * D, 2 * D), full3(N_UP_NET, 1, 2 * D),            # atom up
            full2(3 * D, 1), full2(1, 1),                                        # atom final
        ],
        out_specs=(pl.BlockSpec((1, N_EVENTS, N_FRAMES), lambda i: (i, 0, 0)),
                   pl.BlockSpec((1, N_EVENTS, N_ATOM_SAMPLES), lambda i: (i, 0, 0)),
                   pl.BlockSpec((1, 1, 1), lambda i: (i, 0, 0)),
                   pl.BlockSpec((1, 1, N_ROOMS), lambda i: (i, 0, 0))),
        compiler_params=pltpu.CompilerParams(dimension_semantics=("parallel",)),
    )(events,
      pk["amp_wh"], pk["amp_bh"], pk["amp_wo"], pk["amp_bo"],
      pk["mix_wh"], pk["mix_bh"], pk["mix_wo"], pk["mix_bo"],
      pk["room_wh"], pk["room_bh"], pk["room_wo"], pk["room_bo"],
      pk["t_beg_w"], pk["t_beg_b"], pk["t_up_w"], pk["t_up_b"], pk["t_fin_w"], pk["t_fin_b"],
      pk["n_beg_w"], pk["n_beg_b"], pk["n_up_w"], pk["n_up_b"], pk["n_fin_w"], pk["n_fin_b"])


# ----------------------------- plain-JAX glue ------------------------------------
def fft_convolve(a, b):
    # TODO(synk): FFT has no Pallas primitive; linear conv via jnp.fft, truncated to n.
    n = a.shape[-1]
    pad = [(0, 0)] * (a.ndim - 1) + [(0, n)]
    spec = jnp.fft.rfft(jnp.pad(a, pad), axis=-1) * jnp.fft.rfft(jnp.pad(b, pad), axis=-1)
    return jnp.fft.irfft(spec, n=2 * n, axis=-1)[..., :n]


def gumbel_hard(key, logits, tau=1.0):
    # TODO(synk): forward value of F.gumbel_softmax(hard=True) only (no straight-through grad).
    u = jax.random.uniform(key, logits.shape, minval=1e-6, maxval=1.0 - 1e-6)
    g = -jnp.log(-jnp.log(u))
    idx = jnp.argmax((logits + g) / tau, axis=-1)
    return jax.nn.one_hot(idx, logits.shape[-1], dtype=logits.dtype), idx


def vectorwise_topk(h):
    """h: [B, F, D] channels-last -> top-N_EVENTS frame vectors (unnormalized)."""
    norms = jnp.sqrt(jnp.sum(h * h, axis=-1))
    _, idx = jax.lax.top_k(norms, N_EVENTS)
    return jnp.take_along_axis(h, idx[:, :, None], axis=1)            # [B, E, D]


# ----------------------------- parameters ----------------------------------------
def init_model_params(key):
    keys = iter(jax.random.split(key, 64))

    def u(shape):
        return jax.random.uniform(next(keys), shape, F32, -WEIGHT_INIT, WEIGHT_INIT)

    # fixed positional-encoding buffer [F, 33]
    pos = np.linspace(-1.0, 1.0, N_FRAMES)[:, None]
    feats = [pos]
    for i in range(POS_FREQS):
        feats.append(np.sin(pos * (2.0 ** i) * np.pi))
        feats.append(np.cos(pos * (2.0 ** i) * np.pi))
    pos_feat = jnp.asarray(np.concatenate(feats, axis=-1), F32)

    return {
        # TODO(synk): synthetic filterbank / IRs instead of morlet bank + IR files.
        "fbw": u((FB_KERNEL, N_BANDS)),
        "pos": pos_feat,
        "wr_spec": u((N_BANDS, MODEL_DIM)),
        "wr_pos": u((POS_CH, MODEL_DIM)),
        "br": u((1, MODEL_DIM)),
        "ctx_wd": u((CTX_LAYERS, 3, MODEL_DIM, MODEL_DIM)),
        "ctx_bd": u((CTX_LAYERS, 1, MODEL_DIM)),
        "ctx_w1": u((CTX_LAYERS, MODEL_DIM, MODEL_DIM)),
        "ctx_b1": u((CTX_LAYERS, 1, MODEL_DIM)),
        "mix_wh": u((2, MODEL_DIM, MODEL_DIM)), "mix_bh": u((2, 1, MODEL_DIM)),
        "mix_wo": u((MODEL_DIM, 1)), "mix_bo": u((1, 1)),
        "room_wh": u((2, MODEL_DIM, MODEL_DIM)), "room_bh": u((2, 1, MODEL_DIM)),
        "room_wo": u((MODEL_DIM, N_ROOMS)), "room_bo": u((1, N_ROOMS)),
        "amp_wh": u((3, MODEL_DIM, MODEL_DIM)), "amp_bh": u((3, 1, MODEL_DIM)),
        "amp_wo": u((MODEL_DIM, 1)), "amp_bo": u((1, 1)),
        "t_beg_w": u((M_START, MODEL_DIM, MODEL_DIM)), "t_beg_b": u((M_START, 1, MODEL_DIM)),
        "t_up_w": u((N_UP_TIME, 4, MODEL_DIM, MODEL_DIM)), "t_up_b": u((N_UP_TIME, 1, MODEL_DIM)),
        "t_fin_w": u((3, MODEL_DIM, 1)), "t_fin_b": u((1, 1)),
        "n_beg_w": u((M_START, MODEL_DIM, MODEL_DIM)), "n_beg_b": u((M_START, 1, MODEL_DIM)),
        "n_up_w": u((N_UP_NET, 4, MODEL_DIM, MODEL_DIM)), "n_up_b": u((N_UP_NET, 1, MODEL_DIM)),
        "n_fin_w": u((3, MODEL_DIM, 1)), "n_fin_b": u((1, 1)),
        "impulses": u((N_ROOMS, N_SAMPLES)),
    }


def pack_params(p):
    """Pre-stack / pre-cast weights into the layouts the fused kernels consume."""
    D = MODEL_DIM

    def bf(a):
        return a.astype(BF)

    def stack_up(w):                     # [L,4,C,C] -> [L, 3C, 2C] (even|odd columns)
        zero = jnp.zeros_like(w[:, 0])
        even = jnp.concatenate([w[:, 3], w[:, 1], zero], axis=1)
        odd = jnp.concatenate([zero, w[:, 2], w[:, 0]], axis=1)
        return jnp.concatenate([even, odd], axis=2)

    def stack_begin_w(w):                # [M,D,C] -> [D, M*C]
        return w.transpose(1, 0, 2).reshape(D, M_START * D)

    def stack_begin_b(b):                # [M,1,C] -> [1, M*C]
        return b.transpose(1, 0, 2).reshape(1, M_START * D)

    return {
        "fbw": bf(p["fbw"]),
        "wr_spec": bf(p["wr_spec"]),
        "pos_proj": p["pos"] @ p["wr_pos"] + p["br"],          # constant pos projection
        "ctx_wd": bf(p["ctx_wd"].reshape(CTX_LAYERS, 3 * D, D)),
        "ctx_bd": p["ctx_bd"],
        "ctx_w1": bf(p["ctx_w1"]),
        "ctx_b1": p["ctx_b1"],
        "amp_wh": bf(p["amp_wh"]), "amp_bh": p["amp_bh"],
        "amp_wo": p["amp_wo"].T, "amp_bo": p["amp_bo"],
        "mix_wh": bf(p["mix_wh"]), "mix_bh": p["mix_bh"],
        "mix_wo": p["mix_wo"].T, "mix_bo": p["mix_bo"],
        "room_wh": bf(p["room_wh"]), "room_bh": p["room_bh"],
        "room_wo": bf(p["room_wo"]), "room_bo": p["room_bo"],
        "t_beg_w": bf(stack_begin_w(p["t_beg_w"])), "t_beg_b": stack_begin_b(p["t_beg_b"]),
        "t_up_w": bf(stack_up(p["t_up_w"])),
        "t_up_b": jnp.concatenate([p["t_up_b"], p["t_up_b"]], axis=-1),
        "t_fin_w": bf(p["t_fin_w"].reshape(3 * D, 1)), "t_fin_b": p["t_fin_b"],
        "n_beg_w": bf(stack_begin_w(p["n_beg_w"])), "n_beg_b": stack_begin_b(p["n_beg_b"]),
        "n_up_w": bf(stack_up(p["n_up_w"])),
        "n_up_b": jnp.concatenate([p["n_up_b"], p["n_up_b"]], axis=-1),
        "n_fin_w": bf(p["n_fin_w"].reshape(3 * D, 1)), "n_fin_b": p["n_fin_b"],
        "impulses": p["impulses"],
    }


# ----------------------------- Model forward --------------------------------------
def model_forward(pk, x, key):
    """x: [B, 1, N_SAMPLES] -> [B, 1, N_SAMPLES]."""
    b = x.shape[0]
    # avg_pool commutes with the linear filterbank conv: pool im2col patches to [F, K]
    # (tiny) in XLA so the encoder kernel only sees 8 KiB per example.
    xpad = jnp.pad(x[:, 0, :], ((0, 0), (FB_KERNEL // 2, FB_KERNEL // 2 - 1)))
    idx = jnp.arange(N_SAMPLES)[:, None] + jnp.arange(FB_KERNEL)[None, :]
    patches = xpad[:, idx]                                             # [B, N, K]
    csum = patches.reshape(b, N_FRAMES, STEP, FB_KERNEL).sum(axis=2)   # [B, F, K]
    prev = jnp.pad(csum, ((0, 0), (1, 0), (0, 0)))[:, :N_FRAMES]
    pooled = (csum + prev) * (1.0 / WINDOW)                            # window=64, stride=32

    h = encoder_call(pk, pooled)                                       # [B, F, D]
    events = vectorwise_topk(h)                                        # [B, E, D]

    t_out, atom_out, mix_out, room_out = synth_call(pk, events)
    t_logits = t_out.reshape(b * N_EVENTS, N_FRAMES)
    atoms = atom_out.reshape(b * N_EVENTS, N_ATOM_SAMPLES)
    mx = mix_out.reshape(b, 1)
    room_logits = room_out.reshape(b, N_ROOMS)

    key, k_room, k_time = jax.random.split(key, 3)
    t_hard, _ = gumbel_hard(k_time, t_logits)
    factor = N_SAMPLES // N_FRAMES
    full = jnp.zeros((b * N_EVENTS, N_SAMPLES), F32).at[:, ::factor].set(t_hard)
    atoms_p = jnp.pad(atoms, ((0, 0), (0, N_SAMPLES - N_ATOM_SAMPLES)))
    located = fft_convolve(atoms_p, full).reshape(b, N_EVENTS, N_SAMPLES)

    dry = jnp.sum(located, axis=1)                                     # [B, N]  (XLA glue)
    _, room_idx = gumbel_hard(k_room, room_logits)
    imp = jnp.take(pk["impulses"], room_idx, axis=0)                   # hard one-hot -> gather
    wet = fft_convolve(dry, imp)
    out = mx * wet + (1.0 - mx) * dry                                  # wet/dry mix (XLA glue)
    return out[:, None, :]


# ----------------------------- main -----------------------------------------------
if __name__ == "__main__":
    root = jax.random.PRNGKey(0)
    pkey, xkey, gkey = jax.random.split(root, 3)
    params = init_model_params(pkey)
    packed = pack_params(params)
    x = jax.random.normal(xkey, (BATCH, 1, N_SAMPLES), jnp.float32)

    fwd = jax.jit(model_forward)
    out = jax.block_until_ready(fwd(packed, x, gkey))

    assert out.shape == (BATCH, 1, N_SAMPLES), out.shape
    assert bool(jnp.all(jnp.isfinite(out)))
    print("KERNEL_OK")
</pallas_src>

<mosaic_0001>
module attributes {stable_mosaic.version = 11 : i64} {
  func.func @_encoder_kernel(%arg0: i32, %arg1: memref<1x32x64xf32, #tpu.memory_space<vmem>>, %arg2: memref<64x32xbf16, #tpu.memory_space<vmem>>, %arg3: memref<32x32xbf16, #tpu.memory_space<vmem>>, %arg4: memref<32x32xf32, #tpu.memory_space<vmem>>, %arg5: memref<5x96x32xbf16, #tpu.memory_space<vmem>>, %arg6: memref<5x1x32xf32, #tpu.memory_space<vmem>>, %arg7: memref<5x32x32xbf16, #tpu.memory_space<vmem>>, %arg8: memref<5x1x32xf32, #tpu.memory_space<vmem>>, %arg9: memref<1x32x32xf32, #tpu.memory_space<vmem>>) attributes {dimension_semantics = [#tpu.dimension_semantics<parallel>], iteration_bounds = array<i64: 2>, scalar_prefetch = 0 : i64, scratch_operands = 0 : i64, tpu.core_type = #tpu.core_type<tc>, window_params = [{transform_indices = @transform_0, window_bounds = array<i64: 1, 32, 64>}, {pipeline_mode = #tpu.pipeline_mode<synchronous>, transform_indices = @transform_1, window_bounds = array<i64: 64, 32>}, {pipeline_mode = #tpu.pipeline_mode<synchronous>, transform_indices = @transform_2, window_bounds = array<i64: 32, 32>}, {pipeline_mode = #tpu.pipeline_mode<synchronous>, transform_indices = @transform_3, window_bounds = array<i64: 32, 32>}, {pipeline_mode = #tpu.pipeline_mode<synchronous>, transform_indices = @transform_4, window_bounds = array<i64: 5, 96, 32>}, {pipeline_mode = #tpu.pipeline_mode<synchronous>, transform_indices = @transform_5, window_bounds = array<i64: 5, 1, 32>}, {pipeline_mode = #tpu.pipeline_mode<synchronous>, transform_indices = @transform_6, window_bounds = array<i64: 5, 32, 32>}, {pipeline_mode = #tpu.pipeline_mode<synchronous>, transform_indices = @transform_7, window_bounds = array<i64: 5, 1, 32>}, {transform_indices = @transform_8, window_bounds = array<i64: 1, 32, 32>}]} {
    %c0 = arith.constant 0 : index
    %c0_0 = arith.constant 0 : index
    %c0_1 = arith.constant 0 : index
    %0 = vector.load %arg1[%c0, %c0_0, %c0_1] : memref<1x32x64xf32, #tpu.memory_space<vmem>>, vector<1x32x64xf32>
    %1 = vector.shape_cast %0 : vector<1x32x64xf32> to vector<32x64xf32>
    %2 = arith.truncf %1 : vector<32x64xf32> to vector<32x64xbf16>
    %c0_2 = arith.constant 0 : index
    %c0_3 = arith.constant 0 : index
    %3 = vector.load %arg2[%c0_2, %c0_3] : memref<64x32xbf16, #tpu.memory_space<vmem>>, vector<64x32xbf16>
    %cst = arith.constant dense<0.000000e+00> : vector<32x32xf32>
    %4 = tpu.matmul %2, %3, %cst {dimension_numbers = #tpu.dot_dimension_numbers<[1], [0], [0], [1], [0, 0, 1, 1], [], []>} : vector<32x64xbf16>, vector<64x32xbf16>, vector<32x32xf32> -> vector<32x32xf32>
    %cst_4 = arith.constant dense<0.000000e+00> : vector<32xf32>
    %5 = vector.multi_reduction <add>, %4, %cst_4 [1] : vector<32x32xf32> to vector<32xf32>
    %6 = vector.shape_cast %5 : vector<32xf32> to vector<32x1xf32>
    %cst_5 = arith.constant dense<0.000000e+00> : vector<1xf32>
    %7 = vector.multi_reduction <add>, %6, %cst_5 [0] : vector<32x1xf32> to vector<1xf32>
    %8 = vector.shape_cast %7 : vector<1xf32> to vector<1x1xf32>
    %cst_6 = arith.constant 9.765625E-4 : f32
    %9 = vector.broadcast %cst_6 : f32 to vector<1x1xf32>
    %10 = arith.mulf %8, %9 : vector<1x1xf32>
    %11 = vector.broadcast %10 : vector<1x1xf32> to vector<32x32xf32>
    %12 = arith.subf %4, %11 : vector<32x32xf32>
    %13 = arith.mulf %12, %12 : vector<32x32xf32>
    %cst_7 = arith.constant dense<0.000000e+00> : vector<32xf32>
    %14 = vector.multi_reduction <add>, %13, %cst_7 [1] : vector<32x32xf32> to vector<32xf32>
    %15 = vector.shape_cast %14 : vector<32xf32> to vector<32x1xf32>
    %cst_8 = arith.constant dense<0.000000e+00> : vector<1xf32>
    %16 = vector.multi_reduction <add>, %15, %cst_8 [0] : vector<32x1xf32> to vector<1xf32>
    %17 = vector.shape_cast %16 : vector<1xf32> to vector<1x1xf32>
    %cst_9 = arith.constant 9.77517105E-4 : f32
    %18 = vector.broadcast %cst_9 : f32 to vector<1x1xf32>
    %19 = arith.mulf %17, %18 : vector<1x1xf32>
    %20 = math.sqrt %19 : vector<1x1xf32>
    %cst_10 = arith.constant 9.99999993E-9 : f32
    %21 = vector.broadcast %cst_10 : f32 to vector<1x1xf32>
    %22 = arith.addf %20, %21 : vector<1x1xf32>
    %23 = tpu.reciprocal %22 {approx = true} : vector<1x1xf32> -> vector<1x1xf32>
    %24 = vector.broadcast %23 : vector<1x1xf32> to vector<32x32xf32>
    %25 = arith.mulf %4, %24 : vector<32x32xf32>
    %26 = arith.truncf %25 : vector<32x32xf32> to vector<32x32xbf16>
    %c0_11 = arith.constant 0 : index
    %c0_12 = arith.constant 0 : index
    %27 = vector.load %arg3[%c0_11, %c0_12] : memref<32x32xbf16, #tpu.memory_space<vmem>>, vector<32x32xbf16>
    %cst_13 = arith.constant dense<0.000000e+00> : vector<32x32xf32>
    %28 = tpu.matmul %26, %27, %cst_13 {dimension_numbers = #tpu.dot_dimension_numbers<[1], [0], [0], [1], [0, 0, 1, 1], [], []>} : vector<32x32xbf16>, vector<32x32xbf16>, vector<32x32xf32> -> vector<32x32xf32>
    %c0_14 = arith.constant 0 : index
    %c0_15 = arith.constant 0 : index
    %29 = vector.load %arg4[%c0_14, %c0_15] : memref<32x32xf32, #tpu.memory_space<vmem>>, vector<32x32xf32>
    %30 = arith.addf %28, %29 : vector<32x32xf32>
    %cst_16 = arith.constant 0.000000e+00 : f32
    %31 = vector.broadcast %cst_16 : f32 to vector<1x32xf32>
    %32 = vector.extract_strided_slice %30 {offsets = [0, 0], sizes = [31, 32], strides = [1, 1]} : vector<32x32xf32> to vector<31x32xf32>
    %33 = tpu.concatenate %31, %32 in 0 : vector<1x32xf32>, vector<31x32xf32> -> vector<32x32xf32>
    %cst_17 = arith.constant 0.000000e+00 : f32
    %34 = vector.broadcast %cst_17 : f32 to vector<1x32xf32>
    %35 = vector.extract_strided_slice %30 {offsets = [1, 0], sizes = [31, 32], strides = [1, 1]} : vector<32x32xf32> to vector<31x32xf32>
    %36 = tpu.concatenate %35, %34 in 0 : vector<31x32xf32>, vector<1x32xf32> -> vector<32x32xf32>
    %37 = tpu.concatenate %33, %30, %36 in 1 : vector<32x32xf32>, vector<32x32xf32>, vector<32x32xf32> -> vector<32x96xf32>
    %38 = arith.truncf %37 : vector<32x96xf32> to vector<32x96xbf16>
    %c0_18 = arith.constant 0 : index
    %c0_19 = arith.constant 0 : index
    %c0_20 = arith.constant 0 : index
    %39 = vector.load %arg5[%c0_18, %c0_19, %c0_20] : memref<5x96x32xbf16, #tpu.memory_space<vmem>>, vector<1x96x32xbf16>
    %40 = vector.shape_cast %39 : vector<1x96x32xbf16> to vector<96x32xbf16>
    %cst_21 = arith.constant dense<0.000000e+00> : vector<32x32xf32>
    %41 = tpu.matmul %38, %40, %cst_21 {dimension_numbers = #tpu.dot_dimension_numbers<[1], [0], [0], [1], [0, 0, 1, 1], [], []>} : vector<32x96xbf16>, vector<96x32xbf16>, vector<32x32xf32> -> vector<32x32xf32>
    %c0_22 = arith.constant 0 : index
    %c0_23 = arith.constant 0 : index
    %c0_24 = arith.constant 0 : index
    %42 = vector.load %arg6[%c0_22, %c0_23, %c0_24] : memref<5x1x32xf32, #tpu.memory_space<vmem>>, vector<1x1x32xf32>
    %43 = vector.shape_cast %42 : vector<1x1x32xf32> to vector<1x32xf32>
    %44 = vector.broadcast %43 : vector<1x32xf32> to vector<32x32xf32>
    %45 = arith.addf %41, %44 : vector<32x32xf32>
    %46 = arith.truncf %45 : vector<32x32xf32> to vector<32x32xbf16>
    %c0_25 = arith.constant 0 : index
    %c0_26 = arith.constant 0 : index
    %c0_27 = arith.constant 0 : index
    %47 = vector.load %arg7[%c0_25, %c0_26, %c0_27] : memref<5x32x32xbf16, #tpu.memory_space<vmem>>, vector<1x32x32xbf16>
    %48 = vector.shape_cast %47 : vector<1x32x32xbf16> to vector<32x32xbf16>
    %cst_28 = arith.constant dense<0.000000e+00> : vector<32x32xf32>
    %49 = tpu.matmul %46, %48, %cst_28 {dimension_numbers = #tpu.dot_dimension_numbers<[1], [0], [0], [1], [0, 0, 1, 1], [], []>} : vector<32x32xbf16>, vector<32x32xbf16>, vector<32x32xf32> -> vector<32x32xf32>
    %c0_29 = arith.constant 0 : index
    %c0_30 = arith.constant 0 : index
    %c0_31 = arith.constant 0 : index
    %50 = vector.load %arg8[%c0_29, %c0_30, %c0_31] : memref<5x1x32xf32, #tpu.memory_space<vmem>>, vector<1x1x32xf32>
    %51 = vector.shape_cast %50 : vector<1x1x32xf32> to vector<1x32xf32>
    %52 = vector.broadcast %51 : vector<1x32xf32> to vector<32x32xf32>
    %53 = arith.addf %49, %52 : vector<32x32xf32>
    %54 = arith.addf %53, %30 : vector<32x32xf32>
    %cst_32 = arith.constant 0.000000e+00 : f32
    %55 = vector.broadcast %cst_32 : f32 to vector<32x32xf32>
    %56 = arith.cmpf ogt, %54, %55 : vector<32x32xf32>
    %cst_33 = arith.constant 2.000000e-01 : f32
    %57 = vector.broadcast %cst_33 : f32 to vector<32x32xf32>
    %58 = arith.mulf %57, %54 : vector<32x32xf32>
    %59 = arith.select %56, %54, %58 : vector<32x32xi1>, vector<32x32xf32>
    %cst_34 = arith.constant 0.000000e+00 : f32
    %60 = vector.broadcast %cst_34 : f32 to vector<3x32xf32>
    %61 = vector.extract_strided_slice %59 {offsets = [0, 0], sizes = [29, 32], strides = [1, 1]} : vector<32x32xf32> to vector<29x32xf32>
    %62 = tpu.concatenate %60, %61 in 0 : vector<3x32xf32>, vector<29x32xf32> -> vector<32x32xf32>
    %cst_35 = arith.constant 0.000000e+00 : f32
    %63 = vector.broadcast %cst_35 : f32 to vector<3x32xf32>
    %64 = vector.extract_strided_slice %59 {offsets = [3, 0], sizes = [29, 32], strides = [1, 1]} : vector<32x32xf32> to vector<29x32xf32>
    %65 = tpu.concatenate %64, %63 in 0 : vector<29x32xf32>, vector<3x32xf32> -> vector<32x32xf32>
    %66 = tpu.concatenate %62, %59, %65 in 1 : vector<32x32xf32>, vector<32x32xf32>, vector<32x32xf32> -> vector<32x96xf32>
    %67 = arith.truncf %66 : vector<32x96xf32> to vector<32x96xbf16>
    %c1 = arith.constant 1 : index
    %c0_36 = arith.constant 0 : index
    %c0_37 = arith.constant 0 : index
    %68 = vector.load %arg5[%c1, %c0_36, %c0_37] : memref<5x96x32xbf16, #tpu.memory_space<vmem>>, vector<1x96x32xbf16>
    %69 = vector.shape_cast %68 : vector<1x96x32xbf16> to vector<96x32xbf16>
    %cst_38 = arith.constant dense<0.000000e+00> : vector<32x32xf32>
    %70 = tpu.matmul %67, %69, %cst_38 {dimension_numbers = #tpu.dot_dimension_numbers<[1], [0], [0], [1], [0, 0, 1, 1], [], []>} : vector<32x96xbf16>, vector<96x32xbf16>, vector<32x32xf32> -> vector<32x32xf32>
    %c1_39 = arith.constant 1 : index
    %c0_40 = arith.constant 0 : index
    %c0_41 = arith.constant 0 : index
    %71 = vector.load %arg6[%c1_39, %c0_40, %c0_41] : memref<5x1x32xf32, #tpu.memory_space<vmem>>, vector<1x1x32xf32>
    %72 = vector.shape_cast %71 : vector<1x1x32xf32> to vector<1x32xf32>
    %73 = vector.broadcast %72 : vector<1x32xf32> to vector<32x32xf32>
    %74 = arith.addf %70, %73 : vector<32x32xf32>
    %75 = arith.truncf %74 : vector<32x32xf32> to vector<32x32xbf16>
    %c1_42 = arith.constant 1 : index
    %c0_43 = arith.constant 0 : index
    %c0_44 = arith.constant 0 : index
    %76 = vector.load %arg7[%c1_42, %c0_43, %c0_44] : memref<5x32x32xbf16, #tpu.memory_space<vmem>>, vector<1x32x32xbf16>
    %77 = vector.shape_cast %76 : vector<1x32x32xbf16> to vector<32x32xbf16>
    %cst_45 = arith.constant dense<0.000000e+00> : vector<32x32xf32>
    %78 = tpu.matmul %75, %77, %cst_45 {dimension_numbers = #tpu.dot_dimension_numbers<[1], [0], [0], [1], [0, 0, 1, 1], [], []>} : vector<32x32xbf16>, vector<32x32xbf16>, vector<32x32xf32> -> vector<32x32xf32>
    %c1_46 = arith.constant 1 : index
    %c0_47 = arith.constant 0 : index
    %c0_48 = arith.constant 0 : index
    %79 = vector.load %arg8[%c1_46, %c0_47, %c0_48] : memref<5x1x32xf32, #tpu.memory_space<vmem>>, vector<1x1x32xf32>
    %80 = vector.shape_cast %79 : vector<1x1x32xf32> to vector<1x32xf32>
    %81 = vector.broadcast %80 : vector<1x32xf32> to vector<32x32xf32>
    %82 = arith.addf %78, %81 : vector<32x32xf32>
    %83 = arith.addf %82, %59 : vector<32x32xf32>
    %cst_49 = arith.constant 0.000000e+00 : f32
    %84 = vector.broadcast %cst_49 : f32 to vector<32x32xf32>
    %85 = arith.cmpf ogt, %83, %84 : vector<32x32xf32>
    %cst_50 = arith.constant 2.000000e-01 : f32
    %86 = vector.broadcast %cst_50 : f32 to vector<32x32xf32>
    %87 = arith.mulf %86, %83 : vector<32x32xf32>
    %88 = arith.select %85, %83, %87 : vector<32x32xi1>, vector<32x32xf32>
    %cst_51 = arith.constant 0.000000e+00 : f32
    %89 = vector.broadcast %cst_51 : f32 to vector<9x32xf32>
    %90 = vector.extract_strided_slice %88 {offsets = [0, 0], sizes = [23, 32], strides = [1, 1]} : vector<32x32xf32> to vector<23x32xf32>
    %91 = tpu.concatenate %89, %90 in 0 : vector<9x32xf32>, vector<23x32xf32> -> vector<32x32xf32>
    %cst_52 = arith.constant 0.000000e+00 : f32
    %92 = vector.broadcast %cst_52 : f32 to vector<9x32xf32>
    %93 = vector.extract_strided_slice %88 {offsets = [9, 0], sizes = [23, 32], strides = [1, 1]} : vector<32x32xf32> to vector<23x32xf32>
    %94 = tpu.concatenate %93, %92 in 0 : vector<23x32xf32>, vector<9x32xf32> -> vector<32x32xf32>
    %95 = tpu.concatenate %91, %88, %94 in 1 : vector<32x32xf32>, vector<32x32xf32>, vector<32x32xf32> -> vector<32x96xf32>
    %96 = arith.truncf %95 : vector<32x96xf32> to vector<32x96xbf16>
    %c2 = arith.constant 2 : index
    %c0_53 = arith.constant 0 : index
    %c0_54 = arith.constant 0 : index
    %97 = vector.load %arg5[%c2, %c0_53, %c0_54] : memref<5x96x32xbf16, #tpu.memory_space<vmem>>, vector<1x96x32xbf16>
    %98 = vector.shape_cast %97 : vector<1x96x32xbf16> to vector<96x32xbf16>
    %cst_55 = arith.constant dense<0.000000e+00> : vector<32x32xf32>
    %99 = tpu.matmul %96, %98, %cst_55 {dimension_numbers = #tpu.dot_dimension_numbers<[1], [0], [0], [1], [0, 0, 1, 1], [], []>} : vector<32x96xbf16>, vector<96x32xbf16>, vector<32x32xf32> -> vector<32x32xf32>
    %c2_56 = arith.constant 2 : index
    %c0_57 = arith.constant 0 : index
    %c0_58 = arith.constant 0 : index
    %100 = vector.load %arg6[%c2_56, %c0_57, %c0_58] : memref<5x1x32xf32, #tpu.memory_space<vmem>>, vector<1x1x32xf32>
    %101 = vector.shape_cast %100 : vector<1x1x32xf32> to vector<1x32xf32>
    %102 = vector.broadcast %101 : vector<1x32xf32> to vector<32x32xf32>
    %103 = arith.addf %99, %102 : vector<32x32xf32>
    %104 = arith.truncf %103 : vector<32x32xf32> to vector<32x32xbf16>
    %c2_59 = arith.constant 2 : index
    %c0_60 = arith.constant 0 : index
    %c0_61 = arith.constant 0 : index
    %105 = vector.load %arg7[%c2_59, %c0_60, %c0_61] : memref<5x32x32xbf16, #tpu.memory_space<vmem>>, vector<1x32x32xbf16>
    %106 = vector.shape_cast %105 : vector<1x32x32xbf16> to vector<32x32xbf16>
    %cst_62 = arith.constant dense<0.000000e+00> : vector<32x32xf32>
    %107 = tpu.matmul %104, %106, %cst_62 {dimension_numbers = #tpu.dot_dimension_numbers<[1], [0], [0], [1], [0, 0, 1, 1], [], []>} : vector<32x32xbf16>, vector<32x32xbf16>, vector<32x32xf32> -> vector<32x32xf32>
    %c2_63 = arith.constant 2 : index
    %c0_64 = arith.constant 0 : index
    %c0_65 = arith.constant 0 : index
    %108 = vector.load %arg8[%c2_63, %c0_64, %c0_65] : memref<5x1x32xf32, #tpu.memory_space<vmem>>, vector<1x1x32xf32>
    %109 = vector.shape_cast %108 : vector<1x1x32xf32> to vector<1x32xf32>
    %110 = vector.broadcast %109 : vector<1x32xf32> to vector<32x32xf32>
    %111 = arith.addf %107, %110 : vector<32x32xf32>
    %112 = arith.addf %111, %88 : vector<32x32xf32>
    %cst_66 = arith.constant 0.000000e+00 : f32
    %113 = vector.broadcast %cst_66 : f32 to vector<32x32xf32>
    %114 = arith.cmpf ogt, %112, %113 : vector<32x32xf32>
    %cst_67 = arith.constant 2.000000e-01 : f32
    %115 = vector.broadcast %cst_67 : f32 to vector<32x32xf32>
    %116 = arith.mulf %115, %112 : vector<32x32xf32>
    %117 = arith.select %114, %112, %116 : vector<32x32xi1>, vector<32x32xf32>
    %cst_68 = arith.constant 0.000000e+00 : f32
    %118 = vector.broadcast %cst_68 : f32 to vector<27x32xf32>
    %119 = vector.extract_strided_slice %117 {offsets = [0, 0], sizes = [5, 32], strides = [1, 1]} : vector<32x32xf32> to vector<5x32xf32>
    %120 = tpu.concatenate %118, %119 in 0 : vector<27x32xf32>, vector<5x32xf32> -> vector<32x32xf32>
    %cst_69 = arith.constant 0.000000e+00 : f32
    %121 = vector.broadcast %cst_69 : f32 to vector<27x32xf32>
    %122 = vector.extract_strided_slice %117 {offsets = [27, 0], sizes = [5, 32], strides = [1, 1]} : vector<32x32xf32> to vector<5x32xf32>
    %123 = tpu.concatenate %122, %121 in 0 : vector<5x32xf32>, vector<27x32xf32> -> vector<32x32xf32>
    %124 = tpu.concatenate %120, %117, %123 in 1 : vector<32x32xf32>, vector<32x32xf32>, vector<32x32xf32> -> vector<32x96xf32>
    %125 = arith.truncf %124 : vector<32x96xf32> to vector<32x96xbf16>
    %c3 = arith.constant 3 : index
    %c0_70 = arith.constant 0 : index
    %c0_71 = arith.constant 0 : index
    %126 = vector.load %arg5[%c3, %c0_70, %c0_71] : memref<5x96x32xbf16, #tpu.memory_space<vmem>>, vector<1x96x32xbf16>
    %127 = vector.shape_cast %126 : vector<1x96x32xbf16> to vector<96x32xbf16>
    %cst_72 = arith.constant dense<0.000000e+00> : vector<32x32xf32>
    %128 = tpu.matmul %125, %127, %cst_72 {dimension_numbers = #tpu.dot_dimension_numbers<[1], [0], [0], [1], [0, 0, 1, 1], [], []>} : vector<32x96xbf16>, vector<96x32xbf16>, vector<32x32xf32> -> vector<32x32xf32>
    %c3_73 = arith.constant 3 : index
    %c0_74 = arith.constant 0 : index
    %c0_75 = arith.constant 0 : index
    %129 = vector.load %arg6[%c3_73, %c0_74, %c0_75] : memref<5x1x32xf32, #tpu.memory_space<vmem>>, vector<1x1x32xf32>
    %130 = vector.shape_cast %129 : vector<1x1x32xf32> to vector<1x32xf32>
    %131 = vector.broadcast %130 : vector<1x32xf32> to vector<32x32xf32>
    %132 = arith.addf %128, %131 : vector<32x32xf32>
    %133 = arith.truncf %132 : vector<32x32xf32> to vector<32x32xbf16>
    %c3_76 = arith.constant 3 : index
    %c0_77 = arith.constant 0 : index
    %c0_78 = arith.constant 0 : index
    %134 = vector.load %arg7[%c3_76, %c0_77, %c0_78] : memref<5x32x32xbf16, #tpu.memory_space<vmem>>, vector<1x32x32xbf16>
    %135 = vector.shape_cast %134 : vector<1x32x32xbf16> to vector<32x32xbf16>
    %cst_79 = arith.constant dense<0.000000e+00> : vector<32x32xf32>
    %136 = tpu.matmul %133, %135, %cst_79 {dimension_numbers = #tpu.dot_dimension_numbers<[1], [0], [0], [1], [0, 0, 1, 1], [], []>} : vector<32x32xbf16>, vector<32x32xbf16>, vector<32x32xf32> -> vector<32x32xf32>
    %c3_80 = arith.constant 3 : index
    %c0_81 = arith.constant 0 : index
    %c0_82 = arith.constant 0 : index
    %137 = vector.load %arg8[%c3_80, %c0_81, %c0_82] : memref<5x1x32xf32, #tpu.memory_space<vmem>>, vector<1x1x32xf32>
    %138 = vector.shape_cast %137 : vector<1x1x32xf32> to vector<1x32xf32>
    %139 = vector.broadcast %138 : vector<1x32xf32> to vector<32x32xf32>
    %140 = arith.addf %136, %139 : vector<32x32xf32>
    %141 = arith.addf %140, %117 : vector<32x32xf32>
    %cst_83 = arith.constant 0.000000e+00 : f32
    %142 = vector.broadcast %cst_83 : f32 to vector<32x32xf32>
    %143 = arith.cmpf ogt, %141, %142 : vector<32x32xf32>
    %cst_84 = arith.constant 2.000000e-01 : f32
    %144 = vector.broadcast %cst_84 : f32 to vector<32x32xf32>
    %145 = arith.mulf %144, %141 : vector<32x32xf32>
    %146 = arith.select %143, %141, %145 : vector<32x32xi1>, vector<32x32xf32>
    %cst_85 = arith.constant 0.000000e+00 : f32
    %147 = vector.broadcast %cst_85 : f32 to vector<1x32xf32>
    %148 = vector.extract_strided_slice %146 {offsets = [0, 0], sizes = [31, 32], strides = [1, 1]} : vector<32x32xf32> to vector<31x32xf32>
    %149 = tpu.concatenate %147, %148 in 0 : vector<1x32xf32>, vector<31x32xf32> -> vector<32x32xf32>
    %cst_86 = arith.constant 0.000000e+00 : f32
    %150 = vector.broadcast %cst_86 : f32 to vector<1x32xf32>
    %151 = vector.extract_strided_slice %146 {offsets = [1, 0], sizes = [31, 32], strides = [1, 1]} : vector<32x32xf32> to vector<31x32xf32>
    %152 = tpu.concatenate %151, %150 in 0 : vector<31x32xf32>, vector<1x32xf32> -> vector<32x32xf32>
    %153 = tpu.concatenate %149, %146, %152 in 1 : vector<32x32xf32>, vector<32x32xf32>, vector<32x32xf32> -> vector<32x96xf32>
    %154 = arith.truncf %153 : vector<32x96xf32> to vector<32x96xbf16>
    %c4 = arith.constant 4 : index
    %c0_87 = arith.constant 0 : index
    %c0_88 = arith.constant 0 : index
    %155 = vector.load %arg5[%c4, %c0_87, %c0_88] : memref<5x96x32xbf16, #tpu.memory_space<vmem>>, vector<1x96x32xbf16>
    %156 = vector.shape_cast %155 : vector<1x96x32xbf16> to vector<96x32xbf16>
    %cst_89 = arith.constant dense<0.000000e+00> : vector<32x32xf32>
    %157 = tpu.matmul %154, %156, %cst_89 {dimension_numbers = #tpu.dot_dimension_numbers<[1], [0], [0], [1], [0, 0, 1, 1], [], []>} : vector<32x96xbf16>, vector<96x32xbf16>, vector<32x32xf32> -> vector<32x32xf32>
    %c4_90 = arith.constant 4 : index
    %c0_91 = arith.constant 0 : index
    %c0_92 = arith.constant 0 : index
    %158 = vector.load %arg6[%c4_90, %c0_91, %c0_92] : memref<5x1x32xf32, #tpu.memory_space<vmem>>, vector<1x1x32xf32>
    %159 = vector.shape_cast %158 : vector<1x1x32xf32> to vector<1x32xf32>
    %160 = vector.broadcast %159 : vector<1x32xf32> to vector<32x32xf32>
    %161 = arith.addf %157, %160 : vector<32x32xf32>
    %162 = arith.truncf %161 : vector<32x32xf32> to vector<32x32xbf16>
    %c4_93 = arith.constant 4 : index
    %c0_94 = arith.constant 0 : index
    %c0_95 = arith.constant 0 : index
    %163 = vector.load %arg7[%c4_93, %c0_94, %c0_95] : memref<5x32x32xbf16, #tpu.memory_space<vmem>>, vector<1x32x32xbf16>
    %164 = vector.shape_cast %163 : vector<1x32x32xbf16> to vector<32x32xbf16>
    %cst_96 = arith.constant dense<0.000000e+00> : vector<32x32xf32>
    %165 = tpu.matmul %162, %164, %cst_96 {dimension_numbers = #tpu.dot_dimension_numbers<[1], [0], [0], [1], [0, 0, 1, 1], [], []>} : vector<32x32xbf16>, vector<32x32xbf16>, vector<32x32xf32> -> vector<32x32xf32>
    %c4_97 = arith.constant 4 : index
    %c0_98 = arith.constant 0 : index
    %c0_99 = arith.constant 0 : index
    %166 = vector.load %arg8[%c4_97, %c0_98, %c0_99] : memref<5x1x32xf32, #tpu.memory_space<vmem>>, vector<1x1x32xf32>
    %167 = vector.shape_cast %166 : vector<1x1x32xf32> to vector<1x32xf32>
    %168 = vector.broadcast %167 : vector<1x32xf32> to vector<32x32xf32>
    %169 = arith.addf %165, %168 : vector<32x32xf32>
    %170 = arith.addf %169, %146 : vector<32x32xf32>
    %cst_100 = arith.constant 0.000000e+00 : f32
    %171 = vector.broadcast %cst_100 : f32 to vector<32x32xf32>
    %172 = arith.cmpf ogt, %170, %171 : vector<32x32xf32>
    %cst_101 = arith.constant 2.000000e-01 : f32
    %173 = vector.broadcast %cst_101 : f32 to vector<32x32xf32>
    %174 = arith.mulf %173, %170 : vector<32x32xf32>
    %175 = arith.select %172, %170, %174 : vector<32x32xi1>, vector<32x32xf32>
    %cst_102 = arith.constant dense<0.000000e+00> : vector<32xf32>
    %176 = vector.multi_reduction <add>, %175, %cst_102 [1] : vector<32x32xf32> to vector<32xf32>
    %177 = vector.shape_cast %176 : vector<32xf32> to vector<32x1xf32>
    %cst_103 = arith.constant dense<0.000000e+00> : vector<1xf32>
    %178 = vector.multi_reduction <add>, %177, %cst_103 [0] : vector<32x1xf32> to vector<1xf32>
    %179 = vector.shape_cast %178 : vector<1xf32> to vector<1x1xf32>
    %cst_104 = arith.constant 9.765625E-4 : f32
    %180 = vector.broadcast %cst_104 : f32 to vector<1x1xf32>
    %181 = arith.mulf %179, %180 : vector<1x1xf32>
    %182 = vector.broadcast %181 : vector<1x1xf32> to vector<32x32xf32>
    %183 = arith.subf %175, %182 : vector<32x32xf32>
    %184 = arith.mulf %183, %183 : vector<32x32xf32>
    %cst_105 = arith.constant dense<0.000000e+00> : vector<32xf32>
    %185 = vector.multi_reduction <add>, %184, %cst_105 [1] : vector<32x32xf32> to vector<32xf32>
    %186 = vector.shape_cast %185 : vector<32xf32> to vector<32x1xf32>
    %cst_106 = arith.constant dense<0.000000e+00> : vector<1xf32>
    %187 = vector.multi_reduction <add>, %186, %cst_106 [0] : vector<32x1xf32> to vector<1xf32>
    %188 = vector.shape_cast %187 : vector<1xf32> to vector<1x1xf32>
    %cst_107 = arith.constant 9.77517105E-4 : f32
    %189 = vector.broadcast %cst_107 : f32 to vector<1x1xf32>
    %190 = arith.mulf %188, %189 : vector<1x1xf32>
    %191 = math.sqrt %190 : vector<1x1xf32>
    %cst_108 = arith.constant 9.99999993E-9 : f32
    %192 = vector.broadcast %cst_108 : f32 to vector<1x1xf32>
    %193 = arith.addf %191, %192 : vector<1x1xf32>
    %194 = tpu.reciprocal %193 {approx = true} : vector<1x1xf32> -> vector<1x1xf32>
    %195 = vector.broadcast %194 : vector<1x1xf32> to vector<32x32xf32>
    %196 = arith.mulf %175, %195 : vector<32x32xf32>
    %c0_109 = arith.constant 0 : index
    %c0_110 = arith.constant 0 : index
    %c0_111 = arith.constant 0 : index
    %197 = vector.load %arg9[%c0_109, %c0_110, %c0_111] : memref<1x32x32xf32, #tpu.memory_space<vmem>>, vector<1x32x32xf32>
    %198 = vector.shape_cast %197 : vector<1x32x32xf32> to vector<32x32xf32>
    %199 = vector.shape_cast %196 : vector<32x32xf32> to vector<1x32x32xf32>
    tpu.vector_store %arg9[%c0_109, %c0_110, %c0_111], %199 {strides = array<i32>} : memref<1x32x32xf32, #tpu.memory_space<vmem>>, vector<1x32x32xf32>,
    return
  }
  func.func @transform_0(%arg0: i32) -> (i32, i32, i32) {
    %c0_i32 = arith.constant 0 : i32
    %c0_i32_0 = arith.constant 0 : i32
    %c0_i32_1 = arith.constant 0 : i32
    return %arg0, %c0_i32, %c0_i32_0 : i32, i32, i32
  }
  func.func @transform_1(%arg0: i32) -> (i32, i32) {
    %c0_i32 = arith.constant 0 : i32
    %c0_i32_0 = arith.constant 0 : i32
    %c0_i32_1 = arith.constant 0 : i32
    return %c0_i32, %c0_i32_0 : i32, i32
  }
  func.func @transform_2(%arg0: i32) -> (i32, i32) {
    %c0_i32 = arith.constant 0 : i32
    %c0_i32_0 = arith.constant 0 : i32
    %c0_i32_1 = arith.constant 0 : i32
    return %c0_i32, %c0_i32_0 : i32, i32
  }
  func.func @transform_3(%arg0: i32) -> (i32, i32) {
    %c0_i32 = arith.constant 0 : i32
    %c0_i32_0 = arith.constant 0 : i32
    %c0_i32_1 = arith.constant 0 : i32
    return %c0_i32, %c0_i32_0 : i32, i32
  }
  func.func @transform_4(%arg0: i32) -> (i32, i32, i32) {
    %c0_i32 = arith.constant 0 : i32
    %c0_i32_0 = arith.constant 0 : i32
    %c0_i32_1 = arith.constant 0 : i32
    %c0_i32_2 = arith.constant 0 : i32
    return %c0_i32, %c0_i32_0, %c0_i32_1 : i32, i32, i32
  }
  func.func @transform_5(%arg0: i32) -> (i32, i32, i32) {
    %c0_i32 = arith.constant 0 : i32
    %c0_i32_0 = arith.constant 0 : i32
    %c0_i32_1 = arith.constant 0 : i32
    %c0_i32_2 = arith.constant 0 : i32
    return %c0_i32, %c0_i32_0, %c0_i32_1 : i32, i32, i32
  }
  func.func @transform_6(%arg0: i32) -> (i32, i32, i32) {
    %c0_i32 = arith.constant 0 : i32
    %c0_i32_0 = arith.constant 0 : i32
    %c0_i32_1 = arith.constant 0 : i32
    %c0_i32_2 = arith.constant 0 : i32
    return %c0_i32, %c0_i32_0, %c0_i32_1 : i32, i32, i32
  }
  func.func @transform_7(%arg0: i32) -> (i32, i32, i32) {
    %c0_i32 = arith.constant 0 : i32
    %c0_i32_0 = arith.constant 0 : i32
    %c0_i32_1 = arith.constant 0 : i32
    %c0_i32_2 = arith.constant 0 : i32
    return %c0_i32, %c0_i32_0, %c0_i32_1 : i32, i32, i32
  }
  func.func @transform_8(%arg0: i32) -> (i32, i32, i32) {
    %c0_i32 = arith.constant 0 : i32
    %c0_i32_0 = arith.constant 0 : i32
    %c0_i32_1 = arith.constant 0 : i32
    return %arg0, %c0_i32, %c0_i32_0 : i32, i32, i32
  }
}

module attributes {stable_mosaic.version = 11 : i64} {
  func.func @_synth_kernel(%arg0: i32, %arg1: memref<1x4x32xf32, #tpu.memory_space<vmem>>, %arg2: memref<3x32x32xbf16, #tpu.memory_space<vmem>>, %arg3: memref<3x1x32xf32, #tpu.memory_space<vmem>>, %arg4: memref<1x32xf32, #tpu.memory_space<vmem>>, %arg5: memref<1x1xf32, #tpu.memory_space<vmem>>, %arg6: memref<2x32x32xbf16, #tpu.memory_space<vmem>>, %arg7: memref<2x1x32xf32, #tpu.memory_space<vmem>>, %arg8: memref<1x32xf32, #tpu.memory_space<vmem>>, %arg9: memref<1x1xf32, #tpu.memory_space<vmem>>, %arg10: memref<2x32x32xbf16, #tpu.memory_space<vmem>>, %arg11: memref<2x1x32xf32, #tpu.memory_space<vmem>>, %arg12: memref<32x4xbf16, #tpu.memory_space<vmem>>, %arg13: memref<1x4xf32, #tpu.memory_space<vmem>>, %arg14: memref<32x256xbf16, #tpu.memory_space<vmem>>, %arg15: memref<1x256xf32, #tpu.memory_space<vmem>>, %arg16: memref<2x96x64xbf16, #tpu.memory_space<vmem>>, %arg17: memref<2x1x64xf32, #tpu.memory_space<vmem>>, %arg18: memref<96x1xbf16, #tpu.memory_space<vmem>>, %arg19: memref<1x1xf32, #tpu.memory_space<vmem>>, %arg20: memref<32x256xbf16, #tpu.memory_space<vmem>>, %arg21: memref<1x256xf32, #tpu.memory_space<vmem>>, %arg22: memref<4x96x64xbf16, #tpu.memory_space<vmem>>, %arg23: memref<4x1x64xf32, #tpu.memory_space<vmem>>, %arg24: memref<96x1xbf16, #tpu.memory_space<vmem>>, %arg25: memref<1x1xf32, #tpu.memory_space<vmem>>, %arg26: memref<1x4x32xf32, #tpu.memory_space<vmem>>, %arg27: memref<1x4x128xf32, #tpu.memory_space<vmem>>, %arg28: memref<1x1x1xf32, #tpu.memory_space<vmem>>, %arg29: memref<1x1x4xf32, #tpu.memory_space<vmem>>) attributes {dimension_semantics = [#tpu.dimension_semantics<parallel>], iteration_bounds = array<i64: 2>, scalar_prefetch = 0 : i64, scratch_operands = 0 : i64, tpu.core_type = #tpu.core_type<tc>, window_params = [{transform_indices = @transform_0, window_bounds = array<i64: 1, 4, 32>}, {pipeline_mode = #tpu.pipeline_mode<synchronous>, transform_indices = @transform_1, window_bounds = array<i64: 3, 32, 32>}, {pipeline_mode = #tpu.pipeline_mode<synchronous>, transform_indices = @transform_2, window_bounds = array<i64: 3, 1, 32>}, {pipeline_mode = #tpu.pipeline_mode<synchronous>, transform_indices = @transform_3, window_bounds = array<i64: 1, 32>}, {pipeline_mode = #tpu.pipeline_mode<synchronous>, transform_indices = @transform_4, window_bounds = array<i64: 1, 1>}, {pipeline_mode = #tpu.pipeline_mode<synchronous>, transform_indices = @transform_5, window_bounds = array<i64: 2, 32, 32>}, {pipeline_mode = #tpu.pipeline_mode<synchronous>, transform_indices = @transform_6, window_bounds = array<i64: 2, 1, 32>}, {pipeline_mode = #tpu.pipeline_mode<synchronous>, transform_indices = @transform_7, window_bounds = array<i64: 1, 32>}, {pipeline_mode = #tpu.pipeline_mode<synchronous>, transform_indices = @transform_8, window_bounds = array<i64: 1, 1>}, {pipeline_mode = #tpu.pipeline_mode<synchronous>, transform_indices = @transform_9, window_bounds = array<i64: 2, 32, 32>}, {pipeline_mode = #tpu.pipeline_mode<synchronous>, transform_indices = @transform_10, window_bounds = array<i64: 2, 1, 32>}, {pipeline_mode = #tpu.pipeline_mode<synchronous>, transform_indices = @transform_11, window_bounds = array<i64: 32, 4>}, {pipeline_mode = #tpu.pipeline_mode<synchronous>, transform_indices = @transform_12, window_bounds = array<i64: 1, 4>}, {pipeline_mode = #tpu.pipeline_mode<synchronous>, transform_indices = @transform_13, window_bounds = array<i64: 32, 256>}, {pipeline_mode = #tpu.pipeline_mode<synchronous>, transform_indices = @transform_14, window_bounds = array<i64: 1, 256>}, {pipeline_mode = #tpu.pipeline_mode<synchronous>, transform_indices = @transform_15, window_bounds = array<i64: 2, 96, 64>}, {pipeline_mode = #tpu.pipeline_mode<synchronous>, transform_indices = @transform_16, window_bounds = array<i64: 2, 1, 64>}, {pipeline_mode = #tpu.pipeline_mode<synchronous>, transform_indices = @transform_17, window_bounds = array<i64: 96, 1>}, {pipeline_mode = #tpu.pipeline_mode<synchronous>, transform_indices = @transform_18, window_bounds = array<i64: 1, 1>}, {pipeline_mode = #tpu.pipeline_mode<synchronous>, transform_indices = @transform_19, window_bounds = array<i64: 32, 256>}, {pipeline_mode = #tpu.pipeline_mode<synchronous>, transform_indices = @transform_20, window_bounds = array<i64: 1, 256>}, {pipeline_mode = #tpu.pipeline_mode<synchronous>, transform_indices = @transform_21, window_bounds = array<i64: 4, 96, 64>}, {pipeline_mode = #tpu.pipeline_mode<synchronous>, transform_indices = @transform_22, window_bounds = array<i64: 4, 1, 64>}, {pipeline_mode = #tpu.pipeline_mode<synchronous>, transform_indices = @transform_23, window_bounds = array<i64: 96, 1>}, {pipeline_mode = #tpu.pipeline_mode<synchronous>, transform_indices = @transform_24, window_bounds = array<i64: 1, 1>}, {transform_indices = @transform_25, window_bounds = array<i64: 1, 4, 32>}, {transform_indices = @transform_26, window_bounds = array<i64: 1, 4, 128>}, {transform_indices = @transform_27, window_bounds = array<i64: 1, 1, 1>}, {transform_indices = @transform_28, window_bounds = array<i64: 1, 1, 4>}]} {
    %c0 = arith.constant 0 : index
    %c0_0 = arith.constant 0 : index
    %c0_1 = arith.constant 0 : index
    %0 = vector.load %arg1[%c0, %c0_0, %c0_1] : memref<1x4x32xf32, #tpu.memory_space<vmem>>, vector<1x4x32xf32>
    %1 = vector.shape_cast %0 : vector<1x4x32xf32> to vector<4x32xf32>
    %2 = arith.mulf %1, %1 : vector<4x32xf32>
    %cst = arith.constant dense<0.000000e+00> : vector<4xf32>
    %3 = vector.multi_reduction <add>, %2, %cst [1] : vector<4x32xf32> to vector<4xf32>
    %4 = vector.shape_cast %3 : vector<4xf32> to vector<4x1xf32>
    %5 = math.sqrt %4 : vector<4x1xf32>
    %cst_2 = arith.constant 9.99999993E-9 : f32
    %6 = vector.broadcast %cst_2 : f32 to vector<4x1xf32>
    %7 = arith.addf %5, %6 : vector<4x1xf32>
    %8 = tpu.reciprocal %7 {approx = true} : vector<4x1xf32> -> vector<4x1xf32>
    %9 = vector.broadcast %8 : vector<4x1xf32> to vector<4x32xf32>
    %10 = arith.mulf %1, %9 : vector<4x32xf32>
    %cst_3 = arith.constant dense<0xFF800000> : vector<32xf32>
    %11 = vector.multi_reduction <maximumf>, %10, %cst_3 [0] : vector<4x32xf32> to vector<32xf32>
    %12 = vector.shape_cast %11 : vector<32xf32> to vector<1x32xf32>
    %13 = arith.truncf %12 : vector<1x32xf32> to vector<1x32xbf16>
    %c0_4 = arith.constant 0 : index
    %c0_5 = arith.constant 0 : index
    %c0_6 = arith.constant 0 : index
    %14 = vector.load %arg6[%c0_4, %c0_5, %c0_6] : memref<2x32x32xbf16, #tpu.memory_space<vmem>>, vector<1x32x32xbf16>
    %15 = vector.shape_cast %14 : vector<1x32x32xbf16> to vector<32x32xbf16>
    %cst_7 = arith.constant dense<0.000000e+00> : vector<1x32xf32>
    %16 = tpu.matmul %13, %15, %cst_7 {dimension_numbers = #tpu.dot_dimension_numbers<[1], [0], [0], [1], [0, 0, 1, 1], [], []>} : vector<1x32xbf16>, vector<32x32xbf16>, vector<1x32xf32> -> vector<1x32xf32>
    %c0_8 = arith.constant 0 : index
    %c0_9 = arith.constant 0 : index
    %c0_10 = arith.constant 0 : index
    %17 = vector.load %arg7[%c0_8, %c0_9, %c0_10] : memref<2x1x32xf32, #tpu.memory_space<vmem>>, vector<1x1x32xf32>
    %18 = vector.shape_cast %17 : vector<1x1x32xf32> to vector<1x32xf32>
    %19 = arith.addf %16, %18 : vector<1x32xf32>
    %cst_11 = arith.constant 0.000000e+00 : f32
    %20 = vector.broadcast %cst_11 : f32 to vector<1x32xf32>
    %21 = arith.cmpf ogt, %19, %20 : vector<1x32xf32>
    %cst_12 = arith.constant 2.000000e-01 : f32
    %22 = vector.broadcast %cst_12 : f32 to vector<1x32xf32>
    %23 = arith.mulf %22, %19 : vector<1x32xf32>
    %24 = arith.select %21, %19, %23 : vector<1x32xi1>, vector<1x32xf32>
    %25 = arith.truncf %24 : vector<1x32xf32> to vector<1x32xbf16>
    %c1 = arith.constant 1 : index
    %c0_13 = arith.constant 0 : index
    %c0_14 = arith.constant 0 : index
    %26 = vector.load %arg6[%c1, %c0_13, %c0_14] : memref<2x32x32xbf16, #tpu.memory_space<vmem>>, vector<1x32x32xbf16>
    %27 = vector.shape_cast %26 : vector<1x32x32xbf16> to vector<32x32xbf16>
    %cst_15 = arith.constant dense<0.000000e+00> : vector<1x32xf32>
    %28 = tpu.matmul %25, %27, %cst_15 {dimension_numbers = #tpu.dot_dimension_numbers<[1], [0], [0], [1], [0, 0, 1, 1], [], []>} : vector<1x32xbf16>, vector<32x32xbf16>, vector<1x32xf32> -> vector<1x32xf32>
    %c1_16 = arith.constant 1 : index
    %c0_17 = arith.constant 0 : index
    %c0_18 = arith.constant 0 : index
    %29 = vector.load %arg7[%c1_16, %c0_17, %c0_18] : memref<2x1x32xf32, #tpu.memory_space<vmem>>, vector<1x1x32xf32>
    %30 = vector.shape_cast %29 : vector<1x1x32xf32> to vector<1x32xf32>
    %31 = arith.addf %28, %30 : vector<1x32xf32>
    %cst_19 = arith.constant 0.000000e+00 : f32
    %32 = vector.broadcast %cst_19 : f32 to vector<1x32xf32>
    %33 = arith.cmpf ogt, %31, %32 : vector<1x32xf32>
    %cst_20 = arith.constant 2.000000e-01 : f32
    %34 = vector.broadcast %cst_20 : f32 to vector<1x32xf32>
    %35 = arith.mulf %34, %31 : vector<1x32xf32>
    %36 = arith.select %33, %31, %35 : vector<1x32xi1>, vector<1x32xf32>
    %c0_21 = arith.constant 0 : index
    %c0_22 = arith.constant 0 : index
    %37 = vector.load %arg8[%c0_21, %c0_22] : memref<1x32xf32, #tpu.memory_space<vmem>>, vector<1x32xf32>
    %38 = arith.mulf %36, %37 : vector<1x32xf32>
    %cst_23 = arith.constant dense<0.000000e+00> : vector<1xf32>
    %39 = vector.multi_reduction <add>, %38, %cst_23 [1] : vector<1x32xf32> to vector<1xf32>
    %40 = vector.shape_cast %39 : vector<1xf32> to vector<1x1xf32>
    %c0_24 = arith.constant 0 : index
    %c0_25 = arith.constant 0 : index
    %41 = vector.load %arg9[%c0_24, %c0_25] : memref<1x1xf32, #tpu.memory_space<vmem>>, vector<1x1xf32>
    %42 = arith.addf %40, %41 : vector<1x1xf32>
    %43 = arith.negf %42 : vector<1x1xf32>
    %44 = math.exp %43 : vector<1x1xf32>
    %cst_26 = arith.constant 1.000000e+00 : f32
    %45 = vector.broadcast %cst_26 : f32 to vector<1x1xf32>
    %46 = arith.addf %45, %44 : vector<1x1xf32>
    %47 = arith.divf %45, %46 : vector<1x1xf32>
    %c0_27 = arith.constant 0 : index
    %c0_28 = arith.constant 0 : index
    %c0_29 = arith.constant 0 : index
    %48 = vector.load %arg28[%c0_27, %c0_28, %c0_29] : memref<1x1x1xf32, #tpu.memory_space<vmem>>, vector<1x1x1xf32>
    %49 = vector.shape_cast %48 : vector<1x1x1xf32> to vector<1x1xf32>
    %50 = vector.shape_cast %47 : vector<1x1xf32> to vector<1x1x1xf32>
    tpu.vector_store %arg28[%c0_27, %c0_28, %c0_29], %50 {strides = array<i32>} : memref<1x1x1xf32, #tpu.memory_space<vmem>>, vector<1x1x1xf32>,
    %51 = arith.truncf %12 : vector<1x32xf32> to vector<1x32xbf16>
    %c0_30 = arith.constant 0 : index
    %c0_31 = arith.constant 0 : index
    %c0_32 = arith.constant 0 : index
    %52 = vector.load %arg10[%c0_30, %c0_31, %c0_32] : memref<2x32x32xbf16, #tpu.memory_space<vmem>>, vector<1x32x32xbf16>
    %53 = vector.shape_cast %52 : vector<1x32x32xbf16> to vector<32x32xbf16>
    %cst_33 = arith.constant dense<0.000000e+00> : vector<1x32xf32>
    %54 = tpu.matmul %51, %53, %cst_33 {dimension_numbers = #tpu.dot_dimension_numbers<[1], [0], [0], [1], [0, 0, 1, 1], [], []>} : vector<1x32xbf16>, vector<32x32xbf16>, vector<1x32xf32> -> vector<1x32xf32>
    %c0_34 = arith.constant 0 : index
    %c0_35 = arith.constant 0 : index
    %c0_36 = arith.constant 0 : index
    %55 = vector.load %arg11[%c0_34, %c0_35, %c0_36] : memref<2x1x32xf32, #tpu.memory_space<vmem>>, vector<1x1x32xf32>
    %56 = vector.shape_cast %55 : vector<1x1x32xf32> to vector<1x32xf32>
    %57 = arith.addf %54, %56 : vector<1x32xf32>
    %cst_37 = arith.constant 0.000000e+00 : f32
    %58 = vector.broadcast %cst_37 : f32 to vector<1x32xf32>
    %59 = arith.cmpf ogt, %57, %58 : vector<1x32xf32>
    %cst_38 = arith.constant 2.000000e-01 : f32
    %60 = vector.broadcast %cst_38 : f32 to vector<1x32xf32>
    %61 = arith.mulf %60, %57 : vector<1x32xf32>
    %62 = arith.select %59, %57, %61 : vector<1x32xi1>, vector<1x32xf32>
    %63 = arith.truncf %62 : vector<1x32xf32> to vector<1x32xbf16>
    %c1_39 = arith.constant 1 : index
    %c0_40 = arith.constant 0 : index
    %c0_41 = arith.constant 0 : index
    %64 = vector.load %arg10[%c1_39, %c0_40, %c0_41] : memref<2x32x32xbf16, #tpu.memory_space<vmem>>, vector<1x32x32xbf16>
    %65 = vector.shape_cast %64 : vector<1x32x32xbf16> to vector<32x32xbf16>
    %cst_42 = arith.constant dense<0.000000e+00> : vector<1x32xf32>
    %66 = tpu.matmul %63, %65, %cst_42 {dimension_numbers = #tpu.dot_dimension_numbers<[1], [0], [0], [1], [0, 0, 1, 1], [], []>} : vector<1x32xbf16>, vector<32x32xbf16>, vector<1x32xf32> -> vector<1x32xf32>
    %c1_43 = arith.constant 1 : index
    %c0_44 = arith.constant 0 : index
    %c0_45 = arith.constant 0 : index
    %67 = vector.load %arg11[%c1_43, %c0_44, %c0_45] : memref<2x1x32xf32, #tpu.memory_space<vmem>>, vector<1x1x32xf32>
    %68 = vector.shape_cast %67 : vector<1x1x32xf32> to vector<1x32xf32>
    %69 = arith.addf %66, %68 : vector<1x32xf32>
    %cst_46 = arith.constant 0.000000e+00 : f32
    %70 = vector.broadcast %cst_46 : f32 to vector<1x32xf32>
    %71 = arith.cmpf ogt, %69, %70 : vector<1x32xf32>
    %cst_47 = arith.constant 2.000000e-01 : f32
    %72 = vector.broadcast %cst_47 : f32 to vector<1x32xf32>
    %73 = arith.mulf %72, %69 : vector<1x32xf32>
    %74 = arith.select %71, %69, %73 : vector<1x32xi1>, vector<1x32xf32>
    %75 = arith.truncf %74 : vector<1x32xf32> to vector<1x32xbf16>
    %c0_48 = arith.constant 0 : index
    %c0_49 = arith.constant 0 : index
    %76 = vector.load %arg12[%c0_48, %c0_49] : memref<32x4xbf16, #tpu.memory_space<vmem>>, vector<32x4xbf16>
    %cst_50 = arith.constant dense<0.000000e+00> : vector<1x4xf32>
    %77 = tpu.matmul %75, %76, %cst_50 {dimension_numbers = #tpu.dot_dimension_numbers<[1], [0], [0], [1], [0, 0, 1, 1], [], []>} : vector<1x32xbf16>, vector<32x4xbf16>, vector<1x4xf32> -> vector<1x4xf32>
    %c0_51 = arith.constant 0 : index
    %c0_52 = arith.constant 0 : index
    %78 = vector.load %arg13[%c0_51, %c0_52] : memref<1x4xf32, #tpu.memory_space<vmem>>, vector<1x4xf32>
    %79 = arith.addf %77, %78 : vector<1x4xf32>
    %c0_53 = arith.constant 0 : index
    %c0_54 = arith.constant 0 : index
    %c0_55 = arith.constant 0 : index
    %80 = vector.load %arg29[%c0_53, %c0_54, %c0_55] : memref<1x1x4xf32, #tpu.memory_space<vmem>>, vector<1x1x4xf32>
    %81 = vector.shape_cast %80 : vector<1x1x4xf32> to vector<1x4xf32>
    %82 = vector.shape_cast %79 : vector<1x4xf32> to vector<1x1x4xf32>
    tpu.vector_store %arg29[%c0_53, %c0_54, %c0_55], %82 {strides = array<i32>} : memref<1x1x4xf32, #tpu.memory_space<vmem>>, vector<1x1x4xf32>,
    %83 = arith.truncf %10 : vector<4x32xf32> to vector<4x32xbf16>
    %c0_56 = arith.constant 0 : index
    %c0_57 = arith.constant 0 : index
    %c0_58 = arith.constant 0 : index
    %84 = vector.load %arg2[%c0_56, %c0_57, %c0_58] : memref<3x32x32xbf16, #tpu.memory_space<vmem>>, vector<1x32x32xbf16>
    %85 = vector.shape_cast %84 : vector<1x32x32xbf16> to vector<32x32xbf16>
    %cst_59 = arith.constant dense<0.000000e+00> : vector<4x32xf32>
    %86 = tpu.matmul %83, %85, %cst_59 {dimension_numbers = #tpu.dot_dimension_numbers<[1], [0], [0], [1], [0, 0, 1, 1], [], []>} : vector<4x32xbf16>, vector<32x32xbf16>, vector<4x32xf32> -> vector<4x32xf32>
    %c0_60 = arith.constant 0 : index
    %c0_61 = arith.constant 0 : index
    %c0_62 = arith.constant 0 : index
    %87 = vector.load %arg3[%c0_60, %c0_61, %c0_62] : memref<3x1x32xf32, #tpu.memory_space<vmem>>, vector<1x1x32xf32>
    %88 = vector.shape_cast %87 : vector<1x1x32xf32> to vector<1x32xf32>
    %89 = vector.broadcast %88 : vector<1x32xf32> to vector<4x32xf32>
    %90 = arith.addf %86, %89 : vector<4x32xf32>
    %cst_63 = arith.constant 0.000000e+00 : f32
    %91 = vector.broadcast %cst_63 : f32 to vector<4x32xf32>
    %92 = arith.cmpf ogt, %90, %91 : vector<4x32xf32>
    %cst_64 = arith.constant 2.000000e-01 : f32
    %93 = vector.broadcast %cst_64 : f32 to vector<4x32xf32>
    %94 = arith.mulf %93, %90 : vector<4x32xf32>
    %95 = arith.select %92, %90, %94 : vector<4x32xi1>, vector<4x32xf32>
    %96 = arith.truncf %95 : vector<4x32xf32> to vector<4x32xbf16>
    %c1_65 = arith.constant 1 : index
    %c0_66 = arith.constant 0 : index
    %c0_67 = arith.constant 0 : index
    %97 = vector.load %arg2[%c1_65, %c0_66, %c0_67] : memref<3x32x32xbf16, #tpu.memory_space<vmem>>, vector<1x32x32xbf16>
    %98 = vector.shape_cast %97 : vector<1x32x32xbf16> to vector<32x32xbf16>
    %cst_68 = arith.constant dense<0.000000e+00> : vector<4x32xf32>
    %99 = tpu.matmul %96, %98, %cst_68 {dimension_numbers = #tpu.dot_dimension_numbers<[1], [0], [0], [1], [0, 0, 1, 1], [], []>} : vector<4x32xbf16>, vector<32x32xbf16>, vector<4x32xf32> -> vector<4x32xf32>
    %c1_69 = arith.constant 1 : index
    %c0_70 = arith.constant 0 : index
    %c0_71 = arith.constant 0 : index
    %100 = vector.load %arg3[%c1_69, %c0_70, %c0_71] : memref<3x1x32xf32, #tpu.memory_space<vmem>>, vector<1x1x32xf32>
    %101 = vector.shape_cast %100 : vector<1x1x32xf32> to vector<1x32xf32>
    %102 = vector.broadcast %101 : vector<1x32xf32> to vector<4x32xf32>
    %103 = arith.addf %99, %102 : vector<4x32xf32>
    %cst_72 = arith.constant 0.000000e+00 : f32
    %104 = vector.broadcast %cst_72 : f32 to vector<4x32xf32>
    %105 = arith.cmpf ogt, %103, %104 : vector<4x32xf32>
    %cst_73 = arith.constant 2.000000e-01 : f32
    %106 = vector.broadcast %cst_73 : f32 to vector<4x32xf32>
    %107 = arith.mulf %106, %103 : vector<4x32xf32>
    %108 = arith.select %105, %103, %107 : vector<4x32xi1>, vector<4x32xf32>
    %109 = arith.truncf %108 : vector<4x32xf32> to vector<4x32xbf16>
    %c2 = arith.constant 2 : index
    %c0_74 = arith.constant 0 : index
    %c0_75 = arith.constant 0 : index
    %110 = vector.load %arg2[%c2, %c0_74, %c0_75] : memref<3x32x32xbf16, #tpu.memory_space<vmem>>, vector<1x32x32xbf16>
    %111 = vector.shape_cast %110 : vector<1x32x32xbf16> to vector<32x32xbf16>
    %cst_76 = arith.constant dense<0.000000e+00> : vector<4x32xf32>
    %112 = tpu.matmul %109, %111, %cst_76 {dimension_numbers = #tpu.dot_dimension_numbers<[1], [0], [0], [1], [0, 0, 1, 1], [], []>} : vector<4x32xbf16>, vector<32x32xbf16>, vector<4x32xf32> -> vector<4x32xf32>
    %c2_77 = arith.constant 2 : index
    %c0_78 = arith.constant 0 : index
    %c0_79 = arith.constant 0 : index
    %113 = vector.load %arg3[%c2_77, %c0_78, %c0_79] : memref<3x1x32xf32, #tpu.memory_space<vmem>>, vector<1x1x32xf32>
    %114 = vector.shape_cast %113 : vector<1x1x32xf32> to vector<1x32xf32>
    %115 = vector.broadcast %114 : vector<1x32xf32> to vector<4x32xf32>
    %116 = arith.addf %112, %115 : vector<4x32xf32>
    %cst_80 = arith.constant 0.000000e+00 : f32
    %117 = vector.broadcast %cst_80 : f32 to vector<4x32xf32>
    %118 = arith.cmpf ogt, %116, %117 : vector<4x32xf32>
    %cst_81 = arith.constant 2.000000e-01 : f32
    %119 = vector.broadcast %cst_81 : f32 to vector<4x32xf32>
    %120 = arith.mulf %119, %116 : vector<4x32xf32>
    %121 = arith.select %118, %116, %120 : vector<4x32xi1>, vector<4x32xf32>
    %c0_82 = arith.constant 0 : index
    %c0_83 = arith.constant 0 : index
    %122 = vector.load %arg4[%c0_82, %c0_83] : memref<1x32xf32, #tpu.memory_space<vmem>>, vector<1x32xf32>
    %123 = vector.broadcast %122 : vector<1x32xf32> to vector<4x32xf32>
    %124 = arith.mulf %121, %123 : vector<4x32xf32>
    %cst_84 = arith.constant dense<0.000000e+00> : vector<4xf32>
    %125 = vector.multi_reduction <add>, %124, %cst_84 [1] : vector<4x32xf32> to vector<4xf32>
    %126 = vector.shape_cast %125 : vector<4xf32> to vector<4x1xf32>
    %c0_85 = arith.constant 0 : index
    %c0_86 = arith.constant 0 : index
    %127 = vector.load %arg5[%c0_85, %c0_86] : memref<1x1xf32, #tpu.memory_space<vmem>>, vector<1x1xf32>
    %128 = vector.broadcast %127 : vector<1x1xf32> to vector<4x1xf32>
    %129 = arith.addf %126, %128 : vector<4x1xf32>
    %130 = arith.mulf %129, %129 : vector<4x1xf32>
    %131 = arith.truncf %10 : vector<4x32xf32> to vector<4x32xbf16>
    %c0_87 = arith.constant 0 : index
    %c0_88 = arith.constant 0 : index
    %132 = vector.load %arg14[%c0_87, %c0_88] : memref<32x256xbf16, #tpu.memory_space<vmem>>, vector<32x256xbf16>
    %cst_89 = arith.constant dense<0.000000e+00> : vector<4x256xf32>
    %133 = tpu.matmul %131, %132, %cst_89 {dimension_numbers = #tpu.dot_dimension_numbers<[1], [0], [0], [1], [0, 0, 1, 1], [], []>} : vector<4x32xbf16>, vector<32x256xbf16>, vector<4x256xf32> -> vector<4x256xf32>
    %c0_90 = arith.constant 0 : index
    %c0_91 = arith.constant 0 : index
    %134 = vector.load %arg15[%c0_90, %c0_91] : memref<1x256xf32, #tpu.memory_space<vmem>>, vector<1x256xf32>
    %135 = vector.broadcast %134 : vector<1x256xf32> to vector<4x256xf32>
    %136 = arith.addf %133, %135 : vector<4x256xf32>
    %137 = vector.extract_strided_slice %136 {offsets = [0, 0], sizes = [4, 32], strides = [1, 1]} : vector<4x256xf32> to vector<4x32xf32>
    %138 = vector.extract_strided_slice %136 {offsets = [0, 32], sizes = [4, 32], strides = [1, 1]} : vector<4x256xf32> to vector<4x32xf32>
    %139 = vector.extract_strided_slice %136 {offsets = [0, 64], sizes = [4, 32], strides = [1, 1]} : vector<4x256xf32> to vector<4x32xf32>
    %140 = vector.extract_strided_slice %136 {offsets = [0, 96], sizes = [4, 32], strides = [1, 1]} : vector<4x256xf32> to vector<4x32xf32>
    %141 = vector.extract_strided_slice %136 {offsets = [0, 128], sizes = [4, 32], strides = [1, 1]} : vector<4x256xf32> to vector<4x32xf32>
    %142 = vector.extract_strided_slice %136 {offsets = [0, 160], sizes = [4, 32], strides = [1, 1]} : vector<4x256xf32> to vector<4x32xf32>
    %143 = vector.extract_strided_slice %136 {offsets = [0, 192], sizes = [4, 32], strides = [1, 1]} : vector<4x256xf32> to vector<4x32xf32>
    %144 = vector.extract_strided_slice %136 {offsets = [0, 224], sizes = [4, 32], strides = [1, 1]} : vector<4x256xf32> to vector<4x32xf32>
    %145 = tpu.concatenate %137, %138, %139, %140, %141, %142, %143, %144 in 0 : vector<4x32xf32>, vector<4x32xf32>, vector<4x32xf32>, vector<4x32xf32>, vector<4x32xf32>, vector<4x32xf32>, vector<4x32xf32>, vector<4x32xf32> -> vector<32x32xf32>
    %c0_92 = arith.constant 0 : index
    %c0_93 = arith.constant 0 : index
    %c0_94 = arith.constant 0 : index
    %146 = vector.load %arg16[%c0_92, %c0_93, %c0_94] : memref<2x96x64xbf16, #tpu.memory_space<vmem>>, vector<1x96x64xbf16>
    %147 = vector.shape_cast %146 : vector<1x96x64xbf16> to vector<96x64xbf16>
    %c0_95 = arith.constant 0 : index
    %c0_96 = arith.constant 0 : index
    %c0_97 = arith.constant 0 : index
    %148 = vector.load %arg17[%c0_95, %c0_96, %c0_97] : memref<2x1x64xf32, #tpu.memory_space<vmem>>, vector<1x1x64xf32>
    %149 = vector.shape_cast %148 : vector<1x1x64xf32> to vector<1x64xf32>
    %cst_98 = arith.constant 0.000000e+00 : f32
    %150 = vector.broadcast %cst_98 : f32 to vector<4x32xf32>
    %151 = vector.extract_strided_slice %145 {offsets = [0, 0], sizes = [28, 32], strides = [1, 1]} : vector<32x32xf32> to vector<28x32xf32>
    %152 = tpu.concatenate %150, %151 in 0 : vector<4x32xf32>, vector<28x32xf32> -> vector<32x32xf32>
    %cst_99 = arith.constant 0.000000e+00 : f32
    %153 = vector.broadcast %cst_99 : f32 to vector<4x32xf32>
    %154 = vector.extract_strided_slice %145 {offsets = [4, 0], sizes = [28, 32], strides = [1, 1]} : vector<32x32xf32> to vector<28x32xf32>
    %155 = tpu.concatenate %154, %153 in 0 : vector<28x32xf32>, vector<4x32xf32> -> vector<32x32xf32>
    %156 = tpu.concatenate %152, %145, %155 in 1 : vector<32x32xf32>, vector<32x32xf32>, vector<32x32xf32> -> vector<32x96xf32>
    %157 = arith.truncf %156 : vector<32x96xf32> to vector<32x96xbf16>
    %cst_100 = arith.constant dense<0.000000e+00> : vector<32x64xf32>
    %158 = tpu.matmul %157, %147, %cst_100 {dimension_numbers = #tpu.dot_dimension_numbers<[1], [0], [0], [1], [0, 0, 1, 1], [], []>} : vector<32x96xbf16>, vector<96x64xbf16>, vector<32x64xf32> -> vector<32x64xf32>
    %159 = vector.broadcast %149 : vector<1x64xf32> to vector<32x64xf32>
    %160 = arith.addf %158, %159 : vector<32x64xf32>
    %cst_101 = arith.constant 0.000000e+00 : f32
    %161 = vector.broadcast %cst_101 : f32 to vector<32x64xf32>
    %162 = arith.cmpf ogt, %160, %161 : vector<32x64xf32>
    %cst_102 = arith.constant 2.000000e-01 : f32
    %163 = vector.broadcast %cst_102 : f32 to vector<32x64xf32>
    %164 = arith.mulf %163, %160 : vector<32x64xf32>
    %165 = arith.select %162, %160, %164 : vector<32x64xi1>, vector<32x64xf32>
    %166 = vector.extract_strided_slice %165 {offsets = [0, 0], sizes = [32, 32], strides = [1, 1]} : vector<32x64xf32> to vector<32x32xf32>
    %167 = vector.extract_strided_slice %165 {offsets = [0, 32], sizes = [32, 32], strides = [1, 1]} : vector<32x64xf32> to vector<32x32xf32>
    %c1_103 = arith.constant 1 : index
    %c0_104 = arith.constant 0 : index
    %c0_105 = arith.constant 0 : index
    %168 = vector.load %arg16[%c1_103, %c0_104, %c0_105] : memref<2x96x64xbf16, #tpu.memory_space<vmem>>, vector<1x96x64xbf16>
    %169 = vector.shape_cast %168 : vector<1x96x64xbf16> to vector<96x64xbf16>
    %c1_106 = arith.constant 1 : index
    %c0_107 = arith.constant 0 : index
    %c0_108 = arith.constant 0 : index
    %170 = vector.load %arg17[%c1_106, %c0_107, %c0_108] : memref<2x1x64xf32, #tpu.memory_space<vmem>>, vector<1x1x64xf32>
    %171 = vector.shape_cast %170 : vector<1x1x64xf32> to vector<1x64xf32>
    %cst_109 = arith.constant 0.000000e+00 : f32
    %172 = vector.broadcast %cst_109 : f32 to vector<4x32xf32>
    %173 = vector.extract_strided_slice %167 {offsets = [0, 0], sizes = [28, 32], strides = [1, 1]} : vector<32x32xf32> to vector<28x32xf32>
    %174 = tpu.concatenate %172, %173 in 0 : vector<4x32xf32>, vector<28x32xf32> -> vector<32x32xf32>
    %175 = tpu.concatenate %174, %166, %167 in 1 : vector<32x32xf32>, vector<32x32xf32>, vector<32x32xf32> -> vector<32x96xf32>
    %176 = arith.truncf %175 : vector<32x96xf32> to vector<32x96xbf16>
    %cst_110 = arith.constant dense<0.000000e+00> : vector<32x64xf32>
    %177 = tpu.matmul %176, %169, %cst_110 {dimension_numbers = #tpu.dot_dimension_numbers<[1], [0], [0], [1], [0, 0, 1, 1], [], []>} : vector<32x96xbf16>, vector<96x64xbf16>, vector<32x64xf32> -> vector<32x64xf32>
    %178 = vector.broadcast %171 : vector<1x64xf32> to vector<32x64xf32>
    %179 = arith.addf %177, %178 : vector<32x64xf32>
    %cst_111 = arith.constant 0.000000e+00 : f32
    %180 = vector.broadcast %cst_111 : f32 to vector<32x64xf32>
    %181 = arith.cmpf ogt, %179, %180 : vector<32x64xf32>
    %cst_112 = arith.constant 2.000000e-01 : f32
    %182 = vector.broadcast %cst_112 : f32 to vector<32x64xf32>
    %183 = arith.mulf %182, %179 : vector<32x64xf32>
    %184 = arith.select %181, %179, %183 : vector<32x64xi1>, vector<32x64xf32>
    %185 = vector.extract_strided_slice %184 {offsets = [0, 0], sizes = [32, 32], strides = [1, 1]} : vector<32x64xf32> to vector<32x32xf32>
    %186 = vector.extract_strided_slice %184 {offsets = [0, 32], sizes = [32, 32], strides = [1, 1]} : vector<32x64xf32> to vector<32x32xf32>
    %cst_113 = arith.constant 0.000000e+00 : f32
    %187 = vector.broadcast %cst_113 : f32 to vector<4x32xf32>
    %188 = vector.extract_strided_slice %166 {offsets = [4, 0], sizes = [28, 32], strides = [1, 1]} : vector<32x32xf32> to vector<28x32xf32>
    %189 = tpu.concatenate %188, %187 in 0 : vector<28x32xf32>, vector<4x32xf32> -> vector<32x32xf32>
    %190 = tpu.concatenate %166, %167, %189 in 1 : vector<32x32xf32>, vector<32x32xf32>, vector<32x32xf32> -> vector<32x96xf32>
    %191 = arith.truncf %190 : vector<32x96xf32> to vector<32x96xbf16>
    %cst_114 = arith.constant dense<0.000000e+00> : vector<32x64xf32>
    %192 = tpu.matmul %191, %169, %cst_114 {dimension_numbers = #tpu.dot_dimension_numbers<[1], [0], [0], [1], [0, 0, 1, 1], [], []>} : vector<32x96xbf16>, vector<96x64xbf16>, vector<32x64xf32> -> vector<32x64xf32>
    %193 = vector.broadcast %171 : vector<1x64xf32> to vector<32x64xf32>
    %194 = arith.addf %192, %193 : vector<32x64xf32>
    %cst_115 = arith.constant 0.000000e+00 : f32
    %195 = vector.broadcast %cst_115 : f32 to vector<32x64xf32>
    %196 = arith.cmpf ogt, %194, %195 : vector<32x64xf32>
    %cst_116 = arith.constant 2.000000e-01 : f32
    %197 = vector.broadcast %cst_116 : f32 to vector<32x64xf32>
    %198 = arith.mulf %197, %194 : vector<32x64xf32>
    %199 = arith.select %196, %194, %198 : vector<32x64xi1>, vector<32x64xf32>
    %200 = vector.extract_strided_slice %199 {offsets = [0, 0], sizes = [32, 32], strides = [1, 1]} : vector<32x64xf32> to vector<32x32xf32>
    %201 = vector.extract_strided_slice %199 {offsets = [0, 32], sizes = [32, 32], strides = [1, 1]} : vector<32x64xf32> to vector<32x32xf32>
    %cst_117 = arith.constant 0.000000e+00 : f32
    %202 = vector.broadcast %cst_117 : f32 to vector<4x32xf32>
    %203 = vector.extract_strided_slice %201 {offsets = [0, 0], sizes = [28, 32], strides = [1, 1]} : vector<32x32xf32> to vector<28x32xf32>
    %204 = tpu.concatenate %202, %203 in 0 : vector<4x32xf32>, vector<28x32xf32> -> vector<32x32xf32>
    %205 = tpu.concatenate %204, %185, %186 in 1 : vector<32x32xf32>, vector<32x32xf32>, vector<32x32xf32> -> vector<32x96xf32>
    %206 = tpu.concatenate %185, %186, %200 in 1 : vector<32x32xf32>, vector<32x32xf32>, vector<32x32xf32> -> vector<32x96xf32>
    %207 = tpu.concatenate %186, %200, %201 in 1 : vector<32x32xf32>, vector<32x32xf32>, vector<32x32xf32> -> vector<32x96xf32>
    %cst_118 = arith.constant 0.000000e+00 : f32
    %208 = vector.broadcast %cst_118 : f32 to vector<4x32xf32>
    %209 = vector.extract_strided_slice %185 {offsets = [4, 0], sizes = [28, 32], strides = [1, 1]} : vector<32x32xf32> to vector<28x32xf32>
    %210 = tpu.concatenate %209, %208 in 0 : vector<28x32xf32>, vector<4x32xf32> -> vector<32x32xf32>
    %211 = tpu.concatenate %200, %201, %210 in 1 : vector<32x32xf32>, vector<32x32xf32>, vector<32x32xf32> -> vector<32x96xf32>
    %212 = tpu.concatenate %205, %206, %207, %211 in 0 : vector<32x96xf32>, vector<32x96xf32>, vector<32x96xf32>, vector<32x96xf32> -> vector<128x96xf32>
    %213 = arith.truncf %212 : vector<128x96xf32> to vector<128x96xbf16>
    %c0_119 = arith.constant 0 : index
    %c0_120 = arith.constant 0 : index
    %214 = vector.load %arg18[%c0_119, %c0_120] : memref<96x1xbf16, #tpu.memory_space<vmem>>, vector<96x1xbf16>
    %cst_121 = arith.constant dense<0.000000e+00> : vector<128x1xf32>
    %215 = tpu.matmul %213, %214, %cst_121 {dimension_numbers = #tpu.dot_dimension_numbers<[1], [0], [0], [1], [0, 0, 1, 1], [], []>} : vector<128x96xbf16>, vector<96x1xbf16>, vector<128x1xf32> -> vector<128x1xf32>
    %c0_122 = arith.constant 0 : index
    %c0_123 = arith.constant 0 : index
    %216 = vector.load %arg19[%c0_122, %c0_123] : memref<1x1xf32, #tpu.memory_space<vmem>>, vector<1x1xf32>
    %217 = vector.broadcast %216 : vector<1x1xf32> to vector<128x1xf32>
    %218 = arith.addf %215, %217 : vector<128x1xf32>
    %219 = vector.extract_strided_slice %218 {offsets = [0, 0], sizes = [32, 1], strides = [1, 1]} : vector<128x1xf32> to vector<32x1xf32>
    %220 = vector.extract_strided_slice %218 {offsets = [32, 0], sizes = [32, 1], strides = [1, 1]} : vector<128x1xf32> to vector<32x1xf32>
    %221 = vector.extract_strided_slice %218 {offsets = [64, 0], sizes = [32, 1], strides = [1, 1]} : vector<128x1xf32> to vector<32x1xf32>
    %222 = vector.extract_strided_slice %218 {offsets = [96, 0], sizes = [32, 1], strides = [1, 1]} : vector<128x1xf32> to vector<32x1xf32>
    %223 = tpu.concatenate %219, %220, %221, %222 in 1 : vector<32x1xf32>, vector<32x1xf32>, vector<32x1xf32>, vector<32x1xf32> -> vector<32x4xf32>
    %224 = vector.extract_strided_slice %223 {offsets = [0, 0], sizes = [4, 4], strides = [1, 1]} : vector<32x4xf32> to vector<4x4xf32>
    %225 = vector.extract_strided_slice %223 {offsets = [4, 0], sizes = [4, 4], strides = [1, 1]} : vector<32x4xf32> to vector<4x4xf32>
    %226 = vector.extract_strided_slice %223 {offsets = [8, 0], sizes = [4, 4], strides = [1, 1]} : vector<32x4xf32> to vector<4x4xf32>
    %227 = vector.extract_strided_slice %223 {offsets = [12, 0], sizes = [4, 4], strides = [1, 1]} : vector<32x4xf32> to vector<4x4xf32>
    %228 = vector.extract_strided_slice %223 {offsets = [16, 0], sizes = [4, 4], strides = [1, 1]} : vector<32x4xf32> to vector<4x4xf32>
    %229 = vector.extract_strided_slice %223 {offsets = [20, 0], sizes = [4, 4], strides = [1, 1]} : vector<32x4xf32> to vector<4x4xf32>
    %230 = vector.extract_strided_slice %223 {offsets = [24, 0], sizes = [4, 4], strides = [1, 1]} : vector<32x4xf32> to vector<4x4xf32>
    %231 = vector.extract_strided_slice %223 {offsets = [28, 0], sizes = [4, 4], strides = [1, 1]} : vector<32x4xf32> to vector<4x4xf32>
    %232 = tpu.concatenate %224, %225, %226, %227, %228, %229, %230, %231 in 1 : vector<4x4xf32>, vector<4x4xf32>, vector<4x4xf32>, vector<4x4xf32>, vector<4x4xf32>, vector<4x4xf32>, vector<4x4xf32>, vector<4x4xf32> -> vector<4x32xf32>
    %c0_124 = arith.constant 0 : index
    %c0_125 = arith.constant 0 : index
    %c0_126 = arith.constant 0 : index
    %233 = vector.load %arg26[%c0_124, %c0_125, %c0_126] : memref<1x4x32xf32, #tpu.memory_space<vmem>>, vector<1x4x32xf32>
    %234 = vector.shape_cast %233 : vector<1x4x32xf32> to vector<4x32xf32>
    %235 = vector.shape_cast %232 : vector<4x32xf32> to vector<1x4x32xf32>
    tpu.vector_store %arg26[%c0_124, %c0_125, %c0_126], %235 {strides = array<i32>} : memref<1x4x32xf32, #tpu.memory_space<vmem>>, vector<1x4x32xf32>,
    %236 = arith.truncf %10 : vector<4x32xf32> to vector<4x32xbf16>
    %c0_127 = arith.constant 0 : index
    %c0_128 = arith.constant 0 : index
    %237 = vector.load %arg20[%c0_127, %c0_128] : memref<32x256xbf16, #tpu.memory_space<vmem>>, vector<32x256xbf16>
    %cst_129 = arith.constant dense<0.000000e+00> : vector<4x256xf32>
    %238 = tpu.matmul %236, %237, %cst_129 {dimension_numbers = #tpu.dot_dimension_numbers<[1], [0], [0], [1], [0, 0, 1, 1], [], []>} : vector<4x32xbf16>, vector<32x256xbf16>, vector<4x256xf32> -> vector<4x256xf32>
    %c0_130 = arith.constant 0 : index
    %c0_131 = arith.constant 0 : index
    %239 = vector.load %arg21[%c0_130, %c0_131] : memref<1x256xf32, #tpu.memory_space<vmem>>, vector<1x256xf32>
    %240 = vector.broadcast %239 : vector<1x256xf32> to vector<4x256xf32>
    %241 = arith.addf %238, %240 : vector<4x256xf32>
    %242 = vector.extract_strided_slice %241 {offsets = [0, 0], sizes = [4, 32], strides = [1, 1]} : vector<4x256xf32> to vector<4x32xf32>
    %243 = vector.extract_strided_slice %241 {offsets = [0, 32], sizes = [4, 32], strides = [1, 1]} : vector<4x256xf32> to vector<4x32xf32>
    %244 = vector.extract_strided_slice %241 {offsets = [0, 64], sizes = [4, 32], strides = [1, 1]} : vector<4x256xf32> to vector<4x32xf32>
    %245 = vector.extract_strided_slice %241 {offsets = [0, 96], sizes = [4, 32], strides = [1, 1]} : vector<4x256xf32> to vector<4x32xf32>
    %246 = vector.extract_strided_slice %241 {offsets = [0, 128], sizes = [4, 32], strides = [1, 1]} : vector<4x256xf32> to vector<4x32xf32>
    %247 = vector.extract_strided_slice %241 {offsets = [0, 160], sizes = [4, 32], strides = [1, 1]} : vector<4x256xf32> to vector<4x32xf32>
    %248 = vector.extract_strided_slice %241 {offsets = [0, 192], sizes = [4, 32], strides = [1, 1]} : vector<4x256xf32> to vector<4x32xf32>
    %249 = vector.extract_strided_slice %241 {offsets = [0, 224], sizes = [4, 32], strides = [1, 1]} : vector<4x256xf32> to vector<4x32xf32>
    %250 = tpu.concatenate %242, %243, %244, %245, %246, %247, %248, %249 in 0 : vector<4x32xf32>, vector<4x32xf32>, vector<4x32xf32>, vector<4x32xf32>, vector<4x32xf32>, vector<4x32xf32>, vector<4x32xf32>, vector<4x32xf32> -> vector<32x32xf32>
    %c0_132 = arith.constant 0 : index
    %c0_133 = arith.constant 0 : index
    %c0_134 = arith.constant 0 : index
    %251 = vector.load %arg22[%c0_132, %c0_133, %c0_134] : memref<4x96x64xbf16, #tpu.memory_space<vmem>>, vector<1x96x64xbf16>
    %252 = vector.shape_cast %251 : vector<1x96x64xbf16> to vector<96x64xbf16>
    %c0_135 = arith.constant 0 : index
    %c0_136 = arith.constant 0 : index
    %c0_137 = arith.constant 0 : index
    %253 = vector.load %arg23[%c0_135, %c0_136, %c0_137] : memref<4x1x64xf32, #tpu.memory_space<vmem>>, vector<1x1x64xf32>
    %254 = vector.shape_cast %253 : vector<1x1x64xf32> to vector<1x64xf32>
    %cst_138 = arith.constant 0.000000e+00 : f32
    %255 = vector.broadcast %cst_138 : f32 to vector<4x32xf32>
    %256 = vector.extract_strided_slice %250 {offsets = [0, 0], sizes = [28, 32], strides = [1, 1]} : vector<32x32xf32> to vector<28x32xf32>
    %257 = tpu.concatenate %255, %256 in 0 : vector<4x32xf32>, vector<28x32xf32> -> vector<32x32xf32>
    %cst_139 = arith.constant 0.000000e+00 : f32
    %258 = vector.broadcast %cst_139 : f32 to vector<4x32xf32>
    %259 = vector.extract_strided_slice %250 {offsets = [4, 0], sizes = [28, 32], strides = [1, 1]} : vector<32x32xf32> to vector<28x32xf32>
    %260 = tpu.concatenate %259, %258 in 0 : vector<28x32xf32>, vector<4x32xf32> -> vector<32x32xf32>
    %261 = tpu.concatenate %257, %250, %260 in 1 : vector<32x32xf32>, vector<32x32xf32>, vector<32x32xf32> -> vector<32x96xf32>
    %262 = arith.truncf %261 : vector<32x96xf32> to vector<32x96xbf16>
    %cst_140 = arith.constant dense<0.000000e+00> : vector<32x64xf32>
    %263 = tpu.matmul %262, %252, %cst_140 {dimension_numbers = #tpu.dot_dimension_numbers<[1], [0], [0], [1], [0, 0, 1, 1], [], []>} : vector<32x96xbf16>, vector<96x64xbf16>, vector<32x64xf32> -> vector<32x64xf32>
    %264 = vector.broadcast %254 : vector<1x64xf32> to vector<32x64xf32>
    %265 = arith.addf %263, %264 : vector<32x64xf32>
    %cst_141 = arith.constant 0.000000e+00 : f32
    %266 = vector.broadcast %cst_141 : f32 to vector<32x64xf32>
    %267 = arith.cmpf ogt, %265, %266 : vector<32x64xf32>
    %cst_142 = arith.constant 2.000000e-01 : f32
    %268 = vector.broadcast %cst_142 : f32 to vector<32x64xf32>
    %269 = arith.mulf %268, %265 : vector<32x64xf32>
    %270 = arith.select %267, %265, %269 : vector<32x64xi1>, vector<32x64xf32>
    %271 = vector.extract_strided_slice %270 {offsets = [0, 0], sizes = [32, 32], strides = [1, 1]} : vector<32x64xf32> to vector<32x32xf32>
    %272 = vector.extract_strided_slice %270 {offsets = [0, 32], sizes = [32, 32], strides = [1, 1]} : vector<32x64xf32> to vector<32x32xf32>
    %c1_143 = arith.constant 1 : index
    %c0_144 = arith.constant 0 : index
    %c0_145 = arith.constant 0 : index
    %273 = vector.load %arg22[%c1_143, %c0_144, %c0_145] : memref<4x96x64xbf16, #tpu.memory_space<vmem>>, vector<1x96x64xbf16>
    %274 = vector.shape_cast %273 : vector<1x96x64xbf16> to vector<96x64xbf16>
    %c1_146 = arith.constant 1 : index
    %c0_147 = arith.constant 0 : index
    %c0_148 = arith.constant 0 : index
    %275 = vector.load %arg23[%c1_146, %c0_147, %c0_148] : memref<4x1x64xf32, #tpu.memory_space<vmem>>, vector<1x1x64xf32>
    %276 = vector.shape_cast %275 : vector<1x1x64xf32> to vector<1x64xf32>
    %cst_149 = arith.constant 0.000000e+00 : f32
    %277 = vector.broadcast %cst_149 : f32 to vector<4x32xf32>
    %278 = vector.extract_strided_slice %272 {offsets = [0, 0], sizes = [28, 32], strides = [1, 1]} : vector<32x32xf32> to vector<28x32xf32>
    %279 = tpu.concatenate %277, %278 in 0 : vector<4x32xf32>, vector<28x32xf32> -> vector<32x32xf32>
    %280 = tpu.concatenate %279, %271, %272 in 1 : vector<32x32xf32>, vector<32x32xf32>, vector<32x32xf32> -> vector<32x96xf32>
    %281 = arith.truncf %280 : vector<32x96xf32> to vector<32x96xbf16>
    %cst_150 = arith.constant dense<0.000000e+00> : vector<32x64xf32>
    %282 = tpu.matmul %281, %274, %cst_150 {dimension_numbers = #tpu.dot_dimension_numbers<[1], [0], [0], [1], [0, 0, 1, 1], [], []>} : vector<32x96xbf16>, vector<96x64xbf16>, vector<32x64xf32> -> vector<32x64xf32>
    %283 = vector.broadcast %276 : vector<1x64xf32> to vector<32x64xf32>
    %284 = arith.addf %282, %283 : vector<32x64xf32>
    %cst_151 = arith.constant 0.000000e+00 : f32
    %285 = vector.broadcast %cst_151 : f32 to vector<32x64xf32>
    %286 = arith.cmpf ogt, %284, %285 : vector<32x64xf32>
    %cst_152 = arith.constant 2.000000e-01 : f32
    %287 = vector.broadcast %cst_152 : f32 to vector<32x64xf32>
    %288 = arith.mulf %287, %284 : vector<32x64xf32>
    %289 = arith.select %286, %284, %288 : vector<32x64xi1>, vector<32x64xf32>
    %290 = vector.extract_strided_slice %289 {offsets = [0, 0], sizes = [32, 32], strides = [1, 1]} : vector<32x64xf32> to vector<32x32xf32>
    %291 = vector.extract_strided_slice %289 {offsets = [0, 32], sizes = [32, 32], strides = [1, 1]} : vector<32x64xf32> to vector<32x32xf32>
    %cst_153 = arith.constant 0.000000e+00 : f32
    %292 = vector.broadcast %cst_153 : f32 to vector<4x32xf32>
    %293 = vector.extract_strided_slice %271 {offsets = [4, 0], sizes = [28, 32], strides = [1, 1]} : vector<32x32xf32> to vector<28x32xf32>
    %294 = tpu.concatenate %293, %292 in 0 : vector<28x32xf32>, vector<4x32xf32> -> vector<32x32xf32>
    %295 = tpu.concatenate %271, %272, %294 in 1 : vector<32x32xf32>, vector<32x32xf32>, vector<32x32xf32> -> vector<32x96xf32>
    %296 = arith.truncf %295 : vector<32x96xf32> to vector<32x96xbf16>
    %cst_154 = arith.constant dense<0.000000e+00> : vector<32x64xf32>
    %297 = tpu.matmul %296, %274, %cst_154 {dimension_numbers = #tpu.dot_dimension_numbers<[1], [0], [0], [1], [0, 0, 1, 1], [], []>} : vector<32x96xbf16>, vector<96x64xbf16>, vector<32x64xf32> -> vector<32x64xf32>
    %298 = vector.broadcast %276 : vector<1x64xf32> to vector<32x64xf32>
    %299 = arith.addf %297, %298 : vector<32x64xf32>
    %cst_155 = arith.constant 0.000000e+00 : f32
    %300 = vector.broadcast %cst_155 : f32 to vector<32x64xf32>
    %301 = arith.cmpf ogt, %299, %300 : vector<32x64xf32>
    %cst_156 = arith.constant 2.000000e-01 : f32
    %302 = vector.broadcast %cst_156 : f32 to vector<32x64xf32>
    %303 = arith.mulf %302, %299 : vector<32x64xf32>
    %304 = arith.select %301, %299, %303 : vector<32x64xi1>, vector<32x64xf32>
    %305 = vector.extract_strided_slice %304 {offsets = [0, 0], sizes = [32, 32], strides = [1, 1]} : vector<32x64xf32> to vector<32x32xf32>
    %306 = vector.extract_strided_slice %304 {offsets = [0, 32], sizes = [32, 32], strides = [1, 1]} : vector<32x64xf32> to vector<32x32xf32>
    %c2_157 = arith.constant 2 : index
    %c0_158 = arith.constant 0 : index
    %c0_159 = arith.constant 0 : index
    %307 = vector.load %arg22[%c2_157, %c0_158, %c0_159] : memref<4x96x64xbf16, #tpu.memory_space<vmem>>, vector<1x96x64xbf16>
    %308 = vector.shape_cast %307 : vector<1x96x64xbf16> to vector<96x64xbf16>
    %c2_160 = arith.constant 2 : index
    %c0_161 = arith.constant 0 : index
    %c0_162 = arith.constant 0 : index
    %309 = vector.load %arg23[%c2_160, %c0_161, %c0_162] : memref<4x1x64xf32, #tpu.memory_space<vmem>>, vector<1x1x64xf32>
    %310 = vector.shape_cast %309 : vector<1x1x64xf32> to vector<1x64xf32>
    %cst_163 = arith.constant 0.000000e+00 : f32
    %311 = vector.broadcast %cst_163 : f32 to vector<4x32xf32>
    %312 = vector.extract_strided_slice %306 {offsets = [0, 0], sizes = [28, 32], strides = [1, 1]} : vector<32x32xf32> to vector<28x32xf32>
    %313 = tpu.concatenate %311, %312 in 0 : vector<4x32xf32>, vector<28x32xf32> -> vector<32x32xf32>
    %314 = tpu.concatenate %313, %290, %291 in 1 : vector<32x32xf32>, vector<32x32xf32>, vector<32x32xf32> -> vector<32x96xf32>
    %315 = arith.truncf %314 : vector<32x96xf32> to vector<32x96xbf16>
    %cst_164 = arith.constant dense<0.000000e+00> : vector<32x64xf32>
    %316 = tpu.matmul %315, %308, %cst_164 {dimension_numbers = #tpu.dot_dimension_numbers<[1], [0], [0], [1], [0, 0, 1, 1], [], []>} : vector<32x96xbf16>, vector<96x64xbf16>, vector<32x64xf32> -> vector<32x64xf32>
    %317 = vector.broadcast %310 : vector<1x64xf32> to vector<32x64xf32>
    %318 = arith.addf %316, %317 : vector<32x64xf32>
    %cst_165 = arith.constant 0.000000e+00 : f32
    %319 = vector.broadcast %cst_165 : f32 to vector<32x64xf32>
    %320 = arith.cmpf ogt, %318, %319 : vector<32x64xf32>
    %cst_166 = arith.constant 2.000000e-01 : f32
    %321 = vector.broadcast %cst_166 : f32 to vector<32x64xf32>
    %322 = arith.mulf %321, %318 : vector<32x64xf32>
    %323 = arith.select %320, %318, %322 : vector<32x64xi1>, vector<32x64xf32>
    %324 = vector.extract_strided_slice %323 {offsets = [0, 0], sizes = [32, 32], strides = [1, 1]} : vector<32x64xf32> to vector<32x32xf32>
    %325 = vector.extract_strided_slice %323 {offsets = [0, 32], sizes = [32, 32], strides = [1, 1]} : vector<32x64xf32> to vector<32x32xf32>
    %326 = tpu.concatenate %290, %291, %305 in 1 : vector<32x32xf32>, vector<32x32xf32>, vector<32x32xf32> -> vector<32x96xf32>
    %327 = arith.truncf %326 : vector<32x96xf32> to vector<32x96xbf16>
    %cst_167 = arith.constant dense<0.000000e+00> : vector<32x64xf32>
    %328 = tpu.matmul %327, %308, %cst_167 {dimension_numbers = #tpu.dot_dimension_numbers<[1], [0], [0], [1], [0, 0, 1, 1], [], []>} : vector<32x96xbf16>, vector<96x64xbf16>, vector<32x64xf32> -> vector<32x64xf32>
    %329 = vector.broadcast %310 : vector<1x64xf32> to vector<32x64xf32>
    %330 = arith.addf %328, %329 : vector<32x64xf32>
    %cst_168 = arith.constant 0.000000e+00 : f32
    %331 = vector.broadcast %cst_168 : f32 to vector<32x64xf32>
    %332 = arith.cmpf ogt, %330, %331 : vector<32x64xf32>
    %cst_169 = arith.constant 2.000000e-01 : f32
    %333 = vector.broadcast %cst_169 : f32 to vector<32x64xf32>
    %334 = arith.mulf %333, %330 : vector<32x64xf32>
    %335 = arith.select %332, %330, %334 : vector<32x64xi1>, vector<32x64xf32>
    %336 = vector.extract_strided_slice %335 {offsets = [0, 0], sizes = [32, 32], strides = [1, 1]} : vector<32x64xf32> to vector<32x32xf32>
    %337 = vector.extract_strided_slice %335 {offsets = [0, 32], sizes = [32, 32], strides = [1, 1]} : vector<32x64xf32> to vector<32x32xf32>
    %338 = tpu.concatenate %291, %305, %306 in 1 : vector<32x32xf32>, vector<32x32xf32>, vector<32x32xf32> -> vector<32x96xf32>
    %339 = arith.truncf %338 : vector<32x96xf32> to vector<32x96xbf16>
    %cst_170 = arith.constant dense<0.000000e+00> : vector<32x64xf32>
    %340 = tpu.matmul %339, %308, %cst_170 {dimension_numbers = #tpu.dot_dimension_numbers<[1], [0], [0], [1], [0, 0, 1, 1], [], []>} : vector<32x96xbf16>, vector<96x64xbf16>, vector<32x64xf32> -> vector<32x64xf32>
    %341 = vector.broadcast %310 : vector<1x64xf32> to vector<32x64xf32>
    %342 = arith.addf %340, %341 : vector<32x64xf32>
    %cst_171 = arith.constant 0.000000e+00 : f32
    %343 = vector.broadcast %cst_171 : f32 to vector<32x64xf32>
    %344 = arith.cmpf ogt, %342, %343 : vector<32x64xf32>
    %cst_172 = arith.constant 2.000000e-01 : f32
    %345 = vector.broadcast %cst_172 : f32 to vector<32x64xf32>
    %346 = arith.mulf %345, %342 : vector<32x64xf32>
    %347 = arith.select %344, %342, %346 : vector<32x64xi1>, vector<32x64xf32>
    %348 = vector.extract_strided_slice %347 {offsets = [0, 0], sizes = [32, 32], strides = [1, 1]} : vector<32x64xf32> to vector<32x32xf32>
    %349 = vector.extract_strided_slice %347 {offsets = [0, 32], sizes = [32, 32], strides = [1, 1]} : vector<32x64xf32> to vector<32x32xf32>
    %cst_173 = arith.constant 0.000000e+00 : f32
    %350 = vector.broadcast %cst_173 : f32 to vector<4x32xf32>
    %351 = vector.extract_strided_slice %290 {offsets = [4, 0], sizes = [28, 32], strides = [1, 1]} : vector<32x32xf32> to vector<28x32xf32>
    %352 = tpu.concatenate %351, %350 in 0 : vector<28x32xf32>, vector<4x32xf32> -> vector<32x32xf32>
    %353 = tpu.concatenate %305, %306, %352 in 1 : vector<32x32xf32>, vector<32x32xf32>, vector<32x32xf32> -> vector<32x96xf32>
    %354 = arith.truncf %353 : vector<32x96xf32> to vector<32x96xbf16>
    %cst_174 = arith.constant dense<0.000000e+00> : vector<32x64xf32>
    %355 = tpu.matmul %354, %308, %cst_174 {dimension_numbers = #tpu.dot_dimension_numbers<[1], [0], [0], [1], [0, 0, 1, 1], [], []>} : vector<32x96xbf16>, vector<96x64xbf16>, vector<32x64xf32> -> vector<32x64xf32>
    %356 = vector.broadcast %310 : vector<1x64xf32> to vector<32x64xf32>
    %357 = arith.addf %355, %356 : vector<32x64xf32>
    %cst_175 = arith.constant 0.000000e+00 : f32
    %358 = vector.broadcast %cst_175 : f32 to vector<32x64xf32>
    %359 = arith.cmpf ogt, %357, %358 : vector<32x64xf32>
    %cst_176 = arith.constant 2.000000e-01 : f32
    %360 = vector.broadcast %cst_176 : f32 to vector<32x64xf32>
    %361 = arith.mulf %360, %357 : vector<32x64xf32>
    %362 = arith.select %359, %357, %361 : vector<32x64xi1>, vector<32x64xf32>
    %363 = vector.extract_strided_slice %362 {offsets = [0, 0], sizes = [32, 32], strides = [1, 1]} : vector<32x64xf32> to vector<32x32xf32>
    %364 = vector.extract_strided_slice %362 {offsets = [0, 32], sizes = [32, 32], strides = [1, 1]} : vector<32x64xf32> to vector<32x32xf32>
    %c3 = arith.constant 3 : index
    %c0_177 = arith.constant 0 : index
    %c0_178 = arith.constant 0 : index
    %365 = vector.load %arg22[%c3, %c0_177, %c0_178] : memref<4x96x64xbf16, #tpu.memory_space<vmem>>, vector<1x96x64xbf16>
    %366 = vector.shape_cast %365 : vector<1x96x64xbf16> to vector<96x64xbf16>
    %c3_179 = arith.constant 3 : index
    %c0_180 = arith.constant 0 : index
    %c0_181 = arith.constant 0 : index
    %367 = vector.load %arg23[%c3_179, %c0_180, %c0_181] : memref<4x1x64xf32, #tpu.memory_space<vmem>>, vector<1x1x64xf32>
    %368 = vector.shape_cast %367 : vector<1x1x64xf32> to vector<1x64xf32>
    %cst_182 = arith.constant 0.000000e+00 : f32
    %369 = vector.broadcast %cst_182 : f32 to vector<4x32xf32>
    %370 = vector.extract_strided_slice %364 {offsets = [0, 0], sizes = [28, 32], strides = [1, 1]} : vector<32x32xf32> to vector<28x32xf32>
    %371 = tpu.concatenate %369, %370 in 0 : vector<4x32xf32>, vector<28x32xf32> -> vector<32x32xf32>
    %372 = tpu.concatenate %371, %324, %325 in 1 : vector<32x32xf32>, vector<32x32xf32>, vector<32x32xf32> -> vector<32x96xf32>
    %373 = arith.truncf %372 : vector<32x96xf32> to vector<32x96xbf16>
    %cst_183 = arith.constant dense<0.000000e+00> : vector<32x64xf32>
    %374 = tpu.matmul %373, %366, %cst_183 {dimension_numbers = #tpu.dot_dimension_numbers<[1], [0], [0], [1], [0, 0, 1, 1], [], []>} : vector<32x96xbf16>, vector<96x64xbf16>, vector<32x64xf32> -> vector<32x64xf32>
    %375 = vector.broadcast %368 : vector<1x64xf32> to vector<32x64xf32>
    %376 = arith.addf %374, %375 : vector<32x64xf32>
    %cst_184 = arith.constant 0.000000e+00 : f32
    %377 = vector.broadcast %cst_184 : f32 to vector<32x64xf32>
    %378 = arith.cmpf ogt, %376, %377 : vector<32x64xf32>
    %cst_185 = arith.constant 2.000000e-01 : f32
    %379 = vector.broadcast %cst_185 : f32 to vector<32x64xf32>
    %380 = arith.mulf %379, %376 : vector<32x64xf32>
    %381 = arith.select %378, %376, %380 : vector<32x64xi1>, vector<32x64xf32>
    %382 = vector.extract_strided_slice %381 {offsets = [0, 0], sizes = [32, 32], strides = [1, 1]} : vector<32x64xf32> to vector<32x32xf32>
    %383 = vector.extract_strided_slice %381 {offsets = [0, 32], sizes = [32, 32], strides = [1, 1]} : vector<32x64xf32> to vector<32x32xf32>
    %384 = tpu.concatenate %324, %325, %336 in 1 : vector<32x32xf32>, vector<32x32xf32>, vector<32x32xf32> -> vector<32x96xf32>
    %385 = arith.truncf %384 : vector<32x96xf32> to vector<32x96xbf16>
    %cst_186 = arith.constant dense<0.000000e+00> : vector<32x64xf32>
    %386 = tpu.matmul %385, %366, %cst_186 {dimension_numbers = #tpu.dot_dimension_numbers<[1], [0], [0], [1], [0, 0, 1, 1], [], []>} : vector<32x96xbf16>, vector<96x64xbf16>, vector<32x64xf32> -> vector<32x64xf32>
    %387 = vector.broadcast %368 : vector<1x64xf32> to vector<32x64xf32>
    %388 = arith.addf %386, %387 : vector<32x64xf32>
    %cst_187 = arith.constant 0.000000e+00 : f32
    %389 = vector.broadcast %cst_187 : f32 to vector<32x64xf32>
    %390 = arith.cmpf ogt, %388, %389 : vector<32x64xf32>
    %cst_188 = arith.constant 2.000000e-01 : f32
    %391 = vector.broadcast %cst_188 : f32 to vector<32x64xf32>
    %392 = arith.mulf %391, %388 : vector<32x64xf32>
    %393 = arith.select %390, %388, %392 : vector<32x64xi1>, vector<32x64xf32>
    %394 = vector.extract_strided_slice %393 {offsets = [0, 0], sizes = [32, 32], strides = [1, 1]} : vector<32x64xf32> to vector<32x32xf32>
    %395 = vector.extract_strided_slice %393 {offsets = [0, 32], sizes = [32, 32], strides = [1, 1]} : vector<32x64xf32> to vector<32x32xf32>
    %396 = tpu.concatenate %325, %336, %337 in 1 : vector<32x32xf32>, vector<32x32xf32>, vector<32x32xf32> -> vector<32x96xf32>
    %397 = arith.truncf %396 : vector<32x96xf32> to vector<32x96xbf16>
    %cst_189 = arith.constant dense<0.000000e+00> : vector<32x64xf32>
    %398 = tpu.matmul %397, %366, %cst_189 {dimension_numbers = #tpu.dot_dimension_numbers<[1], [0], [0], [1], [0, 0, 1, 1], [], []>} : vector<32x96xbf16>, vector<96x64xbf16>, vector<32x64xf32> -> vector<32x64xf32>
    %399 = vector.broadcast %368 : vector<1x64xf32> to vector<32x64xf32>
    %400 = arith.addf %398, %399 : vector<32x64xf32>
    %cst_190 = arith.constant 0.000000e+00 : f32
    %401 = vector.broadcast %cst_190 : f32 to vector<32x64xf32>
    %402 = arith.cmpf ogt, %400, %401 : vector<32x64xf32>
    %cst_191 = arith.constant 2.000000e-01 : f32
    %403 = vector.broadcast %cst_191 : f32 to vector<32x64xf32>
    %404 = arith.mulf %403, %400 : vector<32x64xf32>
    %405 = arith.select %402, %400, %404 : vector<32x64xi1>, vector<32x64xf32>
    %406 = vector.extract_strided_slice %405 {offsets = [0, 0], sizes = [32, 32], strides = [1, 1]} : vector<32x64xf32> to vector<32x32xf32>
    %407 = vector.extract_strided_slice %405 {offsets = [0, 32], sizes = [32, 32], strides = [1, 1]} : vector<32x64xf32> to vector<32x32xf32>
    %408 = tpu.concatenate %336, %337, %348 in 1 : vector<32x32xf32>, vector<32x32xf32>, vector<32x32xf32> -> vector<32x96xf32>
    %409 = arith.truncf %408 : vector<32x96xf32> to vector<32x96xbf16>
    %cst_192 = arith.constant dense<0.000000e+00> : vector<32x64xf32>
    %410 = tpu.matmul %409, %366, %cst_192 {dimension_numbers = #tpu.dot_dimension_numbers<[1], [0], [0], [1], [0, 0, 1, 1], [], []>} : vector<32x96xbf16>, vector<96x64xbf16>, vector<32x64xf32> -> vector<32x64xf32>
    %411 = vector.broadcast %368 : vector<1x64xf32> to vector<32x64xf32>
    %412 = arith.addf %410, %411 : vector<32x64xf32>
    %cst_193 = arith.constant 0.000000e+00 : f32
    %413 = vector.broadcast %cst_193 : f32 to vector<32x64xf32>
    %414 = arith.cmpf ogt, %412, %413 : vector<32x64xf32>
    %cst_194 = arith.constant 2.000000e-01 : f32
    %415 = vector.broadcast %cst_194 : f32 to vector<32x64xf32>
    %416 = arith.mulf %415, %412 : vector<32x64xf32>
    %417 = arith.select %414, %412, %416 : vector<32x64xi1>, vector<32x64xf32>
    %418 = vector.extract_strided_slice %417 {offsets = [0, 0], sizes = [32, 32], strides = [1, 1]} : vector<32x64xf32> to vector<32x32xf32>
    %419 = vector.extract_strided_slice %417 {offsets = [0, 32], sizes = [32, 32], strides = [1, 1]} : vector<32x64xf32> to vector<32x32xf32>
    %420 = tpu.concatenate %337, %348, %349 in 1 : vector<32x32xf32>, vector<32x32xf32>, vector<32x32xf32> -> vector<32x96xf32>
    %421 = arith.truncf %420 : vector<32x96xf32> to vector<32x96xbf16>
    %cst_195 = arith.constant dense<0.000000e+00> : vector<32x64xf32>
    %422 = tpu.matmul %421, %366, %cst_195 {dimension_numbers = #tpu.dot_dimension_numbers<[1], [0], [0], [1], [0, 0, 1, 1], [], []>} : vector<32x96xbf16>, vector<96x64xbf16>, vector<32x64xf32> -> vector<32x64xf32>
    %423 = vector.broadcast %368 : vector<1x64xf32> to vector<32x64xf32>
    %424 = arith.addf %422, %423 : vector<32x64xf32>
    %cst_196 = arith.constant 0.000000e+00 : f32
    %425 = vector.broadcast %cst_196 : f32 to vector<32x64xf32>
    %426 = arith.cmpf ogt, %424, %425 : vector<32x64xf32>
    %cst_197 = arith.constant 2.000000e-01 : f32
    %427 = vector.broadcast %cst_197 : f32 to vector<32x64xf32>
    %428 = arith.mulf %427, %424 : vector<32x64xf32>
    %429 = arith.select %426, %424, %428 : vector<32x64xi1>, vector<32x64xf32>
    %430 = vector.extract_strided_slice %429 {offsets = [0, 0], sizes = [32, 32], strides = [1, 1]} : vector<32x64xf32> to vector<32x32xf32>
    %431 = vector.extract_strided_slice %429 {offsets = [0, 32], sizes = [32, 32], strides = [1, 1]} : vector<32x64xf32> to vector<32x32xf32>
    %432 = tpu.concatenate %348, %349, %363 in 1 : vector<32x32xf32>, vector<32x32xf32>, vector<32x32xf32> -> vector<32x96xf32>
    %433 = arith.truncf %432 : vector<32x96xf32> to vector<32x96xbf16>
    %cst_198 = arith.constant dense<0.000000e+00> : vector<32x64xf32>
    %434 = tpu.matmul %433, %366, %cst_198 {dimension_numbers = #tpu.dot_dimension_numbers<[1], [0], [0], [1], [0, 0, 1, 1], [], []>} : vector<32x96xbf16>, vector<96x64xbf16>, vector<32x64xf32> -> vector<32x64xf32>
    %435 = vector.broadcast %368 : vector<1x64xf32> to vector<32x64xf32>
    %436 = arith.addf %434, %435 : vector<32x64xf32>
    %cst_199 = arith.constant 0.000000e+00 : f32
    %437 = vector.broadcast %cst_199 : f32 to vector<32x64xf32>
    %438 = arith.cmpf ogt, %436, %437 : vector<32x64xf32>
    %cst_200 = arith.constant 2.000000e-01 : f32
    %439 = vector.broadcast %cst_200 : f32 to vector<32x64xf32>
    %440 = arith.mulf %439, %436 : vector<32x64xf32>
    %441 = arith.select %438, %436, %440 : vector<32x64xi1>, vector<32x64xf32>
    %442 = vector.extract_strided_slice %441 {offsets = [0, 0], sizes = [32, 32], strides = [1, 1]} : vector<32x64xf32> to vector<32x32xf32>
    %443 = vector.extract_strided_slice %441 {offsets = [0, 32], sizes = [32, 32], strides = [1, 1]} : vector<32x64xf32> to vector<32x32xf32>
    %444 = tpu.concatenate %349, %363, %364 in 1 : vector<32x32xf32>, vector<32x32xf32>, vector<32x32xf32> -> vector<32x96xf32>
    %445 = arith.truncf %444 : vector<32x96xf32> to vector<32x96xbf16>
    %cst_201 = arith.constant dense<0.000000e+00> : vector<32x64xf32>
    %446 = tpu.matmul %445, %366, %cst_201 {dimension_numbers = #tpu.dot_dimension_numbers<[1], [0], [0], [1], [0, 0, 1, 1], [], []>} : vector<32x96xbf16>, vector<96x64xbf16>, vector<32x64xf32> -> vector<32x64xf32>
    %447 = vector.broadcast %368 : vector<1x64xf32> to vector<32x64xf32>
    %448 = arith.addf %446, %447 : vector<32x64xf32>
    %cst_202 = arith.constant 0.000000e+00 : f32
    %449 = vector.broadcast %cst_202 : f32 to vector<32x64xf32>
    %450 = arith.cmpf ogt, %448, %449 : vector<32x64xf32>
    %cst_203 = arith.constant 2.000000e-01 : f32
    %451 = vector.broadcast %cst_203 : f32 to vector<32x64xf32>
    %452 = arith.mulf %451, %448 : vector<32x64xf32>
    %453 = arith.select %450, %448, %452 : vector<32x64xi1>, vector<32x64xf32>
    %454 = vector.extract_strided_slice %453 {offsets = [0, 0], sizes = [32, 32], strides = [1, 1]} : vector<32x64xf32> to vector<32x32xf32>
    %455 = vector.extract_strided_slice %453 {offsets = [0, 32], sizes = [32, 32], strides = [1, 1]} : vector<32x64xf32> to vector<32x32xf32>
    %cst_204 = arith.constant 0.000000e+00 : f32
    %456 = vector.broadcast %cst_204 : f32 to vector<4x32xf32>
    %457 = vector.extract_strided_slice %324 {offsets = [4, 0], sizes = [28, 32], strides = [1, 1]} : vector<32x32xf32> to vector<28x32xf32>
    %458 = tpu.concatenate %457, %456 in 0 : vector<28x32xf32>, vector<4x32xf32> -> vector<32x32xf32>
    %459 = tpu.concatenate %363, %364, %458 in 1 : vector<32x32xf32>, vector<32x32xf32>, vector<32x32xf32> -> vector<32x96xf32>
    %460 = arith.truncf %459 : vector<32x96xf32> to vector<32x96xbf16>
    %cst_205 = arith.constant dense<0.000000e+00> : vector<32x64xf32>
    %461 = tpu.matmul %460, %366, %cst_205 {dimension_numbers = #tpu.dot_dimension_numbers<[1], [0], [0], [1], [0, 0, 1, 1], [], []>} : vector<32x96xbf16>, vector<96x64xbf16>, vector<32x64xf32> -> vector<32x64xf32>
    %462 = vector.broadcast %368 : vector<1x64xf32> to vector<32x64xf32>
    %463 = arith.addf %461, %462 : vector<32x64xf32>
    %cst_206 = arith.constant 0.000000e+00 : f32
    %464 = vector.broadcast %cst_206 : f32 to vector<32x64xf32>
    %465 = arith.cmpf ogt, %463, %464 : vector<32x64xf32>
    %cst_207 = arith.constant 2.000000e-01 : f32
    %466 = vector.broadcast %cst_207 : f32 to vector<32x64xf32>
    %467 = arith.mulf %466, %463 : vector<32x64xf32>
    %468 = arith.select %465, %463, %467 : vector<32x64xi1>, vector<32x64xf32>
    %469 = vector.extract_strided_slice %468 {offsets = [0, 0], sizes = [32, 32], strides = [1, 1]} : vector<32x64xf32> to vector<32x32xf32>
    %470 = vector.extract_strided_slice %468 {offsets = [0, 32], sizes = [32, 32], strides = [1, 1]} : vector<32x64xf32> to vector<32x32xf32>
    %cst_208 = arith.constant 0.000000e+00 : f32
    %471 = vector.broadcast %cst_208 : f32 to vector<4x32xf32>
    %472 = vector.extract_strided_slice %470 {offsets = [0, 0], sizes = [28, 32], strides = [1, 1]} : vector<32x32xf32> to vector<28x32xf32>
    %473 = tpu.concatenate %471, %472 in 0 : vector<4x32xf32>, vector<28x32xf32> -> vector<32x32xf32>
    %474 = tpu.concatenate %473, %382, %383 in 1 : vector<32x32xf32>, vector<32x32xf32>, vector<32x32xf32> -> vector<32x96xf32>
    %475 = tpu.concatenate %382, %383, %394 in 1 : vector<32x32xf32>, vector<32x32xf32>, vector<32x32xf32> -> vector<32x96xf32>
    %476 = tpu.concatenate %383, %394, %395 in 1 : vector<32x32xf32>, vector<32x32xf32>, vector<32x32xf32> -> vector<32x96xf32>
    %477 = tpu.concatenate %394, %395, %406 in 1 : vector<32x32xf32>, vector<32x32xf32>, vector<32x32xf32> -> vector<32x96xf32>
    %478 = tpu.concatenate %395, %406, %407 in 1 : vector<32x32xf32>, vector<32x32xf32>, vector<32x32xf32> -> vector<32x96xf32>
    %479 = tpu.concatenate %406, %407, %418 in 1 : vector<32x32xf32>, vector<32x32xf32>, vector<32x32xf32> -> vector<32x96xf32>
    %480 = tpu.concatenate %407, %418, %419 in 1 : vector<32x32xf32>, vector<32x32xf32>, vector<32x32xf32> -> vector<32x96xf32>
    %481 = tpu.concatenate %418, %419, %430 in 1 : vector<32x32xf32>, vector<32x32xf32>, vector<32x32xf32> -> vector<32x96xf32>
    %482 = tpu.concatenate %419, %430, %431 in 1 : vector<32x32xf32>, vector<32x32xf32>, vector<32x32xf32> -> vector<32x96xf32>
    %483 = tpu.concatenate %430, %431, %442 in 1 : vector<32x32xf32>, vector<32x32xf32>, vector<32x32xf32> -> vector<32x96xf32>
    %484 = tpu.concatenate %431, %442, %443 in 1 : vector<32x32xf32>, vector<32x32xf32>, vector<32x32xf32> -> vector<32x96xf32>
    %485 = tpu.concatenate %442, %443, %454 in 1 : vector<32x32xf32>, vector<32x32xf32>, vector<32x32xf32> -> vector<32x96xf32>
    %486 = tpu.concatenate %443, %454, %455 in 1 : vector<32x32xf32>, vector<32x32xf32>, vector<32x32xf32> -> vector<32x96xf32>
    %487 = tpu.concatenate %454, %455, %469 in 1 : vector<32x32xf32>, vector<32x32xf32>, vector<32x32xf32> -> vector<32x96xf32>
    %488 = tpu.concatenate %455, %469, %470 in 1 : vector<32x32xf32>, vector<32x32xf32>, vector<32x32xf32> -> vector<32x96xf32>
    %cst_209 = arith.constant 0.000000e+00 : f32
    %489 = vector.broadcast %cst_209 : f32 to vector<4x32xf32>
    %490 = vector.extract_strided_slice %382 {offsets = [4, 0], sizes = [28, 32], strides = [1, 1]} : vector<32x32xf32> to vector<28x32xf32>
    %491 = tpu.concatenate %490, %489 in 0 : vector<28x32xf32>, vector<4x32xf32> -> vector<32x32xf32>
    %492 = tpu.concatenate %469, %470, %491 in 1 : vector<32x32xf32>, vector<32x32xf32>, vector<32x32xf32> -> vector<32x96xf32>
    %493 = tpu.concatenate %474, %475, %476, %477, %478, %479, %480, %481, %482, %483, %484, %485, %486, %487, %488, %492 in 0 : vector<32x96xf32>, vector<32x96xf32>, vector<32x96xf32>, vector<32x96xf32>, vector<32x96xf32>, vector<32x96xf32>, vector<32x96xf32>, vector<32x96xf32>, vector<32x96xf32>, vector<32x96xf32>, vector<32x96xf32>, vector<32x96xf32>, vector<32x96xf32>, vector<32x96xf32>, vector<32x96xf32>, vector<32x96xf32> -> vector<512x96xf32>
    %494 = arith.truncf %493 : vector<512x96xf32> to vector<512x96xbf16>
    %c0_210 = arith.constant 0 : index
    %c0_211 = arith.constant 0 : index
    %495 = vector.load %arg24[%c0_210, %c0_211] : memref<96x1xbf16, #tpu.memory_space<vmem>>, vector<96x1xbf16>
    %cst_212 = arith.constant dense<0.000000e+00> : vector<512x1xf32>
    %496 = tpu.matmul %494, %495, %cst_212 {dimension_numbers = #tpu.dot_dimension_numbers<[1], [0], [0], [1], [0, 0, 1, 1], [], []>} : vector<512x96xbf16>, vector<96x1xbf16>, vector<512x1xf32> -> vector<512x1xf32>
    %c0_213 = arith.constant 0 : index
    %c0_214 = arith.constant 0 : index
    %497 = vector.load %arg25[%c0_213, %c0_214] : memref<1x1xf32, #tpu.memory_space<vmem>>, vector<1x1xf32>
    %498 = vector.broadcast %497 : vector<1x1xf32> to vector<512x1xf32>
    %499 = arith.addf %496, %498 : vector<512x1xf32>
    %500 = vector.extract_strided_slice %499 {offsets = [0, 0], sizes = [32, 1], strides = [1, 1]} : vector<512x1xf32> to vector<32x1xf32>
    %501 = vector.extract_strided_slice %499 {offsets = [32, 0], sizes = [32, 1], strides = [1, 1]} : vector<512x1xf32> to vector<32x1xf32>
    %502 = vector.extract_strided_slice %499 {offsets = [64, 0], sizes = [32, 1], strides = [1, 1]} : vector<512x1xf32> to vector<32x1xf32>
    %503 = vector.extract_strided_slice %499 {offsets = [96, 0], sizes = [32, 1], strides = [1, 1]} : vector<512x1xf32> to vector<32x1xf32>
    %504 = vector.extract_strided_slice %499 {offsets = [128, 0], sizes = [32, 1], strides = [1, 1]} : vector<512x1xf32> to vector<32x1xf32>
    %505 = vector.extract_strided_slice %499 {offsets = [160, 0], sizes = [32, 1], strides = [1, 1]} : vector<512x1xf32> to vector<32x1xf32>
    %506 = vector.extract_strided_slice %499 {offsets = [192, 0], sizes = [32, 1], strides = [1, 1]} : vector<512x1xf32> to vector<32x1xf32>
    %507 = vector.extract_strided_slice %499 {offsets = [224, 0], sizes = [32, 1], strides = [1, 1]} : vector<512x1xf32> to vector<32x1xf32>
    %508 = vector.extract_strided_slice %499 {offsets = [256, 0], sizes = [32, 1], strides = [1, 1]} : vector<512x1xf32> to vector<32x1xf32>
    %509 = vector.extract_strided_slice %499 {offsets = [288, 0], sizes = [32, 1], strides = [1, 1]} : vector<512x1xf32> to vector<32x1xf32>
    %510 = vector.extract_strided_slice %499 {offsets = [320, 0], sizes = [32, 1], strides = [1, 1]} : vector<512x1xf32> to vector<32x1xf32>
    %511 = vector.extract_strided_slice %499 {offsets = [352, 0], sizes = [32, 1], strides = [1, 1]} : vector<512x1xf32> to vector<32x1xf32>
    %512 = vector.extract_strided_slice %499 {offsets = [384, 0], sizes = [32, 1], strides = [1, 1]} : vector<512x1xf32> to vector<32x1xf32>
    %513 = vector.extract_strided_slice %499 {offsets = [416, 0], sizes = [32, 1], strides = [1, 1]} : vector<512x1xf32> to vector<32x1xf32>
    %514 = vector.extract_strided_slice %499 {offsets = [448, 0], sizes = [32, 1], strides = [1, 1]} : vector<512x1xf32> to vector<32x1xf32>
    %515 = vector.extract_strided_slice %499 {offsets = [480, 0], sizes = [32, 1], strides = [1, 1]} : vector<512x1xf32> to vector<32x1xf32>
    %516 = tpu.concatenate %500, %501, %502, %503, %504, %505, %506, %507, %508, %509, %510, %511, %512, %513, %514, %515 in 1 : vector<32x1xf32>, vector<32x1xf32>, vector<32x1xf32>, vector<32x1xf32>, vector<32x1xf32>, vector<32x1xf32>, vector<32x1xf32>, vector<32x1xf32>, vector<32x1xf32>, vector<32x1xf32>, vector<32x1xf32>, vector<32x1xf32>, vector<32x1xf32>, vector<32x1xf32>, vector<32x1xf32>, vector<32x1xf32> -> vector<32x16xf32>
    %517 = vector.extract_strided_slice %516 {offsets = [0, 0], sizes = [4, 16], strides = [1, 1]} : vector<32x16xf32> to vector<4x16xf32>
    %518 = vector.extract_strided_slice %516 {offsets = [4, 0], sizes = [4, 16], strides = [1, 1]} : vector<32x16xf32> to vector<4x16xf32>
    %519 = vector.extract_strided_slice %516 {offsets = [8, 0], sizes = [4, 16], strides = [1, 1]} : vector<32x16xf32> to vector<4x16xf32>
    %520 = vector.extract_strided_slice %516 {offsets = [12, 0], sizes = [4, 16], strides = [1, 1]} : vector<32x16xf32> to vector<4x16xf32>
    %521 = vector.extract_strided_slice %516 {offsets = [16, 0], sizes = [4, 16], strides = [1, 1]} : vector<32x16xf32> to vector<4x16xf32>
    %522 = vector.extract_strided_slice %516 {offsets = [20, 0], sizes = [4, 16], strides = [1, 1]} : vector<32x16xf32> to vector<4x16xf32>
    %523 = vector.extract_strided_slice %516 {offsets = [24, 0], sizes = [4, 16], strides = [1, 1]} : vector<32x16xf32> to vector<4x16xf32>
    %524 = vector.extract_strided_slice %516 {offsets = [28, 0], sizes = [4, 16], strides = [1, 1]} : vector<32x16xf32> to vector<4x16xf32>
    %525 = tpu.concatenate %517, %518, %519, %520, %521, %522, %523, %524 in 1 : vector<4x16xf32>, vector<4x16xf32>, vector<4x16xf32>, vector<4x16xf32>, vector<4x16xf32>, vector<4x16xf32>, vector<4x16xf32>, vector<4x16xf32> -> vector<4x128xf32>
    %526 = math.tanh %525 : vector<4x128xf32>
    %527 = vector.broadcast %130 : vector<4x1xf32> to vector<4x128xf32>
    %528 = arith.mulf %526, %527 : vector<4x128xf32>
    %c0_215 = arith.constant 0 : index
    %c0_216 = arith.constant 0 : index
    %c0_217 = arith.constant 0 : index
    %529 = vector.load %arg27[%c0_215, %c0_216, %c0_217] : memref<1x4x128xf32, #tpu.memory_space<vmem>>, vector<1x4x128xf32>
    %530 = vector.shape_cast %529 : vector<1x4x128xf32> to vector<4x128xf32>
    %531 = vector.shape_cast %528 : vector<4x128xf32> to vector<1x4x128xf32>
    tpu.vector_store %arg27[%c0_215, %c0_216, %c0_217], %531 {strides = array<i32>} : memref<1x4x128xf32, #tpu.memory_space<vmem>>, vector<1x4x128xf32>,
    return
  }
  func.func @transform_0(%arg0: i32) -> (i32, i32, i32) {
    %c0_i32 = arith.constant 0 : i32
    %c0_i32_0 = arith.constant 0 : i32
    %c0_i32_1 = arith.constant 0 : i32
    return %arg0, %c0_i32, %c0_i32_0 : i32, i32, i32
  }
  func.func @transform_1(%arg0: i32) -> (i32, i32, i32) {
    %c0_i32 = arith.constant 0 : i32
    %c0_i32_0 = arith.constant 0 : i32
    %c0_i32_1 = arith.constant 0 : i32
    %c0_i32_2 = arith.constant 0 : i32
    return %c0_i32, %c0_i32_0, %c0_i32_1 : i32, i32, i32
  }
  func.func @transform_2(%arg0: i32) -> (i32, i32, i32) {
    %c0_i32 = arith.constant 0 : i32
    %c0_i32_0 = arith.constant 0 : i32
    %c0_i32_1 = arith.constant 0 : i32
    %c0_i32_2 = arith.constant 0 : i32
    return %c0_i32, %c0_i32_0, %c0_i32_1 : i32, i32, i32
  }
  func.func @transform_3(%arg0: i32) -> (i32, i32) {
    %c0_i32 = arith.constant 0 : i32
    %c0_i32_0 = arith.constant 0 : i32
    %c0_i32_1 = arith.constant 0 : i32
    return %c0_i32, %c0_i32_0 : i32, i32
  }
  func.func @transform_4(%arg0: i32) -> (i32, i32) {
    %c0_i32 = arith.constant 0 : i32
    %c0_i32_0 = arith.constant 0 : i32
    %c0_i32_1 = arith.constant 0 : i32
    return %c0_i32, %c0_i32_0 : i32, i32
  }
  func.func @transform_5(%arg0: i32) -> (i32, i32, i32) {
    %c0_i32 = arith.constant 0 : i32
    %c0_i32_0 = arith.constant 0 : i32
    %c0_i32_1 = arith.constant 0 : i32
    %c0_i32_2 = arith.constant 0 : i32
    return %c0_i32, %c0_i32_0, %c0_i32_1 : i32, i32, i32
  }
  func.func @transform_6(%arg0: i32) -> (i32, i32, i32) {
    %c0_i32 = arith.constant 0 : i32
    %c0_i32_0 = arith.constant 0 : i32
    %c0_i32_1 = arith.constant 0 : i32
    %c0_i32_2 = arith.constant 0 : i32
    return %c0_i32, %c0_i32_0, %c0_i32_1 : i32, i32, i32
  }
  func.func @transform_7(%arg0: i32) -> (i32, i32) {
    %c0_i32 = arith.constant 0 : i32
    %c0_i32_0 = arith.constant 0 : i32
    %c0_i32_1 = arith.constant 0 : i32
    return %c0_i32, %c0_i32_0 : i32, i32
  }
  func.func @transform_8(%arg0: i32) -> (i32, i32) {
    %c0_i32 = arith.constant 0 : i32
    %c0_i32_0 = arith.constant 0 : i32
    %c0_i32_1 = arith.constant 0 : i32
    return %c0_i32, %c0_i32_0 : i32, i32
  }
  func.func @transform_9(%arg0: i32) -> (i32, i32, i32) {
    %c0_i32 = arith.constant 0 : i32
    %c0_i32_0 = arith.constant 0 : i32
    %c0_i32_1 = arith.constant 0 : i32
    %c0_i32_2 = arith.constant 0 : i32
    return %c0_i32, %c0_i32_0, %c0_i32_1 : i32, i32, i32
  }
  func.func @transform_10(%arg0: i32) -> (i32, i32, i32) {
    %c0_i32 = arith.constant 0 : i32
    %c0_i32_0 = arith.constant 0 : i32
    %c0_i32_1 = arith.constant 0 : i32
    %c0_i32_2 = arith.constant 0 : i32
    return %c0_i32, %c0_i32_0, %c0_i32_1 : i32, i32, i32
  }
  func.func @transform_11(%arg0: i32) -> (i32, i32) {
    %c0_i32 = arith.constant 0 : i32
    %c0_i32_0 = arith.constant 0 : i32
    %c0_i32_1 = arith.constant 0 : i32
    return %c0_i32, %c0_i32_0 : i32, i32
  }
  func.func @transform_12(%arg0: i32) -> (i32, i32) {
    %c0_i32 = arith.constant 0 : i32
    %c0_i32_0 = arith.constant 0 : i32
    %c0_i32_1 = arith.constant 0 : i32
    return %c0_i32, %c0_i32_0 : i32, i32
  }
  func.func @transform_13(%arg0: i32) -> (i32, i32) {
    %c0_i32 = arith.constant 0 : i32
    %c0_i32_0 = arith.constant 0 : i32
    %c0_i32_1 = arith.constant 0 : i32
    return %c0_i32, %c0_i32_0 : i32, i32
  }
  func.func @transform_14(%arg0: i32) -> (i32, i32) {
    %c0_i32 = arith.constant 0 : i32
    %c0_i32_0 = arith.constant 0 : i32
    %c0_i32_1 = arith.constant 0 : i32
    return %c0_i32, %c0_i32_0 : i32, i32
  }
  func.func @transform_15(%arg0: i32) -> (i32, i32, i32) {
    %c0_i32 = arith.constant 0 : i32
    %c0_i32_0 = arith.constant 0 : i32
    %c0_i32_1 = arith.constant 0 : i32
    %c0_i32_2 = arith.constant 0 : i32
    return %c0_i32, %c0_i32_0, %c0_i32_1 : i32, i32, i32
  }
  func.func @transform_16(%arg0: i32) -> (i32, i32, i32) {
    %c0_i32 = arith.constant 0 : i32
    %c0_i32_0 = arith.constant 0 : i32
    %c0_i32_1 = arith.constant 0 : i32
    %c0_i32_2 = arith.constant 0 : i32
    return %c0_i32, %c0_i32_0, %c0_i32_1 : i32, i32, i32
  }
  func.func @transform_17(%arg0: i32) -> (i32, i32) {
    %c0_i32 = arith.constant 0 : i32
    %c0_i32_0 = arith.constant 0 : i32
    %c0_i32_1 = arith.constant 0 : i32
    return %c0_i32, %c0_i32_0 : i32, i32
  }
  func.func @transform_18(%arg0: i32) -> (i32, i32) {
    %c0_i32 = arith.constant 0 : i32
    %c0_i32_0 = arith.constant 0 : i32
    %c0_i32_1 = arith.constant 0 : i32
    return %c0_i32, %c0_i32_0 : i32, i32
  }
  func.func @transform_19(%arg0: i32) -> (i32, i32) {
    %c0_i32 = arith.constant 0 : i32
    %c0_i32_0 = arith.constant 0 : i32
    %c0_i32_1 = arith.constant 0 : i32
    return %c0_i32, %c0_i32_0 : i32, i32
  }
  func.func @transform_20(%arg0: i32) -> (i32, i32) {
    %c0_i32 = arith.constant 0 : i32
    %c0_i32_0 = arith.constant 0 : i32
    %c0_i32_1 = arith.constant 0 : i32
    return %c0_i32, %c0_i32_0 : i32, i32
  }
  func.func @transform_21(%arg0: i32) -> (i32, i32, i32) {
    %c0_i32 = arith.constant 0 : i32
    %c0_i32_0 = arith.constant 0 : i32
    %c0_i32_1 = arith.constant 0 : i32
    %c0_i32_2 = arith.constant 0 : i32
    return %c0_i32, %c0_i32_0, %c0_i32_1 : i32, i32, i32
  }
  func.func @transform_22(%arg0: i32) -> (i32, i32, i32) {
    %c0_i32 = arith.constant 0 : i32
    %c0_i32_0 = arith.constant 0 : i32
    %c0_i32_1 = arith.constant 0 : i32
    %c0_i32_2 = arith.constant 0 : i32
    return %c0_i32, %c0_i32_0, %c0_i32_1 : i32, i32, i32
  }
  func.func @transform_23(%arg0: i32) -> (i32, i32) {
    %c0_i32 = arith.constant 0 : i32
    %c0_i32_0 = arith.constant 0 : i32
    %c0_i32_1 = arith.constant 0 : i32
    return %c0_i32, %c0_i32_0 : i32, i32
  }
  func.func @transform_24(%arg0: i32) -> (i32, i32) {
    %c0_i32 = arith.constant 0 : i32
    %c0_i32_0 = arith.constant 0 : i32
    %c0_i32_1 = arith.constant 0 : i32
    return %c0_i32, %c0_i32_0 : i32, i32
  }
  func.func @transform_25(%arg0: i32) -> (i32, i32, i32) {
    %c0_i32 = arith.constant 0 : i32
    %c0_i32_0 = arith.constant 0 : i32
    %c0_i32_1 = arith.constant 0 : i32
    return %arg0, %c0_i32, %c0_i32_0 : i32, i32, i32
  }
  func.func @transform_26(%arg0: i32) -> (i32, i32, i32) {
    %c0_i32 = arith.constant 0 : i32
    %c0_i32_0 = arith.constant 0 : i32
    %c0_i32_1 = arith.constant 0 : i32
    return %arg0, %c0_i32, %c0_i32_0 : i32, i32, i32
  }
  func.func @transform_27(%arg0: i32) -> (i32, i32, i32) {
    %c0_i32 = arith.constant 0 : i32
    %c0_i32_0 = arith.constant 0 : i32
    %c0_i32_1 = arith.constant 0 : i32
    return %arg0, %c0_i32, %c0_i32_0 : i32, i32, i32
  }
  func.func @transform_28(%arg0: i32) -> (i32, i32, i32) {
    %c0_i32 = arith.constant 0 : i32
    %c0_i32_0 = arith.constant 0 : i32
    %c0_i32_1 = arith.constant 0 : i32
    return %arg0, %c0_i32, %c0_i32_0 : i32, i32, i32
  }
}

</mosaic_0001>

<bundles_post_ra>
// kernel: model_forward.4
= control target key start
LH: loop header
LB: loop body
LE: loop exit
PB: predicated region body
PF: predicated region fallthrough
CT: control target
= control target key end

     0   :  { %s2577_s27 = smov 0   ;;  %s3069_s0 = inlined_call_operand.vmem [shape: f32[2,32,64], index: 0, kind: input, shape index: {}]   ;;  %s3070_s1 = inlined_call_operand.vmem [shape: bf16[64,32], index: 1, kind: input, shape index: {}]   ;;  %s3071_s2 = inlined_call_operand.vmem [shape: bf16[32,32], index: 2, kind: input, shape index: {}]   ;;  %s3072_s3 = inlined_call_operand.vmem [shape: f32[32,32], index: 3, kind: input, shape index: {}]   ;;  %s3073_s4 = inlined_call_operand.vmem [shape: bf16[5,96,32], index: 4, kind: input, shape index: {}]   ;;  %s3074_s5 = inlined_call_operand.vmem [shape: f32[5,1,32], index: 5, kind: input, shape index: {}]   ;;  %s3075_s6 = inlined_call_operand.vmem [shape: bf16[5,32,32], index: 6, kind: input, shape index: {}]   ;;  %s3076_s7 = inlined_call_operand.vmem [shape: f32[5,1,32], index: 7, kind: input, shape index: {}]   ;;  %s3077_s8 = inlined_call_operand.vmem [shape: f32[2,32,32], index: 8, kind: output, shape index: {}]  }
   0x1 LB: > { %s1991_s28 = sadd.s32 4294967295, %s2527_s27   ;;  %p1995_p0 = scmp.ge.s32.totalorder %s2527_s27, 1  ;;  %s2527_s27 = sphi %s2577_s27, %s18_s27  }
   0x2   : > { %p262_p1 = scmp.lt.s32.totalorder %s2527_s27, 3 }
   0x4   : > { %p263_p2 = pnand %p1995_p0, %p262_p1 }
   0x5   : > { %p296_p3 = scmp.lt.s32.totalorder (!%p263_p2), %s1991_s28, 1  ;;  %s2529_s24 = smov (!%p263_p2), 32  }
   0x6   : > { %266 = sbr.rel (%p263_p2) target bundleno = 3838 (0xefe), region = 52  ;;  %s2530_s25 = smov (!%p263_p2), 64  }
   0xb   : > { %v2467_v0 = vld [vmem:[%s3070_s1 + $0x18] sm:$0xff]   ;;  %v2468_v1 = vld [vmem:[%s3070_s1 + $0x10] sm:$0xff]   ;;  %s3079_s28 = smov (!%p296_p3, %s1991_s28), 1  ;;  %v2469_v2 = vld [vmem:[%s3070_s1 + $0x8] sm:$0xff]   ;;  %vm345_vm0 = vcmask 523264   ;;  %vm401_vm1 = vcmask 261120  }
   0xc   : > { %2226 = vmatprep.subr.bf16.mxu0 %v2467_v0  ;;  %s2154_s13 = sshll.u32 %s3079_s28, 5  ;;  %v2470_v5 = vld [vmem:[%s3070_s1] sm:$0xff]   ;;  %v2471_v44 = vld [vmem:[%s3071_s2 + $0x8] sm:$0xff]   ;;  %vm561_vm4 = vcmask 1046528   ;;  %vm548_vm5 = vcmask 1040384   ;;  %vm661_vm6 = vcmask 785408  }
   0xd   : > { %2227 = vmatpush3.bf16.msra.mxu0 %v2467_v0  ;;  %s300_s16 = scalar_lea.vmem %s3069_s0, %s2154_s13  ;;  %v2472_v45 = vld [vmem:[%s3071_s2] sm:$0xff]   ;;  %2238 = vmatprep.subr.bf16.mxu1 %v2471_v44  ;;  %vm830_vm11 = vcmask 1044480   ;;  %vm817_vm12 = vcmask 1042432   ;;  %s305_s9 = scalar_lea.vmem %s3077_s8, %s2154_s13 }
   0xe   : > { %2228 = vmatprep.subr.bf16.mxu0 %v2468_v1  ;;  %v307_v3 = vld [vmem:[%s300_s16] sm:$0xff]  ;;  %v308_v4 = vld [vmem:[%s300_s16 + $0x8] sm:$0xff]  ;;  %v309_v7 = vld [vmem:[%s300_s16 + $0x10] sm:$0xff]  ;;  %2239 = vmatpush3.bf16.msra.mxu1 %v2471_v44 }
   0xf   : > { %v311_v6 = vpack.c.bf16 %v308_v4, %v307_v3  ;;  %v310_v8 = vld [vmem:[%s300_s16 + $0x18] sm:$0xff]  ;;  %2240 = vmatprep.subr.bf16.mxu1 %v2472_v45 }
  0x10   : > { %v312_v9 = vpack.c.bf16 %v310_v8, %v309_v7 }
  0x11   : > { %2229 = vmatpush3.bf16.msra.mxu0 %v2468_v1  ;;  %2234 = vmatprep.mubr.msk.bf16.mxu0 %vm345_vm0, %v311_v6 }
  0x12   : > { %2230 = vmatprep.subr.bf16.mxu0 %v2469_v2  ;;  %2241 = vmatpush3.bf16.msra.mxu1 %v2472_v45 }
  0x15   : > { %2231 = vmatpush3.bf16.msra.mxu0 %v2469_v2 }
  0x16   : > { %2232 = vmatprep.subr.bf16.mxu0 %v2470_v5 }
  0x19   : > { %2233 = vmatpush3.bf16.msra.mxu0 %v2470_v5 }
  0x1c   : > { %2235 = vmatmul.mubr.msk.bf16.vlgmr.msra.gmra.mxu0 %vm345_vm0, %v312_v9  ;;  %v2473_v9 = vld [vmem:[%s3073_s4 + $0x28] sm:$0xff]  }
  0x1d   : > { %2246 = vmatprep.subr.bf16.mxu1 %v2473_v9 }
  0xdc   : > { %v2607_v10 = vpop.f32.mrf.mxu0 }
  0xdd   : > { %v408_v11 = vsel %vm401_vm1, %v2607_v10, 0.0 }
  0xde   : > { %409 = vadd.xlane.f32.xlu1 %v408_v11  ;;  %v2611_v12 = vpop.f32.mrf.mxu0  ;;  %v2474_v11 = vld [vmem:[%s3073_s4 + $0x20] sm:$0xff]  }
  0xdf   : > { %v402_v13 = vsel %vm401_vm1, %v2611_v12, 0.0 }
  0xe0   : > { %403 = vadd.xlane.f32.xlu0 %v402_v13  ;;  %v2615_v14 = vpop.f32.mrf.mxu0 }
  0xe1   : > { %v411_v15 = vsel %vm401_vm1, %v2615_v14, 0.0 }
  0xe2   : > { %412 = vadd.xlane.f32.xlu1 %v411_v15  ;;  %v2619_v16 = vpop.f32.mrf.mxu0  ;;  %v2477_v15 = vld [vmem:[%s3073_s4 + $0x8] sm:$0xff]  }
  0xe3   : > { %v405_v17 = vsel %vm401_vm1, %v2619_v16, 0.0 }
  0xe4   : > { %406 = vadd.xlane.f32.xlu0 %v405_v17  ;;  %v473_v17 = vld [vmem:[%s3072_s3] sm:$0xff] }
 0x167   : > { %v410_v19 = vpop.xlane.xlu1 %409 }
 0x169   : > { %v404_v18 = vpop.xlane.xlu0 %403 }
 0x16b   : > { %v413_v23 = vpop.xlane.xlu1 %412 }
 0x16d   : > { %v407_v20 = vpop.xlane.xlu0 %406 }
 0x16e   : > { %v414_v21 = vadd.f32 %v407_v20, %v404_v18  ;;  %v476_v18 = vld [vmem:[%s3072_s3 + $0x18] sm:$0xff] }
 0x170   : > { %v415_v22 = vadd.f32 %v414_v21, %v410_v19  ;;  %v474_v21 = vld [vmem:[%s3072_s3 + $0x8] sm:$0xff] }
 0x172   : > { %v416_v24 = vadd.f32 %v415_v22, %v413_v23 }
 0x174   : > { %v417_v25 = vrot.slane %v416_v24, 4 }
 0x176   : > { %v418_v26 = vadd.f32 %v417_v25, %v416_v24  ;;  %v2478_v24 = vld [vmem:[%s3073_s4] sm:$0xff]  }
 0x178   : > { %v419_v27 = vrot.slane %v418_v26, 2 }
 0x17a   : > { %v420_v28 = vadd.f32 %v419_v27, %v418_v26 }
 0x17c   : > { %v421_v29 = vrot.slane %v420_v28, 1 }
 0x17e   : > { %v422_v30 = vadd.f32 %v421_v29, %v420_v28 }
 0x180   : > { %v423_v31 = vmul.f32 0.0009765625, %v422_v30 }
 0x182   : > { %v425_v32 = vsub.f32 %v2619_v16, %v423_v31  ;;  %v424_v33 = vsub.f32 %v2611_v12, %v423_v31  ;;  %v427_v34 = vsub.f32 %v2615_v14, %v423_v31  ;;  %v426_v35 = vsub.f32 %v2607_v10, %v423_v31 }
 0x184   : > { %v429_v36 = vmul.f32 %v425_v32, %v425_v32  ;;  %v428_v37 = vmul.f32 %v424_v33, %v424_v33  ;;  %v431_v40 = vmul.f32 %v427_v34, %v427_v34  ;;  %v430_v41 = vmul.f32 %v426_v35, %v426_v35 }
 0x186   : > { %v435_v38 = vsel %vm401_vm1, %v429_v36, 0.0  ;;  %v432_v39 = vsel %vm401_vm1, %v428_v37, 0.0  ;;  %v441_v42 = vsel %vm401_vm1, %v431_v40, 0.0  ;;  %v438_v43 = vsel %vm401_vm1, %v430_v41, 0.0 }
 0x187   : > { %436 = vadd.xlane.f32.xlu1 %v435_v38  ;;  %433 = vadd.xlane.f32.xlu0 %v432_v39 }
 0x18b   : > { %442 = vadd.xlane.f32.xlu1 %v441_v42  ;;  %439 = vadd.xlane.f32.xlu0 %v438_v43 }
 0x210   : > { %v437_v46 = vpop.xlane.xlu1 %436  ;;  %v434_v47 = vpop.xlane.xlu0 %433 }
 0x211   : > { %v444_v48 = vadd.f32 %v437_v46, %v434_v47 }
 0x214   : > { %v440_v49 = vpop.xlane.xlu0 %439  ;;  %v443_v51 = vpop.xlane.xlu1 %442 }
 0x215   : > { %v445_v50 = vadd.f32 %v444_v48, %v440_v49 }
 0x217   : > { %v446_v52 = vadd.f32 %v445_v50, %v443_v51 }
 0x219   : > { %v447_v53 = vrot.slane %v446_v52, 4 }
 0x21b   : > { %v448_v54 = vadd.f32 %v447_v53, %v446_v52 }
 0x21d   : > { %v449_v55 = vrot.slane %v448_v54, 2 }
 0x21f   : > { %v450_v56 = vadd.f32 %v449_v55, %v448_v54 }
 0x221   : > { %v451_v57 = vrot.slane %v450_v56, 1 }
 0x223   : > { %v452_v58 = vadd.f32 %v451_v57, %v450_v56 }
 0x225   : > { %v453_v59 = vmul.f32 0.0009775171, %v452_v58 }
 0x227   : > { %2513 = vrsqrt.f32 %v453_v59  ;;  %vm456_vm2 = vcmp.eq.f32.partialorder %v453_v59, inf  ;;  %v459_v62 = vand.u32 2147483648, %v453_v59  ;;  %vm458_vm3 = vcmp.eq.f32.partialorder %v453_v59, 0.0 }
 0x234   : > { %v2514_v60 = vpop.eup %2513 }
 0x235   : > { %v455_v61 = vmul.f32 %v2514_v60, %v453_v59 }
 0x237   : > { %v457_v63 = vsel %vm456_vm2, %v453_v59, %v455_v61 }
 0x238   : > { %v460_v0 = vsel %vm458_vm3, %v459_v62, %v457_v63 }
 0x239   : > { %v461_v1 = vadd.f32 1e-08, %v460_v0 }
 0x23b   : > { %2515 = vrcp.f32 %v461_v1 }
 0x248   : > { %v2516_v2 = vpop.eup %2515 }
 0x249   : > { %v463_v3 = vmul.f32 %v2516_v2, %v2611_v12  ;;  %v464_v4 = vmul.f32 %v2516_v2, %v2619_v16  ;;  %v465_v5 = vmul.f32 %v2516_v2, %v2607_v10  ;;  %v466_v6 = vmul.f32 %v2516_v2, %v2615_v14  ;;  %v2475_v10 = vld [vmem:[%s3073_s4 + $0x18] sm:$0xff]   ;;  %v2476_v12 = vld [vmem:[%s3073_s4 + $0x10] sm:$0xff]  }
 0x24a   : > { %v475_v14 = vld [vmem:[%s3072_s3 + $0x10] sm:$0xff] }
 0x24b   : > { %v467_v7 = vpack.c.bf16 %v464_v4, %v463_v3  ;;  %v468_v8 = vpack.c.bf16 %v466_v6, %v465_v5  ;;  %v2479_v5 = vld [vmem:[%s3075_s6 + $0x8] sm:$0xff]   ;;  %v2480_v6 = vld [vmem:[%s3075_s6] sm:$0xff]  }
 0x24c   : > { %2262 = vmatprep.subr.bf16.mxu0 %v2479_v5 }
 0x24d   : > { %2242 = vmatprep.mubr.msk.bf16.mxu1 %vm401_vm1, %v467_v7  ;;  %2263 = vmatpush3.bf16.msra.mxu0 %v2479_v5 }
 0x24e   : > { %2243 = vmatmul.mubr.msk.bf16.vlgmr.msra.gmra.mxu1 %vm401_vm1, %v468_v8  ;;  %2264 = vmatprep.subr.bf16.mxu0 %v2480_v6 }
 0x24f   : > { %2247 = vmatpush3.bf16.msra.mxu1 %v2473_v9 }
 0x250   : > { %2248 = vmatprep.subr.bf16.mxu1 %v2474_v11 }
 0x251   : > { %2265 = vmatpush3.bf16.msra.mxu0 %v2480_v6 }
 0x253   : > { %2249 = vmatpush3.bf16.msra.mxu1 %v2474_v11  ;;  %v2010_v11 = vld [vmem:[%s3074_s5] ss:$0 sm:$0xff] }
 0x254   : > { %2250 = vmatprep.subr.bf16.mxu1 %v2475_v10 }
 0x257   : > { %2251 = vmatpush3.bf16.msra.mxu1 %v2475_v10 }
 0x258   : > { %2252 = vmatprep.subr.bf16.mxu1 %v2476_v12 }
 0x25b   : > { %2253 = vmatpush3.bf16.msra.mxu1 %v2476_v12 }
 0x25c   : > { %2254 = vmatprep.subr.bf16.mxu1 %v2477_v15 }
 0x25f   : > { %2255 = vmatpush3.bf16.msra.mxu1 %v2477_v15 }
 0x260   : > { %2256 = vmatprep.subr.bf16.mxu1 %v2478_v24 }
 0x263   : > { %2257 = vmatpush3.bf16.msra.mxu1 %v2478_v24  ;;  %v2019_v24 = vld [vmem:[%s3076_s7] ss:$0 sm:$0xff] }
 0x30e   : > { %v2244_v13 = vpop.f32.mrf.mxu1 }
 0x30f   : > { %v2667_v19 = vadd.f32 %v2244_v13, %v475_v14 }
 0x310   : > { %v529_v16 = vpop.f32.mrf.mxu1 }
 0x311   : > { %v2672_v22 = vadd.f32 %v529_v16, %v473_v17  ;;  %v565_v28 = vrot.slane %v2667_v19, 1  ;;  %v552_v55 = vrot.slane %v2667_v19, 7 }
 0x312   : > { %v2245_v20 = vpop.f32.mrf.mxu1 }
 0x313   : > { %v2674_v23 = vadd.f32 %v2245_v20, %v476_v18  ;;  %v562_v29 = vrot.slane %v2672_v22, 1  ;;  %v549_v40 = vrot.slane %v2672_v22, 7  ;;  %v2481_v18 = vld [vmem:[%s3073_s4 + $0x58] sm:$0xff]   ;;  %v2482_v20 = vld [vmem:[%s3073_s4 + $0x50] sm:$0xff]  }
 0x314   : > { %v532_v25 = vpop.f32.mrf.mxu1  ;;  %2270 = vmatprep.subr.bf16.mxu0 %v2481_v18 }
 0x315   : > { %v2679_v26 = vadd.f32 %v532_v25, %v474_v21  ;;  %v2382_v27 = vpack.i.bf16 %v2674_v23, %v2667_v19  ;;  %v567_v32 = vrot.slane %v2674_v23, 1  ;;  %v554_v45 = vrot.slane %v2674_v23, 7  ;;  %v2483_v21 = vld [vmem:[%s3073_s4 + $0x48] sm:$0xff]  }
 0x316   : > { %v560_v48 = vsel %vm548_vm5, 0.0, %v549_v40 }
 0x317   : > { %v563_v30 = vrot.slane %v2679_v26, 1  ;;  %2383 = vrot.lane.b32.xlu1 %v2382_v27, %s2529_s24  ;;  %v2377_v31 = vpack.i.bf16 %v2679_v26, %v2672_v22  ;;  %v568_v36 = vsel %vm561_vm4, %v565_v28, %v567_v32  ;;  %v570_v37 = vsel %vm561_vm4, %v567_v32, 0.0 }
 0x318   : > { %v2392_v38 = vpack.i.bf16 %v570_v37, %v568_v36  ;;  %v550_v41 = vrot.slane %v2679_v26, 7  ;;  %v555_v61 = vsel %vm548_vm5, %v552_v55, %v554_v45 }
 0x319   : > { %2378 = vrot.lane.b32.xlu0 %v2377_v31, %s2529_s24  ;;  %v564_v33 = vsel %vm561_vm4, %v562_v29, %v563_v30  ;;  %v566_v34 = vsel %vm561_vm4, %v563_v30, %v565_v28  ;;  %v2484_v28 = vld [vmem:[%s3073_s4 + $0x40] sm:$0xff]  }
 0x31a   : > { %v2387_v35 = vpack.i.bf16 %v566_v34, %v564_v33  ;;  %v551_v47 = vsel %vm548_vm5, %v549_v40, %v550_v41  ;;  %v553_v60 = vsel %vm548_vm5, %v550_v41, %v552_v55 }
 0x31c   : > { %2388 = vrot.lane.b32.xlu1 %v2387_v35, %s2530_s25  ;;  %v2485_v35 = vld [vmem:[%s3073_s4 + $0x38] sm:$0xff]  }
 0x320   : > { %2393 = vrot.lane.b32.xlu1 %v2392_v38, %s2530_s25 }
 0x389   : > { %v2384_v39 = vpop.permute.xlu1 %2383 }
 0x38a   : > { %v2386_v51 = vunpack.i.h.bf16 %v2384_v39  ;;  %v2385_v52 = vunpack.i.l.bf16 %v2384_v39 }
 0x38b   : > { %v2379_v42 = vpop.permute.xlu0 %2378 }
 0x38c   : > { %v2381_v43 = vunpack.i.h.bf16 %v2379_v42  ;;  %v2380_v44 = vunpack.i.l.bf16 %v2379_v42  ;;  %v598_v0 = vsel %vm401_vm1, %v553_v60, %v2385_v52  ;;  %v599_v1 = vsel %vm401_vm1, %v555_v61, %v2386_v51 }
 0x38e   : > { %v2389_v46 = vpop.permute.xlu1 %2388  ;;  %v596_v53 = vsel %vm401_vm1, %v560_v48, %v2380_v44  ;;  %v597_v54 = vsel %vm401_vm1, %v551_v47, %v2381_v43 }
 0x38f   : > { %v2391_v49 = vunpack.i.h.bf16 %v2389_v46  ;;  %v2390_v50 = vunpack.i.l.bf16 %v2389_v46 }
 0x391   : > { %v600_v56 = vsel %vm345_vm0, %v596_v53, %v2390_v50  ;;  %v601_v57 = vsel %vm345_vm0, %v597_v54, %v2391_v49 }
 0x392   : > { %v604_v58 = vpack.c.bf16 %v601_v57, %v600_v56  ;;  %v2394_v59 = vpop.permute.xlu1 %2393 }
 0x393   : > { %v2396_v62 = vunpack.i.h.bf16 %v2394_v59  ;;  %v2395_v63 = vunpack.i.l.bf16 %v2394_v59 }
 0x394   : > { %2258 = vmatprep.mubr.msk.bf16.mxu1 %vm661_vm6, %v604_v58 }
 0x395   : > { %v603_v2 = vsel %vm345_vm0, %v599_v1, %v2396_v62  ;;  %v602_v3 = vsel %vm345_vm0, %v598_v0, %v2395_v63 }
 0x396   : > { %v605_v4 = vpack.c.bf16 %v603_v2, %v602_v3 }
 0x398   : > { %2259 = vmatmul.mubr.msk.bf16.vlgmr.msra.gmra.mxu1 %vm661_vm6, %v605_v4 }
 0x458   : > { %v2260_v7 = vpop.f32.mrf.mxu1 }
 0x459   : > { %v711_v15 = vadd.f32 %v2260_v7, %v2010_v11 }
 0x45a   : > { %v702_v8 = vpop.f32.mrf.mxu1 }
 0x45b   : > { %v703_v13 = vadd.f32 %v2010_v11, %v702_v8 }
 0x45c   : > { %v2261_v9 = vpop.f32.mrf.mxu1 }
 0x45d   : > { %v714_v10 = vadd.f32 %v2261_v9, %v2010_v11 }
 0x45e   : > { %v705_v12 = vpop.f32.mrf.mxu1 }
 0x45f   : > { %v706_v14 = vadd.f32 %v2010_v11, %v705_v12  ;;  %v718_v17 = vpack.c.bf16 %v714_v10, %v711_v15 }
 0x461   : > { %v717_v16 = vpack.c.bf16 %v706_v14, %v703_v13 }
 0x463   : > { %2266 = vmatprep.mubr.msk.bf16.mxu0 %vm401_vm1, %v717_v16 }
 0x464   : > { %2267 = vmatmul.mubr.msk.bf16.vlgmr.msra.gmra.mxu0 %vm401_vm1, %v718_v17 }
 0x465   : > { %2271 = vmatpush3.bf16.msra.mxu0 %v2481_v18 }
 0x466   : > { %2272 = vmatprep.subr.bf16.mxu0 %v2482_v20 }
 0x469   : > { %2273 = vmatpush3.bf16.msra.mxu0 %v2482_v20 }
 0x46a   : > { %2274 = vmatprep.subr.bf16.mxu0 %v2483_v21 }
 0x46d   : > { %2275 = vmatpush3.bf16.msra.mxu0 %v2483_v21 }
 0x46e   : > { %2276 = vmatprep.subr.bf16.mxu0 %v2484_v28 }
 0x471   : > { %2277 = vmatpush3.bf16.msra.mxu0 %v2484_v28  ;;  %v2488_v28 = vld [vmem:[%s3075_s6 + $0x10] sm:$0xff]  }
 0x472   : > { %2278 = vmatprep.subr.bf16.mxu0 %v2485_v35 }
 0x475   : > { %2279 = vmatpush3.bf16.msra.mxu0 %v2485_v35 }
 0x524   : > { %v2268_v25 = vpop.f32.mrf.mxu0 }
 0x525   : > { %v791_v27 = vadd.f32 %v2268_v25, %v2019_v24 }
 0x526   : > { %v782_v29 = vpop.f32.mrf.mxu0 }
 0x527   : > { %v799_v30 = vadd.f32 %v791_v27, %v2667_v19  ;;  %v783_v31 = vadd.f32 %v2019_v24, %v782_v29  ;;  %v2487_v27 = vld [vmem:[%s3075_s6 + $0x18] sm:$0xff]  }
 0x528   : > { %v2269_v32 = vpop.f32.mrf.mxu0  ;;  %2286 = vmatprep.subr.bf16.mxu1 %v2487_v27 }
 0x529   : > { %v797_v33 = vadd.f32 %v783_v31, %v2672_v22  ;;  %v794_v34 = vadd.f32 %v2269_v32, %v2019_v24  ;;  %v807_v36 = vmul.f32 0.2, %v799_v30  ;;  %vm803_vm7 = vcmp.gt.f32.partialorder %v799_v30, 0.0  ;;  %v2486_v22 = vld [vmem:[%s3073_s4 + $0x30] sm:$0xff]   ;;  %2287 = vmatpush3.bf16.msra.mxu1 %v2487_v27  ;;  %v2037_v32 = vld [vmem:[%s3074_s5 + $0x1] ss:$0 sm:$0xff] }
 0x52a   : > { %v785_v37 = vpop.f32.mrf.mxu0  ;;  %2280 = vmatprep.subr.bf16.mxu0 %v2486_v22  ;;  %2288 = vmatprep.subr.bf16.mxu1 %v2488_v28 }
 0x52b   : > { %v800_v38 = vadd.f32 %v794_v34, %v2674_v23  ;;  %v786_v39 = vadd.f32 %v2019_v24, %v785_v37  ;;  %v805_v19 = vmul.f32 0.2, %v797_v33  ;;  %v2750_v41 = vsel %vm803_vm7, %v799_v30, %v807_v36  ;;  %2281 = vmatpush3.bf16.msra.mxu0 %v2486_v22  ;;  %v2491_v22 = vld [vmem:[%s3073_s4 + $0x78] sm:$0xff]  }
 0x52c   : > { %vm801_vm9 = vcmp.gt.f32.partialorder %v797_v33, 0.0  ;;  %v834_v46 = vrot.slane %v2750_v41, 3  ;;  %v821_v62 = vrot.slane %v2750_v41, 5 }
 0x52d   : > { %vm804_vm8 = vcmp.gt.f32.partialorder %v800_v38, 0.0  ;;  %v808_v40 = vmul.f32 0.2, %v800_v38  ;;  %v798_v42 = vadd.f32 %v786_v39, %v2679_v26  ;;  %v2757_v45 = vsel %vm801_vm9, %v797_v33, %v805_v19  ;;  %2289 = vmatpush3.bf16.msra.mxu1 %v2488_v28  ;;  %v2489_v19 = vld [vmem:[%s3073_s4 + $0x88] sm:$0xff]  }
 0x52e   : > { %v831_v52 = vrot.slane %v2757_v45, 3  ;;  %v818_v61 = vrot.slane %v2757_v45, 5  ;;  %2294 = vmatprep.subr.bf16.mxu1 %v2489_v19 }
 0x52f   : > { %v2753_v43 = vsel %vm804_vm8, %v800_v38, %v808_v40  ;;  %vm802_vm10 = vcmp.gt.f32.partialorder %v798_v42, 0.0  ;;  %v806_v23 = vmul.f32 0.2, %v798_v42  ;;  %v2490_v40 = vld [vmem:[%s3073_s4 + $0x80] sm:$0xff]  }
 0x530   : > { %v2397_v44 = vpack.i.bf16 %v2753_v43, %v2750_v41  ;;  %v836_v47 = vrot.slane %v2753_v43, 3  ;;  %v823_v58 = vrot.slane %v2753_v43, 5  ;;  %v829_v9 = vsel %vm817_vm12, 0.0, %v818_v61 }
 0x531   : > { %v2761_v48 = vsel %vm802_vm10, %v798_v42, %v806_v23  ;;  %v2051_v42 = vld [vmem:[%s3076_s7 + $0x1] ss:$0 sm:$0xff] }
 0x532   : > { %2398 = vrot.lane.b32.xlu1 %v2397_v44, %s2529_s24  ;;  %v2402_v26 = vpack.i.bf16 %v2761_v48, %v2757_v45  ;;  %v837_v49 = vsel %vm830_vm11, %v834_v46, %v836_v47  ;;  %v839_v50 = vsel %vm830_vm11, %v836_v47, 0.0  ;;  %v832_v53 = vrot.slane %v2761_v48, 3  ;;  %v2492_v44 = vld [vmem:[%s3073_s4 + $0x70] sm:$0xff]  }
 0x533   : > { %v2412_v51 = vpack.i.bf16 %v839_v50, %v837_v49  ;;  %v819_v59 = vrot.slane %v2761_v48, 5  ;;  %v824_v7 = vsel %vm817_vm12, %v821_v62, %v823_v58 }
 0x534   : > { %2403 = vrot.lane.b32.xlu0 %v2402_v26, %s2529_s24  ;;  %v833_v54 = vsel %vm830_vm11, %v831_v52, %v832_v53  ;;  %v835_v55 = vsel %vm830_vm11, %v832_v53, %v834_v46 }
 0x535   : > { %v2407_v56 = vpack.i.bf16 %v835_v55, %v833_v54  ;;  %v822_v6 = vsel %vm817_vm12, %v819_v59, %v821_v62  ;;  %v820_v8 = vsel %vm817_vm12, %v818_v61, %v819_v59 }
 0x536   : > { %2413 = vrot.lane.b32.xlu1 %v2412_v51, %s2530_s25  ;;  %v2493_v51 = vld [vmem:[%s3073_s4 + $0x68] sm:$0xff]  }
 0x538   : > { %2408 = vrot.lane.b32.xlu0 %v2407_v56, %s2530_s25 }
 0x5a4   : > { %v2399_v57 = vpop.permute.xlu1 %2398 }
 0x5a5   : > { %v2401_v63 = vunpack.i.h.bf16 %v2399_v57  ;;  %v2400_v0 = vunpack.i.l.bf16 %v2399_v57 }
 0x5a6   : > { %v2404_v60 = vpop.permute.xlu0 %2403 }
 0x5a7   : > { %v2406_v2 = vunpack.i.h.bf16 %v2404_v60  ;;  %v2405_v3 = vunpack.i.l.bf16 %v2404_v60  ;;  %v867_v10 = vsel %vm401_vm1, %v822_v6, %v2400_v0  ;;  %v868_v12 = vsel %vm401_vm1, %v824_v7, %v2401_v63 }
 0x5a8   : > { %v2414_v1 = vpop.permute.xlu1 %2413 }
 0x5a9   : > { %v2416_v4 = vunpack.i.h.bf16 %v2414_v1  ;;  %v2415_v5 = vunpack.i.l.bf16 %v2414_v1  ;;  %v865_v15 = vsel %vm401_vm1, %v829_v9, %v2405_v3  ;;  %v866_v16 = vsel %vm401_vm1, %v820_v8, %v2406_v2 }
 0x5aa   : > { %v2409_v11 = vpop.permute.xlu0 %2408  ;;  %v2531_v3 = vmov 0.0  }
 0x5ab   : > { %v2411_v13 = vunpack.i.h.bf16 %v2409_v11  ;;  %v2410_v14 = vunpack.i.l.bf16 %v2409_v11  ;;  %v871_v17 = vsel %vm345_vm0, %v867_v10, %v2415_v5  ;;  %v872_v18 = vsel %vm345_vm0, %v868_v12, %v2416_v4 }
 0x5ac   : > { %v874_v25 = vpack.c.bf16 %v872_v18, %v871_v17 }
 0x5ad   : > { %v869_v20 = vsel %vm345_vm0, %v865_v15, %v2410_v14  ;;  %v870_v21 = vsel %vm345_vm0, %v866_v16, %v2411_v13 }
 0x5ae   : > { %v873_v24 = vpack.c.bf16 %v870_v21, %v869_v20 }
 0x5b0   : > { %2282 = vmatprep.mubr.msk.bf16.mxu0 %vm661_vm6, %v873_v24 }
 0x5b1   : > { %2283 = vmatmul.mubr.msk.bf16.vlgmr.msra.gmra.mxu0 %vm661_vm6, %v874_v25 }
 0x671   : > { %v2284_v29 = vpop.f32.mrf.mxu0 }
 0x672   : > { %v981_v37 = vadd.f32 %v2284_v29, %v2037_v32 }
 0x673   : > { %v972_v30 = vpop.f32.mrf.mxu0 }
 0x674   : > { %v973_v35 = vadd.f32 %v2037_v32, %v972_v30 }
 0x675   : > { %v2285_v31 = vpop.f32.mrf.mxu0 }
 0x676   : > { %v984_v33 = vadd.f32 %v2285_v31, %v2037_v32 }
 0x677   : > { %v975_v34 = vpop.f32.mrf.mxu0 }
 0x678   : > { %v976_v36 = vadd.f32 %v2037_v32, %v975_v34  ;;  %v988_v39 = vpack.c.bf16 %v984_v33, %v981_v37 }
 0x67a   : > { %v987_v38 = vpack.c.bf16 %v976_v36, %v973_v35 }
 0x67c   : > { %2290 = vmatprep.mubr.msk.bf16.mxu1 %vm401_vm1, %v987_v38 }
 0x67d   : > { %2291 = vmatmul.mubr.msk.bf16.vlgmr.msra.gmra.mxu1 %vm401_vm1, %v988_v39 }
 0x67e   : > { %2295 = vmatpush3.bf16.msra.mxu1 %v2489_v19 }
 0x67f   : > { %2296 = vmatprep.subr.bf16.mxu1 %v2490_v40 }
 0x682   : > { %2297 = vmatpush3.bf16.msra.mxu1 %v2490_v40 }
 0x683   : > { %2298 = vmatprep.subr.bf16.mxu1 %v2491_v22 }
 0x686   : > { %2299 = vmatpush3.bf16.msra.mxu1 %v2491_v22  ;;  %v2495_v22 = vld [vmem:[%s3075_s6 + $0x28] sm:$0xff]  }
 0x687   : > { %2300 = vmatprep.subr.bf16.mxu1 %v2492_v44  ;;  %2310 = vmatprep.subr.bf16.mxu0 %v2495_v22 }
 0x688   : > { %2311 = vmatpush3.bf16.msra.mxu0 %v2495_v22  ;;  %v2503_v22 = vld [vmem:[%s3075_s6 + $0x38] sm:$0xff]  }
 0x68a   : > { %2301 = vmatpush3.bf16.msra.mxu1 %v2492_v44 }
 0x68b   : > { %2302 = vmatprep.subr.bf16.mxu1 %v2493_v51 }
 0x68e   : > { %2303 = vmatpush3.bf16.msra.mxu1 %v2493_v51 }
 0x73d   : > { %v2292_v23 = vpop.f32.mrf.mxu1 }
 0x73e   : > { %v1063_v46 = vadd.f32 %v2292_v23, %v2051_v42 }
 0x73f   : > { %v1054_v47 = vpop.f32.mrf.mxu1 }
 0x740   : > { %v1071_v26 = vadd.f32 %v1063_v46, %v2750_v41  ;;  %v1055_v49 = vadd.f32 %v2051_v42, %v1054_v47  ;;  %v2494_v41 = vld [vmem:[%s3073_s4 + $0x60] sm:$0xff]  }
 0x741   : > { %v2293_v50 = vpop.f32.mrf.mxu1  ;;  %2304 = vmatprep.subr.bf16.mxu1 %v2494_v41  ;;  %v2069_v47 = vld [vmem:[%s3074_s5 + $0x2] ss:$0 sm:$0xff] }
 0x742   : > { %v1066_v52 = vadd.f32 %v2293_v50, %v2051_v42  ;;  %v1069_v53 = vadd.f32 %v1055_v49, %v2757_v45  ;;  %v1079_v55 = vmul.f32 0.2, %v1071_v26  ;;  %vm1075_vm13 = vcmp.gt.f32.partialorder %v1071_v26, 0.0  ;;  %2305 = vmatpush3.bf16.msra.mxu1 %v2494_v41  ;;  %v2500_v41 = vld [vmem:[%s3073_s4 + $0xa0] sm:$0xff]  }
 0x743   : > { %v1057_v54 = vpop.f32.mrf.mxu1  ;;  %2334 = vmatprep.subr.bf16.mxu1 %v2503_v22 }
 0x744   : > { %v1072_v56 = vadd.f32 %v1066_v52, %v2753_v43  ;;  %v1058_v57 = vadd.f32 %v2051_v42, %v1057_v54  ;;  %v1077_v59 = vmul.f32 0.2, %v1069_v53  ;;  %v2829_v61 = vsel %vm1075_vm13, %v1071_v26, %v1079_v55  ;;  %v2496_v42 = vld [vmem:[%s3075_s6 + $0x20] sm:$0xff]   ;;  %v2497_v55 = vld [vmem:[%s3073_s4 + $0xb8] sm:$0xff]  }
 0x745   : > { %vm1073_vm15 = vcmp.gt.f32.partialorder %v1069_v53, 0.0  ;;  %v1099_v6 = vrot.slane %v2829_v61, 1  ;;  %v1091_v14 = vrot.slane %v2829_v61, 7  ;;  %2312 = vmatprep.subr.bf16.mxu0 %v2496_v42 }
 0x746   : > { %vm1076_vm14 = vcmp.gt.f32.partialorder %v1072_v56, 0.0  ;;  %v1080_v58 = vmul.f32 0.2, %v1072_v56  ;;  %v1070_v60 = vadd.f32 %v1058_v57, %v2761_v48  ;;  %v2839_v1 = vsel %vm1073_vm15, %v1069_v53, %v1077_v59  ;;  %2313 = vmatpush3.bf16.msra.mxu0 %v2496_v42  ;;  %v2499_v57 = vld [vmem:[%s3073_s4 + $0xa8] sm:$0xff]   ;;  %v2504_v42 = vld [vmem:[%s3075_s6 + $0x30] sm:$0xff]  }
 0x747   : > { %v1088_v12 = vrot.slane %v2839_v1, 7  ;;  %2318 = vmatprep.subr.bf16.mxu0 %v2497_v55 }
 0x748   : > { %v2831_v45 = vsel %vm1076_vm14, %v1072_v56, %v1080_v58  ;;  %vm1074_vm2 = vcmp.gt.f32.partialorder %v1070_v60, 0.0  ;;  %v1078_v43 = vmul.f32 0.2, %v1070_v60  ;;  %v2498_v56 = vld [vmem:[%s3073_s4 + $0xb0] sm:$0xff]   ;;  %v2083_v58 = vld [vmem:[%s3076_s7 + $0x2] ss:$0 sm:$0xff] }
 0x749   : > { %v2417_v62 = vpack.i.bf16 %v2831_v45, %v2829_v61  ;;  %v1101_v63 = vrot.slane %v2831_v45, 1  ;;  %v1096_v28 = vsel %vm548_vm5, 0.0, %v1088_v12 }
 0x74a   : > { %v2836_v0 = vsel %vm1074_vm2, %v1070_v60, %v1078_v43 }
 0x74b   : > { %2418 = vrot.lane.b32.xlu1 %v2417_v62, %s2529_s24  ;;  %v1104_v48 = vsel %vm561_vm4, %v1101_v63, 0.0  ;;  %v2422_v2 = vpack.i.bf16 %v2836_v0, %v2839_v1  ;;  %v1098_v5 = vrot.slane %v2836_v0, 1  ;;  %v1102_v8 = vsel %vm561_vm4, %v1099_v6, %v1101_v63  ;;  %v2501_v62 = vld [vmem:[%s3073_s4 + $0x98] sm:$0xff]  }
 0x74c   : > { %v2432_v4 = vpack.i.bf16 %v2531_v3, %v1104_v48  ;;  %v1089_v10 = vrot.slane %v2836_v0, 7 }
 0x74d   : > { %2423 = vrot.lane.b32.xlu0 %v2422_v2, %s2529_s24  ;;  %v1100_v7 = vsel %vm561_vm4, %v1098_v5, %v1099_v6  ;;  %v2502_v6 = vld [vmem:[%s3073_s4 + $0x90] sm:$0xff]  }
 0x74e   : > { %v2427_v9 = vpack.i.bf16 %v1102_v8, %v1100_v7  ;;  %v1090_v25 = vsel %vm548_vm5, %v1088_v12, %v1089_v10  ;;  %v1092_v27 = vsel %vm548_vm5, %v1089_v10, %v1091_v14 }
 0x74f   : > { %2433 = vrot.lane.b32.xlu1 %v2432_v4, %s2530_s25 }
 0x751   : > { %2428 = vrot.lane.b32.xlu0 %v2427_v9, %s2530_s25 }
 0x7bd   : > { %v2419_v11 = vpop.permute.xlu1 %2418 }
 0x7be   : > { %v2421_v15 = vunpack.i.h.bf16 %v2419_v11  ;;  %v2420_v16 = vunpack.i.l.bf16 %v2419_v11 }
 0x7bf   : > { %v2424_v13 = vpop.permute.xlu0 %2423 }
 0x7c0   : > { %v2426_v18 = vunpack.i.h.bf16 %v2424_v13  ;;  %v2425_v20 = vunpack.i.l.bf16 %v2424_v13  ;;  %v1133_v30 = vsel %vm401_vm1, %v1090_v25, %v2420_v16  ;;  %v1134_v31 = vsel %vm401_vm1, %v1092_v27, %v2421_v15 }
 0x7c1   : > { %v2434_v17 = vpop.permute.xlu1 %2433 }
 0x7c2   : > { %v2854_v21 = vunpack.i.h.bf16 %v2434_v17  ;;  %v2435_v24 = vunpack.i.l.bf16 %v2434_v17  ;;  %v1131_v34 = vsel %vm401_vm1, 0.0, %v2425_v20  ;;  %v1132_v35 = vsel %vm401_vm1, %v1096_v28, %v2426_v18 }
 0x7c3   : > { %v2429_v29 = vpop.permute.xlu0 %2428 }
 0x7c4   : > { %v2431_v32 = vunpack.i.h.bf16 %v2429_v29  ;;  %v2430_v33 = vunpack.i.l.bf16 %v2429_v29  ;;  %v1137_v36 = vsel %vm345_vm0, %v1133_v30, %v2435_v24  ;;  %v1138_v37 = vsel %vm345_vm0, %v1134_v31, %v2854_v21 }
 0x7c5   : > { %v1140_v40 = vpack.c.bf16 %v1138_v37, %v1137_v36 }
 0x7c6   : > { %v1135_v38 = vsel %vm345_vm0, %v1131_v34, %v2430_v33  ;;  %v1136_v39 = vsel %vm345_vm0, %v1132_v35, %v2431_v32 }
 0x7c7   : > { %v1139_v19 = vpack.c.bf16 %v1136_v39, %v1135_v38 }
 0x7c9   : > { %2306 = vmatprep.mubr.msk.bf16.mxu1 %vm661_vm6, %v1139_v19 }
 0x7ca   : > { %2307 = vmatmul.mubr.msk.bf16.vlgmr.msra.gmra.mxu1 %vm661_vm6, %v1140_v40 }
 0x7cb   : > { %2335 = vmatpush3.bf16.msra.mxu1 %v2503_v22 }
 0x7cc   : > { %2336 = vmatprep.subr.bf16.mxu1 %v2504_v42 }
 0x7cf   : > { %2337 = vmatpush3.bf16.msra.mxu1 %v2504_v42 }
 0x88a   : > { %v2308_v23 = vpop.f32.mrf.mxu1 }
 0x88b   : > { %v1247_v52 = vadd.f32 %v2308_v23, %v2069_v47 }
 0x88c   : > { %v1238_v44 = vpop.f32.mrf.mxu1 }
 0x88d   : > { %v1239_v50 = vadd.f32 %v2069_v47, %v1238_v44 }
 0x88e   : > { %v2309_v46 = vpop.f32.mrf.mxu1 }
 0x88f   : > { %v1250_v26 = vadd.f32 %v2309_v46, %v2069_v47  ;;  %v2101_v46 = vld [vmem:[%s3074_s5 + $0x3] ss:$0 sm:$0xff] }
 0x890   : > { %v1241_v49 = vpop.f32.mrf.mxu1 }
 0x891   : > { %v1242_v51 = vadd.f32 %v2069_v47, %v1241_v49  ;;  %v1254_v54 = vpack.c.bf16 %v1250_v26, %v1247_v52 }
 0x893   : > { %v1253_v53 = vpack.c.bf16 %v1242_v51, %v1239_v50 }
 0x895   : > { %2314 = vmatprep.mubr.msk.bf16.mxu0 %vm401_vm1, %v1253_v53 }
 0x896   : > { %2315 = vmatmul.mubr.msk.bf16.vlgmr.msra.gmra.mxu0 %vm401_vm1, %v1254_v54  ;;  %v2505_v54 = vld [vmem:[%s3073_s4 + $0xe8] sm:$0xff]  }
 0x897   : > { %2319 = vmatpush3.bf16.msra.mxu0 %v2497_v55  ;;  %v2506_v55 = vld [vmem:[%s3073_s4 + $0xe0] sm:$0xff]   ;;  %2342 = vmatprep.subr.bf16.mxu1 %v2505_v54 }
 0x898   : > { %2320 = vmatprep.subr.bf16.mxu0 %v2498_v56 }
 0x89b   : > { %2321 = vmatpush3.bf16.msra.mxu0 %v2498_v56  ;;  %v2507_v56 = vld [vmem:[%s3073_s4 + $0xd8] sm:$0xff]  }
 0x89c   : > { %2322 = vmatprep.subr.bf16.mxu0 %v2499_v57 }
 0x89f   : > { %2323 = vmatpush3.bf16.msra.mxu0 %v2499_v57  ;;  %v2115_v57 = vld [vmem:[%s3076_s7 + $0x3] ss:$0 sm:$0xff] }
 0x8a0   : > { %2324 = vmatprep.subr.bf16.mxu0 %v2500_v41 }
 0x8a3   : > { %2325 = vmatpush3.bf16.msra.mxu0 %v2500_v41 }
 0x8a4   : > { %2326 = vmatprep.subr.bf16.mxu0 %v2501_v62 }
 0x8a7   : > { %2327 = vmatpush3.bf16.msra.mxu0 %v2501_v62 }
 0x8a8   : > { %2328 = vmatprep.subr.bf16.mxu0 %v2502_v6 }
 0x8ab   : > { %2329 = vmatpush3.bf16.msra.mxu0 %v2502_v6 }
 0x956   : > { %v2316_v59 = vpop.f32.mrf.mxu0 }
 0x957   : > { %v1329_v60 = vadd.f32 %v2316_v59, %v2083_v58  ;;  %v2508_v59 = vld [vmem:[%s3073_s4 + $0xd0] sm:$0xff]  }
 0x958   : > { %v1320_v43 = vpop.f32.mrf.mxu0 }
 0x959   : > { %v1337_v63 = vadd.f32 %v1329_v60, %v2829_v61  ;;  %v1321_v48 = vadd.f32 %v2083_v58, %v1320_v43 }
 0x95a   : > { %v2317_v2 = vpop.f32.mrf.mxu0 }
 0x95b   : > { %v1335_v3 = vadd.f32 %v1321_v48, %v2839_v1  ;;  %v1332_v4 = vadd.f32 %v2317_v2, %v2083_v58  ;;  %v1345_v7 = vmul.f32 0.2, %v1337_v63  ;;  %vm1341_vm3 = vcmp.gt.f32.partialorder %v1337_v63, 0.0 }
 0x95c   : > { %v1323_v5 = vpop.f32.mrf.mxu0 }
 0x95d   : > { %v1338_v8 = vadd.f32 %v1332_v4, %v2831_v45  ;;  %v1324_v9 = vadd.f32 %v2083_v58, %v1323_v5  ;;  %v1343_v11 = vmul.f32 0.2, %v1335_v3  ;;  %vm1339_vm8 = vcmp.gt.f32.partialorder %v1335_v3, 0.0 }
 0x95e   : > { %v2906_v12 = vsel %vm1341_vm3, %v1337_v63, %v1345_v7 }
 0x95f   : > { %vm1342_vm7 = vcmp.gt.f32.partialorder %v1338_v8, 0.0  ;;  %v1346_v61 = vmul.f32 0.2, %v1338_v8  ;;  %v1336_v10 = vadd.f32 %v1324_v9, %v2836_v0  ;;  %v2912_v45 = vsel %vm1339_vm8, %v1335_v3, %v1343_v11  ;;  %v2509_v3 = vld [vmem:[%s3073_s4 + $0xc8] sm:$0xff]   ;;  %v2510_v11 = vld [vmem:[%s3073_s4 + $0xc0] sm:$0xff]  }
 0x960   : > { %v1352_v18 = vrot.slane %v2912_v45, 5 }
 0x961   : > { %vm1340_vm9 = vcmp.gt.f32.partialorder %v1336_v10, 0.0  ;;  %v1344_v1 = vmul.f32 0.2, %v1336_v10  ;;  %v2908_v13 = vsel %vm1342_vm7, %v1338_v8, %v1346_v61 }
 0x962   : > { %v2437_v14 = vpack.i.bf16 %v2908_v13, %v2906_v12  ;;  %v1356_v16 = vrot.slane %v2908_v13, 3  ;;  %v1354_v27 = vsel %vm817_vm12, 0.0, %v1352_v18 }
 0x963   : > { %v2914_v15 = vsel %vm1340_vm9, %v1336_v10, %v1344_v1 }
 0x964   : > { %2438 = vrot.lane.b32.xlu1 %v2437_v14, %s2529_s24  ;;  %v2442_v0 = vpack.i.bf16 %v2914_v15, %v2912_v45  ;;  %v1358_v17 = vsel %vm830_vm11, %v1356_v16, 0.0 }
 0x966   : > { %2443 = vrot.lane.b32.xlu0 %v2442_v0, %s2529_s24 }
 0x96a   : > { %1374 = vrot.lane.b32.xlu0 %v1358_v17, %s2530_s25 }
 0x9d6   : > { %v2439_v20 = vpop.permute.xlu1 %2438 }
 0x9d7   : > { %v2441_v24 = vunpack.i.h.bf16 %v2439_v20  ;;  %v2440_v25 = vunpack.i.l.bf16 %v2439_v20 }
 0x9d8   : > { %v2444_v28 = vpop.permute.xlu0 %2443 }
 0x9d9   : > { %v1379_v29 = vsel %vm401_vm1, 0.0, %v2440_v25  ;;  %v1380_v30 = vsel %vm401_vm1, %v1354_v27, %v2441_v24  ;;  %v2446_v31 = vunpack.i.h.bf16 %v2444_v28  ;;  %v2445_v32 = vunpack.i.l.bf16 %v2444_v28 }
 0x9da   : > { %v1383_v35 = vsel %vm345_vm0, %v1379_v29, %v2854_v21  ;;  %v1384_v36 = vsel %vm345_vm0, %v1380_v30, %v2854_v21 }
 0x9db   : > { %v1378_v33 = vsel %vm401_vm1, 0.0, %v2446_v31  ;;  %v1377_v34 = vsel %vm401_vm1, 0.0, %v2445_v32  ;;  %v1386_v40 = vpack.c.bf16 %v1384_v36, %v1383_v35 }
 0x9dc   : > { %v1375_v37 = vpop.permute.xlu0 %1374  ;;  %v1382_v38 = vsel %vm345_vm0, %v1378_v33, %v2854_v21 }
 0x9dd   : > { %v1381_v39 = vsel %vm345_vm0, %v1377_v34, %v1375_v37 }
 0x9de   : > { %v1385_v19 = vpack.c.bf16 %v1382_v38, %v1381_v39 }
 0x9e0   : > { %2330 = vmatprep.mubr.msk.bf16.mxu0 %vm661_vm6, %v1385_v19 }
 0x9e1   : > { %2331 = vmatmul.mubr.msk.bf16.vlgmr.msra.gmra.mxu0 %vm661_vm6, %v1386_v40 }
 0xaa1   : > { %v2332_v21 = vpop.f32.mrf.mxu0 }
 0xaa2   : > { %v1493_v51 = vadd.f32 %v2332_v21, %v2101_v46 }
 0xaa3   : > { %v1484_v23 = vpop.f32.mrf.mxu0 }
 0xaa4   : > { %v1485_v49 = vadd.f32 %v2101_v46, %v1484_v23 }
 0xaa5   : > { %v2333_v44 = vpop.f32.mrf.mxu0 }
 0xaa6   : > { %v1496_v47 = vadd.f32 %v2333_v44, %v2101_v46 }
 0xaa7   : > { %v1487_v26 = vpop.f32.mrf.mxu0 }
 0xaa8   : > { %v1488_v50 = vadd.f32 %v2101_v46, %v1487_v26  ;;  %v1500_v53 = vpack.c.bf16 %v1496_v47, %v1493_v51 }
 0xaaa   : > { %v1499_v52 = vpack.c.bf16 %v1488_v50, %v1485_v49 }
 0xaac   : > { %2338 = vmatprep.mubr.msk.bf16.mxu1 %vm401_vm1, %v1499_v52 }
 0xaad   : > { %2339 = vmatmul.mubr.msk.bf16.vlgmr.msra.gmra.mxu1 %vm401_vm1, %v1500_v53 }
 0xaae   : > { %2343 = vmatpush3.bf16.msra.mxu1 %v2505_v54 }
 0xaaf   : > { %2344 = vmatprep.subr.bf16.mxu1 %v2506_v55 }
 0xab2   : > { %2345 = vmatpush3.bf16.msra.mxu1 %v2506_v55 }
 0xab3   : > { %2346 = vmatprep.subr.bf16.mxu1 %v2507_v56 }
 0xab6   : > { %2347 = vmatpush3.bf16.msra.mxu1 %v2507_v56 }
 0xab7   : > { %2348 = vmatprep.subr.bf16.mxu1 %v2508_v59 }
 0xaba   : > { %2349 = vmatpush3.bf16.msra.mxu1 %v2508_v59  ;;  %v2512_v59 = vld [vmem:[%s3075_s6 + $0x40] sm:$0xff]  }
 0xabb   : > { %2350 = vmatprep.subr.bf16.mxu1 %v2509_v3 }
 0xabe   : > { %2351 = vmatpush3.bf16.msra.mxu1 %v2509_v3 }
 0xabf   : > { %2352 = vmatprep.subr.bf16.mxu1 %v2510_v11 }
 0xac2   : > { %2353 = vmatpush3.bf16.msra.mxu1 %v2510_v11 }
 0xb6d   : > { %v2340_v41 = vpop.f32.mrf.mxu1 }
 0xb6e   : > { %v1575_v58 = vadd.f32 %v2340_v41, %v2115_v57 }
 0xb6f   : > { %v1566_v60 = vpop.f32.mrf.mxu1 }
 0xb70   : > { %v1583_v43 = vadd.f32 %v1575_v58, %v2906_v12  ;;  %v1567_v62 = vadd.f32 %v2115_v57, %v1566_v60  ;;  %v2511_v58 = vld [vmem:[%s3075_s6 + $0x48] sm:$0xff]  }
 0xb71   : > { %v2341_v63 = vpop.f32.mrf.mxu1  ;;  %2358 = vmatprep.subr.bf16.mxu0 %v2511_v58 }
 0xb72   : > { %v1581_v48 = vadd.f32 %v1567_v62, %v2912_v45  ;;  %v1578_v2 = vadd.f32 %v2341_v63, %v2115_v57  ;;  %v1591_v4 = vmul.f32 0.2, %v1583_v43  ;;  %vm1587_vm10 = vcmp.gt.f32.partialorder %v1583_v43, 0.0  ;;  %2359 = vmatpush3.bf16.msra.mxu0 %v2511_v58  ;;  %v2133_v63 = vld [vmem:[%s3074_s5 + $0x4] ss:$0 sm:$0xff] }
 0xb73   : > { %v1569_v5 = vpop.f32.mrf.mxu1  ;;  %2360 = vmatprep.subr.bf16.mxu0 %v2512_v59 }
 0xb74   : > { %v1584_v6 = vadd.f32 %v1578_v2, %v2908_v13  ;;  %v1570_v7 = vadd.f32 %v2115_v57, %v1569_v5  ;;  %v1589_v8 = vmul.f32 0.2, %v1581_v48  ;;  %v2973_v61 = vsel %vm1587_vm10, %v1583_v43, %v1591_v4 }
 0xb75   : > { %vm1585_vm12 = vcmp.gt.f32.partialorder %v1581_v48, 0.0  ;;  %v1616_v45 = vrot.slane %v2973_v61, 1  ;;  %v1604_v35 = vrot.slane %v2973_v61, 7 }
 0xb76   : > { %vm1588_vm11 = vcmp.gt.f32.partialorder %v1584_v6, 0.0  ;;  %v1592_v9 = vmul.f32 0.2, %v1584_v6  ;;  %v1582_v10 = vadd.f32 %v1570_v7, %v2914_v15  ;;  %v2980_v14 = vsel %vm1585_vm12, %v1581_v48, %v1589_v8  ;;  %2361 = vmatpush3.bf16.msra.mxu0 %v2512_v59  ;;  %v2147_v8 = vld [vmem:[%s3076_s7 + $0x4] ss:$0 sm:$0xff] }
 0xb77   : > { %v1613_v24 = vrot.slane %v2980_v14, 1  ;;  %v1601_v34 = vrot.slane %v2980_v14, 7 }
 0xb78   : > { %v2976_v1 = vsel %vm1588_vm11, %v1584_v6, %v1592_v9  ;;  %vm1586_vm13 = vcmp.gt.f32.partialorder %v1582_v10, 0.0  ;;  %v1590_v12 = vmul.f32 0.2, %v1582_v10 }
 0xb79   : > { %v2447_v13 = vpack.i.bf16 %v2976_v1, %v2973_v61  ;;  %v1618_v0 = vrot.slane %v2976_v1, 1  ;;  %v1606_v31 = vrot.slane %v2976_v1, 7  ;;  %v1612_v44 = vsel %vm548_vm5, 0.0, %v1601_v34 }
 0xb7a   : > { %v2984_v16 = vsel %vm1586_vm13, %v1582_v10, %v1590_v12 }
 0xb7b   : > { %2448 = vrot.lane.b32.xlu0 %v2447_v13, %s2529_s24  ;;  %v2452_v15 = vpack.i.bf16 %v2984_v16, %v2980_v14  ;;  %v1619_v17 = vsel %vm561_vm4, %v1616_v45, %v1618_v0  ;;  %v1621_v18 = vsel %vm561_vm4, %v1618_v0, 0.0  ;;  %v1614_v25 = vrot.slane %v2984_v16, 1 }
 0xb7c   : > { %v2462_v20 = vpack.i.bf16 %v1621_v18, %v1619_v17  ;;  %v1602_v32 = vrot.slane %v2984_v16, 7  ;;  %v1607_v21 = vsel %vm548_vm5, %v1604_v35, %v1606_v31 }
 0xb7d   : > { %2453 = vrot.lane.b32.xlu1 %v2452_v15, %s2529_s24  ;;  %v1615_v27 = vsel %vm561_vm4, %v1613_v24, %v1614_v25  ;;  %v1617_v28 = vsel %vm561_vm4, %v1614_v25, %v1616_v45 }
 0xb7e   : > { %v2457_v29 = vpack.i.bf16 %v1617_v28, %v1615_v27  ;;  %v1605_v42 = vsel %vm548_vm5, %v1602_v32, %v1604_v35  ;;  %v1603_v23 = vsel %vm548_vm5, %v1601_v34, %v1602_v32 }
 0xb7f   : > { %2463 = vrot.lane.b32.xlu0 %v2462_v20, %s2530_s25 }
 0xb81   : > { %2458 = vrot.lane.b32.xlu1 %v2457_v29, %s2530_s25 }
 0xbed   : > { %v2449_v30 = vpop.permute.xlu0 %2448 }
 0xbee   : > { %v2451_v36 = vunpack.i.h.bf16 %v2449_v30  ;;  %v2450_v37 = vunpack.i.l.bf16 %v2449_v30 }
 0xbef   : > { %v2454_v33 = vpop.permute.xlu1 %2453 }
 0xbf0   : > { %v2456_v39 = vunpack.i.h.bf16 %v2454_v33  ;;  %v2455_v19 = vunpack.i.l.bf16 %v2454_v33  ;;  %v1649_v47 = vsel %vm401_vm1, %v1605_v42, %v2450_v37  ;;  %v1650_v26 = vsel %vm401_vm1, %v1607_v21, %v2451_v36 }
 0xbf1   : > { %v2464_v38 = vpop.permute.xlu0 %2463 }
 0xbf2   : > { %v2466_v40 = vunpack.i.h.bf16 %v2464_v38  ;;  %v2465_v22 = vunpack.i.l.bf16 %v2464_v38  ;;  %v1647_v51 = vsel %vm401_vm1, %v1612_v44, %v2455_v19  ;;  %v1648_v52 = vsel %vm401_vm1, %v1603_v23, %v2456_v39 }
 0xbf3   : > { %v2459_v46 = vpop.permute.xlu1 %2458 }
 0xbf4   : > { %v2461_v49 = vunpack.i.h.bf16 %v2459_v46  ;;  %v2460_v50 = vunpack.i.l.bf16 %v2459_v46  ;;  %v1653_v53 = vsel %vm345_vm0, %v1649_v47, %v2465_v22  ;;  %v1654_v54 = vsel %vm345_vm0, %v1650_v26, %v2466_v40 }
 0xbf5   : > { %v1656_v41 = vpack.c.bf16 %v1654_v54, %v1653_v53 }
 0xbf6   : > { %v1651_v55 = vsel %vm345_vm0, %v1647_v51, %v2460_v50  ;;  %v1652_v56 = vsel %vm345_vm0, %v1648_v52, %v2461_v49 }
 0xbf7   : > { %v1655_v57 = vpack.c.bf16 %v1652_v56, %v1651_v55 }
 0xbf9   : > { %2354 = vmatprep.mubr.msk.bf16.mxu1 %vm661_vm6, %v1655_v57 }
 0xbfa   : > { %2355 = vmatmul.mubr.msk.bf16.vlgmr.msra.gmra.mxu1 %vm661_vm6, %v1656_v41 }
 0xcba   : > { %v2356_v60 = vpop.f32.mrf.mxu1 }
 0xcbb   : > { %v1763_v5 = vadd.f32 %v2356_v60, %v2133_v63 }
 0xcbc   : > { %v1754_v43 = vpop.f32.mrf.mxu1 }
 0xcbd   : > { %v1755_v3 = vadd.f32 %v2133_v63, %v1754_v43 }
 0xcbe   : > { %v2357_v62 = vpop.f32.mrf.mxu1 }
 0xcbf   : > { %v1766_v48 = vadd.f32 %v2357_v62, %v2133_v63 }
 0xcc0   : > { %v1757_v2 = vpop.f32.mrf.mxu1 }
 0xcc1   : > { %v1758_v4 = vadd.f32 %v2133_v63, %v1757_v2  ;;  %v1770_v7 = vpack.c.bf16 %v1766_v48, %v1763_v5 }
 0xcc3   : > { %v1769_v6 = vpack.c.bf16 %v1758_v4, %v1755_v3 }
 0xcc5   : > { %2362 = vmatprep.mubr.msk.bf16.mxu0 %vm401_vm1, %v1769_v6 }
 0xcc6   : > { %2363 = vmatmul.mubr.msk.bf16.vlgmr.msra.gmra.mxu0 %vm401_vm1, %v1770_v7 }
 0xd86   : > { %v2364_v9 = vpop.f32.mrf.mxu0 }
 0xd87   : > { %v1845_v11 = vadd.f32 %v2364_v9, %v2147_v8 }
 0xd88   : > { %v1836_v10 = vpop.f32.mrf.mxu0 }
 0xd89   : > { %v1853_v12 = vadd.f32 %v1845_v11, %v2973_v61  ;;  %v1837_v13 = vadd.f32 %v2147_v8, %v1836_v10 }
 0xd8a   : > { %v2365_v45 = vpop.f32.mrf.mxu0 }
 0xd8b   : > { %v1861_v0 = vmul.f32 0.2, %v1853_v12  ;;  %v1851_v15 = vadd.f32 %v1837_v13, %v2980_v14  ;;  %v1848_v17 = vadd.f32 %v2365_v45, %v2147_v8  ;;  %vm1857_vm0 = vcmp.gt.f32.partialorder %v1853_v12, 0.0 }
 0xd8c   : > { %v1839_v18 = vpop.f32.mrf.mxu0 }
 0xd8d   : > { %v1859_v20 = vmul.f32 0.2, %v1851_v15  ;;  %v1854_v24 = vadd.f32 %v1848_v17, %v2976_v1  ;;  %v1840_v25 = vadd.f32 %v2147_v8, %v1839_v18  ;;  %v3033_v27 = vsel %vm1857_vm0, %v1853_v12, %v1861_v0 }
 0xd8e   : > { %v1873_v28 = vsel %vm401_vm1, %v3033_v27, 0.0  ;;  %vm1855_vm4 = vcmp.gt.f32.partialorder %v1851_v15, 0.0 }
 0xd8f   : > { %v1852_v61 = vadd.f32 %v1840_v25, %v2984_v16  ;;  %1874 = vadd.xlane.f32.xlu0 %v1873_v28  ;;  %v3038_v29 = vsel %vm1855_vm4, %v1851_v15, %v1859_v20  ;;  %v1862_v30 = vmul.f32 0.2, %v1854_v24  ;;  %vm1858_vm6 = vcmp.gt.f32.partialorder %v1854_v24, 0.0 }
 0xd90   : > { %v1867_v14 = vsel %vm401_vm1, %v3038_v29, 0.0 }
 0xd91   : > { %v1860_v31 = vmul.f32 0.2, %v1852_v61  ;;  %1868 = vadd.xlane.f32.xlu1 %v1867_v14  ;;  %vm1856_vm5 = vcmp.gt.f32.partialorder %v1852_v61, 0.0  ;;  %v1866_v33 = vsel %vm1858_vm6, %v1854_v24, %v1862_v30 }
 0xd92   : > { %v1876_v16 = vsel %vm401_vm1, %v1866_v33, 0.0 }
 0xd93   : > { %v3042_v1 = vsel %vm1856_vm5, %v1852_v61, %v1860_v31 }
 0xd94   : > { %v1870_v32 = vsel %vm401_vm1, %v3042_v1, 0.0 }
 0xd95   : > { %1871 = vadd.xlane.f32.xlu0 %v1870_v32 }
 0xd99   : > { %1877 = vadd.xlane.f32.xlu0 %v1876_v16 }
 0xe18   : > { %v1875_v34 = vpop.xlane.xlu0 %1874 }
 0xe1a   : > { %v1869_v35 = vpop.xlane.xlu1 %1868 }
 0xe1e   : > { %v1872_v36 = vpop.xlane.xlu0 %1871 }
 0xe1f   : > { %v1879_v37 = vadd.f32 %v1872_v36, %v1869_v35 }
 0xe21   : > { %v1880_v38 = vadd.f32 %v1879_v37, %v1875_v34 }
 0xe22   : > { %v1878_v39 = vpop.xlane.xlu0 %1877 }
 0xe23   : > { %v1881_v19 = vadd.f32 %v1880_v38, %v1878_v39 }
 0xe25   : > { %v1882_v40 = vrot.slane %v1881_v19, 4 }
 0xe27   : > { %v1883_v22 = vadd.f32 %v1882_v40, %v1881_v19 }
 0xe29   : > { %v1884_v42 = vrot.slane %v1883_v22, 2 }
 0xe2b   : > { %v1885_v21 = vadd.f32 %v1884_v42, %v1883_v22 }
 0xe2d   : > { %v1886_v23 = vrot.slane %v1885_v21, 1 }
 0xe2f   : > { %v1887_v44 = vadd.f32 %v1886_v23, %v1885_v21 }
 0xe31   : > { %v1888_v46 = vmul.f32 0.0009765625, %v1887_v44 }
 0xe33   : > { %v1890_v47 = vsub.f32 %v3042_v1, %v1888_v46  ;;  %v1889_v26 = vsub.f32 %v3038_v29, %v1888_v46  ;;  %v1892_v49 = vsub.f32 %v1866_v33, %v1888_v46  ;;  %v1891_v50 = vsub.f32 %v3033_v27, %v1888_v46 }
 0xe35   : > { %v1894_v51 = vmul.f32 %v1890_v47, %v1890_v47  ;;  %v1893_v52 = vmul.f32 %v1889_v26, %v1889_v26  ;;  %v1896_v55 = vmul.f32 %v1892_v49, %v1892_v49  ;;  %v1895_v56 = vmul.f32 %v1891_v50, %v1891_v50 }
 0xe37   : > { %v1900_v53 = vsel %vm401_vm1, %v1894_v51, 0.0  ;;  %v1897_v54 = vsel %vm401_vm1, %v1893_v52, 0.0  ;;  %v1906_v57 = vsel %vm401_vm1, %v1896_v55, 0.0  ;;  %v1903_v41 = vsel %vm401_vm1, %v1895_v56, 0.0 }
 0xe38   : > { %1901 = vadd.xlane.f32.xlu0 %v1900_v53  ;;  %1898 = vadd.xlane.f32.xlu1 %v1897_v54 }
 0xe3c   : > { %1907 = vadd.xlane.f32.xlu0 %v1906_v57  ;;  %1904 = vadd.xlane.f32.xlu1 %v1903_v41 }
 0xec1   : > { %v1902_v58 = vpop.xlane.xlu0 %1901  ;;  %v1899_v59 = vpop.xlane.xlu1 %1898 }
 0xec2   : > { %v1909_v60 = vadd.f32 %v1902_v58, %v1899_v59 }
 0xec5   : > { %v1905_v43 = vpop.xlane.xlu1 %1904  ;;  %v1908_v63 = vpop.xlane.xlu0 %1907 }
 0xec6   : > { %v1910_v62 = vadd.f32 %v1909_v60, %v1905_v43 }
 0xec8   : > { %v1911_v48 = vadd.f32 %v1910_v62, %v1908_v63 }
 0xeca   : > { %v1912_v2 = vrot.slane %v1911_v48, 4 }
 0xecc   : > { %v1913_v3 = vadd.f32 %v1912_v2, %v1911_v48 }
 0xece   : > { %v1914_v4 = vrot.slane %v1913_v3, 2 }
 0xed0   : > { %v1915_v5 = vadd.f32 %v1914_v4, %v1913_v3 }
 0xed2   : > { %v1916_v6 = vrot.slane %v1915_v5, 1 }
 0xed4   : > { %v1917_v7 = vadd.f32 %v1916_v6, %v1915_v5 }
 0xed6   : > { %v1918_v8 = vmul.f32 0.0009775171, %v1917_v7 }
 0xed8   : > { %2517 = vrsqrt.f32 %v1918_v8  ;;  %vm1921_vm14 = vcmp.eq.f32.partialorder %v1918_v8, inf  ;;  %v1924_v10 = vand.u32 2147483648, %v1918_v8  ;;  %vm1923_vm15 = vcmp.eq.f32.partialorder %v1918_v8, 0.0 }
 0xee5   : > { %v2518_v9 = vpop.eup %2517 }
 0xee6   : > { %v1920_v11 = vmul.f32 %v2518_v9, %v1918_v8 }
 0xee8   : > { %v1922_v12 = vsel %vm1921_vm14, %v1918_v8, %v1920_v11 }
 0xee9   : > { %v1925_v13 = vsel %vm1923_vm15, %v1924_v10, %v1922_v12 }
 0xeea   : > { %v1926_v45 = vadd.f32 1e-08, %v1925_v13 }
 0xeec   : > { %2519 = vrcp.f32 %v1926_v45 }
 0xef9   : > { %v2520_v0 = vpop.eup %2519 }
 0xefa   : > { %v1928_v15 = vmul.f32 %v2520_v0, %v3038_v29  ;;  %v1929_v17 = vmul.f32 %v2520_v0, %v3042_v1  ;;  %v1930_v18 = vmul.f32 %v2520_v0, %v3033_v27  ;;  %v1931_v20 = vmul.f32 %v2520_v0, %v1866_v33 }
 0xefc   : > { %1932 = vst.msk [vmem:[%s305_s9] sm:$0xff] %vm401_vm1, %v1928_v15  ;;  %1933 = vst.msk [vmem:[%s305_s9 + $0x8] sm:$0xff] %vm401_vm1, %v1929_v17 }
 0xefd   : > { %1934 = vst.msk [vmem:[%s305_s9 + $0x10] sm:$0xff] %vm401_vm1, %v1930_v18  ;;  %1935 = vst.msk [vmem:[%s305_s9 + $0x18] sm:$0xff] %vm401_vm1, %v1931_v20 }
 0xefe PF: > { %s18_s27 = sadd.s32 1, %s2527_s27  }
 0xeff   : > { %p15_p4 = scmp.ge.s32.totalorder %s18_s27, 4  }
 0xf01   :  { %17 = sbr.rel (!%p15_p4) target bundleno = 1 (0x1), region = 98 }

// kernel: model_forward.5
= control target key start
LH: loop header
LB: loop body
LE: loop exit
PB: predicated region body
PF: predicated region fallthrough
CT: control target
= control target key end

     0   :  { %s7513_s29 = smov 0   ;;  %s9451_s0 = inlined_call_operand.vmem [shape: f32[2,4,32], index: 0, kind: input, shape index: {}]   ;;  %s9452_s1 = inlined_call_operand.vmem [shape: bf16[3,32,32], index: 1, kind: input, shape index: {}]   ;;  %s9453_s2 = inlined_call_operand.vmem [shape: f32[3,1,32], index: 2, kind: input, shape index: {}]   ;;  %s9454_s3 = inlined_call_operand.vmem [shape: f32[1,32], index: 3, kind: input, shape index: {}]   ;;  %s9455_s4 = inlined_call_operand.<no memory space> [shape: f32[1,1], index: 4, kind: input, shape index: {}]   ;;  %s9456_s5 = inlined_call_operand.vmem [shape: bf16[2,32,32], index: 5, kind: input, shape index: {}]   ;;  %s9457_s6 = inlined_call_operand.vmem [shape: f32[2,1,32], index: 6, kind: input, shape index: {}]   ;;  %s9458_s7 = inlined_call_operand.vmem [shape: f32[1,32], index: 7, kind: input, shape index: {}]   ;;  %s9459_s9 = inlined_call_operand.vmem [shape: bf16[2,32,32], index: 9, kind: input, shape index: {}]   ;;  %s9460_s10 = inlined_call_operand.vmem [shape: f32[2,1,32], index: 10, kind: input, shape index: {}]   ;;  %s9461_s11 = inlined_call_operand.vmem [shape: bf16[32,4], index: 11, kind: input, shape index: {}]   ;;  %s9462_s12 = inlined_call_operand.vmem [shape: f32[1,4], index: 12, kind: input, shape index: {}]   ;;  %s9463_s13 = inlined_call_operand.vmem [shape: bf16[32,256], index: 13, kind: input, shape index: {}]   ;;  %s9464_s14 = inlined_call_operand.vmem [shape: f32[1,256], index: 14, kind: input, shape index: {}]   ;;  %s9465_s15 = inlined_call_operand.vmem [shape: bf16[2,96,64], index: 15, kind: input, shape index: {}]   ;;  %s9466_s16 = inlined_call_operand.vmem [shape: f32[2,1,64], index: 16, kind: input, shape index: {}]   ;;  %s9467_s17 = inlined_call_operand.vmem [shape: bf16[96,1], index: 17, kind: input, shape index: {}]   ;;  %s9468_s19 = inlined_call_operand.vmem [shape: bf16[32,256], index: 19, kind: input, shape index: {}]   ;;  %s9469_s20 = inlined_call_operand.vmem [shape: f32[1,256], index: 20, kind: input, shape index: {}]   ;;  %s9470_s21 = inlined_call_operand.vmem [shape: bf16[4,96,64], index: 21, kind: input, shape index: {}]   ;;  %s9471_s22 = inlined_call_operand.vmem [shape: f32[4,1,64], index: 22, kind: input, shape index: {}]   ;;  %s9472_s23 = inlined_call_operand.vmem [shape: bf16[96,1], index: 23, kind: input, shape index: {}]   ;;  %s9473_s25 = inlined_call_operand.vmem [shape: f32[2,4,32], index: 25, kind: output, shape index: {0}]   ;;  %s9474_s26 = inlined_call_operand.vmem [shape: f32[2,4,128], index: 26, kind: output, shape index: {1}]   ;;  %s9475_s27 = inlined_call_operand.vmem [shape: f32[2,1,1], index: 27, kind: output, shape index: {2}]   ;;  %s9476_s28 = inlined_call_operand.vmem [shape: f32[2,1,4], index: 28, kind: output, shape index: {3}]   ;;  %s9477_s8 = inlined_call_operand.<no memory space> [shape: f32[1,1], index: 8, kind: input, shape index: {}]   ;;  %s9478_s18 = inlined_call_operand.<no memory space> [shape: f32[1,1], index: 18, kind: input, shape index: {}]   ;;  %s9479_s24 = inlined_call_operand.<no memory space> [shape: f32[1,1], index: 24, kind: input, shape index: {}]  }
   0x1   :  { %9499 = sst [smem:[#allocation20_spill]] %s9451_s0  ;;  %v36_v1 = vstv %s9477_s8  ;;  %v38_v2 = vstv %s9478_s18  ;;  %v40_v3 = vstv %s9479_s24 }
   0x2   :  { %9500 = sst [smem:[#allocation21_spill]] %s9452_s1  ;;  %37 = vst [vmem:[#allocation3] sm:$0x1] %v36_v1  ;;  %39 = vst [vmem:[#allocation4] sm:$0x1] %v38_v2 }
   0x3   :  { %9501 = sst [smem:[#allocation22_spill]] %s9453_s2  ;;  %41 = vst [vmem:[#allocation5] sm:$0x1] %v40_v3 }
   0x4   :  { %9502 = sst [smem:[#allocation23_spill]] %s9454_s3 }
   0x5   :  { %9503 = sst [smem:[#allocation24_spill]] %s9455_s4 }
   0x6   :  { %9504 = sst [smem:[#allocation25_spill]] %s9456_s5 }
   0x7   :  { %9505 = sst [smem:[#allocation26_spill]] %s9457_s6 }
   0x8   :  { %9506 = sst [smem:[#allocation27_spill]] %s9458_s7 }
   0x9   :  { %9507 = sst [smem:[#allocation28_spill]] %s9459_s9 }
   0xa   :  { %9508 = sst [smem:[#allocation29_spill]] %s9460_s10 }
   0xb   :  { %9509 = sst [smem:[#allocation30_spill]] %s9461_s11 }
   0xc   :  { %9510 = sst [smem:[#allocation31_spill]] %s9462_s12 }
   0xd   :  { %9511 = sst [smem:[#allocation32_spill]] %s9463_s13 }
   0xe   :  { %s9512_s10 = sld [smem:[#allocation24_spill]] }
  0x14   :  { %v34_v0 = vstv %s9512_s10 }
  0x15   :  { %35 = vst [vmem:[#allocation2] sm:$0x1] %v34_v0 }
  0x16 LB: > { %s5644_s8 = sadd.s32 4294967295, %s7326_s29   ;;  %p5648_p0 = scmp.ge.s32.totalorder %s7326_s29, 1  ;;  %s7326_s29 = sphi %s7513_s29, %s47_s29  }
  0x17   : > { %p776_p1 = scmp.lt.s32.totalorder %s7326_s29, 3 }
  0x19   : > { %p777_p2 = pnand %p5648_p0, %p776_p1 }
  0x1b   : > { %780 = sbr.rel (%p777_p2) target bundleno = 3890 (0xf32), region = 120 }
  0x20   : > { %p858_p3 = scmp.lt.s32.totalorder %s5644_s8, 1  ;;  %vm9497_vm0 = vcmask 257024   ;;  %s9513_s7 = sld [smem:[#allocation20_spill]]  ;;  %v7328_v9 = vmov 0.0   ;;  %vm7329_vm1 = vmmov 0   ;;  %vm918_vm4 = vcmask 261120  }
  0x21   : > { %s9514_s9 = sld [smem:[#allocation25_spill]]  ;;  %6118 = vmatprep.subr.bf16.mxu0 %v7328_v9  ;;  %6122 = vmatprep.mubr.msk.bf16.mxu0 %vm7329_vm1, %v7328_v9  ;;  %v7330_v56 = vmov 0   ;;  %vm1234_vm9 = vcmask 24576   ;;  %s9491_s1 = smov 96   ;;  %vm1569_vm11 = vcmask 1043456   ;;  %vm1634_vm12 = vcmask 523264  }
  0x22   : > { %s9559_s8 = smov (!%p858_p3, %s5644_s8), 1  ;;  %6126 = vmatprep.subr.bf16.mxu1 %v7328_v9  ;;  %6130 = vmatprep.mubr.msk.bf16.mxu1 %vm7329_vm1, %v7328_v9  ;;  %s9515_s6 = sld [smem:[#allocation28_spill]]  ;;  %vm9498_vm13 = vcmask 785408  }
  0x23   : > { %s7524_s18 = sshll.u32 %s9559_s8, 2  ;;  %s9516_s4 = sld [smem:[#allocation26_spill]]  ;;  %7232 = vset.pattern.permute.xlu0 %v7330_v56 }
  0x24   : > { %s9517_s11 = sld [smem:[#allocation29_spill]]  ;;  %s7333_s5 = smov 32  }
  0x25   : > { %s9519_s30 = sld [smem:[#allocation30_spill]]  ;;  %s9523_s24 = smov 96  }
  0x26   : > { %s861_s13 = scalar_lea.vmem %s9513_s7, %s7524_s18  ;;  %s9518_s7 = sld [smem:[#allocation21_spill]] }
  0x27   : > { %v877_v4 = vld [vmem:[%s861_s13] sm:$0xf]  ;;  %v7233_v7 = vld [vmem:[%s9514_s9 + $0x8] sm:$0xff]   ;;  %v7237_v29 = vld [vmem:[%s9514_s9 + $0x18] sm:$0xff]   ;;  %s9520_s10 = sld [smem:[#allocation22_spill]]  ;;  %s7334_s13 = smov 1  }
  0x28   : > { %v878_v5 = vmul.f32 %v877_v4, %v877_v4  ;;  %v7234_v8 = vld [vmem:[%s9514_s9] sm:$0xff]   ;;  %6119 = vmatpush3.bf16.msra.mxu0 %v7233_v7  ;;  %v7235_v26 = vld [vmem:[%s9515_s6 + $0x8] sm:$0xff]   ;;  %6127 = vmatpush3.bf16.msra.mxu1 %v7237_v29  ;;  %v7238_v30 = vld [vmem:[%s9514_s9 + $0x10] sm:$0xff]   ;;  %s9521_s2 = sld [smem:[#allocation32_spill]]  ;;  %s875_s9 = scalar_lea.vmem %s9476_s28, %s9559_s8 }
  0x29   : > { %6120 = vmatprep.subr.bf16.mxu0 %v7328_v9  ;;  %v7236_v28 = vld [vmem:[%s9515_s6] sm:$0xff]   ;;  %6128 = vmatprep.subr.bf16.mxu1 %v7328_v9  ;;  %v7239_v38 = vld [vmem:[%s9515_s6 + $0x18] sm:$0xff]   ;;  %v7240_v44 = vld [vmem:[%s9515_s6 + $0x10] sm:$0xff]   ;;  %s9522_s12 = sld [smem:[#allocation31_spill]]  ;;  %s7335_s3 = smov 9  }
  0x2a   : > { %v880_v6 = vsel %vm9497_vm0, %v878_v5, 0.0  ;;  %v905_v31 = vld [vmem:[%s9516_s4] sm:$0x1]  ;;  %v5671_v61 = vld [vmem:[%s9517_s11 + $0x1] sm:$0x1]  ;;  %s7337_s0 = smov 2  }
  0x2b   : > { %881 = vadd.xlane.f32.xlu0 %v880_v6  ;;  %v1051_v41 = vld [vmem:[%s9517_s11] sm:$0x1]  ;;  %v7243_v54 = vld [vmem:[%s9519_s30 + $0x8] sm:$0xff]   ;;  %s7339_s6 = smov 3  }
  0x2c   : > { %6121 = vmatpush3.bf16.msra.mxu0 %v7234_v8  ;;  %6129 = vmatpush3.bf16.msra.mxu1 %v7238_v30  ;;  %v7241_v49 = vld [vmem:[%s9518_s7 + $0x8] sm:$0xff]   ;;  %v7242_v52 = vld [vmem:[%s9518_s7] sm:$0xff]  }
  0x2d   : > { %6134 = vmatprep.subr.bf16.mxu0 %v7328_v9  ;;  %6142 = vmatprep.subr.bf16.mxu1 %v7328_v9  ;;  %v7244_v55 = vld [vmem:[%s9519_s30] sm:$0xff]  }
  0x2e   : > { %v5678_v7 = vld [vmem:[%s9520_s10] ss:$0 sm:$0xff] }
  0xb4   : > { %v882_v10 = vpop.xlane.xlu0 %881 }
  0xb5   : > { %7309 = vrsqrt.f32 %v882_v10  ;;  %vm885_vm2 = vcmp.eq.f32.partialorder %v882_v10, inf  ;;  %v888_v13 = vand.u32 2147483648, %v882_v10  ;;  %vm887_vm3 = vcmp.eq.f32.partialorder %v882_v10, 0.0 }
  0xc2   : > { %v7310_v11 = vpop.eup %7309 }
  0xc3   : > { %v884_v12 = vmul.f32 %v7310_v11, %v882_v10  ;;  %v7246_v11 = vld [vmem:[%s9518_s7 + $0x10] sm:$0xff]  }
  0xc5   : > { %v886_v14 = vsel %vm885_vm2, %v882_v10, %v884_v12 }
  0xc6   : > { %v889_v15 = vsel %vm887_vm3, %v888_v13, %v886_v14  ;;  %v7249_v13 = vld [vmem:[%s9521_s2 + $0x14] ss:$8 sps:$4 sm:$0xff]  }
  0xc7   : > { %v890_v16 = vadd.f32 1e-08, %v889_v15 }
  0xc9   : > { %7311 = vrcp.f32 %v890_v16 }
  0xd6   : > { %v7312_v17 = vpop.eup %7311 }
  0xd7   : > { %v892_v18 = vmul.f32 %v7312_v17, %v877_v4  ;;  %v7245_v4 = vld [vmem:[%s9518_s7 + $0x18] sm:$0xff]  }
  0xd8   : > { %v7247_v17 = vld [vmem:[%s9521_s2 + $0x10] ss:$8 sps:$4 sm:$0xff]  }
  0xd9   : > { %v893_v19 = vsel %vm9497_vm0, %v892_v18, -inf  ;;  %v7595_v53 = vpack.c.bf16 %v892_v18, %v892_v18 }
  0xda   : > { %v894_v20 = vrot.slane %v893_v19, 4 }
  0xdc   : > { %v895_v21 = vmax.f32 %v893_v19, %v894_v20  ;;  %v7252_v20 = vld [vmem:[%s9521_s2 + $0x4] ss:$8 sps:$4 sm:$0xff]  }
  0xde   : > { %v896_v22 = vrot.slane %v895_v21, 2 }
  0xe0   : > { %v897_v23 = vmax.f32 %v895_v21, %v896_v22  ;;  %v7250_v21 = vld [vmem:[%s9521_s2] ss:$8 sps:$4 sm:$0xff]   ;;  %s9496_s2 = smov 12  }
  0xe1   : > { %v7253_v22 = vld [vmem:[%s9518_s7 + $0x28] sm:$0xff]  }
  0xe2   : > { %v898_v24 = vrot.slane %v897_v23, 1 }
  0xe4   : > { %v899_v25 = vmax.f32 %v897_v23, %v898_v24  ;;  %v7254_v23 = vld [vmem:[%s9518_s7 + $0x20] sm:$0xff]  }
  0xe5   : > { %v1178_v24 = vld [vmem:[%s9522_s12] sm:$0x1]  ;;  %s9539_s12 = sld [smem:[#allocation27_spill]] }
  0xe6   : > { %v900_v27 = vpack.c.bf16 %v899_v25, %v899_v25 }
  0xe8   : > { %6123 = vmatmul.mubr.msk.bf16.vlgmr.msra.gmra.mxu0 %vm918_vm4, %v900_v27 }
  0xe9   : > { %6135 = vmatpush3.bf16.msra.mxu0 %v7235_v26  ;;  %6138 = vmatprep.mubr.msk.bf16.mxu0 %vm7329_vm1, %v7328_v9 }
  0xea   : > { %6136 = vmatprep.subr.bf16.mxu0 %v7328_v9 }
  0xed   : > { %6137 = vmatpush3.bf16.msra.mxu0 %v7236_v28 }
  0xee   : > { %6150 = vmatprep.subr.bf16.mxu0 %v7328_v9 }
  0xf0   : > { %6139 = vmatmul.mubr.msk.bf16.vlgmr.msra.gmra.mxu0 %vm918_vm4, %v900_v27  ;;  %v1476_v27 = vlaneseq }
  0xf1   : > { %6154 = vmatprep.mubr.msk.bf16.mxu0 %vm7329_vm1, %v7328_v9  ;;  %6151 = vmatpush3.bf16.msra.mxu0 %v7243_v54 }
  0xf2   : > { %6152 = vmatprep.subr.bf16.mxu0 %v7328_v9  ;;  %v7659_v29 = vshrl.u32 %v1476_v27, 7 }
  0xf5   : > { %6153 = vmatpush3.bf16.msra.mxu0 %v7244_v55 }
  0xf6   : > { %6166 = vmatprep.subr.bf16.mxu0 %v7328_v9 }
 0x1a8   : > { %v956_v32 = vpop.f32.mrf.mxu0 }
 0x1a9   : > { %v957_v33 = vadd.f32 %v956_v32, %v905_v31  ;;  %v5687_v31 = vld [vmem:[%s9520_s10 + $0x1] ss:$0 sm:$0xff] }
 0x1aa   : > { %v6124_v34 = vpop.f32.mrf.mxu0 }
 0x1ab   : > { %vm962_vm5 = vcmp.gt.f32.partialorder %v957_v33, 0.0  ;;  %v963_v35 = vmul.f32 0.2, %v957_v33  ;;  %v1478_v34 = vsub.s32 0, %v7659_v29 }
 0x1ac   : > { %v959_v36 = vpop.f32.mrf.mxu0 }
 0x1ad   : > { %v964_v37 = vsel %vm962_vm5, %v957_v33, %v963_v35  ;;  %v1474_v36 = vld [vmem:[%s9464_s14] sm:$0x3] }
 0x1ae   : > { %v965_v39 = vpack.c.bf16 %v964_v37, %v964_v37  ;;  %v6125_v40 = vpop.f32.mrf.mxu0 }
 0x1b0   : > { %6131 = vmatmul.mubr.msk.bf16.vlgmr.msra.gmra.mxu1 %vm918_vm4, %v965_v39  ;;  %v1098_v42 = vpop.f32.mrf.mxu0 }
 0x1b1   : > { %v1099_v43 = vadd.f32 %v1098_v42, %v1051_v41  ;;  %6143 = vmatpush3.bf16.msra.mxu1 %v7239_v38  ;;  %6146 = vmatprep.mubr.msk.bf16.mxu1 %vm7329_vm1, %v7328_v9  ;;  %v1482_v38 = vsub.s32 1, %v7659_v29  ;;  %v1479_v41 = vrot.slane %v1474_v36, %v1478_v34 }
 0x1b2   : > { %v6140_v45 = vpop.f32.mrf.mxu0  ;;  %6144 = vmatprep.subr.bf16.mxu1 %v7328_v9 }
 0x1b3   : > { %vm1104_vm6 = vcmp.gt.f32.partialorder %v1099_v43, 0.0  ;;  %v1105_v46 = vmul.f32 0.2, %v1099_v43 }
 0x1b4   : > { %v1101_v47 = vpop.f32.mrf.mxu0 }
 0x1b5   : > { %v1106_v48 = vsel %vm1104_vm6, %v1099_v43, %v1105_v46  ;;  %6145 = vmatpush3.bf16.msra.mxu1 %v7240_v44  ;;  %v1483_v44 = vrot.slane %v1474_v36, %v1482_v38 }
 0x1b6   : > { %v1107_v50 = vpack.c.bf16 %v1106_v48, %v1106_v48  ;;  %v6141_v51 = vpop.f32.mrf.mxu0  ;;  %6158 = vmatprep.subr.bf16.mxu1 %v7328_v9 }
 0x1b8   : > { %6147 = vmatmul.mubr.msk.bf16.vlgmr.msra.gmra.mxu1 %vm918_vm4, %v1107_v50 }
 0x1b9   : > { %6159 = vmatpush3.bf16.msra.mxu1 %v7241_v49  ;;  %6162 = vmatprep.mubr.msk.bf16.mxu1 %vm7329_vm1, %v7328_v9 }
 0x1ba   : > { %6160 = vmatprep.subr.bf16.mxu1 %v7328_v9 }
 0x1bd   : > { %6161 = vmatpush3.bf16.msra.mxu1 %v7242_v52 }
 0x1be   : > { %6174 = vmatprep.subr.bf16.mxu1 %v7328_v9 }
 0x1c0   : > { %6163 = vmatmul.mubr.msk.bf16.vlgmr.msra.gmra.mxu1 %vm918_vm4, %v7595_v53 }
 0x1c1   : > { %6178 = vmatprep.mubr.msk.bf16.mxu1 %vm7329_vm1, %v7328_v9  ;;  %6175 = vmatpush3.bf16.msra.mxu1 %v7253_v22 }
 0x1c2   : > { %6176 = vmatprep.subr.bf16.mxu1 %v7328_v9 }
 0x1c5   : > { %6177 = vmatpush3.bf16.msra.mxu1 %v7254_v23 }
 0x270   : > { %v7611_v57 = vpop.f32.mrf.mxu1 }
 0x272   : > { %v6132_v58 = vpop.f32.mrf.mxu1 }
 0x273   : > { %v7255_v58 = vld [vmem:[%s9465_s15 + $0x28] sm:$0xff]  }
 0x274   : > { %v1025_v59 = vpop.f32.mrf.mxu1  ;;  %6182 = vmatprep.subr.bf16.mxu1 %v7255_v58 }
 0x275   : > { %v7256_v59 = vld [vmem:[%s9465_s15 + $0x20] sm:$0xff]  }
 0x276   : > { %v6133_v60 = vpop.f32.mrf.mxu1 }
 0x277   : > { %v7257_v60 = vld [vmem:[%s9465_s15 + $0x18] sm:$0xff]  }
 0x278   : > { %v1164_v62 = vpop.f32.mrf.mxu1 }
 0x279   : > { %v1165_v63 = vadd.f32 %v5671_v61, %v1164_v62  ;;  %v7258_v62 = vld [vmem:[%s9465_s15 + $0x10] sm:$0xff]  }
 0x27a   : > { %v6148_v0 = vpop.f32.mrf.mxu1 }
 0x27b   : > { %vm1170_vm7 = vcmp.gt.f32.partialorder %v1165_v63, 0.0  ;;  %v1171_v1 = vmul.f32 0.2, %v1165_v63 }
 0x27c   : > { %v1167_v2 = vpop.f32.mrf.mxu1 }
 0x27d   : > { %v1172_v3 = vsel %vm1170_vm7, %v1165_v63, %v1171_v1 }
 0x27e   : > { %v1173_v5 = vpack.c.bf16 %v1172_v3, %v1172_v3  ;;  %v6149_v6 = vpop.f32.mrf.mxu1 }
 0x27f   : > { %v7259_v6 = vld [vmem:[%s9465_s15 + $0x8] sm:$0xff]  }
 0x280   : > { %6155 = vmatmul.mubr.msk.bf16.vlgmr.msra.gmra.mxu0 %vm918_vm4, %v1173_v5  ;;  %v1297_v8 = vpop.f32.mrf.mxu1 }
 0x281   : > { %v1298_v10 = vadd.f32 %v5678_v7, %v1297_v8  ;;  %6167 = vmatpush3.bf16.msra.mxu0 %v7245_v4  ;;  %6170 = vmatprep.mubr.msk.bf16.mxu0 %vm7329_vm1, %v7328_v9 }
 0x282   : > { %v6164_v12 = vpop.f32.mrf.mxu1  ;;  %6168 = vmatprep.subr.bf16.mxu0 %v7328_v9 }
 0x283   : > { %vm1303_vm8 = vcmp.gt.f32.partialorder %v1298_v10, 0.0  ;;  %v1304_v14 = vmul.f32 0.2, %v1298_v10 }
 0x284   : > { %v1300_v15 = vpop.f32.mrf.mxu1 }
 0x285   : > { %v1305_v16 = vsel %vm1303_vm8, %v1298_v10, %v1304_v14  ;;  %6169 = vmatpush3.bf16.msra.mxu0 %v7246_v11  ;;  %v7260_v15 = vld [vmem:[%s9465_s15] sm:$0xff]  }
 0x286   : > { %v1306_v18 = vpack.c.bf16 %v1305_v16, %v1305_v16  ;;  %v6165_v19 = vpop.f32.mrf.mxu1  ;;  %1518 = vmatprep.subr.bf16.mxu0 %v7249_v13 }
 0x288   : > { %6171 = vmatmul.mubr.msk.bf16.vlgmr.msra.gmra.mxu0 %vm918_vm4, %v1306_v18 }
 0x289   : > { %1519 = vmatpush1.bf16.msra.mxu0 %v7247_v17  ;;  %1538 = vmatprep.mubr.bf16.mxu0 %v7330_v56 }
 0x28a   : > { %1520 = vmatprep.subr.bf16.mxu0 %v7252_v20 }
 0x28d   : > { %1521 = vmatpush1.bf16.msra.mxu0 %v7250_v21 }
 0x290   : > { %5706 = vmatmul.mubr.msk.bf16.vlgmr.msra.gmra.mxu0 %vm918_vm4, %v7595_v53 }
 0x340   : > { %v1228_v25 = vpop.f32.mrf.mxu0 }
 0x341   : > { %v1229_v26 = vadd.f32 %v1228_v25, %v1178_v24 }
 0x342   : > { %v6156_v28 = vpop.f32.mrf.mxu0 }
 0x343   : > { %1235 = vst.msk [vmem:[%s875_s9] sm:$0x1] %vm1234_vm9, %v1229_v26  ;;  %s9493_s9 = smov 64  }
 0x344   : > { %v1231_v9 = vpop.f32.mrf.mxu0 }
 0x346   : > { %v6157_v30 = vpop.f32.mrf.mxu0 }
 0x348   : > { %v1369_v32 = vpop.f32.mrf.mxu0 }
 0x349   : > { %v1370_v33 = vadd.f32 %v5687_v31, %v1369_v32 }
 0x34a   : > { %v6172_v35 = vpop.f32.mrf.mxu0 }
 0x34b   : > { %vm1375_vm10 = vcmp.gt.f32.partialorder %v1370_v33, 0.0  ;;  %v1376_v37 = vmul.f32 0.2, %v1370_v33 }
 0x34c   : > { %v1372_v39 = vpop.f32.mrf.mxu0 }
 0x34d   : > { %v1377_v40 = vsel %vm1375_vm10, %v1370_v33, %v1376_v37 }
 0x34e   : > { %v1378_v42 = vpack.c.bf16 %v1377_v40, %v1377_v40  ;;  %v6173_v43 = vpop.f32.mrf.mxu0 }
 0x350   : > { %6179 = vmatmul.mubr.msk.bf16.vlgmr.msra.gmra.mxu1 %vm918_vm4, %v1378_v42  ;;  %v1540_v45 = vpop.f32.mrf.mxu0 }
 0x351   : > { %v1541_v46 = vadd.f32 %v1540_v45, %v1479_v41  ;;  %6183 = vmatpush3.bf16.msra.mxu1 %v7255_v58  ;;  %v7261_v58 = vld [vmem:[%s9465_s15 + $0x58] sm:$0xff]  }
 0x352   : > { %v1542_v47 = vpop.f32.mrf.mxu0  ;;  %6184 = vmatprep.subr.bf16.mxu1 %v7256_v59  ;;  %6198 = vmatprep.subr.bf16.mxu0 %v7261_v58 }
 0x353   : > { %v1543_v48 = vadd.f32 %v1542_v47, %v1483_v44  ;;  %v1548_v50 = vrot.slane %v1541_v46, 4  ;;  %6199 = vmatpush3.bf16.msra.mxu0 %v7261_v58 }
 0x354   : > { %v1544_v49 = vpop.f32.mrf.mxu0 }
 0x355   : > { %v1559_v51 = vrot.slane %v1543_v48, 4  ;;  %v6627_v52 = vpack.i.bf16 %v1543_v48, %v1541_v46  ;;  %6185 = vmatpush3.bf16.msra.mxu1 %v7256_v59  ;;  %v7262_v59 = vld [vmem:[%s9465_s15 + $0x50] sm:$0xff]  }
 0x356   : > { %v1545_v54 = vpop.f32.mrf.mxu0  ;;  %6186 = vmatprep.subr.bf16.mxu1 %v7257_v60  ;;  %6200 = vmatprep.subr.bf16.mxu0 %v7262_v59 }
 0x357   : > { %6628 = vrot.lane.b32.xlu1 %v6627_v52, %s9493_s9  ;;  %v6622_v55 = vpack.i.bf16 %v1559_v51, %v1548_v50  ;;  %6201 = vmatpush3.bf16.msra.mxu0 %v7262_v59 }
 0x359   : > { %6623 = vrot.lane.b32.xlu0 %v6622_v55, %s9491_s1  ;;  %6187 = vmatpush3.bf16.msra.mxu1 %v7257_v60  ;;  %v7263_v60 = vld [vmem:[%s9465_s15 + $0x48] sm:$0xff]   ;;  %s9524_s1 = smov 64  }
 0x35a   : > { %6188 = vmatprep.subr.bf16.mxu1 %v7258_v62  ;;  %6202 = vmatprep.subr.bf16.mxu0 %v7263_v60 }
 0x35b   : > { %6633 = vrot.lane.b32.xlu1 %v6622_v55, %s7333_s5  ;;  %6203 = vmatpush3.bf16.msra.mxu0 %v7263_v60 }
 0x35d   : > { %6189 = vmatpush3.bf16.msra.mxu1 %v7258_v62  ;;  %v7265_v62 = vld [vmem:[%s9465_s15 + $0x38] sm:$0xff]  }
 0x35e   : > { %6190 = vmatprep.subr.bf16.mxu1 %v7259_v6 }
 0x361   : > { %6191 = vmatpush3.bf16.msra.mxu1 %v7259_v6 }
 0x362   : > { %6192 = vmatprep.subr.bf16.mxu1 %v7260_v15 }
 0x365   : > { %6193 = vmatpush3.bf16.msra.mxu1 %v7260_v15 }
 0x366   : > { %6214 = vmatprep.subr.bf16.mxu1 %v7261_v58 }
 0x3c9   : > { %v6629_v61 = vpop.permute.xlu1 %6628 }
 0x3ca   : > { %v6630_v3 = vunpack.i.l.bf16 %v6629_v61  ;;  %v6631_v7 = vunpack.i.h.bf16 %v6629_v61  ;;  %v7264_v61 = vld [vmem:[%s9465_s15 + $0x40] sm:$0xff]  }
 0x3cb   : > { %v6624_v63 = vpop.permute.xlu0 %6623  ;;  %6204 = vmatprep.subr.bf16.mxu0 %v7264_v61 }
 0x3cc   : > { %v6625_v0 = vunpack.i.l.bf16 %v6624_v63  ;;  %v6626_v1 = vunpack.i.h.bf16 %v6624_v63  ;;  %6205 = vmatpush3.bf16.msra.mxu0 %v7264_v61  ;;  %v5707_v63 = vld [vmem:[%s9466_s16] ss:$0 sm:$0xff] }
 0x3cd   : > { %v6634_v2 = vpop.permute.xlu1 %6633  ;;  %6206 = vmatprep.subr.bf16.mxu0 %v7265_v62 }
 0x3ce   : > { %v6636_v4 = vunpack.i.h.bf16 %v6634_v2  ;;  %v6635_v5 = vunpack.i.l.bf16 %v6634_v2  ;;  %v1570_v8 = vsel %vm1569_vm11, %v1541_v46, %v6625_v0  ;;  %v1572_v12 = vsel %vm1569_vm11, %v1543_v48, %v6626_v1 }
 0x3cf   : > { %v1591_v16 = vrot.slane %v1570_v8, 4  ;;  %v1594_v17 = vrot.slane %v1572_v12, 4 }
 0x3d0   : > { %v1571_v10 = vsel %vm1569_vm11, %v6630_v3, %v6635_v5  ;;  %v1573_v14 = vsel %vm1569_vm11, %v6631_v7, %v6636_v4  ;;  %6207 = vmatpush3.bf16.msra.mxu0 %v7265_v62 }
 0x3d1   : > { %v6637_v11 = vpack.i.bf16 %v1571_v10, %v1570_v8  ;;  %v1592_v13 = vrot.slane %v1571_v10, 4  ;;  %v6642_v18 = vpack.i.bf16 %v1573_v14, %v1572_v12  ;;  %v1596_v19 = vrot.slane %v1573_v14, 4  ;;  %v7266_v8 = vld [vmem:[%s9465_s15 + $0x30] sm:$0xff]  }
 0x3d2   : > { %v1602_v36 = vsel %vm1569_vm11, 0.0, %v1591_v16  ;;  %6208 = vmatprep.subr.bf16.mxu0 %v7266_v8 }
 0x3d3   : > { %6638 = vrot.lane.b32.xlu1 %v6637_v11, %s7333_s5  ;;  %v1593_v20 = vsel %vm1569_vm11, %v1591_v16, %v1592_v13  ;;  %v1595_v21 = vsel %vm1569_vm11, %v1592_v13, %v1594_v17  ;;  %v1597_v23 = vsel %vm1569_vm11, %v1594_v17, %v1596_v19  ;;  %v1604_v24 = vsel %vm1569_vm11, %v1596_v19, 0.0  ;;  %v7269_v19 = vld [vmem:[%s9468_s19 + $0x14] ss:$8 sps:$4 sm:$0xff]  }
 0x3d4   : > { %v6647_v22 = vpack.i.bf16 %v1595_v21, %v1593_v20  ;;  %v6652_v25 = vpack.i.bf16 %v1604_v24, %v1597_v23  ;;  %6209 = vmatpush3.bf16.msra.mxu0 %v7266_v8 }
 0x3d7   : > { %6643 = vrot.lane.b32.xlu1 %v6642_v18, %s7333_s5 }
 0x3db   : > { %6648 = vrot.lane.b32.xlu1 %v6647_v22, %s9493_s9 }
 0x3df   : > { %6653 = vrot.lane.b32.xlu1 %v6652_v25, %s9493_s9 }
 0x410   : > { %v7707_v26 = vpop.f32.mrf.mxu1 }
 0x412   : > { %v6180_v27 = vpop.f32.mrf.mxu1 }
 0x414   : > { %v1444_v28 = vpop.f32.mrf.mxu1 }
 0x416   : > { %v6181_v9 = vpop.f32.mrf.mxu1 }
 0x445   : > { %v6639_v30 = vpop.permute.xlu1 %6638 }
 0x446   : > { %v6641_v32 = vunpack.i.h.bf16 %v6639_v30  ;;  %v6640_v33 = vunpack.i.l.bf16 %v6639_v30 }
 0x448   : > { %v1630_v40 = vsel %vm918_vm4, %v1602_v36, %v6640_v33  ;;  %v1631_v41 = vsel %vm918_vm4, %v1593_v20, %v6641_v32 }
 0x449   : > { %v6644_v31 = vpop.permute.xlu1 %6643 }
 0x44a   : > { %v6646_v42 = vunpack.i.h.bf16 %v6644_v31  ;;  %v6645_v43 = vunpack.i.l.bf16 %v6644_v31 }
 0x44c   : > { %v1633_v50 = vsel %vm918_vm4, %v1597_v23, %v6646_v42  ;;  %v1632_v51 = vsel %vm918_vm4, %v1595_v21, %v6645_v43 }
 0x44d   : > { %v6649_v35 = vpop.permute.xlu1 %6648 }
 0x44e   : > { %v6651_v37 = vunpack.i.h.bf16 %v6649_v35  ;;  %v6650_v39 = vunpack.i.l.bf16 %v6649_v35 }
 0x450   : > { %v1635_v44 = vsel %vm1634_vm12, %v1630_v40, %v6650_v39  ;;  %v1636_v45 = vsel %vm1634_vm12, %v1631_v41, %v6651_v37 }
 0x451   : > { %v6654_v46 = vpop.permute.xlu1 %6653  ;;  %v1639_v47 = vpack.c.bf16 %v1636_v45, %v1635_v44  ;;  %v7267_v45 = vld [vmem:[%s9468_s19 + $0x10] ss:$8 sps:$4 sm:$0xff]  }
 0x452   : > { %v6656_v48 = vunpack.i.h.bf16 %v6654_v46  ;;  %v6655_v49 = vunpack.i.l.bf16 %v6654_v46 }
 0x453   : > { %6194 = vmatprep.mubr.msk.bf16.mxu1 %vm9498_vm13, %v1639_v47  ;;  %v7272_v47 = vld [vmem:[%s9468_s19 + $0x4] ss:$8 sps:$4 sm:$0xff]  }
 0x454   : > { %v1638_v52 = vsel %vm1634_vm12, %v1633_v50, %v6656_v48  ;;  %v1637_v54 = vsel %vm1634_vm12, %v1632_v51, %v6655_v49  ;;  %v7270_v48 = vld [vmem:[%s9468_s19] ss:$8 sps:$4 sm:$0xff]  }
 0x455   : > { %v1640_v55 = vpack.c.bf16 %v1638_v52, %v1637_v54  ;;  %v2426_v51 = vld [vmem:[%s9469_s20] sm:$0x3] }
 0x456   : > { %v2431_v54 = vrot.slane %v2426_v51, %v1478_v34 }
 0x457   : > { %6195 = vmatmul.mubr.msk.bf16.vlgmr.msra.gmra.mxu1 %vm9498_vm13, %v1640_v55 }
 0x458   : > { %6215 = vmatpush3.bf16.msra.mxu1 %v7261_v58  ;;  %v2435_v58 = vrot.slane %v2426_v51, %v1482_v38  ;;  %v7273_v38 = vld [vmem:[%s9470_s21 + $0x28] sm:$0xff]  }
 0x459   : > { %6216 = vmatprep.subr.bf16.mxu1 %v7262_v59 }
 0x45c   : > { %6217 = vmatpush3.bf16.msra.mxu1 %v7262_v59 }
 0x45d   : > { %6218 = vmatprep.subr.bf16.mxu1 %v7263_v60 }
 0x460   : > { %6219 = vmatpush3.bf16.msra.mxu1 %v7263_v60 }
 0x461   : > { %6220 = vmatprep.subr.bf16.mxu1 %v7264_v61 }
 0x464   : > { %6221 = vmatpush3.bf16.msra.mxu1 %v7264_v61 }
 0x465   : > { %6222 = vmatprep.subr.bf16.mxu1 %v7265_v62 }
 0x468   : > { %6223 = vmatpush3.bf16.msra.mxu1 %v7265_v62 }
 0x469   : > { %6224 = vmatprep.subr.bf16.mxu1 %v7266_v8 }
 0x46c   : > { %6225 = vmatpush3.bf16.msra.mxu1 %v7266_v8 }
 0x46d   : > { %2470 = vmatprep.subr.bf16.mxu1 %v7269_v19 }
 0x517   : > { %v6196_v0 = vpop.f32.mrf.mxu1 }
 0x518   : > { %v1733_v1 = vadd.f32 %v6196_v0, %v5707_v63 }
 0x519   : > { %v1724_v2 = vpop.f32.mrf.mxu1 }
 0x51a   : > { %v1745_v3 = vmul.f32 0.2, %v1733_v1  ;;  %v1725_v4 = vadd.f32 %v5707_v63, %v1724_v2  ;;  %vm1741_vm14 = vcmp.gt.f32.partialorder %v1733_v1, 0.0 }
 0x51b   : > { %v6197_v5 = vpop.f32.mrf.mxu1 }
 0x51c   : > { %v1743_v6 = vmul.f32 0.2, %v1725_v4  ;;  %v1736_v7 = vadd.f32 %v6197_v5, %v5707_v63  ;;  %vm1739_vm15 = vcmp.gt.f32.partialorder %v1725_v4, 0.0  ;;  %v7741_v11 = vsel %vm1741_vm14, %v1733_v1, %v1745_v3  ;;  %v7274_v3 = vld [vmem:[%s9470_s21 + $0x20] sm:$0xff]   ;;  %v7276_v5 = vld [vmem:[%s9470_s21 + $0x10] sm:$0xff]  }
 0x51d   : > { %v1727_v10 = vpop.f32.mrf.mxu1  ;;  %v1773_v17 = vrot.slane %v7741_v11, 4 }
 0x51e   : > { %vm1742_vm1 = vcmp.gt.f32.partialorder %v1736_v7, 0.0  ;;  %v1746_v12 = vmul.f32 0.2, %v1736_v7  ;;  %v1728_v13 = vadd.f32 %v5707_v63, %v1727_v10  ;;  %v7743_v14 = vsel %vm1739_vm15, %v1725_v4, %v1743_v6  ;;  %v7275_v4 = vld [vmem:[%s9470_s21 + $0x18] sm:$0xff]   ;;  %v7812_v6 = vld [vmem:[%s9466_s16 + $0x1] ss:$0 sm:$0xff] }
 0x51f   : > { %v1770_v21 = vrot.slane %v7743_v14, 4 }
 0x520   : > { %v7745_v15 = vsel %vm1742_vm1, %v1736_v7, %v1746_v12  ;;  %vm1740_vm2 = vcmp.gt.f32.partialorder %v1728_v13, 0.0  ;;  %v1744_v16 = vmul.f32 0.2, %v1728_v13 }
 0x521   : > { %v1775_v18 = vrot.slane %v7745_v15, 4  ;;  %v6697_v34 = vpack.i.bf16 %v7745_v15, %v7741_v11 }
 0x522   : > { %v1748_v20 = vsel %vm1740_vm2, %v1728_v13, %v1744_v16  ;;  %v7277_v13 = vld [vmem:[%s9470_s21 + $0x8] sm:$0xff]  }
 0x523   : > { %v1771_v22 = vrot.slane %v1748_v20, 4  ;;  %v1776_v23 = vsel %vm1569_vm11, %v1773_v17, %v1775_v18  ;;  %v1922_v24 = vsel %vm1569_vm11, %v1775_v18, 0.0  ;;  %v6687_v29 = vpack.i.bf16 %v1748_v20, %v7743_v14 }
 0x524   : > { %v6662_v25 = vpack.i.bf16 %v1922_v24, %v1776_v23 }
 0x525   : > { %v1772_v27 = vsel %vm1569_vm11, %v1770_v21, %v1771_v22  ;;  %v1774_v28 = vsel %vm1569_vm11, %v1771_v22, %v1773_v17  ;;  %v7278_v22 = vld [vmem:[%s9470_s21] sm:$0xff]  }
 0x526   : > { %6663 = vrot.lane.b32.xlu0 %v6662_v25, %s9493_s9  ;;  %v6657_v9 = vpack.i.bf16 %v1774_v28, %v1772_v27  ;;  %v6682_v30 = vpack.i.bf16 %v1772_v27, %v1770_v21  ;;  %v6692_v31 = vpack.i.bf16 %v1776_v23, %v1774_v28 }
 0x528   : > { %6658 = vrot.lane.b32.xlu1 %v6657_v9, %s9493_s9 }
 0x598   : > { %v6664_v32 = vpop.permute.xlu0 %6663 }
 0x599   : > { %v6666_v33 = vunpack.i.h.bf16 %v6664_v32  ;;  %v6665_v35 = vunpack.i.l.bf16 %v6664_v32 }
 0x59a   : > { %v6659_v36 = vpop.permute.xlu1 %6658 }
 0x59b   : > { %v6661_v37 = vunpack.i.h.bf16 %v6659_v36  ;;  %v6660_v39 = vunpack.i.l.bf16 %v6659_v36  ;;  %v1939_v40 = vsel %vm1634_vm12, %v7745_v15, %v6666_v33  ;;  %v1938_v41 = vsel %vm1634_vm12, %v7741_v11, %v6665_v35 }
 0x59c   : > { %v1941_v46 = vpack.c.bf16 %v1939_v40, %v1938_v41 }
 0x59d   : > { %v1937_v42 = vsel %vm1634_vm12, %v1748_v20, %v6661_v37  ;;  %v1936_v43 = vsel %vm1634_vm12, %v7743_v14, %v6660_v39 }
 0x59e   : > { %v1940_v44 = vpack.c.bf16 %v1937_v42, %v1936_v43 }
 0x5a0   : > { %6226 = vmatprep.mubr.msk.bf16.mxu1 %vm9498_vm13, %v1940_v44 }
 0x5a1   : > { %6227 = vmatmul.mubr.msk.bf16.vlgmr.msra.gmra.mxu1 %vm9498_vm13, %v1941_v46 }
 0x5a2   : > { %2471 = vmatpush1.bf16.msra.mxu1 %v7267_v45  ;;  %2490 = vmatprep.mubr.bf16.mxu1 %v7330_v56 }
 0x5a3   : > { %2472 = vmatprep.subr.bf16.mxu1 %v7272_v47 }
 0x5a6   : > { %2473 = vmatpush1.bf16.msra.mxu1 %v7270_v48 }
 0x5a7   : > { %6258 = vmatprep.subr.bf16.mxu1 %v7273_v38 }
 0x5a9   : > { %5759 = vmatmul.mubr.msk.bf16.vlgmr.msra.gmra.mxu1 %vm918_vm4, %v7595_v53 }
 0x5aa   : > { %6259 = vmatpush3.bf16.msra.mxu1 %v7273_v38 }
 0x5ab   : > { %6260 = vmatprep.subr.bf16.mxu1 %v7274_v3 }
 0x5ae   : > { %6261 = vmatpush3.bf16.msra.mxu1 %v7274_v3 }
 0x5af   : > { %6262 = vmatprep.subr.bf16.mxu1 %v7275_v4 }
 0x5b2   : > { %6263 = vmatpush3.bf16.msra.mxu1 %v7275_v4 }
 0x5b3   : > { %6264 = vmatprep.subr.bf16.mxu1 %v7276_v5 }
 0x5b6   : > { %6265 = vmatpush3.bf16.msra.mxu1 %v7276_v5 }
 0x5b7   : > { %6266 = vmatprep.subr.bf16.mxu1 %v7277_v13 }
 0x5ba   : > { %6267 = vmatpush3.bf16.msra.mxu1 %v7277_v13 }
 0x5bb   : > { %6268 = vmatprep.subr.bf16.mxu1 %v7278_v22 }
 0x5be   : > { %6269 = vmatpush3.bf16.msra.mxu1 %v7278_v22 }
 0x661   : > { %v6228_v49 = vpop.f32.mrf.mxu1 }
 0x662   : > { %v1991_v10 = vadd.f32 %v6228_v49, %v7812_v6 }
 0x663   : > { %v1982_v50 = vpop.f32.mrf.mxu1 }
 0x664   : > { %v1983_v7 = vadd.f32 %v7812_v6, %v1982_v50  ;;  %v2003_v19 = vmul.f32 0.2, %v1991_v10  ;;  %vm1999_vm6 = vcmp.gt.f32.partialorder %v1991_v10, 0.0 }
 0x665   : > { %v6229_v52 = vpop.f32.mrf.mxu1 }
 0x666   : > { %v1994_v11 = vadd.f32 %v6229_v52, %v7812_v6  ;;  %v2001_v14 = vmul.f32 0.2, %v1983_v7  ;;  %vm1997_vm3 = vcmp.gt.f32.partialorder %v1983_v7, 0.0  ;;  %v7832_v35 = vsel %vm1999_vm6, %v1991_v10, %v2003_v19  ;;  %v7279_v19 = vld [vmem:[%s9467_s17 + $0x28] sm:$0xff]  }
 0x667   : > { %v1985_v55 = vpop.f32.mrf.mxu1  ;;  %v2016_v5 = vrot.slane %v7832_v35, 4  ;;  %6230 = vmatprep.subr.bf16.mxu0 %v7279_v19 }
 0x668   : > { %v1986_v8 = vadd.f32 %v7812_v6, %v1985_v55  ;;  %v2004_v20 = vmul.f32 0.2, %v1994_v11  ;;  %v7824_v23 = vsel %vm1997_vm3, %v1983_v7, %v2001_v14  ;;  %vm2000_vm7 = vcmp.gt.f32.partialorder %v1994_v11, 0.0 }
 0x669   : > { %v2492_v56 = vpop.f32.mrf.mxu1  ;;  %v2013_v39 = vrot.slane %v7824_v23, 4 }
 0x66a   : > { %v2493_v59 = vadd.f32 %v2492_v56, %v2431_v54  ;;  %v2002_v15 = vmul.f32 0.2, %v1986_v8  ;;  %vm1998_vm5 = vcmp.gt.f32.partialorder %v1986_v8, 0.0  ;;  %v7834_v36 = vsel %vm2000_vm7, %v1994_v11, %v2004_v20 }
 0x66b   : > { %v2494_v60 = vpop.f32.mrf.mxu1  ;;  %v2018_v7 = vrot.slane %v7834_v36, 4 }
 0x66c   : > { %v2495_v61 = vadd.f32 %v2494_v60, %v2435_v58  ;;  %v2500_v53 = vrot.slane %v2493_v59, 4  ;;  %v7826_v24 = vsel %vm1998_vm5, %v1986_v8, %v2002_v15 }
 0x66d   : > { %v2496_v62 = vpop.f32.mrf.mxu1  ;;  %v2014_v37 = vrot.slane %v7826_v24, 4 }
 0x66e   : > { %v2511_v63 = vrot.slane %v2495_v61, 4  ;;  %v6667_v0 = vpack.i.bf16 %v2495_v61, %v2493_v59 }
 0x66f   : > { %v2497_v1 = vpop.f32.mrf.mxu1  ;;  %v2017_v15 = vsel %vm1569_vm11, %v2014_v37, %v2016_v5 }
 0x670   : > { %6668 = vrot.lane.b32.xlu0 %v6667_v0, %s9493_s9  ;;  %v6672_v2 = vpack.i.bf16 %v2511_v63, %v2500_v53  ;;  %s9538_s9 = sld [smem:[#allocation23_spill]] }
 0x672   : > { %6673 = vrot.lane.b32.xlu1 %v6672_v2, %s9523_s24 }
 0x674   : > { %6683 = vrot.lane.b32.xlu0 %v6682_v30, %s9523_s24 }
 0x676   : > { %6678 = vrot.lane.b32.xlu1 %v6672_v2, %s7333_s5 }
 0x678   : > { %6693 = vrot.lane.b32.xlu0 %v6692_v31, %s9523_s24 }
 0x67a   : > { %6688 = vrot.lane.b32.xlu1 %v6687_v29, %s7333_s5  ;;  %v2015_v29 = vsel %vm1569_vm11, %v2013_v39, %v2014_v37 }
 0x67b   : > { %v6722_v13 = vpack.i.bf16 %v2015_v29, %v2013_v39 }
 0x67e   : > { %6698 = vrot.lane.b32.xlu1 %v6697_v34, %s7333_s5 }
 0x6e2   : > { %v6669_v12 = vpop.permute.xlu0 %6668 }
 0x6e3   : > { %v6671_v25 = vunpack.i.h.bf16 %v6669_v12  ;;  %v6670_v30 = vunpack.i.l.bf16 %v6669_v12 }
 0x6e4   : > { %v6674_v16 = vpop.permute.xlu1 %6673 }
 0x6e5   : > { %v6676_v17 = vunpack.i.h.bf16 %v6674_v16  ;;  %v6675_v18 = vunpack.i.l.bf16 %v6674_v16  ;;  %v2019_v16 = vsel %vm1569_vm11, %v2016_v5, %v2018_v7 }
 0x6e6   : > { %v6684_v21 = vpop.permute.xlu0 %6683 }
 0x6e7   : > { %v2523_v28 = vsel %vm1569_vm11, %v2495_v61, %v6676_v17  ;;  %v7830_v9 = vsel %vm1569_vm11, %v2493_v59, %v6675_v18  ;;  %v6685_v31 = vunpack.i.l.bf16 %v6684_v21  ;;  %v6686_v49 = vunpack.i.h.bf16 %v6684_v21 }
 0x6e8   : > { %v6679_v27 = vpop.permute.xlu1 %6678  ;;  %v2545_v41 = vrot.slane %v2523_v28, 4  ;;  %v2542_v43 = vrot.slane %v7830_v9, 4  ;;  %v6732_v17 = vpack.i.bf16 %v2019_v16, %v2017_v15  ;;  %v7870_v18 = vpack.i.bf16 %v7826_v24, %v7824_v23 }
 0x6e9   : > { %v6681_v32 = vunpack.i.h.bf16 %v6679_v27  ;;  %v6680_v33 = vunpack.i.l.bf16 %v6679_v27  ;;  %v1789_v50 = vsel %vm1569_vm11, 0.0, %v6685_v31 }
 0x6ea   : > { %v6694_v51 = vpop.permute.xlu0 %6693 }
 0x6eb   : > { %v2524_v40 = vsel %vm1569_vm11, %v6671_v25, %v6681_v32  ;;  %v2522_v42 = vsel %vm1569_vm11, %v6670_v30, %v6680_v33  ;;  %v6696_v63 = vunpack.i.h.bf16 %v6694_v51  ;;  %v6695_v34 = vunpack.i.l.bf16 %v6694_v51  ;;  %v7281_v51 = vld [vmem:[%s9467_s17 + $0x18] sm:$0xff]  }
 0x6ec   : > { %v6689_v44 = vpop.permute.xlu1 %6688  ;;  %v2547_v45 = vrot.slane %v2524_v40, 4  ;;  %v6707_v46 = vpack.i.bf16 %v2524_v40, %v2523_v28  ;;  %v2543_v47 = vrot.slane %v2522_v42, 4  ;;  %v6702_v48 = vpack.i.bf16 %v2522_v42, %v7830_v9 }
 0x6ed   : > { %v6691_v52 = vunpack.i.h.bf16 %v6689_v44  ;;  %v6690_v54 = vunpack.i.l.bf16 %v6689_v44  ;;  %v2553_v9 = vsel %vm1569_vm11, 0.0, %v2542_v43 }
 0x6ee   : > { %6708 = vrot.lane.b32.xlu1 %v6707_v46, %s7333_s5  ;;  %6703 = vrot.lane.b32.xlu0 %v6702_v48, %s7333_s5  ;;  %v2548_v55 = vsel %vm1569_vm11, %v2545_v41, %v2547_v45  ;;  %v2555_v58 = vsel %vm1569_vm11, %v2547_v45, 0.0  ;;  %v2544_v56 = vsel %vm1569_vm11, %v2542_v43, %v2543_v47  ;;  %v2546_v59 = vsel %vm1569_vm11, %v2543_v47, %v2545_v41 }
 0x6ef   : > { %v1803_v60 = vsel %vm918_vm4, %v6686_v49, %v6691_v52  ;;  %v1802_v61 = vsel %vm918_vm4, %v1789_v50, %v6690_v54  ;;  %v6717_v62 = vpack.i.bf16 %v2555_v58, %v2548_v55  ;;  %v6712_v53 = vpack.i.bf16 %v2546_v59, %v2544_v56  ;;  %v7280_v50 = vld [vmem:[%s9467_s17 + $0x20] sm:$0xff]  }
 0x6f0   : > { %v1807_v0 = vsel %vm1634_vm12, %v1803_v60, %v6691_v52  ;;  %v1806_v1 = vsel %vm1634_vm12, %v1802_v61, %v6690_v54  ;;  %v6699_v2 = vpop.permute.xlu1 %6698  ;;  %v7282_v54 = vld [vmem:[%s9467_s17 + $0x10] sm:$0xff]  }
 0x6f1   : > { %v6701_v38 = vunpack.i.h.bf16 %v6699_v2  ;;  %v6700_v3 = vunpack.i.l.bf16 %v6699_v2  ;;  %v1810_v4 = vpack.c.bf16 %v1807_v0, %v1806_v1  ;;  %v7284_v0 = vld [vmem:[%s9467_s17] sm:$0xff]  }
 0x6f2   : > { %6718 = vrot.lane.b32.xlu1 %v6717_v62, %s9524_s1  ;;  %6713 = vrot.lane.b32.xlu0 %v6712_v53, %s9524_s1 }
 0x6f3   : > { %v1805_v8 = vsel %vm918_vm4, %v6696_v63, %v6701_v38  ;;  %v1804_v10 = vsel %vm918_vm4, %v6695_v34, %v6700_v3  ;;  %6210 = vmatprep.mubr.msk.bf16.mxu0 %vm9498_vm13, %v1810_v4 }
 0x6f4   : > { %v1809_v11 = vsel %vm1634_vm12, %v1805_v8, %v6701_v38  ;;  %v1808_v12 = vsel %vm1634_vm12, %v1804_v10, %v6700_v3 }
 0x6f5   : > { %v1811_v14 = vpack.c.bf16 %v1809_v11, %v1808_v12 }
 0x6f6   : > { %6723 = vrot.lane.b32.xlu0 %v6722_v13, %s9523_s24 }
 0x6f7   : > { %6211 = vmatmul.mubr.msk.bf16.vlgmr.msra.gmra.mxu0 %vm9498_vm13, %v1811_v14 }
 0x6f8   : > { %6231 = vmatpush3.bf16.msra.mxu0 %v7279_v19 }
 0x6f9   : > { %6232 = vmatprep.subr.bf16.mxu0 %v7280_v50 }
 0x6fa   : > { %6733 = vrot.lane.b32.xlu0 %v6732_v17, %s9523_s24 }
 0x6fc   : > { %6233 = vmatpush3.bf16.msra.mxu0 %v7280_v50 }
 0x6fd   : > { %6234 = vmatprep.subr.bf16.mxu0 %v7281_v51 }
 0x6fe   : > { %6743 = vrot.lane.b32.xlu0 %v7870_v18, %s9524_s1 }
 0x700   : > { %6235 = vmatpush3.bf16.msra.mxu0 %v7281_v51 }
 0x701   : > { %6236 = vmatprep.subr.bf16.mxu0 %v7282_v54 }
 0x704   : > { %6237 = vmatpush3.bf16.msra.mxu0 %v7282_v54 }
 0x760   : > { %v6709_v20 = vpop.permute.xlu1 %6708  ;;  %v6704_v21 = vpop.permute.xlu0 %6703 }
 0x761   : > { %v6711_v22 = vunpack.i.h.bf16 %v6709_v20  ;;  %v6710_v25 = vunpack.i.l.bf16 %v6709_v20  ;;  %v6706_v27 = vunpack.i.h.bf16 %v6704_v21  ;;  %v6705_v28 = vunpack.i.l.bf16 %v6704_v21 }
 0x763   : > { %v2583_v40 = vsel %vm918_vm4, %v2546_v59, %v6710_v25  ;;  %v2584_v41 = vsel %vm918_vm4, %v2548_v55, %v6711_v22  ;;  %v2581_v42 = vsel %vm918_vm4, %v2553_v9, %v6705_v28  ;;  %v2582_v44 = vsel %vm918_vm4, %v2544_v56, %v6706_v27  ;;  %v7283_v59 = vld [vmem:[%s9467_s17 + $0x8] sm:$0xff]  }
 0x764   : > { %v6719_v30 = vpop.permute.xlu1 %6718  ;;  %v6714_v31 = vpop.permute.xlu0 %6713  ;;  %6238 = vmatprep.subr.bf16.mxu0 %v7283_v59  ;;  %v6747_v22 = vpack.i.bf16 %v7834_v36, %v7832_v35 }
 0x765   : > { %v6721_v32 = vunpack.i.h.bf16 %v6719_v30  ;;  %v6720_v33 = vunpack.i.l.bf16 %v6719_v30  ;;  %v6716_v37 = vunpack.i.h.bf16 %v6714_v31  ;;  %v6715_v39 = vunpack.i.l.bf16 %v6714_v31  ;;  %6239 = vmatpush3.bf16.msra.mxu0 %v7283_v59  ;;  %v7946_v31 = vld [vmem:[%s9470_s21 + $0x58] sm:$0xff]  }
 0x766   : > { %6240 = vmatprep.subr.bf16.mxu0 %v7284_v0  ;;  %6290 = vmatprep.subr.bf16.mxu1 %v7946_v31 }
 0x767   : > { %v2587_v45 = vsel %vm1634_vm12, %v2583_v40, %v6720_v33  ;;  %v2588_v46 = vsel %vm1634_vm12, %v2584_v41, %v6721_v32  ;;  %v2585_v43 = vsel %vm1634_vm12, %v2581_v42, %v6715_v39  ;;  %v2586_v47 = vsel %vm1634_vm12, %v2582_v44, %v6716_v37  ;;  %v7951_v32 = vld [vmem:[%s9470_s21 + $0x50] sm:$0xff]   ;;  %v7967_v33 = vld [vmem:[%s9470_s21 + $0x40] sm:$0xff]  }
 0x768   : > { %v2590_v48 = vpack.c.bf16 %v2588_v46, %v2587_v45  ;;  %v2589_v49 = vpack.c.bf16 %v2586_v47, %v2585_v43  ;;  %v7894_v52 = vpop.permute.xlu0 %6723  ;;  %v5760_v37 = vld [vmem:[%s9471_s22] ss:$0 sm:$0xff]  ;;  %v7978_v46 = vld [vmem:[%s9470_s21 + $0x38] sm:$0xff]  }
 0x769   : > { %6241 = vmatpush3.bf16.msra.mxu0 %v7284_v0 }
 0x76a   : > { %6270 = vmatprep.mubr.msk.bf16.mxu1 %vm9498_vm13, %v2589_v49  ;;  %6274 = vmatprep.subr.bf16.mxu0 %v7946_v31 }
 0x76b   : > { %6271 = vmatmul.mubr.msk.bf16.vlgmr.msra.gmra.mxu1 %vm9498_vm13, %v2590_v48 }
 0x76c   : > { %v7899_v58 = vpop.permute.xlu0 %6733  ;;  %6291 = vmatpush3.bf16.msra.mxu1 %v7946_v31 }
 0x76d   : > { %6292 = vmatprep.subr.bf16.mxu1 %v7951_v32 }
 0x770   : > { %v6744_v29 = vpop.permute.xlu0 %6743  ;;  %6293 = vmatpush3.bf16.msra.mxu1 %v7951_v32 }
 0x771   : > { %v6746_v4 = vunpack.i.h.bf16 %v6744_v29  ;;  %v6745_v8 = vunpack.i.l.bf16 %v6744_v29 }
 0x7b7   : > { %v6212_v55 = vpop.f32.mrf.mxu0 }
 0x7b8   : > { %v1903_v61 = vadd.f32 %v6212_v55, %v7812_v6  ;;  %v7989_v55 = vld [vmem:[%s9470_s21 + $0x30] sm:$0xff]  }
 0x7b9   : > { %v1894_v56 = vpop.f32.mrf.mxu0 }
 0x7ba   : > { %v1895_v60 = vadd.f32 %v7812_v6, %v1894_v56  ;;  %v1915_v34 = vmul.f32 0.2, %v1903_v61  ;;  %vm1911_vm9 = vcmp.gt.f32.partialorder %v1903_v61, 0.0 }
 0x7bb   : > { %v6213_v62 = vpop.f32.mrf.mxu0 }
 0x7bc   : > { %v1906_v53 = vadd.f32 %v6213_v62, %v7812_v6  ;;  %v1913_v1 = vmul.f32 0.2, %v1895_v60  ;;  %vm1909_vm8 = vcmp.gt.f32.partialorder %v1895_v60, 0.0  ;;  %v7911_v10 = vsel %vm1911_vm9, %v1903_v61, %v1915_v34 }
 0x7bd   : > { %v1897_v63 = vpop.f32.mrf.mxu0  ;;  %v2108_v15 = vrot.slane %v7911_v10, 4 }
 0x7be   : > { %v1898_v2 = vadd.f32 %v7812_v6, %v1897_v63  ;;  %v1916_v38 = vmul.f32 0.2, %v1906_v53  ;;  %vm1912_vm14 = vcmp.gt.f32.partialorder %v1906_v53, 0.0  ;;  %v1917_v5 = vsel %vm1909_vm8, %v1895_v60, %v1913_v1 }
 0x7bf   : > { %v7921_v14 = vsel %vm1634_vm12, %v1917_v5, %v6745_v8  ;;  %v2105_v16 = vrot.slane %v1917_v5, 4  ;;  %v6725_v60 = vunpack.i.l.bf16 %v7894_v52 }
 0x7c0   : > { %vm1910_vm10 = vcmp.gt.f32.partialorder %v1898_v2, 0.0  ;;  %v1914_v3 = vmul.f32 0.2, %v1898_v2  ;;  %v7913_v12 = vsel %vm1912_vm14, %v1906_v53, %v1916_v38  ;;  %v6726_v38 = vunpack.i.h.bf16 %v7894_v52 }
 0x7c1   : > { %v6737_v19 = vpack.i.bf16 %v7913_v12, %v7911_v10  ;;  %v2110_v27 = vrot.slane %v7913_v12, 4 }
 0x7c2   : > { %v1918_v7 = vsel %vm1910_vm10, %v1898_v2, %v1914_v3 }
 0x7c3   : > { %v6727_v11 = vpack.i.bf16 %v1918_v7, %v1917_v5  ;;  %v2106_v6 = vrot.slane %v1918_v7, 4  ;;  %v7916_v13 = vsel %vm1634_vm12, %v1918_v7, %v6746_v4  ;;  %v2111_v28 = vsel %vm1569_vm11, %v2108_v15, %v2110_v27 }
 0x7c4   : > { %v2133_v17 = vpack.c.bf16 %v7916_v13, %v7921_v14  ;;  %v2113_v9 = vsel %vm1569_vm11, %v2110_v27, 0.0  ;;  %v2032_v5 = vsel %vm1569_vm11, 0.0, %v6725_v60 }
 0x7c5   : > { %6728 = vrot.lane.b32.xlu1 %v6727_v11, %s7333_s5  ;;  %6753 = vrot.lane.b32.xlu0 %v6727_v11, %s9523_s24  ;;  %v2107_v20 = vsel %vm1569_vm11, %v2105_v16, %v2106_v6  ;;  %v2109_v21 = vsel %vm1569_vm11, %v2106_v6, %v2108_v15  ;;  %v6777_v30 = vpack.i.bf16 %v2113_v9, %v2111_v28 }
 0x7c6   : > { %v6772_v25 = vpack.i.bf16 %v2109_v21, %v2107_v20 }
 0x7c9   : > { %6738 = vrot.lane.b32.xlu1 %v6737_v19, %s7333_s5  ;;  %6763 = vrot.lane.b32.xlu0 %v6737_v19, %s9523_s24 }
 0x7cd   : > { %6748 = vrot.lane.b32.xlu1 %v6747_v22, %s9524_s1  ;;  %6773 = vrot.lane.b32.xlu0 %v6772_v25, %s9524_s1  ;;  %v6735_v25 = vunpack.i.l.bf16 %v7899_v58 }
 0x7d1   : > { %6758 = vrot.lane.b32.xlu1 %v7870_v18, %s7333_s5  ;;  %v7960_v18 = vld [vmem:[%s9470_s21 + $0x48] sm:$0xff]  }
 0x7d2   : > { %6294 = vmatprep.subr.bf16.mxu1 %v7960_v18 }
 0x7d3   : > { %6295 = vmatpush3.bf16.msra.mxu1 %v7960_v18 }
 0x7d4   : > { %6296 = vmatprep.subr.bf16.mxu1 %v7967_v33 }
 0x7d5   : > { %6768 = vrot.lane.b32.xlu1 %v6747_v22, %s7333_s5  ;;  %v6736_v22 = vunpack.i.h.bf16 %v7899_v58 }
 0x7d7   : > { %6297 = vmatpush3.bf16.msra.mxu1 %v7967_v33 }
 0x7d8   : > { %6298 = vmatprep.subr.bf16.mxu1 %v7978_v46 }
 0x7d9   : > { %6778 = vrot.lane.b32.xlu1 %v6777_v30, %s9524_s1 }
 0x7db   : > { %6299 = vmatpush3.bf16.msra.mxu1 %v7978_v46 }
 0x7dc   : > { %6300 = vmatprep.subr.bf16.mxu1 %v7989_v55 }
 0x7df   : > { %6301 = vmatpush3.bf16.msra.mxu1 %v7989_v55 }
 0x82b   : > { %v6272_v39 = vpop.f32.mrf.mxu1 }
 0x82c   : > { %v2682_v40 = vadd.f32 %v6272_v39, %v5760_v37 }
 0x82d   : > { %v2673_v41 = vpop.f32.mrf.mxu1 }
 0x82e   : > { %v2694_v42 = vmul.f32 0.2, %v2682_v40  ;;  %v2674_v44 = vadd.f32 %v5760_v37, %v2673_v41  ;;  %vm2690_vm15 = vcmp.gt.f32.partialorder %v2682_v40, 0.0 }
 0x82f   : > { %v6273_v45 = vpop.f32.mrf.mxu1 }
 0x830   : > { %vm2688_vm1 = vcmp.gt.f32.partialorder %v2674_v44, 0.0  ;;  %v2692_v43 = vmul.f32 0.2, %v2674_v44  ;;  %v2685_v47 = vadd.f32 %v6273_v45, %v5760_v37  ;;  %v7981_v49 = vsel %vm2690_vm15, %v2682_v40, %v2694_v42 }
 0x831   : > { %v2676_v48 = vpop.f32.mrf.mxu1  ;;  %v2722_v61 = vrot.slane %v7981_v49, 4 }
 0x832   : > { %vm2691_vm2 = vcmp.gt.f32.partialorder %v2685_v47, 0.0  ;;  %v2695_v50 = vmul.f32 0.2, %v2685_v47  ;;  %v2677_v51 = vadd.f32 %v5760_v37, %v2676_v48  ;;  %v7984_v54 = vsel %vm2688_vm1, %v2674_v44, %v2692_v43 }
 0x833   : > { %v2719_v63 = vrot.slane %v7984_v54, 4 }
 0x834   : > { %v7991_v56 = vsel %vm2691_vm2, %v2685_v47, %v2695_v50  ;;  %vm2689_vm3 = vcmp.gt.f32.partialorder %v2677_v51, 0.0  ;;  %v2693_v59 = vmul.f32 0.2, %v2677_v51 }
 0x835   : > { %v2724_v62 = vrot.slane %v7991_v56, 4  ;;  %v6807_v58 = vpack.i.bf16 %v7991_v56, %v7981_v49 }
 0x836   : > { %v7997_v53 = vsel %vm2689_vm3, %v2677_v51, %v2693_v59 }
 0x837   : > { %v2720_v0 = vrot.slane %v7997_v53, 4  ;;  %v6729_v1 = vpop.permute.xlu1 %6728  ;;  %v6782_v2 = vpack.i.bf16 %v7997_v53, %v7984_v54  ;;  %v2725_v29 = vsel %vm1569_vm11, %v2722_v61, %v2724_v62  ;;  %v2871_v34 = vsel %vm1569_vm11, %v2724_v62, 0.0  ;;  %v6754_v20 = vpop.permute.xlu0 %6753 }
 0x838   : > { %v6731_v3 = vunpack.i.h.bf16 %v6729_v1  ;;  %v6730_v4 = vunpack.i.l.bf16 %v6729_v1  ;;  %v6787_v7 = vpack.i.bf16 %v2871_v34, %v2725_v29  ;;  %v6756_v51 = vunpack.i.h.bf16 %v6754_v20 }
 0x839   : > { %6783 = vrot.lane.b32.xlu1 %v6782_v2, %s7333_s5  ;;  %v2721_v8 = vsel %vm1569_vm11, %v2719_v63, %v2720_v0  ;;  %v2723_v16 = vsel %vm1569_vm11, %v2720_v0, %v2722_v61  ;;  %v6755_v59 = vunpack.i.l.bf16 %v6754_v20 }
 0x83a   : > { %v2049_v11 = vsel %vm918_vm4, %v2032_v5, %v6730_v4  ;;  %v2050_v6 = vsel %vm918_vm4, %v6726_v38, %v6731_v3  ;;  %v6797_v15 = vpack.i.bf16 %v2721_v8, %v2719_v63  ;;  %6788 = vrot.lane.b32.xlu0 %v6787_v7, %s9524_s1  ;;  %v6792_v9 = vpack.i.bf16 %v2723_v16, %v2721_v8 }
 0x83b   : > { %v2053_v19 = vsel %vm1634_vm12, %v2049_v11, %v6730_v4  ;;  %v2054_v52 = vsel %vm1634_vm12, %v2050_v6, %v6731_v3  ;;  %v6739_v21 = vpop.permute.xlu1 %6738  ;;  %v6764_v45 = vpop.permute.xlu0 %6763  ;;  %v6802_v48 = vpack.i.bf16 %v2725_v29, %v2723_v16 }
 0x83c   : > { %v6741_v27 = vunpack.i.h.bf16 %v6739_v21  ;;  %v6740_v28 = vunpack.i.l.bf16 %v6739_v21  ;;  %v2131_v30 = vpack.c.bf16 %v2054_v52, %v2053_v19  ;;  %v6766_v14 = vunpack.i.h.bf16 %v6764_v45 }
 0x83d   : > { %6798 = vrot.lane.b32.xlu1 %v6797_v15, %s9523_s24 }
 0x83e   : > { %v2051_v37 = vsel %vm918_vm4, %v6735_v25, %v6740_v28  ;;  %v2052_v39 = vsel %vm918_vm4, %v6736_v22, %v6741_v27  ;;  %6793 = vrot.lane.b32.xlu0 %v6792_v9, %s9524_s1  ;;  %6242 = vmatprep.mubr.msk.bf16.mxu0 %vm9498_vm13, %v2131_v30 }
 0x83f   : > { %v2055_v40 = vsel %vm1634_vm12, %v2051_v37, %v6740_v28  ;;  %v2056_v41 = vsel %vm1634_vm12, %v2052_v39, %v6741_v27  ;;  %v6749_v42 = vpop.permute.xlu1 %6748  ;;  %v6774_v1 = vpop.permute.xlu0 %6773 }
 0x840   : > { %v2132_v44 = vpack.c.bf16 %v2056_v41, %v2055_v40  ;;  %v6751_v43 = vunpack.i.h.bf16 %v6749_v42  ;;  %v6750_v47 = vunpack.i.l.bf16 %v6749_v42  ;;  %v6775_v4 = vunpack.i.l.bf16 %v6774_v1 }
 0x841   : > { %6808 = vrot.lane.b32.xlu1 %v6807_v58, %s7333_s5 }
 0x842   : > { %6243 = vmatmul.mubr.msk.bf16.vlgmr.msra.gmra.mxu0 %vm9498_vm13, %v2132_v44  ;;  %6803 = vrot.lane.b32.xlu0 %v6802_v48, %s9523_s24  ;;  %v2072_v62 = vsel %vm1634_vm12, %v7913_v12, %v6751_v43  ;;  %v2071_v63 = vsel %vm1634_vm12, %v7911_v10, %v6750_v47  ;;  %v6776_v10 = vunpack.i.h.bf16 %v6774_v1  ;;  %v2127_v6 = vsel %vm1634_vm12, %v7824_v23, %v6775_v4 }
 0x843   : > { %v6759_v50 = vpop.permute.xlu1 %6758  ;;  %6246 = vmatprep.mubr.msk.bf16.mxu0 %vm9498_vm13, %v2133_v17  ;;  %6275 = vmatpush3.bf16.msra.mxu0 %v7946_v31  ;;  %v6765_v17 = vunpack.i.l.bf16 %v6764_v45  ;;  %v2134_v12 = vpack.c.bf16 %v2072_v62, %v2071_v63 }
 0x844   : > { %v6761_v60 = vunpack.i.h.bf16 %v6759_v50  ;;  %v6760_v61 = vunpack.i.l.bf16 %v6759_v50  ;;  %6276 = vmatprep.subr.bf16.mxu0 %v7951_v32 }
 0x846   : > { %v2097_v0 = vsel %vm918_vm4, %v6755_v59, %v6760_v61  ;;  %v2098_v13 = vsel %vm918_vm4, %v6756_v51, %v6761_v60 }
 0x847   : > { %v2101_v2 = vsel %vm1634_vm12, %v2097_v0, %v6760_v61  ;;  %v2102_v29 = vsel %vm1634_vm12, %v2098_v13, %v6761_v60  ;;  %v6769_v31 = vpop.permute.xlu1 %6768  ;;  %6277 = vmatpush3.bf16.msra.mxu0 %v7951_v32  ;;  %v2128_v32 = vsel %vm1634_vm12, %v7826_v24, %v6776_v10  ;;  %v5740_v13 = vld [vmem:[#allocation4] ss:$0 sm:$0xff] }
 0x848   : > { %v6771_v34 = vunpack.i.h.bf16 %v6769_v31  ;;  %v6770_v38 = vunpack.i.l.bf16 %v6769_v31  ;;  %v2135_v3 = vpack.c.bf16 %v2102_v29, %v2101_v2  ;;  %6278 = vmatprep.subr.bf16.mxu0 %v7960_v18  ;;  %v2137_v20 = vpack.c.bf16 %v2128_v32, %v2127_v6 }
 0x84a   : > { %v2099_v5 = vsel %vm918_vm4, %v6765_v17, %v6770_v38  ;;  %v2100_v7 = vsel %vm918_vm4, %v6766_v14, %v6771_v34  ;;  %6247 = vmatmul.mubr.msk.bf16.gmra.mxu0 %vm9498_vm13, %v2134_v12 }
 0x84b   : > { %6250 = vmatprep.mubr.msk.bf16.mxu0 %vm9498_vm13, %v2135_v3  ;;  %6279 = vmatpush3.bf16.msra.mxu0 %v7960_v18  ;;  %v2103_v8 = vsel %vm1634_vm12, %v2099_v5, %v6770_v38  ;;  %v2104_v11 = vsel %vm1634_vm12, %v2100_v7, %v6771_v34  ;;  %v6779_v15 = vpop.permute.xlu1 %6778 }
 0x84c   : > { %6280 = vmatprep.subr.bf16.mxu0 %v7967_v33  ;;  %v2136_v16 = vpack.c.bf16 %v2104_v11, %v2103_v8  ;;  %v6781_v19 = vunpack.i.h.bf16 %v6779_v15  ;;  %v6780_v52 = vunpack.i.l.bf16 %v6779_v15 }
 0x84e   : > { %v2130_v24 = vsel %vm1634_vm12, %v7834_v36, %v6781_v19  ;;  %v2129_v23 = vsel %vm1634_vm12, %v7832_v35, %v6780_v52 }
 0x84f   : > { %6281 = vmatpush3.bf16.msra.mxu0 %v7967_v33  ;;  %v2138_v18 = vpack.c.bf16 %v2130_v24, %v2129_v23 }
 0x850   : > { %6282 = vmatprep.subr.bf16.mxu0 %v7978_v46 }
 0x852   : > { %6251 = vmatmul.mubr.msk.bf16.gmra.mxu0 %vm9498_vm13, %v2136_v16 }
 0x853   : > { %6254 = vmatprep.mubr.msk.bf16.mxu0 %vm9498_vm13, %v2137_v20  ;;  %6283 = vmatpush3.bf16.msra.mxu0 %v7978_v46 }
 0x854   : > { %6284 = vmatprep.subr.bf16.mxu0 %v7989_v55 }
 0x857   : > { %6285 = vmatpush3.bf16.msra.mxu0 %v7989_v55 }
 0x85a   : > { %6255 = vmatmul.mubr.msk.bf16.gmra.mxu0 %vm9498_vm13, %v2138_v18 }
 0x8ab   : > { %v6784_v33 = vpop.permute.xlu1 %6783 }
 0x8ac   : > { %v6789_v21 = vpop.permute.xlu0 %6788  ;;  %v6786_v28 = vunpack.i.h.bf16 %v6784_v33  ;;  %v6785_v30 = vunpack.i.l.bf16 %v6784_v33 }
 0x8ad   : > { %v6791_v22 = vunpack.i.h.bf16 %v6789_v21  ;;  %v6790_v25 = vunpack.i.l.bf16 %v6789_v21 }
 0x8af   : > { %v6799_v27 = vpop.permute.xlu1 %6798  ;;  %v2888_v55 = vsel %vm1634_vm12, %v7991_v56, %v6791_v22  ;;  %v2887_v41 = vsel %vm1634_vm12, %v7981_v49, %v6790_v25  ;;  %v8124_v25 = vld [vmem:[%s9470_s21 + $0x88] sm:$0xff]  }
 0x8b0   : > { %v6801_v46 = vunpack.i.h.bf16 %v6799_v27  ;;  %v6800_v9 = vunpack.i.l.bf16 %v6799_v27  ;;  %v6794_v36 = vpop.permute.xlu0 %6793  ;;  %v2890_v59 = vpack.c.bf16 %v2888_v55, %v2887_v41  ;;  %v8129_v27 = vld [vmem:[%s9470_s21 + $0x80] sm:$0xff]   ;;  %6306 = vmatprep.subr.bf16.mxu0 %v8124_v25  ;;  %6322 = vmatprep.subr.bf16.mxu1 %v8124_v25  ;;  %v8156_v55 = vld [vmem:[%s9470_s21 + $0x70] sm:$0xff]  }
 0x8b1   : > { %v6796_v39 = vunpack.i.h.bf16 %v6794_v36  ;;  %v6795_v40 = vunpack.i.l.bf16 %v6794_v36 }
 0x8b2   : > { %v2738_v37 = vsel %vm1569_vm11, 0.0, %v6800_v9  ;;  %v2752_v35 = vsel %vm918_vm4, %v6801_v46, %v6786_v28  ;;  %v5782_v46 = vld [vmem:[%s9471_s22 + $0x1] ss:$0 sm:$0xff] }
 0x8b3   : > { %v2751_v42 = vsel %vm918_vm4, %v2738_v37, %v6785_v30  ;;  %v6809_v58 = vpop.permute.xlu1 %6808  ;;  %v2756_v44 = vsel %vm1634_vm12, %v2752_v35, %v6786_v28  ;;  %v2886_v45 = vsel %vm1634_vm12, %v7997_v53, %v6796_v39  ;;  %v2885_v43 = vsel %vm1634_vm12, %v7984_v54, %v6795_v40  ;;  %v8140_v28 = vld [vmem:[%s9470_s21 + $0x78] sm:$0xff]  }
 0x8b4   : > { %v6811_v47 = vunpack.i.h.bf16 %v6809_v58  ;;  %v6810_v48 = vunpack.i.l.bf16 %v6809_v58  ;;  %v6804_v50 = vpop.permute.xlu0 %6803  ;;  %v2889_v51 = vpack.c.bf16 %v2886_v45, %v2885_v43  ;;  %v2755_v56 = vsel %vm1634_vm12, %v2751_v42, %v6785_v30 }
 0x8b5   : > { %v6806_v60 = vunpack.i.h.bf16 %v6804_v50  ;;  %v6805_v49 = vunpack.i.l.bf16 %v6804_v50  ;;  %v2759_v61 = vpack.c.bf16 %v2756_v44, %v2755_v56  ;;  %v8167_v56 = vld [vmem:[%s9470_s21 + $0x68] sm:$0xff]  }
 0x8b6   : > { %6302 = vmatprep.mubr.msk.bf16.mxu1 %vm9498_vm13, %v2889_v51 }
 0x8b7   : > { %v2754_v62 = vsel %vm918_vm4, %v6806_v60, %v6811_v47  ;;  %v2753_v63 = vsel %vm918_vm4, %v6805_v49, %v6810_v48  ;;  %6286 = vmatprep.mubr.msk.bf16.mxu0 %vm9498_vm13, %v2759_v61  ;;  %6303 = vmatmul.mubr.msk.bf16.vlgmr.msra.gmra.mxu1 %vm9498_vm13, %v2890_v59 }
 0x8b8   : > { %v2758_v54 = vsel %vm1634_vm12, %v2754_v62, %v6811_v47  ;;  %v2757_v53 = vsel %vm1634_vm12, %v2753_v63, %v6810_v48  ;;  %6323 = vmatpush3.bf16.msra.mxu1 %v8124_v25 }
 0x8b9   : > { %v2760_v0 = vpack.c.bf16 %v2758_v54, %v2757_v53  ;;  %6324 = vmatprep.subr.bf16.mxu1 %v8129_v27 }
 0x8bb   : > { %6287 = vmatmul.mubr.msk.bf16.vlgmr.msra.gmra.mxu0 %vm9498_vm13, %v2760_v0 }
 0x8bc   : > { %6307 = vmatpush3.bf16.msra.mxu0 %v8124_v25  ;;  %6325 = vmatpush3.bf16.msra.mxu1 %v8129_v27 }
 0x8bd   : > { %6308 = vmatprep.subr.bf16.mxu0 %v8129_v27  ;;  %6326 = vmatprep.subr.bf16.mxu1 %v8140_v28 }
 0x8c0   : > { %6309 = vmatpush3.bf16.msra.mxu0 %v8129_v27  ;;  %6327 = vmatpush3.bf16.msra.mxu1 %v8140_v28 }
 0x8c1   : > { %6310 = vmatprep.subr.bf16.mxu0 %v8140_v28  ;;  %6328 = vmatprep.subr.bf16.mxu1 %v8156_v55 }
 0x8c4   : > { %6311 = vmatpush3.bf16.msra.mxu0 %v8140_v28  ;;  %6329 = vmatpush3.bf16.msra.mxu1 %v8156_v55 }
 0x8c5   : > { %6312 = vmatprep.subr.bf16.mxu0 %v8156_v55  ;;  %6330 = vmatprep.subr.bf16.mxu1 %v8167_v56 }
 0x8c8   : > { %6313 = vmatpush3.bf16.msra.mxu0 %v8156_v55  ;;  %6331 = vmatpush3.bf16.msra.mxu1 %v8167_v56 }
 0x8c9   : > { %6314 = vmatprep.subr.bf16.mxu0 %v8167_v56 }
 0x8cc   : > { %6315 = vmatpush3.bf16.msra.mxu0 %v8167_v56 }
 0x902   : > { %v6244_v14 = vpop.f32.mrf.mxu0 }
 0x903   : > { %v8091_v17 = vadd.f32 %v6244_v14, %v5740_v13 }
 0x904   : > { %v2252_v1 = vpop.f32.mrf.mxu0 }
 0x905   : > { %9525 = vst [vmem:[#allocation6_spill] sm:$0xff] %v8091_v17  ;;  %v8093_v2 = vadd.f32 %v5740_v13, %v2252_v1 }
 0x906   : > { %v6245_v29 = vpop.f32.mrf.mxu0 }
 0x907   : > { %9526 = vst [vmem:[#allocation7_spill] sm:$0xff] %v8093_v2  ;;  %v8095_v31 = vadd.f32 %v6245_v29, %v5740_v13  ;;  %v8186_v29 = vld [vmem:[%s9470_s21 + $0x60] sm:$0xff]  }
 0x908   : > { %v2255_v34 = vpop.f32.mrf.mxu0  ;;  %6316 = vmatprep.subr.bf16.mxu0 %v8186_v29  ;;  %6332 = vmatprep.subr.bf16.mxu1 %v8186_v29 }
 0x909   : > { %9527 = vst [vmem:[#allocation8_spill] sm:$0xff] %v8095_v31  ;;  %v8097_v38 = vadd.f32 %v5740_v13, %v2255_v34  ;;  %6317 = vmatpush3.bf16.msra.mxu0 %v8186_v29  ;;  %6333 = vmatpush3.bf16.msra.mxu1 %v8186_v29 }
 0x90a   : > { %v6248_v12 = vpop.f32.mrf.mxu0  ;;  %6338 = vmatprep.subr.bf16.mxu0 %v8124_v25  ;;  %6354 = vmatprep.subr.bf16.mxu1 %v8124_v25 }
 0x90b   : > { %9528 = vst [vmem:[#allocation9_spill] sm:$0xff] %v8097_v38  ;;  %v8099_v3 = vadd.f32 %v6248_v12, %v5740_v13 }
 0x90c   : > { %v8101_v10 = vpop.f32.mrf.mxu0 }
 0x90d   : > { %9529 = vst [vmem:[#allocation10_spill] sm:$0xff] %v8099_v3 }
 0x90e   : > { %v6249_v4 = vpop.f32.mrf.mxu0 }
 0x90f   : > { %v8103_v5 = vadd.f32 %v6249_v4, %v5740_v13 }
 0x910   : > { %v2271_v7 = vpop.f32.mrf.mxu0 }
 0x911   : > { %9530 = vst [vmem:[#allocation11_spill] sm:$0xff] %v8103_v5  ;;  %v8105_v8 = vadd.f32 %v5740_v13, %v2271_v7 }
 0x912   : > { %v6252_v11 = vpop.f32.mrf.mxu0 }
 0x913   : > { %9531 = vst [vmem:[#allocation12_spill] sm:$0xff] %v8105_v8  ;;  %v8107_v32 = vadd.f32 %v6252_v11, %v5740_v13 }
 0x914   : > { %v2284_v6 = vpop.f32.mrf.mxu0 }
 0x915   : > { %9532 = vst [vmem:[#allocation13_spill] sm:$0xff] %v8107_v32  ;;  %v8109_v15 = vadd.f32 %v5740_v13, %v2284_v6 }
 0x916   : > { %v6253_v16 = vpop.f32.mrf.mxu0 }
 0x917   : > { %v8111_v19 = vadd.f32 %v6253_v16, %v5740_v13 }
 0x918   : > { %v2287_v52 = vpop.f32.mrf.mxu0 }
 0x919   : > { %9533 = vst [vmem:[#allocation14_spill] sm:$0xff] %v8111_v19  ;;  %v8113_v20 = vadd.f32 %v5740_v13, %v2287_v52 }
 0x91a   : > { %v6256_v24 = vpop.f32.mrf.mxu0 }
 0x91b   : > { %9534 = vst [vmem:[#allocation15_spill] sm:$0xff] %v8113_v20  ;;  %v8115_v23 = vadd.f32 %v6256_v24, %v5740_v13 }
 0x91c   : > { %v2300_v18 = vpop.f32.mrf.mxu0 }
 0x91d   : > { %9535 = vst [vmem:[#allocation16_spill] sm:$0xff] %v8115_v23  ;;  %v8117_v33 = vadd.f32 %v5740_v13, %v2300_v18 }
 0x91e   : > { %v6257_v21 = vpop.f32.mrf.mxu0 }
 0x91f   : > { %v8119_v22 = vadd.f32 %v6257_v21, %v5740_v13 }
 0x920   : > { %v8151_v30 = vpop.f32.mrf.mxu0 }
 0x921   : > { %9536 = vst [vmem:[#allocation17_spill] sm:$0xff] %v8119_v22  ;;  %9537 = vst [vmem:[#allocation18_spill] sm:$0xff] %v8151_v30 }
 0x977   : > { %v6304_v9 = vpop.f32.mrf.mxu1 }
 0x978   : > { %v2940_v37 = vadd.f32 %v6304_v9, %v5782_v46 }
 0x979   : > { %v2931_v36 = vpop.f32.mrf.mxu1 }
 0x97a   : > { %v2932_v35 = vadd.f32 %v5782_v46, %v2931_v36  ;;  %v2952_v45 = vmul.f32 0.2, %v2940_v37  ;;  %vm2948_vm6 = vcmp.gt.f32.partialorder %v2940_v37, 0.0 }
 0x97b   : > { %v6288_v39 = vpop.f32.mrf.mxu0  ;;  %v6305_v40 = vpop.f32.mrf.mxu1 }
 0x97c   : > { %v2950_v41 = vmul.f32 0.2, %v2932_v35  ;;  %vm2946_vm5 = vcmp.gt.f32.partialorder %v2932_v35, 0.0  ;;  %v2943_v42 = vadd.f32 %v6305_v40, %v5782_v46  ;;  %v8169_v61 = vsel %vm2948_vm6, %v2940_v37, %v2952_v45 }
 0x97d   : > { %v2843_v58 = vpop.f32.mrf.mxu0  ;;  %v2934_v44 = vpop.f32.mrf.mxu1  ;;  %v2852_v62 = vadd.f32 %v6288_v39, %v5782_v46  ;;  %v2980_v4 = vrot.slane %v8169_v61, 4 }
 0x97e   : > { %v2844_v43 = vadd.f32 %v5782_v46, %v2843_v58  ;;  %v2935_v47 = vadd.f32 %v5782_v46, %v2934_v44  ;;  %v8162_v50 = vsel %vm2946_vm5, %v2932_v35, %v2950_v41  ;;  %v2953_v51 = vmul.f32 0.2, %v2943_v42 }
 0x97f   : > { %v6289_v48 = vpop.f32.mrf.mxu0  ;;  %vm2949_vm7 = vcmp.gt.f32.partialorder %v2943_v42, 0.0  ;;  %v2977_v0 = vrot.slane %v8162_v50, 4  ;;  %v2864_v7 = vmul.f32 0.2, %v2852_v62  ;;  %vm2860_vm15 = vcmp.gt.f32.partialorder %v2852_v62, 0.0 }
 0x980   : > { %vm2947_vm8 = vcmp.gt.f32.partialorder %v2935_v47, 0.0  ;;  %v2951_v59 = vmul.f32 0.2, %v2935_v47  ;;  %v2855_v60 = vadd.f32 %v6289_v48, %v5782_v46  ;;  %v2862_v63 = vmul.f32 0.2, %v2844_v43 }
 0x981   : > { %v2846_v49 = vpop.f32.mrf.mxu0  ;;  %v8178_v13 = vsel %vm2949_vm7, %v2943_v42, %v2953_v51  ;;  %vm2858_vm9 = vcmp.gt.f32.partialorder %v2844_v43, 0.0  ;;  %v2868_v9 = vsel %vm2860_vm15, %v2852_v62, %v2864_v7 }
 0x982   : > { %v8173_v54 = vsel %vm2947_vm8, %v2935_v47, %v2951_v59  ;;  %v2847_v53 = vadd.f32 %v5782_v46, %v2846_v49  ;;  %v2865_v34 = vmul.f32 0.2, %v2855_v60  ;;  %vm2861_vm14 = vcmp.gt.f32.partialorder %v2855_v60, 0.0 }
 0x983   : > { %v2978_v14 = vrot.slane %v8173_v54, 4  ;;  %v6812_v1 = vpack.i.bf16 %v8173_v54, %v8162_v50  ;;  %v2982_v6 = vrot.slane %v8178_v13, 4  ;;  %v2866_v16 = vsel %vm2858_vm9, %v2844_v43, %v2862_v63 }
 0x984   : > { %vm2859_vm10 = vcmp.gt.f32.partialorder %v2847_v53, 0.0  ;;  %v2863_v12 = vmul.f32 0.2, %v2847_v53  ;;  %v8196_v21 = vsel %vm2861_vm14, %v2855_v60, %v2865_v34  ;;  %v6837_v39 = vpack.i.bf16 %v8178_v13, %v8169_v61 }
 0x985   : > { %6813 = vrot.lane.b32.xlu0 %v6812_v1, %s9524_s1  ;;  %v2979_v11 = vsel %vm1569_vm11, %v2977_v0, %v2978_v14  ;;  %v2981_v46 = vsel %vm1569_vm11, %v2978_v14, %v2980_v4  ;;  %v2983_v36 = vsel %vm1569_vm11, %v2980_v4, %v2982_v6  ;;  %v6827_v37 = vpack.i.bf16 %v8196_v21, %v2868_v9 }
 0x986   : > { %v2867_v52 = vsel %vm2859_vm10, %v2847_v53, %v2863_v12  ;;  %v6822_v24 = vpack.i.bf16 %v2979_v11, %v2977_v0  ;;  %v6832_v35 = vpack.i.bf16 %v2983_v36, %v2981_v46  ;;  %v3321_v41 = vrot.slane %v2868_v9, 4 }
 0x987   : > { %v6817_v18 = vpack.i.bf16 %v2867_v52, %v2866_v16  ;;  %v3319_v40 = vrot.slane %v2867_v52, 4  ;;  %v3318_v42 = vrot.slane %v2866_v16, 4  ;;  %v3323_v45 = vrot.slane %v8196_v21, 4 }
 0x989   : > { %6823 = vrot.lane.b32.xlu0 %v6822_v24, %s9523_s24  ;;  %6818 = vrot.lane.b32.xlu1 %v6817_v18, %s7333_s5  ;;  %v3320_v58 = vsel %vm1569_vm11, %v3318_v42, %v3319_v40  ;;  %v3322_v44 = vsel %vm1569_vm11, %v3319_v40, %v3321_v41  ;;  %v3324_v47 = vsel %vm1569_vm11, %v3321_v41, %v3323_v45  ;;  %v3326_v48 = vsel %vm1569_vm11, %v3323_v45, 0.0 }
 0x98a   : > { %v6862_v43 = vpack.i.bf16 %v3322_v44, %v3320_v58  ;;  %v6867_v51 = vpack.i.bf16 %v3326_v48, %v3324_v47 }
 0x98d   : > { %6828 = vrot.lane.b32.xlu0 %v6827_v37, %s7333_s5  ;;  %6833 = vrot.lane.b32.xlu1 %v6832_v35, %s9523_s24 }
 0x991   : > { %6843 = vrot.lane.b32.xlu0 %v6817_v18, %s9523_s24  ;;  %6838 = vrot.lane.b32.xlu1 %v6837_v39, %s9524_s1 }
 0x995   : > { %6853 = vrot.lane.b32.xlu0 %v6827_v37, %s9523_s24  ;;  %6848 = vrot.lane.b32.xlu1 %v6812_v1, %s7333_s5 }
 0x999   : > { %6858 = vrot.lane.b32.xlu1 %v6837_v39, %s7333_s5  ;;  %6863 = vrot.lane.b32.xlu0 %v6862_v43, %s9524_s1 }
 0x99d   : > { %6868 = vrot.lane.b32.xlu1 %v6867_v51, %s9524_s1 }
 0x9f7   : > { %v6814_v59 = vpop.permute.xlu0 %6813 }
 0x9f8   : > { %v6816_v60 = vunpack.i.h.bf16 %v6814_v59  ;;  %v6815_v49 = vunpack.i.l.bf16 %v6814_v59 }
 0x9fa   : > { %v3144_v62 = vsel %vm1634_vm12, %v2866_v16, %v6815_v49  ;;  %v3145_v63 = vsel %vm1634_vm12, %v2867_v52, %v6816_v60 }
 0x9fb   : > { %v6824_v53 = vpop.permute.xlu0 %6823  ;;  %v6819_v0 = vpop.permute.xlu1 %6818  ;;  %v3148_v14 = vpack.c.bf16 %v3145_v63, %v3144_v62 }
 0x9fc   : > { %v6826_v1 = vunpack.i.h.bf16 %v6824_v53  ;;  %v6825_v34 = vunpack.i.l.bf16 %v6824_v53  ;;  %v6821_v12 = vunpack.i.h.bf16 %v6819_v0  ;;  %v6820_v4 = vunpack.i.l.bf16 %v6819_v0 }
 0x9fd   : > { %6334 = vmatprep.mubr.msk.bf16.mxu1 %vm9498_vm13, %v3148_v14 }
 0x9fe   : > { %v2996_v7 = vsel %vm1569_vm11, 0.0, %v6825_v34  ;;  %v3014_v11 = vsel %vm918_vm4, %v6826_v1, %v6821_v12 }
 0x9ff   : > { %v3018_v6 = vsel %vm1634_vm12, %v3014_v11, %v6821_v12  ;;  %v3013_v24 = vsel %vm918_vm4, %v2996_v7, %v6820_v4  ;;  %v6829_v16 = vpop.permute.xlu0 %6828  ;;  %v6834_v18 = vpop.permute.xlu1 %6833 }
 0xa00   : > { %v3017_v52 = vsel %vm1634_vm12, %v3013_v24, %v6820_v4  ;;  %v6831_v46 = vunpack.i.h.bf16 %v6829_v16  ;;  %v6830_v36 = vunpack.i.l.bf16 %v6829_v16  ;;  %v6836_v37 = vunpack.i.h.bf16 %v6834_v18 }
 0xa01   : > { %v6835_v35 = vunpack.i.l.bf16 %v6834_v18  ;;  %v3021_v39 = vpack.c.bf16 %v3018_v6, %v3017_v52 }
 0xa02   : > { %v3016_v40 = vsel %vm918_vm4, %v6836_v37, %v6831_v46 }
 0xa03   : > { %v3020_v41 = vsel %vm1634_vm12, %v3016_v40, %v6831_v46  ;;  %v3015_v42 = vsel %vm918_vm4, %v6835_v35, %v6830_v36  ;;  %v6844_v58 = vpop.permute.xlu0 %6843  ;;  %v6839_v44 = vpop.permute.xlu1 %6838  ;;  %6318 = vmatprep.mubr.msk.bf16.mxu0 %vm9498_vm13, %v3021_v39 }
 0xa04   : > { %v3019_v45 = vsel %vm1634_vm12, %v3015_v42, %v6830_v36  ;;  %v6841_v43 = vunpack.i.h.bf16 %v6839_v44  ;;  %v6840_v48 = vunpack.i.l.bf16 %v6839_v44  ;;  %v6846_v62 = vunpack.i.h.bf16 %v6844_v58 }
 0xa05   : > { %v3022_v47 = vpack.c.bf16 %v3020_v41, %v3019_v45  ;;  %v6845_v0 = vunpack.i.l.bf16 %v6844_v58  ;;  %v8289_v58 = vld [vmem:[%s9470_s21 + $0xb0] sm:$0xff]   ;;  %v8329_v45 = vld [vmem:[%s9471_s22 + $0x2] ss:$0 sm:$0xff] }
 0xa06   : > { %v3147_v51 = vsel %vm1634_vm12, %v8196_v21, %v6841_v43  ;;  %v3146_v59 = vsel %vm1634_vm12, %v2868_v9, %v6840_v48 }
 0xa07   : > { %6319 = vmatmul.mubr.msk.bf16.vlgmr.msra.gmra.mxu0 %vm9498_vm13, %v3022_v47  ;;  %v6854_v60 = vpop.permute.xlu0 %6853  ;;  %v6849_v49 = vpop.permute.xlu1 %6848  ;;  %v3149_v63 = vpack.c.bf16 %v3147_v51, %v3146_v59  ;;  %v8336_v51 = vld [vmem:[%s9470_s21 + $0x90] sm:$0xff]  }
 0xa08   : > { %6339 = vmatpush3.bf16.msra.mxu0 %v8124_v25  ;;  %v6851_v53 = vunpack.i.h.bf16 %v6849_v49  ;;  %v6850_v14 = vunpack.i.l.bf16 %v6849_v49 }
 0xa09   : > { %6340 = vmatprep.subr.bf16.mxu0 %v8129_v27  ;;  %6335 = vmatmul.mubr.msk.bf16.vlgmr.msra.gmra.mxu1 %vm9498_vm13, %v3149_v63 }
 0xa0a   : > { %v3242_v1 = vsel %vm918_vm4, %v6846_v62, %v6851_v53  ;;  %v3241_v9 = vsel %vm918_vm4, %v6845_v0, %v6850_v14  ;;  %6355 = vmatpush3.bf16.msra.mxu1 %v8124_v25 }
 0xa0b   : > { %v3246_v21 = vsel %vm1634_vm12, %v3242_v1, %v6851_v53  ;;  %v6864_v34 = vpop.permute.xlu0 %6863  ;;  %v3245_v12 = vsel %vm1634_vm12, %v3241_v9, %v6850_v14  ;;  %6356 = vmatprep.subr.bf16.mxu1 %v8129_v27  ;;  %v6859_v25 = vpop.permute.xlu1 %6858 }
 0xa0c   : > { %6341 = vmatpush3.bf16.msra.mxu0 %v8129_v27  ;;  %v6866_v4 = vunpack.i.h.bf16 %v6864_v34  ;;  %v6865_v7 = vunpack.i.l.bf16 %v6864_v34  ;;  %v3249_v11 = vpack.c.bf16 %v3246_v21, %v3245_v12  ;;  %v6861_v18 = vunpack.i.h.bf16 %v6859_v25 }
 0xa0d   : > { %6342 = vmatprep.subr.bf16.mxu0 %v8140_v28  ;;  %v6860_v52 = vunpack.i.l.bf16 %v6859_v25 }
 0xa0e   : > { %v3341_v6 = vsel %vm1634_vm12, %v8173_v54, %v6866_v4  ;;  %v3340_v24 = vsel %vm1634_vm12, %v8162_v50, %v6865_v7  ;;  %6357 = vmatpush3.bf16.msra.mxu1 %v8129_v27  ;;  %6350 = vmatprep.mubr.msk.bf16.mxu0 %vm9498_vm13, %v3249_v11  ;;  %v6856_v27 = vunpack.i.h.bf16 %v6854_v60  ;;  %v6855_v50 = vunpack.i.l.bf16 %v6854_v60 }
 0xa0f   : > { %6358 = vmatprep.subr.bf16.mxu1 %v8140_v28  ;;  %v3344_v16 = vpack.c.bf16 %v3341_v6, %v3340_v24  ;;  %v6869_v54 = vpop.permute.xlu1 %6868 }
 0xa10   : > { %6343 = vmatpush3.bf16.msra.mxu0 %v8140_v28  ;;  %v3244_v46 = vsel %vm918_vm4, %v6856_v27, %v6861_v18  ;;  %v3243_v36 = vsel %vm918_vm4, %v6855_v50, %v6860_v52  ;;  %v6870_v37 = vunpack.i.l.bf16 %v6869_v54 }
 0xa11   : > { %6344 = vmatprep.subr.bf16.mxu0 %v8156_v55  ;;  %6366 = vmatprep.mubr.msk.bf16.mxu1 %vm9498_vm13, %v3344_v16  ;;  %v3248_v35 = vsel %vm1634_vm12, %v3244_v46, %v6861_v18  ;;  %v3247_v39 = vsel %vm1634_vm12, %v3243_v36, %v6860_v52 }
 0xa12   : > { %6359 = vmatpush3.bf16.msra.mxu1 %v8140_v28  ;;  %v6871_v28 = vunpack.i.h.bf16 %v6869_v54  ;;  %v3250_v40 = vpack.c.bf16 %v3248_v35, %v3247_v39  ;;  %v3342_v41 = vsel %vm1634_vm12, %v8169_v61, %v6870_v37  ;;  %v8299_v61 = vld [vmem:[%s9470_s21 + $0xa8] sm:$0xff]  }
 0xa13   : > { %6360 = vmatprep.subr.bf16.mxu1 %v8156_v55 }
 0xa14   : > { %6345 = vmatpush3.bf16.msra.mxu0 %v8156_v55 }
 0xa15   : > { %6346 = vmatprep.subr.bf16.mxu0 %v8167_v56 }
 0xa16   : > { %6361 = vmatpush3.bf16.msra.mxu1 %v8156_v55  ;;  %v3343_v55 = vsel %vm1634_vm12, %v8178_v13, %v6871_v28  ;;  %v8308_v13 = vld [vmem:[%s9470_s21 + $0xa0] sm:$0xff]  }
 0xa17   : > { %6362 = vmatprep.subr.bf16.mxu1 %v8167_v56  ;;  %v3345_v42 = vpack.c.bf16 %v3343_v55, %v3342_v41 }
 0xa18   : > { %6347 = vmatpush3.bf16.msra.mxu0 %v8167_v56 }
 0xa19   : > { %6348 = vmatprep.subr.bf16.mxu0 %v8186_v29 }
 0xa1a   : > { %6363 = vmatpush3.bf16.msra.mxu1 %v8167_v56  ;;  %v8284_v56 = vld [vmem:[%s9470_s21 + $0xb8] sm:$0xff]  }
 0xa1b   : > { %6364 = vmatprep.subr.bf16.mxu1 %v8186_v29 }
 0xa1c   : > { %6349 = vmatpush3.bf16.msra.mxu0 %v8186_v29 }
 0xa1d   : > { %6370 = vmatprep.subr.bf16.mxu0 %v8284_v56 }
 0xa1e   : > { %6365 = vmatpush3.bf16.msra.mxu1 %v8186_v29  ;;  %v8317_v29 = vld [vmem:[%s9470_s21 + $0x98] sm:$0xff]  }
 0xa1f   : > { %6351 = vmatmul.mubr.msk.bf16.vlgmr.msra.gmra.mxu0 %vm9498_vm13, %v3250_v40  ;;  %6386 = vmatprep.subr.bf16.mxu1 %v8284_v56 }
 0xa20   : > { %6371 = vmatpush3.bf16.msra.mxu0 %v8284_v56 }
 0xa21   : > { %6367 = vmatmul.mubr.msk.bf16.vlgmr.msra.gmra.mxu1 %vm9498_vm13, %v3345_v42  ;;  %6372 = vmatprep.subr.bf16.mxu0 %v8289_v58 }
 0xa22   : > { %6387 = vmatpush3.bf16.msra.mxu1 %v8284_v56 }
 0xa23   : > { %6388 = vmatprep.subr.bf16.mxu1 %v8289_v58 }
 0xa24   : > { %6373 = vmatpush3.bf16.msra.mxu0 %v8289_v58 }
 0xa25   : > { %6374 = vmatprep.subr.bf16.mxu0 %v8299_v61 }
 0xa26   : > { %6389 = vmatpush3.bf16.msra.mxu1 %v8289_v58 }
 0xa27   : > { %6390 = vmatprep.subr.bf16.mxu1 %v8299_v61 }
 0xa28   : > { %6375 = vmatpush3.bf16.msra.mxu0 %v8299_v61 }
 0xa29   : > { %6376 = vmatprep.subr.bf16.mxu0 %v8308_v13 }
 0xa2a   : > { %6391 = vmatpush3.bf16.msra.mxu1 %v8299_v61 }
 0xa2b   : > { %6392 = vmatprep.subr.bf16.mxu1 %v8308_v13 }
 0xa2c   : > { %6377 = vmatpush3.bf16.msra.mxu0 %v8308_v13 }
 0xa2d   : > { %6378 = vmatprep.subr.bf16.mxu0 %v8317_v29 }
 0xa2e   : > { %6393 = vmatpush3.bf16.msra.mxu1 %v8308_v13 }
 0xa2f   : > { %6394 = vmatprep.subr.bf16.mxu1 %v8317_v29 }
 0xa30   : > { %6379 = vmatpush3.bf16.msra.mxu0 %v8317_v29 }
 0xa31   : > { %6380 = vmatprep.subr.bf16.mxu0 %v8336_v51 }
 0xa32   : > { %6395 = vmatpush3.bf16.msra.mxu1 %v8317_v29 }
 0xa33   : > { %6396 = vmatprep.subr.bf16.mxu1 %v8336_v51 }
 0xa34   : > { %6381 = vmatpush3.bf16.msra.mxu0 %v8336_v51 }
 0xa35   : > { %6402 = vmatprep.subr.bf16.mxu0 %v8284_v56 }
 0xa36   : > { %6397 = vmatpush3.bf16.msra.mxu1 %v8336_v51 }
 0xa37   : > { %6418 = vmatprep.subr.bf16.mxu1 %v8284_v56 }
 0xac7   : > { %v6320_v59 = vpop.f32.mrf.mxu0 }
 0xac8   : > { %v3114_v28 = vadd.f32 %v6320_v59, %v8329_v45 }
 0xac9   : > { %v6336_v44 = vpop.f32.mrf.mxu1  ;;  %v3105_v14 = vpop.f32.mrf.mxu0 }
 0xaca   : > { %v3199_v43 = vadd.f32 %v6336_v44, %v8329_v45  ;;  %v3106_v18 = vadd.f32 %v8329_v45, %v3105_v14 }
 0xacb   : > { %v3190_v47 = vpop.f32.mrf.mxu1  ;;  %v6321_v11 = vpop.f32.mrf.mxu0 }
 0xacc   : > { %v3191_v48 = vadd.f32 %v8329_v45, %v3190_v47  ;;  %v3211_v49 = vmul.f32 0.2, %v3199_v43  ;;  %vm3207_vm1 = vcmp.gt.f32.partialorder %v3199_v43, 0.0  ;;  %v3117_v27 = vadd.f32 %v6321_v11, %v8329_v45 }
 0xacd   : > { %v6337_v60 = vpop.f32.mrf.mxu1  ;;  %v3108_v24 = vpop.f32.mrf.mxu0  ;;  %vm3120_vm7 = vcmp.gt.f32.partialorder %v3106_v18, 0.0  ;;  %v3124_v39 = vmul.f32 0.2, %v3106_v18 }
 0xace   : > { %v3202_v62 = vadd.f32 %v6337_v60, %v8329_v45  ;;  %v3209_v53 = vmul.f32 0.2, %v3191_v48  ;;  %vm3205_vm2 = vcmp.gt.f32.partialorder %v3191_v48, 0.0  ;;  %v8346_v9 = vsel %vm3207_vm1, %v3199_v43, %v3211_v49 }
 0xacf   : > { %v3193_v63 = vpop.f32.mrf.mxu1  ;;  %v3109_v25 = vadd.f32 %v8329_v45, %v3108_v24  ;;  %v3127_v41 = vmul.f32 0.2, %v3117_v27 }
 0xad0   : > { %v3194_v0 = vadd.f32 %v8329_v45, %v3193_v63  ;;  %vm3208_vm3 = vcmp.gt.f32.partialorder %v3202_v62, 0.0  ;;  %v3212_v1 = vmul.f32 0.2, %v3202_v62  ;;  %v8350_v12 = vsel %vm3205_vm2, %v3191_v48, %v3209_v53 }
 0xad1   : > { %v3125_v50 = vmul.f32 0.2, %v3109_v25  ;;  %vm3121_vm6 = vcmp.gt.f32.partialorder %v3109_v25, 0.0 }
 0xad2   : > { %vm3206_vm5 = vcmp.gt.f32.partialorder %v3194_v0, 0.0  ;;  %v3210_v21 = vmul.f32 0.2, %v3194_v0  ;;  %v8348_v34 = vsel %vm3208_vm3, %v3202_v62, %v3212_v1 }
 0xad3   : > { %v8356_v7 = vpack.i.bf16 %v8348_v34, %v8346_v9  ;;  %v8373_v42 = vsel %vm3121_vm6, %v3109_v25, %v3125_v50  ;;  %vm3122_vm6 = vcmp.gt.f32.partialorder %v3114_v28, 0.0 }
 0xad4   : > { %v8352_v4 = vsel %vm3206_vm5, %v3194_v0, %v3210_v21  ;;  %vm3123_vm5 = vcmp.gt.f32.partialorder %v3117_v27, 0.0 }
 0xad5   : > { %v8360_v6 = vpack.i.bf16 %v8352_v4, %v8350_v12  ;;  %6878 = vrot.lane.b32.xlu1 %v8356_v7, %s9524_s1 }
 0xad7   : > { %6873 = vrot.lane.b32.xlu0 %v8360_v6, %s9524_s1 }
 0xadf   : > { %v6352_v16 = vpop.f32.mrf.mxu0 }
 0xae0   : > { %v3300_v52 = vadd.f32 %v6352_v16, %v8329_v45 }
 0xae1   : > { %v3291_v54 = vpop.f32.mrf.mxu0  ;;  %v6368_v36 = vpop.f32.mrf.mxu1 }
 0xae2   : > { %v3292_v46 = vadd.f32 %v8329_v45, %v3291_v54  ;;  %v3312_v37 = vmul.f32 0.2, %v3300_v52  ;;  %vm3308_vm8 = vcmp.gt.f32.partialorder %v3300_v52, 0.0  ;;  %v3395_v44 = vadd.f32 %v6368_v36, %v8329_v45 }
 0xae3   : > { %v6353_v35 = vpop.f32.mrf.mxu0  ;;  %v3386_v55 = vpop.f32.mrf.mxu1 }
 0xae4   : > { %v3303_v40 = vadd.f32 %v6353_v35, %v8329_v45  ;;  %v3387_v43 = vadd.f32 %v8329_v45, %v3386_v55  ;;  %v3310_v48 = vmul.f32 0.2, %v3292_v46  ;;  %v8378_v62 = vsel %vm3308_vm8, %v3300_v52, %v3312_v37 }
 0xae5   : > { %v3294_v47 = vpop.f32.mrf.mxu0  ;;  %v6369_v49 = vpop.f32.mrf.mxu1  ;;  %vm3306_vm10 = vcmp.gt.f32.partialorder %v3292_v46, 0.0  ;;  %vm3403_vm1 = vcmp.gt.f32.partialorder %v3395_v44, 0.0  ;;  %v3407_v21 = vmul.f32 0.2, %v3395_v44  ;;  %v3126_v37 = vmul.f32 0.2, %v3114_v28 }
 0xae6   : > { %vm3309_vm9 = vcmp.gt.f32.partialorder %v3303_v40, 0.0  ;;  %v3313_v60 = vmul.f32 0.2, %v3303_v40  ;;  %v3295_v59 = vadd.f32 %v8329_v45, %v3294_v47  ;;  %v3405_v63 = vmul.f32 0.2, %v3387_v43 }
 0xae7   : > { %v3398_v53 = vadd.f32 %v6369_v49, %v8329_v45  ;;  %vm3401_vm14 = vcmp.gt.f32.partialorder %v3387_v43, 0.0  ;;  %v3389_v1 = vpop.f32.mrf.mxu1  ;;  %v8384_v25 = vsel %vm3306_vm10, %v3292_v46, %v3310_v48  ;;  %v8397_v46 = vsel %vm3403_vm1, %v3395_v44, %v3407_v21 }
 0xae8   : > { %v8381_v0 = vsel %vm3309_vm9, %v3303_v40, %v3313_v60  ;;  %vm3307_vm15 = vcmp.gt.f32.partialorder %v3295_v59, 0.0  ;;  %v3311_v14 = vmul.f32 0.2, %v3295_v59  ;;  %v3390_v24 = vadd.f32 %v8329_v45, %v3389_v1 }
 0xae9   : > { %v3408_v11 = vmul.f32 0.2, %v3398_v53  ;;  %vm3404_vm2 = vcmp.gt.f32.partialorder %v3398_v53, 0.0  ;;  %v6887_v52 = vpack.i.bf16 %v8381_v0, %v8378_v62  ;;  %v8390_v50 = vsel %vm3401_vm14, %v3387_v43, %v3405_v63 }
 0xaea   : > { %v8386_v16 = vsel %vm3307_vm15, %v3295_v59, %v3311_v14  ;;  %vm3402_vm3 = vcmp.gt.f32.partialorder %v3390_v24, 0.0  ;;  %v3406_v54 = vmul.f32 0.2, %v3390_v24  ;;  %v3128_v45 = vsel %vm3120_vm7, %v3106_v18, %v3124_v39 }
 0xaeb   : > { %v6882_v36 = vpack.i.bf16 %v8386_v16, %v8384_v25  ;;  %6888 = vrot.lane.b32.xlu1 %v6887_v52, %s9524_s1  ;;  %v8399_v35 = vsel %vm3404_vm2, %v3398_v53, %v3408_v11  ;;  %v6897_v43 = vpack.i.bf16 %v8373_v42, %v3128_v45  ;;  %v3432_v47 = vrot.slane %v8390_v50, 4 }
 0xaec   : > { %v8401_v40 = vsel %vm3402_vm3, %v3390_v24, %v3406_v54  ;;  %v3131_v48 = vsel %vm3123_vm5, %v3117_v27, %v3127_v41  ;;  %v3435_v60 = vrot.slane %v8397_v46, 4  ;;  %v3437_v18 = vrot.slane %v8399_v35, 4 }
 0xaed   : > { %6883 = vrot.lane.b32.xlu0 %v6882_v36, %s9524_s1  ;;  %v3433_v55 = vrot.slane %v8401_v40, 4  ;;  %v3130_v44 = vsel %vm3122_vm6, %v3114_v28, %v3126_v37  ;;  %v6917_v41 = vpack.i.bf16 %v8399_v35, %v8397_v46  ;;  %v6912_v28 = vpack.i.bf16 %v8401_v40, %v8390_v50 }
 0xaee   : > { %v6907_v49 = vpack.i.bf16 %v3131_v48, %v3130_v44  ;;  %v3438_v53 = vsel %vm1569_vm11, %v3435_v60, %v3437_v18  ;;  %v4158_v14 = vrot.slane %v3131_v48, 4  ;;  %v4156_v1 = vrot.slane %v3130_v44, 4 }
 0xaef   : > { %6898 = vrot.lane.b32.xlu1 %v6897_v43, %s7333_s5  ;;  %v3434_v39 = vsel %vm1569_vm11, %v3432_v47, %v3433_v55  ;;  %v3436_v63 = vsel %vm1569_vm11, %v3433_v55, %v3435_v60  ;;  %v4154_v21 = vrot.slane %v8373_v42, 4  ;;  %v4153_v54 = vrot.slane %v3128_v45, 4 }
 0xaf0   : > { %v6892_v59 = vpack.i.bf16 %v3434_v39, %v3432_v47  ;;  %v6902_v27 = vpack.i.bf16 %v3438_v53, %v3436_v63  ;;  %v4159_v11 = vsel %vm1569_vm11, %v4156_v1, %v4158_v14  ;;  %v4161_v24 = vsel %vm1569_vm11, %v4158_v14, 0.0 }
 0xaf1   : > { %v6947_v37 = vpack.i.bf16 %v4161_v24, %v4159_v11  ;;  %v4155_v55 = vsel %vm1569_vm11, %v4153_v54, %v4154_v21  ;;  %v4157_v47 = vsel %vm1569_vm11, %v4154_v21, %v4156_v1 }
 0xaf2   : > { %6893 = vrot.lane.b32.xlu0 %v6892_v59, %s9523_s24  ;;  %v6942_v60 = vpack.i.bf16 %v4157_v47, %v4155_v55 }
 0xaf3   : > { %6908 = vrot.lane.b32.xlu1 %v6907_v49, %s7333_s5 }
 0xaf6   : > { %6903 = vrot.lane.b32.xlu0 %v6902_v27, %s9523_s24 }
 0xaf7   : > { %6918 = vrot.lane.b32.xlu1 %v6917_v41, %s9524_s1 }
 0xafa   : > { %6913 = vrot.lane.b32.xlu0 %v6912_v28, %s9524_s1 }
 0xafb   : > { %6928 = vrot.lane.b32.xlu1 %v8360_v6, %s7333_s5 }
 0xafe   : > { %6923 = vrot.lane.b32.xlu0 %v6897_v43, %s9523_s24 }
 0xaff   : > { %6938 = vrot.lane.b32.xlu1 %v8356_v7, %s7333_s5 }
 0xb02   : > { %6933 = vrot.lane.b32.xlu0 %v6907_v49, %s9523_s24 }
 0xb03   : > { %6948 = vrot.lane.b32.xlu1 %v6947_v37, %s9524_s1 }
 0xb06   : > { %6943 = vrot.lane.b32.xlu0 %v6942_v60, %s9524_s1 }
 0xb07   : > { %6963 = vrot.lane.b32.xlu1 %v6882_v36, %s7333_s5 }
 0xb0a   : > { %6953 = vrot.lane.b32.xlu0 %v8360_v6, %s9523_s24 }
 0xb0b   : > { %6968 = vrot.lane.b32.xlu1 %v6887_v52, %s7333_s5 }
 0xb0e   : > { %6958 = vrot.lane.b32.xlu0 %v8356_v7, %s9523_s24 }
 0xb0f   : > { %6973 = vrot.lane.b32.xlu1 %v6912_v28, %s7333_s5 }
 0xb12   : > { %6978 = vrot.lane.b32.xlu0 %v6882_v36, %s9523_s24 }
 0xb13   : > { %6988 = vrot.lane.b32.xlu1 %v6917_v41, %s7333_s5 }
 0xb16   : > { %6983 = vrot.lane.b32.xlu0 %v6887_v52, %s9523_s24 }
 0xb47   : > { %v6879_v43 = vpop.permute.xlu1 %6878 }
 0xb48   : > { %v6881_v18 = vunpack.i.h.bf16 %v6879_v43  ;;  %v6880_v39 = vunpack.i.l.bf16 %v6879_v43 }
 0xb49   : > { %v6874_v59 = vpop.permute.xlu0 %6873 }
 0xb4a   : > { %v6876_v49 = vunpack.i.h.bf16 %v6874_v59  ;;  %v6875_v63 = vunpack.i.l.bf16 %v6874_v59  ;;  %v3606_v6 = vsel %vm1634_vm12, %v3131_v48, %v6881_v18  ;;  %v3605_v53 = vsel %vm1634_vm12, %v3130_v44, %v6880_v39 }
 0xb4b   : > { %v3608_v28 = vpack.c.bf16 %v3606_v6, %v3605_v53 }
 0xb4c   : > { %v3604_v7 = vsel %vm1634_vm12, %v8373_v42, %v6876_v49  ;;  %v3603_v27 = vsel %vm1634_vm12, %v3128_v45, %v6875_v63 }
 0xb4d   : > { %v3607_v36 = vpack.c.bf16 %v3604_v7, %v3603_v27 }
 0xb4f   : > { %6398 = vmatprep.mubr.msk.bf16.mxu1 %vm9498_vm13, %v3607_v36 }
 0xb50   : > { %6399 = vmatmul.mubr.msk.bf16.vlgmr.msra.gmra.mxu1 %vm9498_vm13, %v3608_v28 }
 0xb51   : > { %6419 = vmatpush3.bf16.msra.mxu1 %v8284_v56 }
 0xb52   : > { %6420 = vmatprep.subr.bf16.mxu1 %v8289_v58 }
 0xb55   : > { %6421 = vmatpush3.bf16.msra.mxu1 %v8289_v58 }
 0xb56   : > { %6422 = vmatprep.subr.bf16.mxu1 %v8299_v61 }
 0xb59   : > { %6423 = vmatpush3.bf16.msra.mxu1 %v8299_v61 }
 0xb5a   : > { %6424 = vmatprep.subr.bf16.mxu1 %v8308_v13 }
 0xb5d   : > { %v6889_v42 = vpop.permute.xlu1 %6888  ;;  %6425 = vmatpush3.bf16.msra.mxu1 %v8308_v13 }
 0xb5e   : > { %6426 = vmatprep.subr.bf16.mxu1 %v8317_v29  ;;  %v6891_v45 = vunpack.i.h.bf16 %v6889_v42  ;;  %v6890_v48 = vunpack.i.l.bf16 %v6889_v42 }
 0xb5f   : > { %v6884_v52 = vpop.permute.xlu0 %6883 }
 0xb60   : > { %v6886_v44 = vunpack.i.h.bf16 %v6884_v52  ;;  %v6885_v41 = vunpack.i.l.bf16 %v6884_v52  ;;  %v3796_v24 = vsel %vm1634_vm12, %v8348_v34, %v6891_v45  ;;  %v3795_v54 = vsel %vm1634_vm12, %v8346_v9, %v6890_v48 }
 0xb61   : > { %v6899_v21 = vpop.permute.xlu1 %6898  ;;  %6427 = vmatpush3.bf16.msra.mxu1 %v8317_v29 }
 0xb62   : > { %v3794_v14 = vsel %vm1634_vm12, %v8352_v4, %v6886_v44  ;;  %v3793_v1 = vsel %vm1634_vm12, %v8350_v12, %v6885_v41  ;;  %6428 = vmatprep.subr.bf16.mxu1 %v8336_v51  ;;  %v6901_v55 = vunpack.i.h.bf16 %v6899_v21  ;;  %v3798_v12 = vpack.c.bf16 %v3796_v24, %v3795_v54 }
 0xb63   : > { %v3797_v11 = vpack.c.bf16 %v3794_v14, %v3793_v1  ;;  %v6900_v43 = vunpack.i.l.bf16 %v6899_v21 }
 0xb64   : > { %v6894_v37 = vpop.permute.xlu0 %6893 }
 0xb65   : > { %6430 = vmatprep.mubr.msk.bf16.mxu1 %vm9498_vm13, %v3797_v11  ;;  %v6909_v4 = vpop.permute.xlu1 %6908  ;;  %v6896_v47 = vunpack.i.h.bf16 %v6894_v37  ;;  %v6895_v60 = vunpack.i.l.bf16 %v6894_v37  ;;  %6429 = vmatpush3.bf16.msra.mxu1 %v8336_v51 }
 0xb66   : > { %6450 = vmatprep.subr.bf16.mxu1 %v8284_v56  ;;  %v6911_v39 = vunpack.i.h.bf16 %v6909_v4  ;;  %v6910_v63 = vunpack.i.l.bf16 %v6909_v4 }
 0xb67   : > { %v3469_v18 = vsel %vm918_vm4, %v6896_v47, %v6901_v55  ;;  %v3451_v34 = vsel %vm1569_vm11, 0.0, %v6895_v60 }
 0xb68   : > { %v3468_v9 = vsel %vm918_vm4, %v3451_v34, %v6900_v43  ;;  %v6904_v59 = vpop.permute.xlu0 %6903  ;;  %6431 = vmatmul.mubr.msk.bf16.vlgmr.msra.gmra.mxu1 %vm9498_vm13, %v3798_v12  ;;  %v3473_v49 = vsel %vm1634_vm12, %v3469_v18, %v6901_v55 }
 0xb69   : > { %v6919_v6 = vpop.permute.xlu1 %6918  ;;  %v6906_v53 = vunpack.i.h.bf16 %v6904_v59  ;;  %v6905_v7 = vunpack.i.l.bf16 %v6904_v59  ;;  %6451 = vmatpush3.bf16.msra.mxu1 %v8284_v56  ;;  %v3472_v27 = vsel %vm1634_vm12, %v3468_v9, %v6900_v43 }
 0xb6a   : > { %v3476_v36 = vpack.c.bf16 %v3473_v49, %v3472_v27  ;;  %6452 = vmatprep.subr.bf16.mxu1 %v8289_v58  ;;  %v6921_v9 = vunpack.i.h.bf16 %v6919_v6  ;;  %v6920_v59 = vunpack.i.l.bf16 %v6919_v6 }
 0xb6b   : > { %v3471_v28 = vsel %vm918_vm4, %v6906_v53, %v6911_v39  ;;  %v3470_v42 = vsel %vm918_vm4, %v6905_v7, %v6910_v63 }
 0xb6c   : > { %v3475_v52 = vsel %vm1634_vm12, %v3471_v28, %v6911_v39  ;;  %v3474_v45 = vsel %vm1634_vm12, %v3470_v42, %v6910_v63  ;;  %v6914_v48 = vpop.permute.xlu0 %6913  ;;  %6382 = vmatprep.mubr.msk.bf16.mxu0 %vm9498_vm13, %v3476_v36  ;;  %v3982_v7 = vsel %vm1634_vm12, %v8381_v0, %v6921_v9  ;;  %v3981_v27 = vsel %vm1634_vm12, %v8378_v62, %v6920_v59 }
 0xb6d   : > { %v3477_v44 = vpack.c.bf16 %v3475_v52, %v3474_v45  ;;  %v6929_v41 = vpop.permute.xlu1 %6928  ;;  %v6916_v14 = vunpack.i.h.bf16 %v6914_v48  ;;  %v6915_v1 = vunpack.i.l.bf16 %v6914_v48  ;;  %6453 = vmatpush3.bf16.msra.mxu1 %v8289_v58  ;;  %v3984_v62 = vpack.c.bf16 %v3982_v7, %v3981_v27 }
 0xb6e   : > { %6454 = vmatprep.subr.bf16.mxu1 %v8299_v61  ;;  %v6931_v37 = vunpack.i.h.bf16 %v6929_v41  ;;  %v6930_v55 = vunpack.i.l.bf16 %v6929_v41 }
 0xb6f   : > { %v3980_v21 = vsel %vm1634_vm12, %v8386_v16, %v6916_v14  ;;  %v3979_v11 = vsel %vm1634_vm12, %v8384_v25, %v6915_v1  ;;  %6383 = vmatmul.mubr.msk.bf16.vlgmr.msra.gmra.mxu0 %vm9498_vm13, %v3477_v44 }
 0xb70   : > { %6403 = vmatpush3.bf16.msra.mxu0 %v8284_v56  ;;  %v6924_v24 = vpop.permute.xlu0 %6923  ;;  %v3983_v54 = vpack.c.bf16 %v3980_v21, %v3979_v11 }
 0xb71   : > { %v6939_v4 = vpop.permute.xlu1 %6938  ;;  %v6926_v47 = vunpack.i.h.bf16 %v6924_v24  ;;  %v6925_v60 = vunpack.i.l.bf16 %v6924_v24  ;;  %6455 = vmatpush3.bf16.msra.mxu1 %v8299_v61  ;;  %6404 = vmatprep.subr.bf16.mxu0 %v8289_v58 }
 0xb72   : > { %6462 = vmatprep.mubr.msk.bf16.mxu1 %vm9498_vm13, %v3983_v54  ;;  %6456 = vmatprep.subr.bf16.mxu1 %v8308_v13  ;;  %v6941_v48 = vunpack.i.h.bf16 %v6939_v4  ;;  %v6940_v44 = vunpack.i.l.bf16 %v6939_v4 }
 0xb73   : > { %v3701_v25 = vsel %vm918_vm4, %v6926_v47, %v6931_v37  ;;  %v3700_v16 = vsel %vm918_vm4, %v6925_v60, %v6930_v55 }
 0xb74   : > { %6405 = vmatpush3.bf16.msra.mxu0 %v8289_v58  ;;  %v6934_v12 = vpop.permute.xlu0 %6933  ;;  %v3704_v43 = vsel %vm1634_vm12, %v3700_v16, %v6930_v55  ;;  %v3705_v18 = vsel %vm1634_vm12, %v3701_v25, %v6931_v37 }
 0xb75   : > { %v8503_v34 = vpop.permute.xlu1 %6948  ;;  %6457 = vmatpush3.bf16.msra.mxu1 %v8308_v13  ;;  %6406 = vmatprep.subr.bf16.mxu0 %v8299_v61  ;;  %v3708_v39 = vpack.c.bf16 %v3705_v18, %v3704_v43  ;;  %v6936_v6 = vunpack.i.h.bf16 %v6934_v12  ;;  %v6935_v36 = vunpack.i.l.bf16 %v6934_v12 }
 0xb76   : > { %6458 = vmatprep.subr.bf16.mxu1 %v8317_v29  ;;  %v6951_v12 = vunpack.i.h.bf16 %v8503_v34  ;;  %v6950_v43 = vunpack.i.l.bf16 %v8503_v34 }
 0xb77   : > { %6414 = vmatprep.mubr.msk.bf16.mxu0 %vm9498_vm13, %v3708_v39 }
 0xb78   : > { %6407 = vmatpush3.bf16.msra.mxu0 %v8299_v61  ;;  %v6944_v49 = vpop.permute.xlu0 %6943  ;;  %v4178_v39 = vsel %vm1634_vm12, %v8399_v35, %v6951_v12  ;;  %v4177_v9 = vsel %vm1634_vm12, %v8397_v46, %v6950_v43 }
 0xb79   : > { %v6946_v63 = vunpack.i.h.bf16 %v6944_v49  ;;  %v6945_v53 = vunpack.i.l.bf16 %v6944_v49  ;;  %6459 = vmatpush3.bf16.msra.mxu1 %v8317_v29  ;;  %6408 = vmatprep.subr.bf16.mxu0 %v8308_v13  ;;  %v6964_v28 = vpop.permute.xlu1 %6963 }
 0xb7a   : > { %6460 = vmatprep.subr.bf16.mxu1 %v8336_v51  ;;  %v6966_v0 = vunpack.i.h.bf16 %v6964_v28  ;;  %v6965_v1 = vunpack.i.l.bf16 %v6964_v28 }
 0xb7b   : > { %v4176_v42 = vsel %vm1634_vm12, %v8401_v40, %v6946_v63  ;;  %v4175_v52 = vsel %vm1634_vm12, %v8390_v50, %v6945_v53  ;;  %v3703_v40 = vsel %vm918_vm4, %v6936_v6, %v6941_v48  ;;  %v3702_v50 = vsel %vm918_vm4, %v6935_v36, %v6940_v44 }
 0xb7c   : > { %6409 = vmatpush3.bf16.msra.mxu0 %v8308_v13  ;;  %v6954_v45 = vpop.permute.xlu0 %6953  ;;  %v4179_v21 = vpack.c.bf16 %v4176_v42, %v4175_v52  ;;  %v3707_v54 = vsel %vm1634_vm12, %v3703_v40, %v6941_v48  ;;  %v3706_v37 = vsel %vm1634_vm12, %v3702_v50, %v6940_v44  ;;  %v4180_v6 = vpack.c.bf16 %v4178_v39, %v4177_v9 }
 0xb7d   : > { %v6956_v41 = vunpack.i.h.bf16 %v6954_v45  ;;  %v6955_v14 = vunpack.i.l.bf16 %v6954_v45  ;;  %6461 = vmatpush3.bf16.msra.mxu1 %v8336_v51  ;;  %6410 = vmatprep.subr.bf16.mxu0 %v8317_v29  ;;  %v3709_v47 = vpack.c.bf16 %v3707_v54, %v3706_v37  ;;  %v6969_v16 = vpop.permute.xlu1 %6968 }
 0xb7e   : > { %6482 = vmatprep.subr.bf16.mxu1 %v8284_v56  ;;  %v6971_v7 = vunpack.i.h.bf16 %v6969_v16  ;;  %v6970_v27 = vunpack.i.l.bf16 %v6969_v16 }
 0xb7f   : > { %v3891_v11 = vsel %vm918_vm4, %v6956_v41, %v6966_v0  ;;  %v3890_v24 = vsel %vm918_vm4, %v6955_v14, %v6965_v1 }
 0xb80   : > { %6411 = vmatpush3.bf16.msra.mxu0 %v8317_v29  ;;  %6463 = vmatmul.mubr.msk.bf16.vlgmr.msra.gmra.mxu1 %vm9498_vm13, %v3984_v62  ;;  %v3894_v55 = vsel %vm1634_vm12, %v3890_v24, %v6965_v1  ;;  %v3895_v4 = vsel %vm1634_vm12, %v3891_v11, %v6966_v0  ;;  %v6959_v25 = vpop.permute.xlu0 %6958 }
 0xb81   : > { %6483 = vmatpush3.bf16.msra.mxu1 %v8284_v56  ;;  %6494 = vmatprep.mubr.msk.bf16.mxu1 %vm9498_vm13, %v4179_v21  ;;  %v3898_v60 = vpack.c.bf16 %v3895_v4, %v3894_v55  ;;  %v6974_v59 = vpop.permute.xlu1 %6973  ;;  %v6961_v49 = vunpack.i.h.bf16 %v6959_v25  ;;  %v6960_v63 = vunpack.i.l.bf16 %v6959_v25 }
 0xb82   : > { %6412 = vmatprep.subr.bf16.mxu0 %v8336_v51  ;;  %6484 = vmatprep.subr.bf16.mxu1 %v8289_v58  ;;  %v6976_v36 = vunpack.i.h.bf16 %v6974_v59  ;;  %v6975_v28 = vunpack.i.l.bf16 %v6974_v59 }
 0xb83   : > { %v3893_v35 = vsel %vm918_vm4, %v6961_v49, %v6971_v7  ;;  %v3892_v46 = vsel %vm918_vm4, %v6960_v63, %v6970_v27 }
 0xb84   : > { %6413 = vmatpush3.bf16.msra.mxu0 %v8336_v51  ;;  %v6979_v18 = vpop.permute.xlu0 %6978  ;;  %v3897_v45 = vsel %vm1634_vm12, %v3893_v35, %v6971_v7  ;;  %v3896_v48 = vsel %vm1634_vm12, %v3892_v46, %v6970_v27  ;;  %v7303_v27 = vld [vmem:[%s9472_s23 + $0x28] sm:$0xff]  }
 0xb85   : > { %6485 = vmatpush3.bf16.msra.mxu1 %v8289_v58  ;;  %6434 = vmatprep.subr.bf16.mxu0 %v8284_v56  ;;  %v6981_v53 = vunpack.i.h.bf16 %v6979_v18  ;;  %v6980_v34 = vunpack.i.l.bf16 %v6979_v18  ;;  %v3899_v14 = vpack.c.bf16 %v3897_v45, %v3896_v48  ;;  %v6989_v1 = vpop.permute.xlu1 %6988  ;;  %v7305_v45 = vld [vmem:[%s9472_s23 + $0x18] sm:$0xff]  }
 0xb86   : > { %6486 = vmatprep.subr.bf16.mxu1 %v8299_v61  ;;  %v6991_v21 = vunpack.i.h.bf16 %v6989_v1 }
 0xb87   : > { %6415 = vmatmul.mubr.msk.bf16.vlgmr.msra.gmra.mxu0 %vm9498_vm13, %v3709_v47  ;;  %v4077_v42 = vsel %vm918_vm4, %v6981_v53, %v6976_v36  ;;  %v4076_v52 = vsel %vm918_vm4, %v6980_v34, %v6975_v28 }
 0xb88   : > { %6435 = vmatpush3.bf16.msra.mxu0 %v8284_v56  ;;  %6446 = vmatprep.mubr.msk.bf16.mxu0 %vm9498_vm13, %v3898_v60  ;;  %v4080_v44 = vsel %vm1634_vm12, %v4076_v52, %v6975_v28  ;;  %v4081_v41 = vsel %vm1634_vm12, %v4077_v42, %v6976_v36  ;;  %v6984_v0 = vpop.permute.xlu0 %6983  ;;  %v7304_v52 = vld [vmem:[%s9472_s23 + $0x20] sm:$0xff]  }
 0xb89   : > { %6487 = vmatpush3.bf16.msra.mxu1 %v8299_v61  ;;  %6436 = vmatprep.subr.bf16.mxu0 %v8289_v58  ;;  %v4084_v62 = vpack.c.bf16 %v4081_v41, %v4080_v44  ;;  %v6986_v40 = vunpack.i.h.bf16 %v6984_v0  ;;  %v6985_v50 = vunpack.i.l.bf16 %v6984_v0 }
 0xb8a   : > { %6488 = vmatprep.subr.bf16.mxu1 %v8308_v13 }
 0xb8b   : > { %v4079_v11 = vsel %vm918_vm4, %v6986_v40, %v6991_v21 }
 0xb8c   : > { %6437 = vmatpush3.bf16.msra.mxu0 %v8289_v58 }
 0xb8d   : > { %6489 = vmatpush3.bf16.msra.mxu1 %v8308_v13  ;;  %6438 = vmatprep.subr.bf16.mxu0 %v8299_v61 }
 0xb8e   : > { %6490 = vmatprep.subr.bf16.mxu1 %v8317_v29 }
 0xb90   : > { %6439 = vmatpush3.bf16.msra.mxu0 %v8299_v61 }
 0xb91   : > { %6491 = vmatpush3.bf16.msra.mxu1 %v8317_v29  ;;  %6440 = vmatprep.subr.bf16.mxu0 %v8308_v13 }
 0xb92   : > { %6492 = vmatprep.subr.bf16.mxu1 %v8336_v51 }
 0xb94   : > { %6441 = vmatpush3.bf16.msra.mxu0 %v8308_v13 }
 0xb95   : > { %6493 = vmatpush3.bf16.msra.mxu1 %v8336_v51  ;;  %6442 = vmatprep.subr.bf16.mxu0 %v8317_v29 }
 0xb96   : > { %6574 = vmatprep.subr.bf16.mxu1 %v7303_v27 }
 0xb98   : > { %6443 = vmatpush3.bf16.msra.mxu0 %v8317_v29  ;;  %6495 = vmatmul.mubr.msk.bf16.vlgmr.msra.gmra.mxu1 %vm9498_vm13, %v4180_v6 }
 0xb99   : > { %6444 = vmatprep.subr.bf16.mxu0 %v8336_v51  ;;  %6580 = vmatpush3.bf16.msra.mxu1 %v7303_v27 }
 0xb9a   : > { %6575 = vmatprep.subr.bf16.mxu1 %v7304_v52 }
 0xb9c   : > { %6445 = vmatpush3.bf16.msra.mxu0 %v8336_v51 }
 0xb9d   : > { %6466 = vmatprep.subr.bf16.mxu0 %v8284_v56  ;;  %6581 = vmatpush3.bf16.msra.mxu1 %v7304_v52 }
 0xb9e   : > { %6576 = vmatprep.subr.bf16.mxu1 %v7305_v45 }
 0xb9f   : > { %6447 = vmatmul.mubr.msk.bf16.vlgmr.msra.gmra.mxu0 %vm9498_vm13, %v3899_v14 }
 0xba0   : > { %6467 = vmatpush3.bf16.msra.mxu0 %v8284_v56  ;;  %6478 = vmatprep.mubr.msk.bf16.mxu0 %vm9498_vm13, %v4084_v62  ;;  %v6990_v56 = vunpack.i.l.bf16 %v6989_v1 }
 0xba1   : > { %6468 = vmatprep.subr.bf16.mxu0 %v8289_v58  ;;  %6582 = vmatpush3.bf16.msra.mxu1 %v7305_v45 }
 0xba4   : > { %6469 = vmatpush3.bf16.msra.mxu0 %v8289_v58  ;;  %v4078_v58 = vsel %vm918_vm4, %v6985_v50, %v6990_v56 }
 0xba5   : > { %6470 = vmatprep.subr.bf16.mxu0 %v8299_v61  ;;  %v4082_v24 = vsel %vm1634_vm12, %v4078_v58, %v6990_v56 }
 0xba8   : > { %6471 = vmatpush3.bf16.msra.mxu0 %v8299_v61  ;;  %v4083_v61 = vsel %vm1634_vm12, %v4079_v11, %v6991_v21  ;;  %v7306_v21 = vld [vmem:[%s9472_s23 + $0x10] sm:$0xff]  }
 0xba9   : > { %6472 = vmatprep.subr.bf16.mxu0 %v8308_v13  ;;  %v4085_v54 = vpack.c.bf16 %v4083_v61, %v4082_v24  ;;  %6577 = vmatprep.subr.bf16.mxu1 %v7306_v21 }
 0xbaa   : > { %6583 = vmatpush3.bf16.msra.mxu1 %v7306_v21 }
 0xbac   : > { %6473 = vmatpush3.bf16.msra.mxu0 %v8308_v13  ;;  %v8600_v13 = vld [vmem:[%s9471_s22 + $0x3] ss:$0 sm:$0xff] }
 0xbad   : > { %6474 = vmatprep.subr.bf16.mxu0 %v8317_v29 }
 0xbb0   : > { %6475 = vmatpush3.bf16.msra.mxu0 %v8317_v29 }
 0xbb1   : > { %6476 = vmatprep.subr.bf16.mxu0 %v8336_v51 }
 0xbb4   : > { %6477 = vmatpush3.bf16.msra.mxu0 %v8336_v51 }
 0xbb5   : > { %6498 = vmatprep.subr.bf16.mxu0 %v7303_v27 }
 0xbb7   : > { %6479 = vmatmul.mubr.msk.bf16.vlgmr.msra.gmra.mxu0 %vm9498_vm13, %v4085_v54 }
 0xbb8   : > { %6499 = vmatpush3.bf16.msra.mxu0 %v7303_v27 }
 0xbb9   : > { %6500 = vmatprep.subr.bf16.mxu0 %v7304_v52 }
 0xbbc   : > { %6501 = vmatpush3.bf16.msra.mxu0 %v7304_v52 }
 0xbbd   : > { %6502 = vmatprep.subr.bf16.mxu0 %v7305_v45 }
 0xbc0   : > { %6503 = vmatpush3.bf16.msra.mxu0 %v7305_v45 }
 0xbc1   : > { %6504 = vmatprep.subr.bf16.mxu0 %v7306_v21 }
 0xbc4   : > { %6505 = vmatpush3.bf16.msra.mxu0 %v7306_v21 }
 0xc10   : > { %v6400_v37 = vpop.f32.mrf.mxu1 }
 0xc11   : > { %v3658_v55 = vadd.f32 %v6400_v37, %v8600_v13 }
 0xc12   : > { %v3649_v29 = vpop.f32.mrf.mxu1 }
 0xc13   : > { %v3650_v4 = vadd.f32 %v8600_v13, %v3649_v29  ;;  %v3670_v60 = vmul.f32 0.2, %v3658_v55  ;;  %vm3666_vm7 = vcmp.gt.f32.partialorder %v3658_v55, 0.0  ;;  %v7307_v29 = vld [vmem:[%s9472_s23 + $0x8] sm:$0xff]  }
 0xc14   : > { %v6401_v47 = vpop.f32.mrf.mxu1  ;;  %6578 = vmatprep.subr.bf16.mxu1 %v7307_v29  ;;  %6506 = vmatprep.subr.bf16.mxu0 %v7307_v29 }
 0xc15   : > { %v3661_v25 = vadd.f32 %v6401_v47, %v8600_v13  ;;  %v3668_v16 = vmul.f32 0.2, %v3650_v4  ;;  %vm3664_vm9 = vcmp.gt.f32.partialorder %v3650_v4, 0.0  ;;  %v8606_v18 = vsel %vm3666_vm7, %v3658_v55, %v3670_v60  ;;  %6584 = vmatpush3.bf16.msra.mxu1 %v7307_v29  ;;  %6507 = vmatpush3.bf16.msra.mxu0 %v7307_v29 }
 0xc16   : > { %v3652_v51 = vpop.f32.mrf.mxu1 }
 0xc17   : > { %vm3667_vm8 = vcmp.gt.f32.partialorder %v3661_v25, 0.0  ;;  %v3671_v12 = vmul.f32 0.2, %v3661_v25  ;;  %v3653_v43 = vadd.f32 %v8600_v13, %v3652_v51  ;;  %v8614_v49 = vsel %vm3664_vm9, %v3650_v4, %v3668_v16 }
 0xc19   : > { %v8608_v39 = vsel %vm3667_vm8, %v3661_v25, %v3671_v12  ;;  %vm3665_vm10 = vcmp.gt.f32.partialorder %v3653_v43, 0.0  ;;  %v3669_v9 = vmul.f32 0.2, %v3653_v43 }
 0xc1a   : > { %v8612_v59 = vpack.i.bf16 %v8608_v39, %v8606_v18 }
 0xc1b   : > { %v8616_v63 = vsel %vm3665_vm10, %v3653_v43, %v3669_v9  ;;  %v7308_v9 = vld [vmem:[%s9472_s23] sm:$0xff]  }
 0xc1c   : > { %6993 = vrot.lane.b32.xlu1 %v8612_v59, %s9524_s1  ;;  %v8622_v53 = vpack.i.bf16 %v8616_v63, %v8614_v49  ;;  %6579 = vmatprep.subr.bf16.mxu1 %v7308_v9 }
 0xc1d   : > { %6508 = vmatprep.subr.bf16.mxu0 %v7308_v9  ;;  %6585 = vmatpush3.bf16.msra.mxu1 %v7308_v9 }
 0xc1e   : > { %7003 = vrot.lane.b32.xlu0 %v8622_v53, %s9524_s1  ;;  %6509 = vmatpush3.bf16.msra.mxu0 %v7308_v9 }
 0xc20   : > { %6998 = vrot.lane.b32.xlu1 %v8612_v59, %s7333_s5 }
 0xc24   : > { %7008 = vrot.lane.b32.xlu1 %v8622_v53, %s7333_s5 }
 0xc28   : > { %v8634_v36 = vpop.f32.mrf.mxu1 }
 0xc2a   : > { %v8644_v44 = vpop.f32.mrf.mxu1 }
 0xc2c   : > { %v8656_v56 = vpop.f32.mrf.mxu1 }
 0xc2e   : > { %v8666_v24 = vpop.f32.mrf.mxu1 }
 0xc2f   : > { %v6384_v34 = vpop.f32.mrf.mxu0 }
 0xc30   : > { %v3569_v7 = vadd.f32 %v6384_v34, %v8600_v13 }
 0xc31   : > { %v3560_v6 = vpop.f32.mrf.mxu0 }
 0xc32   : > { %v3581_v28 = vmul.f32 0.2, %v3569_v7  ;;  %vm3577_vm14 = vcmp.gt.f32.partialorder %v3569_v7, 0.0  ;;  %v3561_v46 = vadd.f32 %v8600_v13, %v3560_v6 }
 0xc33   : > { %v6385_v35 = vpop.f32.mrf.mxu0 }
 0xc34   : > { %v3572_v42 = vadd.f32 %v6385_v35, %v8600_v13  ;;  %v8647_v62 = vsel %vm3577_vm14, %v3569_v7, %v3581_v28  ;;  %v3579_v0 = vmul.f32 0.2, %v3561_v46  ;;  %vm3575_vm2 = vcmp.gt.f32.partialorder %v3561_v46, 0.0 }
 0xc35   : > { %v3563_v48 = vpop.f32.mrf.mxu0 }
 0xc36   : > { %vm3578_vm15 = vcmp.gt.f32.partialorder %v3572_v42, 0.0  ;;  %v3582_v41 = vmul.f32 0.2, %v3572_v42  ;;  %v3564_v14 = vadd.f32 %v8600_v13, %v3563_v48  ;;  %v8662_v58 = vsel %vm3575_vm2, %v3561_v46, %v3579_v0 }
 0xc38   : > { %v8649_v1 = vsel %vm3578_vm15, %v3572_v42, %v3582_v41  ;;  %vm3576_vm1 = vcmp.gt.f32.partialorder %v3564_v14, 0.0  ;;  %v3580_v40 = vmul.f32 0.2, %v3564_v14 }
 0xc39   : > { %v7012_v50 = vpack.i.bf16 %v8649_v1, %v8647_v62 }
 0xc3a   : > { %v8658_v11 = vsel %vm3576_vm1, %v3564_v14, %v3580_v40 }
 0xc3b   : > { %7013 = vrot.lane.b32.xlu1 %v7012_v50, %s7333_s5  ;;  %7018 = vrot.lane.b32.xlu0 %v7012_v50, %s9523_s24  ;;  %v7022_v61 = vpack.i.bf16 %v8658_v11, %v8662_v58 }
 0xc3f   : > { %7023 = vrot.lane.b32.xlu1 %v7022_v61, %s7333_s5  ;;  %7028 = vrot.lane.b32.xlu0 %v7022_v61, %s9523_s24 }
 0xc40   : > { %v6464_v54 = vpop.f32.mrf.mxu1 }
 0xc41   : > { %v4034_v37 = vadd.f32 %v6464_v54, %v8600_v13 }
 0xc42   : > { %v4025_v55 = vpop.f32.mrf.mxu1 }
 0xc43   : > { %v4046_v4 = vmul.f32 0.2, %v4034_v37  ;;  %vm4042_vm3 = vcmp.gt.f32.partialorder %v4034_v37, 0.0  ;;  %v4026_v60 = vadd.f32 %v8600_v13, %v4025_v55 }
 0xc44   : > { %v6465_v47 = vpop.f32.mrf.mxu1 }
 0xc45   : > { %v4037_v25 = vadd.f32 %v6465_v47, %v8600_v13  ;;  %v8680_v34 = vsel %vm4042_vm3, %v4034_v37, %v4046_v4  ;;  %v4044_v27 = vmul.f32 0.2, %v4026_v60  ;;  %vm4040_vm7 = vcmp.gt.f32.partialorder %v4026_v60, 0.0 }
 0xc46   : > { %v4028_v51 = vpop.f32.mrf.mxu1 }
 0xc47   : > { %vm4043_vm5 = vcmp.gt.f32.partialorder %v4037_v25, 0.0  ;;  %v4047_v16 = vmul.f32 0.2, %v4037_v25  ;;  %v6416_v12 = vpop.f32.mrf.mxu0  ;;  %v4029_v43 = vadd.f32 %v8600_v13, %v4028_v51  ;;  %v8695_v14 = vsel %vm4040_vm7, %v4026_v60, %v4044_v27 }
 0xc48   : > { %v3759_v7 = vadd.f32 %v6416_v12, %v8600_v13 }
 0xc49   : > { %v8683_v6 = vsel %vm4043_vm5, %v4037_v25, %v4047_v16  ;;  %vm4041_vm6 = vcmp.gt.f32.partialorder %v4029_v43, 0.0  ;;  %v4045_v28 = vmul.f32 0.2, %v4029_v43  ;;  %v3750_v35 = vpop.f32.mrf.mxu0 }
 0xc4a   : > { %v8687_v46 = vpack.i.bf16 %v8683_v6, %v8680_v34  ;;  %v3771_v42 = vmul.f32 0.2, %v3759_v7  ;;  %vm3767_vm8 = vcmp.gt.f32.partialorder %v3759_v7, 0.0  ;;  %v3751_v48 = vadd.f32 %v8600_v13, %v3750_v35 }
 0xc4b   : > { %v8689_v52 = vsel %vm4041_vm6, %v4029_v43, %v4045_v28  ;;  %v6417_v45 = vpop.f32.mrf.mxu0  ;;  %v3843_v43 = vadd.f32 %v8600_v13, %v8666_v24  ;;  %v3851_v24 = vadd.f32 %v8656_v56, %v8600_v13 }
 0xc4c   : > { %v3762_v41 = vadd.f32 %v6417_v45, %v8600_v13  ;;  %7033 = vrot.lane.b32.xlu0 %v8687_v46, %s9524_s1  ;;  %v8700_v21 = vpack.i.bf16 %v8689_v52, %v8695_v14  ;;  %v8702_v61 = vsel %vm3767_vm8, %v3759_v7, %v3771_v42  ;;  %v3769_v54 = vmul.f32 0.2, %v3751_v48 }
 0xc4d   : > { %v3753_v0 = vpop.f32.mrf.mxu0  ;;  %vm3765_vm14 = vcmp.gt.f32.partialorder %v3751_v48, 0.0  ;;  %vm3855_vm5 = vcmp.gt.f32.partialorder %v3843_v43, 0.0  ;;  %vm3857_vm7 = vcmp.gt.f32.partialorder %v3851_v24, 0.0 }
 0xc4e   : > { %vm3768_vm9 = vcmp.gt.f32.partialorder %v3762_v41, 0.0  ;;  %v3772_v40 = vmul.f32 0.2, %v3762_v41  ;;  %v3754_v50 = vadd.f32 %v8600_v13, %v3753_v0  ;;  %v8716_v47 = vsel %vm3765_vm14, %v3751_v48, %v3769_v54 }
 0xc4f   : > { %v3859_v0 = vmul.f32 0.2, %v3843_v43 }
 0xc50   : > { %v8704_v37 = vsel %vm3768_vm9, %v3762_v41, %v3772_v40  ;;  %vm3766_vm10 = vcmp.gt.f32.partialorder %v3754_v50, 0.0  ;;  %v3770_v55 = vmul.f32 0.2, %v3754_v50  ;;  %7043 = vrot.lane.b32.xlu0 %v8700_v21, %s9524_s1  ;;  %v3840_v41 = vadd.f32 %v8600_v13, %v8644_v44 }
 0xc51   : > { %v8710_v29 = vpack.i.bf16 %v8704_v37, %v8702_v61 }
 0xc52   : > { %v8712_v4 = vsel %vm3766_vm10, %v3754_v50, %v3770_v55  ;;  %vm3854_vm6 = vcmp.gt.f32.partialorder %v3840_v41, 0.0  ;;  %v3858_v56 = vmul.f32 0.2, %v3840_v41 }
 0xc53   : > { %7038 = vrot.lane.b32.xlu1 %v8710_v29, %s9524_s1  ;;  %v8720_v60 = vpack.i.bf16 %v8712_v4, %v8716_v47 }
 0xc57   : > { %7048 = vrot.lane.b32.xlu1 %v8720_v60, %s9524_s1 }
 0xc58   : > { %v6496_v25 = vpop.f32.mrf.mxu1 }
 0xc59   : > { %v4230_v51 = vadd.f32 %v6496_v25, %v8600_v13  ;;  %v3848_v25 = vadd.f32 %v8634_v36, %v8600_v13 }
 0xc5a   : > { %v4221_v16 = vpop.f32.mrf.mxu1 }
 0xc5b   : > { %v4222_v12 = vadd.f32 %v8600_v13, %v4221_v16  ;;  %7068 = vrot.lane.b32.xlu1 %v8700_v21, %s7333_s5  ;;  %v4242_v28 = vmul.f32 0.2, %v4230_v51  ;;  %vm4238_vm1 = vcmp.gt.f32.partialorder %v4230_v51, 0.0  ;;  %v3860_v17 = vmul.f32 0.2, %v3848_v25 }
 0xc5c   : > { %v6497_v9 = vpop.f32.mrf.mxu1  ;;  %vm3856_vm8 = vcmp.gt.f32.partialorder %v3848_v25, 0.0 }
 0xc5d   : > { %v4240_v7 = vmul.f32 0.2, %v4222_v12  ;;  %v4233_v27 = vadd.f32 %v6497_v9, %v8600_v13  ;;  %vm4236_vm15 = vcmp.gt.f32.partialorder %v4222_v12, 0.0  ;;  %v8740_v55 = vsel %vm4238_vm1, %v4230_v51, %v4242_v28 }
 0xc5e   : > { %v4224_v35 = vpop.f32.mrf.mxu1  ;;  %v8752_v51 = vsel %vm3855_vm5, %v3843_v43, %v3859_v0  ;;  %v4255_v28 = vrot.slane %v8740_v55, 4  ;;  %v8762_v43 = vsel %vm3854_vm6, %v3840_v41, %v3858_v56  ;;  %v8775_v56 = vsel %vm3856_vm8, %v3848_v25, %v3860_v17 }
 0xc5f   : > { %v4243_v42 = vmul.f32 0.2, %v4233_v27  ;;  %v6448_v45 = vpop.f32.mrf.mxu0  ;;  %v4225_v48 = vadd.f32 %v8600_v13, %v4224_v35  ;;  %7078 = vrot.lane.b32.xlu1 %v8720_v60, %s7333_s5  ;;  %vm4239_vm2 = vcmp.gt.f32.partialorder %v4233_v27, 0.0  ;;  %v8738_v40 = vsel %vm4236_vm15, %v4222_v12, %v4240_v7 }
 0xc60   : > { %v4252_v7 = vrot.slane %v8738_v40, 4  ;;  %v3861_v35 = vmul.f32 0.2, %v3851_v24  ;;  %vm1033_vm8 = vcmask 253952  }
 0xc61   : > { %vm4237_vm3 = vcmp.gt.f32.partialorder %v4225_v48, 0.0  ;;  %v4241_v50 = vmul.f32 0.2, %v4225_v48  ;;  %v3940_v54 = vpop.f32.mrf.mxu0  ;;  %v8744_v16 = vsel %vm4239_vm2, %v4233_v27, %v4243_v42 }
 0xc62   : > { %v4257_v27 = vrot.slane %v8744_v16, 4  ;;  %v3941_v42 = vadd.f32 %v8600_v13, %v3940_v54  ;;  %v8768_v54 = vpack.i.bf16 %v8752_v51, %v8762_v43 }
 0xc63   : > { %v8746_v9 = vsel %vm4237_vm3, %v4225_v48, %v4241_v50  ;;  %v6449_v44 = vpop.f32.mrf.mxu0  ;;  %7088 = vrot.lane.b32.xlu1 %v8687_v46, %s7333_s5 }
 0xc64   : > { %v4253_v12 = vrot.slane %v8746_v9, 4  ;;  %v3959_v2 = vmul.f32 0.2, %v3941_v42  ;;  %vm3955_vm10 = vcmp.gt.f32.partialorder %v3941_v42, 0.0 }
 0xc65   : > { %v3943_v36 = vpop.f32.mrf.mxu0 }
 0xc66   : > { %v3944_v48 = vadd.f32 %v8600_v13, %v3943_v36  ;;  %v4254_v50 = vsel %vm1569_vm11, %v4252_v7, %v4253_v12  ;;  %v4256_v38 = vsel %vm1569_vm11, %v4253_v12, %v4255_v28  ;;  %v8770_v36 = vsel %vm3857_vm7, %v3851_v24, %v3861_v35 }
 0xc67   : > { %7098 = vrot.lane.b32.xlu1 %v8710_v29, %s7333_s5  ;;  %v7052_v31 = vpack.i.bf16 %v4254_v50, %v4252_v7  ;;  %v4258_v7 = vsel %vm1569_vm11, %v4255_v28, %v4257_v27  ;;  %v3952_v12 = vadd.f32 %v6449_v44, %v8600_v13  ;;  %v3949_v24 = vadd.f32 %v6448_v45, %v8600_v13 }
 0xc68   : > { %v3960_v0 = vmul.f32 0.2, %v3944_v48  ;;  %vm3956_vm9 = vcmp.gt.f32.partialorder %v3944_v48, 0.0  ;;  %v7057_v41 = vpack.i.bf16 %v4258_v7, %v4256_v38  ;;  %v8786_v35 = vsel %vm3955_vm10, %v3941_v42, %v3959_v2 }
 0xc69   : > { %7053 = vrot.lane.b32.xlu0 %v7052_v31, %s9523_s24  ;;  %v8783_v31 = vpack.i.bf16 %v8770_v36, %v8775_v56  ;;  %v3962_v38 = vmul.f32 0.2, %v3952_v12  ;;  %vm3958_vm14 = vcmp.gt.f32.partialorder %v3952_v12, 0.0  ;;  %v3961_v25 = vmul.f32 0.2, %v3949_v24 }
 0xc6a   : > { %v8778_v50 = vsel %vm3956_vm9, %v3944_v48, %v3960_v0  ;;  %vm3957_vm15 = vcmp.gt.f32.partialorder %v3949_v24, 0.0  ;;  %vm2368_vm9 = vcmask 15360   ;;  %vm2363_vm10 = vcmask 7168  }
 0xc6b   : > { %7103 = vrot.lane.b32.xlu1 %v8768_v54, %s9524_s1  ;;  %v7062_v17 = vpack.i.bf16 %v8778_v50, %v8786_v35  ;;  %v8795_v44 = vsel %vm3958_vm14, %v3952_v12, %v3962_v38  ;;  %v8799_v2 = vsel %vm3957_vm15, %v3949_v24, %v3961_v25  ;;  %vm2373_vm14 = vcmask 23552  }
 0xc6c   : > { %v7082_v28 = vpack.i.bf16 %v8795_v44, %v8799_v2  ;;  %vm2407_vm15 = vcmask 31744  }
 0xc6d   : > { %7058 = vrot.lane.b32.xlu0 %v7057_v41, %s9523_s24 }
 0xc6f   : > { %7108 = vrot.lane.b32.xlu1 %v8783_v31, %s9524_s1 }
 0xc71   : > { %7063 = vrot.lane.b32.xlu0 %v7062_v17, %s9523_s24 }
 0xc73   : > { %7123 = vrot.lane.b32.xlu1 %v8768_v54, %s7333_s5 }
 0xc75   : > { %7073 = vrot.lane.b32.xlu0 %v8622_v53, %s9523_s24 }
 0xc77   : > { %v6480_v45 = vpop.f32.mrf.mxu0 }
 0xc78   : > { %v4135_v27 = vadd.f32 %v6480_v45, %v8600_v13 }
 0xc79   : > { %v4126_v42 = vpop.f32.mrf.mxu0  ;;  %7083 = vrot.lane.b32.xlu0 %v7082_v28, %s9523_s24 }
 0xc7a   : > { %v4147_v0 = vmul.f32 0.2, %v4135_v27  ;;  %vm4143_vm1 = vcmp.gt.f32.partialorder %v4135_v27, 0.0  ;;  %v4127_v45 = vadd.f32 %v8600_v13, %v4126_v42  ;;  %v4661_v42 = vrot.slane %v8649_v1, 4 }
 0xc7b   : > { %v6481_v48 = vpop.f32.mrf.mxu0 }
 0xc7c   : > { %v4138_v7 = vadd.f32 %v6481_v48, %v8600_v13  ;;  %v8808_v12 = vsel %vm4143_vm1, %v4135_v27, %v4147_v0  ;;  %v4145_v27 = vmul.f32 0.2, %v4127_v45  ;;  %vm4141_vm5 = vcmp.gt.f32.partialorder %v4127_v45, 0.0 }
 0xc7d   : > { %7093 = vrot.lane.b32.xlu0 %v8612_v59, %s9523_s24  ;;  %v4129_v41 = vpop.f32.mrf.mxu0  ;;  %vm5410_vm1 = vcmask 39936  }
 0xc7e   : > { %vm4144_vm2 = vcmp.gt.f32.partialorder %v4138_v7, 0.0  ;;  %v4148_v53 = vmul.f32 0.2, %v4138_v7  ;;  %v4130_v25 = vadd.f32 %v8600_v13, %v4129_v41  ;;  %v8828_v48 = vsel %vm4141_vm5, %v4127_v45, %v4145_v27 }
 0xc7f   : > { %v4656_v41 = vrot.slane %v8662_v58, 4  ;;  %vm2409_vm5 = vcmask 64512  }
 0xc80   : > { %v8810_v24 = vsel %vm4144_vm2, %v4138_v7, %v4148_v53  ;;  %v4146_v59 = vmul.f32 0.2, %v4130_v25  ;;  %vm4142_vm3 = vcmp.gt.f32.partialorder %v4130_v25, 0.0  ;;  %v4664_v7 = vsel %vm1569_vm11, %v4661_v42, 0.0 }
 0xc81   : > { %7113 = vrot.lane.b32.xlu0 %v8700_v21, %s9523_s24  ;;  %v7137_v38 = vpack.i.bf16 %v8810_v24, %v8808_v12  ;;  %v4657_v53 = vrot.slane %v8658_v11, 4  ;;  %vm5415_vm2 = vcmask 48128  }
 0xc82   : > { %v8825_v21 = vsel %vm4142_vm3, %v4130_v25, %v4146_v59  ;;  %vm5420_vm3 = vcmask 56320  }
 0xc83   : > { %7138 = vrot.lane.b32.xlu1 %v7137_v38, %s7333_s5  ;;  %v7172_v13 = vpack.i.bf16 %v8825_v21, %v8828_v48 }
 0xc85   : > { %7118 = vrot.lane.b32.xlu0 %v8720_v60, %s9523_s24  ;;  %v7167_v60 = vpack.i.bf16 %v8744_v16, %v8740_v55 }
 0xc87   : > { %7153 = vrot.lane.b32.xlu1 %v8783_v31, %s7333_s5 }
 0xc89   : > { %7128 = vrot.lane.b32.xlu0 %v8687_v46, %s9523_s24  ;;  %v7182_v46 = vpack.i.bf16 %v8746_v9, %v8738_v40 }
 0xc8b   : > { %7163 = vrot.lane.b32.xlu1 %v7062_v17, %s9524_s1 }
 0xc8d   : > { %7133 = vrot.lane.b32.xlu0 %v7137_v38, %s9524_s1 }
 0xc8e   : > { %v8859_v25 = vpop.permute.xlu1 %6993 }
 0xc8f   : > { %7173 = vrot.lane.b32.xlu1 %v7172_v13, %s7333_s5  ;;  %v6995_v30 = vunpack.i.l.bf16 %v8859_v25 }
 0xc91   : > { %7143 = vrot.lane.b32.xlu0 %v7172_v13, %s9524_s1 }
 0xc92   : > { %v8867_v59 = vpop.permute.xlu1 %6998 }
 0xc93   : > { %7178 = vrot.lane.b32.xlu1 %v7082_v28, %s9524_s1 }
 0xc95   : > { %7148 = vrot.lane.b32.xlu0 %v8710_v29, %s9523_s24  ;;  %v4659_v29 = vrot.slane %v8647_v62, 4 }
 0xc97   : > { %7183 = vrot.lane.b32.xlu1 %v7182_v46, %s7333_s5  ;;  %v4662_v0 = vsel %vm1569_vm11, %v4659_v29, %v4661_v42  ;;  %v4660_v45 = vsel %vm1569_vm11, %v4657_v53, %v4659_v29  ;;  %v5659_v29 = vld [vmem:[%s9516_s4 + $0x1] sm:$0x1] }
 0xc99   : > { %7158 = vrot.lane.b32.xlu0 %v7182_v46, %s9524_s1  ;;  %v5696_v46 = vld [vmem:[%s9520_s10 + $0x2] ss:$0 sm:$0xff] }
 0xc9a   : > { %v1442_v42 = vadd.f32 %v5696_v46, %v7707_v26  ;;  %v5700_v26 = vld [vmem:[%s9538_s9] ss:$0 sm:$0xff]  ;;  %s872_s9 = scalar_lea.vmem %s9475_s27, %s9559_s8  ;;  %s7336_s8 = smov 10  }
 0xc9b   : > { %7193 = vrot.lane.b32.xlu1 %v7062_v17, %s7333_s5  ;;  %v7227_v17 = vpack.i.bf16 %v4664_v7, %v4662_v0 }
 0xc9c   : > { %v1448_v7 = vmul.f32 0.2, %v1442_v42  ;;  %vm1447_vm6 = vcmp.gt.f32.partialorder %v1442_v42, 0.0 }
 0xc9d   : > { %7168 = vrot.lane.b32.xlu0 %v7167_v60, %s9524_s1 }
 0xc9e   : > { %v1449_v22 = vsel %vm1447_vm6, %v1442_v42, %v1448_v7  ;;  %vm5429_vm6 = vcmask 72704  }
 0xc9f   : > { %7203 = vrot.lane.b32.xlu1 %v7167_v60, %s7333_s5  ;;  %v1457_v7 = vmul.f32 %v5700_v26, %v1449_v22 }
 0xca1   : > { %7188 = vrot.lane.b32.xlu0 %v8768_v54, %s9523_s24  ;;  %v4658_v54 = vsel %vm1569_vm11, %v4656_v41, %v4657_v53 }
 0xca3   : > { %7218 = vrot.lane.b32.xlu1 %v7082_v28, %s7333_s5  ;;  %v7222_v28 = vpack.i.bf16 %v4660_v45, %v4658_v54 }
 0xca5   : > { %7198 = vrot.lane.b32.xlu0 %v7137_v38, %s9523_s24  ;;  %v8865_v38 = vpop.permute.xlu0 %7003 }
 0xca6   : > { %v7006_v26 = vunpack.i.h.bf16 %v8865_v38 }
 0xca7   : > { %7228 = vrot.lane.b32.xlu1 %v7227_v17, %s9524_s1  ;;  %v1023_v17 = vadd.f32 %v5659_v29, %v7611_v57 }
 0xca9   : > { %7208 = vrot.lane.b32.xlu0 %v7172_v13, %s9523_s24  ;;  %v8872_v13 = vpop.permute.xlu1 %7008  ;;  %v1029_v46 = vmul.f32 0.2, %v1023_v17  ;;  %vm1028_vm7 = vcmp.gt.f32.partialorder %v1023_v17, 0.0 }
 0xcab   : > { %v1030_v32 = vsel %vm1028_vm7, %v1023_v17, %v1029_v46  ;;  %v7005_v46 = vunpack.i.l.bf16 %v8865_v38  ;;  %vm5434_vm7 = vcmask 80896  }
 0xcad   : > { %7213 = vrot.lane.b32.xlu0 %v8783_v31, %s9523_s24  ;;  %v8870_v27 = vpop.permute.xlu0 %7018  ;;  %v8880_v31 = vpop.permute.xlu1 %7013 }
 0xcb1   : > { %7223 = vrot.lane.b32.xlu0 %v7222_v28, %s9524_s1  ;;  %v8877_v60 = vpop.permute.xlu0 %7028  ;;  %v7024_v54 = vpop.permute.xlu1 %7023 }
 0xcb2   : > { %v7026_v17 = vunpack.i.h.bf16 %v7024_v54 }
 0xcbe   : > { %v7034_v0 = vpop.permute.xlu0 %7033 }
 0xcbf   : > { %v7036_v53 = vunpack.i.h.bf16 %v7034_v0  ;;  %v7035_v41 = vunpack.i.l.bf16 %v7034_v0 }
 0xcc1   : > { %v4523_v5 = vsel %vm1634_vm12, %v8795_v44, %v7036_v53  ;;  %v4522_v23 = vsel %vm1634_vm12, %v8799_v2, %v7035_v41  ;;  %v1031_v44 = vld [vmem:[%s9539_s12] sm:$0x1]  ;;  %s7338_s12 = smov 11  }
 0xcc2   : > { %v7044_v45 = vpop.permute.xlu0 %7043 }
 0xcc3   : > { %v7046_v28 = vunpack.i.h.bf16 %v7044_v45  ;;  %v7045_v19 = vunpack.i.l.bf16 %v7044_v45  ;;  %v4701_v45 = vpack.c.bf16 %v4523_v5, %v4522_v23 }
 0xcc5   : > { %v4521_v57 = vsel %vm1634_vm12, %v8778_v50, %v7046_v28  ;;  %v4520_v29 = vsel %vm1634_vm12, %v8786_v35, %v7045_v19  ;;  %v8897_v0 = vpop.permute.xlu1 %7038  ;;  %v1458_v50 = vsel %vm9497_vm0, %v1457_v7, 0.0  ;;  %v1032_v19 = vmul.f32 %v1031_v44, %v1030_v32 }
 0xcc6   : > { %v4700_v42 = vpack.c.bf16 %v4521_v57, %v4520_v29  ;;  %v7025_v57 = vunpack.i.l.bf16 %v7024_v54  ;;  %vm5448_vm0 = vcmask 105472  }
 0xcc7   : > { %v1034_v53 = vsel %vm1033_vm8, %v1032_v19, 0.0  ;;  %vm5439_vm8 = vcmask 89088  }
 0xcc8   : > { %6546 = vmatprep.mubr.msk.bf16.mxu1 %vm9498_vm13, %v4700_v42  ;;  %v8915_v42 = vld [vmem:[#allocation4] ss:$0 sm:$0xff] }
 0xcc9   : > { %v8903_v2 = vpop.permute.xlu1 %7048  ;;  %6547 = vmatmul.mubr.msk.bf16.vlgmr.msra.gmra.mxu1 %vm9498_vm13, %v4701_v45  ;;  %9540 = vst [vmem:[#allocation19_spill] sm:$0xff] %v8915_v42  ;;  %v2269_v7 = vadd.f32 %v8915_v42, %v8101_v10  ;;  %v7016_v45 = vunpack.i.h.bf16 %v8880_v31  ;;  %v4312_v10 = vsel %vm1634_vm12, %v8662_v58, %v7005_v46 }
 0xccb   : > { %1459 = vadd.xlane.f32.xlu1 %v1458_v50 }
 0xccd   : > { %v7069_v35 = vpop.permute.xlu1 %7068 }
 0xcce   : > { %v7071_v3 = vunpack.i.h.bf16 %v7069_v35  ;;  %v7070_v8 = vunpack.i.l.bf16 %v7069_v35 }
 0xcd0   : > { %1035 = vadd.xlane.f32.xlu0 %v1034_v53  ;;  %v7015_v53 = vunpack.i.l.bf16 %v8880_v31 }
 0xcd1   : > { %v8907_v5 = vpop.permute.xlu1 %7078 }
 0xcd5   : > { %v8909_v23 = vpop.permute.xlu1 %7088 }
 0xcd9   : > { %v8920_v44 = vpop.permute.xlu1 %7098 }
 0xcdb   : > { %v7054_v22 = vpop.permute.xlu0 %7053 }
 0xcdc   : > { %v7056_v41 = vunpack.i.h.bf16 %v7054_v22  ;;  %v7055_v28 = vunpack.i.l.bf16 %v7054_v22 }
 0xcde   : > { %v4289_v29 = vsel %vm918_vm4, %v7056_v41, %v7026_v17  ;;  %v4271_v32 = vsel %vm1569_vm11, 0.0, %v7055_v28  ;;  %v6996_v41 = vunpack.i.h.bf16 %v8859_v25  ;;  %v4313_v28 = vsel %vm1634_vm12, %v8658_v11, %v7006_v26 }
 0xcdf   : > { %v4288_v50 = vsel %vm918_vm4, %v4271_v32, %v7025_v57  ;;  %v7059_v19 = vpop.permute.xlu0 %7058  ;;  %v4293_v22 = vsel %vm1634_vm12, %v4289_v29, %v7026_v17  ;;  %v7031_v32 = vunpack.i.h.bf16 %v8877_v60  ;;  %v7030_v17 = vunpack.i.l.bf16 %v8877_v60 }
 0xce0   : > { %v7061_v38 = vunpack.i.h.bf16 %v7059_v19  ;;  %v7060_v54 = vunpack.i.l.bf16 %v7059_v19  ;;  %v4292_v42 = vsel %vm1634_vm12, %v4288_v50, %v7025_v57  ;;  %v4684_v57 = vpack.c.bf16 %v4313_v28, %v4312_v10 }
 0xce1   : > { %v4682_v26 = vpack.c.bf16 %v4293_v22, %v4292_v42  ;;  %v7011_v25 = vunpack.i.h.bf16 %v8872_v13  ;;  %v7010_v50 = vunpack.i.l.bf16 %v8872_v13  ;;  %v4314_v22 = vsel %vm1634_vm12, %v8647_v62, %v6995_v30 }
 0xce2   : > { %v4291_v31 = vsel %vm918_vm4, %v7061_v38, %v7016_v45  ;;  %v4290_v19 = vsel %vm918_vm4, %v7060_v54, %v7015_v53  ;;  %v8940_v38 = vpop.permute.xlu1 %7103  ;;  %v7020_v10 = vunpack.i.l.bf16 %v8870_v27  ;;  %vm1045_vm11 = vcmask 0  }
 0xce3   : > { %v4295_v29 = vsel %vm1634_vm12, %v4291_v31, %v7016_v45  ;;  %v4294_v20 = vsel %vm1634_vm12, %v4290_v19, %v7015_v53  ;;  %v7064_v11 = vpop.permute.xlu0 %7063  ;;  %6510 = vmatprep.mubr.msk.bf16.mxu0 %vm9498_vm13, %v4682_v26  ;;  %v4340_v42 = vsel %vm918_vm4, %v7030_v17, %v7010_v50  ;;  %v4315_v53 = vsel %vm1634_vm12, %v8649_v1, %v6996_v41 }
 0xce4   : > { %v4683_v58 = vpack.c.bf16 %v4295_v29, %v4294_v20  ;;  %v7066_v46 = vunpack.i.h.bf16 %v7064_v11  ;;  %v7065_v54 = vunpack.i.l.bf16 %v7064_v11  ;;  %v4341_v20 = vsel %vm918_vm4, %v7031_v32, %v7011_v25 }
 0xce5   : > { %v4344_v31 = vsel %vm1634_vm12, %v4340_v42, %v7010_v50  ;;  %v4345_v19 = vsel %vm1634_vm12, %v4341_v20, %v7011_v25  ;;  %v7001_v17 = vunpack.i.h.bf16 %v8867_v59  ;;  %v4685_v62 = vpack.c.bf16 %v4315_v53, %v4314_v22 }
 0xce6   : > { %v4549_v60 = vsel %vm918_vm4, %v7066_v46, %v7071_v3  ;;  %6511 = vmatmul.mubr.msk.bf16.vlgmr.msra.gmra.mxu0 %vm9498_vm13, %v4683_v58  ;;  %2319 = vrot.lane.b32.xlu0 %v2269_v7, %s7334_s13  ;;  %v4548_v45 = vsel %vm918_vm4, %v7065_v54, %v7070_v8  ;;  %v7021_v7 = vunpack.i.h.bf16 %v8870_v27  ;;  %v8962_v29 = vpop.permute.xlu1 %7108  ;;  %v7090_v1 = vunpack.i.l.bf16 %v8909_v23 }
 0xce7   : > { %v7074_v13 = vpop.permute.xlu0 %7073  ;;  %6514 = vmatprep.mubr.msk.bf16.mxu0 %vm9498_vm13, %v4684_v57  ;;  %v4553_v35 = vsel %vm1634_vm12, %v4549_v60, %v7071_v3  ;;  %v4552_v28 = vsel %vm1634_vm12, %v4548_v45, %v7070_v8  ;;  %v7000_v3 = vunpack.i.l.bf16 %v8867_v59  ;;  %v7091_v8 = vunpack.i.h.bf16 %v8909_v23 }
 0xce8   : > { %v4702_v32 = vpack.c.bf16 %v4553_v35, %v4552_v28  ;;  %v4343_v11 = vsel %vm918_vm4, %v7021_v7, %v7001_v17  ;;  %v4686_v58 = vpack.c.bf16 %v4345_v19, %v4344_v31  ;;  %v7051_v46 = vunpack.i.h.bf16 %v8903_v2 }
 0xce9   : > { %v4342_v26 = vsel %vm918_vm4, %v7020_v10, %v7000_v3  ;;  %v7050_v59 = vunpack.i.l.bf16 %v8903_v2  ;;  %v4347_v2 = vsel %vm1634_vm12, %v4343_v11, %v7001_v17  ;;  %v7076_v53 = vunpack.i.h.bf16 %v7074_v13 }
 0xcea   : > { %6550 = vmatprep.mubr.msk.bf16.mxu1 %vm9498_vm13, %v4702_v32  ;;  %v8977_v20 = vpop.permute.xlu1 %7123  ;;  %v4346_v42 = vsel %vm1634_vm12, %v4342_v26, %v7000_v3  ;;  %v4365_v45 = vsel %vm1634_vm12, %v8616_v63, %v7051_v46  ;;  %v7075_v22 = vunpack.i.l.bf16 %v7074_v13  ;;  %v7041_v7 = vunpack.i.h.bf16 %v8897_v0 }
 0xceb   : > { %v7084_v30 = vpop.permute.xlu0 %7083  ;;  %v4364_v35 = vsel %vm1634_vm12, %v8614_v49, %v7050_v59  ;;  %v4687_v10 = vpack.c.bf16 %v4347_v2, %v4346_v42  ;;  %v7040_v32 = vunpack.i.l.bf16 %v8897_v0  ;;  %v7081_v31 = vunpack.i.h.bf16 %v8907_v5 }
 0xcec   : > { %v7086_v27 = vunpack.i.h.bf16 %v7084_v30  ;;  %v7085_v41 = vunpack.i.l.bf16 %v7084_v30  ;;  %v7080_v19 = vunpack.i.l.bf16 %v8907_v5  ;;  %v4688_v63 = vpack.c.bf16 %v4365_v45, %v4364_v35 }
 0xced   : > { %v4393_v49 = vsel %vm918_vm4, %v7076_v53, %v7081_v31  ;;  %v4367_v30 = vsel %vm1634_vm12, %v8608_v39, %v7041_v7  ;;  %v7106_v0 = vunpack.i.h.bf16 %v8940_v38  ;;  %v4366_v5 = vsel %vm1634_vm12, %v8606_v18, %v7040_v32 }
 0xcee   : > { %v4551_v57 = vsel %vm918_vm4, %v7086_v27, %v7091_v8  ;;  %v4550_v25 = vsel %vm918_vm4, %v7085_v41, %v7090_v1  ;;  %6515 = vmatmul.mubr.msk.bf16.gmra.mxu0 %vm9498_vm13, %v4685_v62  ;;  %v4392_v3 = vsel %vm918_vm4, %v7075_v22, %v7080_v19  ;;  %v7105_v62 = vunpack.i.l.bf16 %v8940_v38 }
 0xcef   : > { %v7094_v50 = vpop.permute.xlu0 %7093  ;;  %6518 = vmatprep.mubr.msk.bf16.mxu0 %vm9498_vm13, %v4686_v58  ;;  %v4554_v23 = vsel %vm1634_vm12, %v4550_v25, %v7090_v1  ;;  %v4555_v54 = vsel %vm1634_vm12, %v4551_v57, %v7091_v8  ;;  %v4396_v41 = vsel %vm1634_vm12, %v4392_v3, %v7080_v19  ;;  %v4397_v11 = vsel %vm1634_vm12, %v4393_v49, %v7081_v31 }
 0xcf0   : > { %v4703_v60 = vpack.c.bf16 %v4555_v54, %v4554_v23  ;;  %v7096_v8 = vunpack.i.h.bf16 %v7094_v50  ;;  %v7095_v1 = vunpack.i.l.bf16 %v7094_v50  ;;  %v7101_v26 = vunpack.i.h.bf16 %v8920_v44 }
 0xcf1   : > { %v7100_v58 = vunpack.i.l.bf16 %v8920_v44  ;;  %v4417_v46 = vsel %vm1634_vm12, %v8712_v4, %v7106_v0  ;;  %v4689_v59 = vpack.c.bf16 %v4367_v30, %v4366_v5  ;;  %v4416_v18 = vsel %vm1634_vm12, %v8716_v47, %v7105_v62 }
 0xcf2   : > { %6551 = vmatmul.mubr.msk.bf16.gmra.mxu1 %vm9498_vm13, %v4703_v60  ;;  %v4395_v38 = vsel %vm918_vm4, %v7096_v8, %v7101_v26  ;;  %v4690_v50 = vpack.c.bf16 %v4397_v11, %v4396_v41  ;;  %v7111_v44 = vunpack.i.h.bf16 %v8962_v29  ;;  %v4692_v47 = vpack.c.bf16 %v4417_v46, %v4416_v18 }
 0xcf3   : > { %v7114_v28 = vpop.permute.xlu0 %7113  ;;  %v4394_v57 = vsel %vm918_vm4, %v7095_v1, %v7100_v58  ;;  %v4399_v60 = vsel %vm1634_vm12, %v4395_v38, %v7101_v26  ;;  %v7110_v42 = vunpack.i.l.bf16 %v8962_v29  ;;  %v7125_v2 = vunpack.i.l.bf16 %v8977_v20 }
 0xcf4   : > { %v4398_v4 = vsel %vm1634_vm12, %v4394_v57, %v7100_v58  ;;  %v7116_v22 = vunpack.i.h.bf16 %v7114_v28  ;;  %v7115_v7 = vunpack.i.l.bf16 %v7114_v28  ;;  %v7126_v31 = vunpack.i.h.bf16 %v8977_v20 }
 0xcf5   : > { %v8990_v17 = vpop.permute.xlu1 %7138  ;;  %v4691_v3 = vpack.c.bf16 %v4399_v60, %v4398_v4  ;;  %v4418_v46 = vsel %vm1634_vm12, %v8702_v61, %v7110_v42 }
 0xcf6   : > { %6519 = vmatmul.mubr.msk.bf16.gmra.mxu0 %vm9498_vm13, %v4687_v10 }
 0xcf7   : > { %v7119_v13 = vpop.permute.xlu0 %7118  ;;  %6522 = vmatprep.mubr.msk.bf16.mxu0 %vm9498_vm13, %v4688_v63 }
 0xcf8   : > { %v7120_v23 = vunpack.i.l.bf16 %v7119_v13  ;;  %v7121_v19 = vunpack.i.h.bf16 %v7119_v13 }
 0xcf9   : > { %v9002_v27 = vpop.permute.xlu1 %7153 }
 0xcfa   : > { %v4444_v63 = vsel %vm918_vm4, %v7120_v23, %v7125_v2  ;;  %v4445_v58 = vsel %vm918_vm4, %v7121_v19, %v7126_v31 }
 0xcfb   : > { %v7129_v39 = vpop.permute.xlu0 %7128  ;;  %v4448_v57 = vsel %vm1634_vm12, %v4444_v63, %v7125_v2  ;;  %v4449_v61 = vsel %vm1634_vm12, %v4445_v58, %v7126_v31 }
 0xcfc   : > { %v7131_v62 = vunpack.i.h.bf16 %v7129_v39  ;;  %v7130_v8 = vunpack.i.l.bf16 %v7129_v39 }
 0xcfd   : > { %v9014_v25 = vpop.permute.xlu1 %7163 }
 0xcfe   : > { %6523 = vmatmul.mubr.msk.bf16.gmra.mxu0 %vm9498_vm13, %v4689_v59  ;;  %v7141_v59 = vunpack.i.h.bf16 %v8990_v17  ;;  %v7165_v42 = vunpack.i.l.bf16 %v9014_v25 }
 0xcff   : > { %v7134_v54 = vpop.permute.xlu0 %7133  ;;  %6526 = vmatprep.mubr.msk.bf16.mxu0 %vm9498_vm13, %v4690_v50 }
 0xd00   : > { %v7136_v45 = vunpack.i.h.bf16 %v7134_v54  ;;  %v7135_v35 = vunpack.i.l.bf16 %v7134_v54  ;;  %v4603_v50 = vsel %vm918_vm4, %v7131_v62, %v7141_v59  ;;  %v4468_v63 = vsel %vm1634_vm12, %v8762_v43, %v7165_v42 }
 0xd01   : > { %v7174_v53 = vpop.permute.xlu1 %7173 }
 0xd02   : > { %v7176_v10 = vunpack.i.h.bf16 %v7174_v53  ;;  %v7175_v32 = vunpack.i.l.bf16 %v7174_v53  ;;  %v4575_v28 = vsel %vm1634_vm12, %v8683_v6, %v7136_v45  ;;  %v4574_v1 = vsel %vm1634_vm12, %v8680_v34, %v7135_v35 }
 0xd03   : > { %v7144_v49 = vpop.permute.xlu0 %7143  ;;  %v4419_v6 = vsel %vm1634_vm12, %v8704_v37, %v7111_v44  ;;  %v4705_v18 = vpack.c.bf16 %v4575_v28, %v4574_v1  ;;  %v7155_v44 = vunpack.i.l.bf16 %v9002_v27 }
 0xd04   : > { %v4600_v30 = vsel %vm918_vm4, %v7115_v7, %v7175_v32  ;;  %v4601_v29 = vsel %vm918_vm4, %v7116_v22, %v7176_v10  ;;  %v7146_v0 = vunpack.i.h.bf16 %v7144_v49  ;;  %v7145_v5 = vunpack.i.l.bf16 %v7144_v49 }
 0xd05   : > { %v9031_v20 = vpop.permute.xlu1 %7178  ;;  %v4604_v13 = vsel %vm1634_vm12, %v4600_v30, %v7175_v32  ;;  %v4605_v41 = vsel %vm1634_vm12, %v4601_v29, %v7176_v10  ;;  %v4693_v60 = vpack.c.bf16 %v4419_v6, %v4418_v46  ;;  %v4694_v22 = vpack.c.bf16 %v4449_v61, %v4448_v57 }
 0xd06   : > { %v4573_v11 = vsel %vm1634_vm12, %v8689_v52, %v7146_v0  ;;  %v4572_v26 = vsel %vm1634_vm12, %v8695_v14, %v7145_v5  ;;  %6527 = vmatmul.mubr.msk.bf16.gmra.mxu0 %vm9498_vm13, %v4691_v3  ;;  %v7140_v52 = vunpack.i.l.bf16 %v8990_v17  ;;  %v4706_v37 = vpack.c.bf16 %v4605_v41, %v4604_v13 }
 0xd07   : > { %v7149_v34 = vpop.permute.xlu0 %7148  ;;  %6530 = vmatprep.mubr.msk.bf16.mxu0 %vm9498_vm13, %v4692_v47  ;;  %v4704_v39 = vpack.c.bf16 %v4573_v11, %v4572_v26  ;;  %v7156_v17 = vunpack.i.h.bf16 %v9002_v27  ;;  %v7166_v47 = vunpack.i.h.bf16 %v9014_v25  ;;  %v4607_v10 = vsel %vm1634_vm12, %v4603_v50, %v7141_v59 }
 0xd08   : > { %v7150_v14 = vunpack.i.l.bf16 %v7149_v34  ;;  %v4602_v23 = vsel %vm918_vm4, %v7130_v8, %v7140_v52  ;;  %v7151_v54 = vunpack.i.h.bf16 %v7149_v34  ;;  %v7180_v8 = vunpack.i.l.bf16 %v9031_v20 }
 0xd09   : > { %v9048_v38 = vpop.permute.xlu1 %7183  ;;  %6554 = vmatprep.mubr.msk.bf16.mxu1 %vm9498_vm13, %v4704_v39  ;;  %v4606_v7 = vsel %vm1634_vm12, %v4602_v23, %v7140_v52  ;;  %v4469_v19 = vsel %vm1634_vm12, %v8752_v51, %v7166_v47 }
 0xd0a   : > { %6555 = vmatmul.mubr.msk.bf16.gmra.mxu1 %vm9498_vm13, %v4705_v18  ;;  %v4446_v35 = vsel %vm918_vm4, %v7150_v14, %v7155_v44  ;;  %v4447_v27 = vsel %vm918_vm4, %v7151_v54, %v7156_v17  ;;  %v4707_v49 = vpack.c.bf16 %v4607_v10, %v4606_v7  ;;  %v4696_v51 = vpack.c.bf16 %v4469_v19, %v4468_v63 }
 0xd0b   : > { %v7159_v4 = vpop.permute.xlu0 %7158  ;;  %6558 = vmatprep.mubr.msk.bf16.mxu1 %vm9498_vm13, %v4706_v37  ;;  %v4450_v3 = vsel %vm1634_vm12, %v4446_v35, %v7155_v44  ;;  %v4451_v0 = vsel %vm1634_vm12, %v4447_v27, %v7156_v17  ;;  %v4470_v39 = vsel %vm1634_vm12, %v8775_v56, %v7180_v8  ;;  %v7186_v56 = vunpack.i.h.bf16 %v9048_v38 }
 0xd0c   : > { %v7161_v2 = vunpack.i.h.bf16 %v7159_v4  ;;  %v7160_v45 = vunpack.i.l.bf16 %v7159_v4  ;;  %v4695_v1 = vpack.c.bf16 %v4451_v0, %v4450_v3  ;;  %v7185_v54 = vunpack.i.l.bf16 %v9048_v38 }
 0xd0d   : > { %v7194_v53 = vpop.permute.xlu1 %7193 }
 0xd0e   : > { %v4621_v32 = vsel %vm1634_vm12, %v8825_v21, %v7161_v2  ;;  %v4620_v31 = vsel %vm1634_vm12, %v8828_v48, %v7160_v45  ;;  %6531 = vmatmul.mubr.msk.bf16.gmra.mxu0 %vm9498_vm13, %v4693_v60  ;;  %v7181_v48 = vunpack.i.h.bf16 %v9031_v20  ;;  %v7196_v13 = vunpack.i.h.bf16 %v7194_v53 }
 0xd0f   : > { %v7169_v25 = vpop.permute.xlu0 %7168  ;;  %6534 = vmatprep.mubr.msk.bf16.mxu0 %vm9498_vm13, %v4694_v22  ;;  %v4708_v21 = vpack.c.bf16 %v4621_v32, %v4620_v31  ;;  %v7195_v41 = vunpack.i.l.bf16 %v7194_v53 }
 0xd10   : > { %v7171_v30 = vunpack.i.h.bf16 %v7169_v25  ;;  %v7170_v29 = vunpack.i.l.bf16 %v7169_v25  ;;  %v4471_v6 = vsel %vm1634_vm12, %v8770_v36, %v7181_v48 }
 0xd11   : > { %v7204_v5 = vpop.permute.xlu1 %7203  ;;  %v4697_v23 = vpack.c.bf16 %v4471_v6, %v4470_v39 }
 0xd12   : > { %6559 = vmatmul.mubr.msk.bf16.gmra.mxu1 %vm9498_vm13, %v4707_v49  ;;  %v4623_v11 = vsel %vm1634_vm12, %v8810_v24, %v7171_v30  ;;  %v4622_v26 = vsel %vm1634_vm12, %v8808_v12, %v7170_v29  ;;  %v7206_v52 = vunpack.i.h.bf16 %v7204_v5  ;;  %v7205_v12 = vunpack.i.l.bf16 %v7204_v5 }
 0xd13   : > { %v7189_v62 = vpop.permute.xlu0 %7188  ;;  %6562 = vmatprep.mubr.msk.bf16.mxu1 %vm9498_vm13, %v4708_v21  ;;  %v4709_v59 = vpack.c.bf16 %v4623_v11, %v4622_v26 }
 0xd14   : > { %v7191_v43 = vunpack.i.h.bf16 %v7189_v62  ;;  %v7190_v28 = vunpack.i.l.bf16 %v7189_v62 }
 0xd15   : > { %v7219_v18 = vpop.permute.xlu1 %7218 }
 0xd16   : > { %6535 = vmatmul.mubr.msk.bf16.gmra.mxu0 %vm9498_vm13, %v4695_v1  ;;  %v4497_v58 = vsel %vm918_vm4, %v7191_v43, %v7196_v13  ;;  %v4496_v20 = vsel %vm918_vm4, %v7190_v28, %v7195_v41  ;;  %v7221_v2 = vunpack.i.h.bf16 %v7219_v18  ;;  %v7220_v22 = vunpack.i.l.bf16 %v7219_v18  ;;  %v1037_v28 = vld [vmem:[#allocation3] sm:$0x1] }
 0xd17   : > { %v7199_v34 = vpop.permute.xlu0 %7198  ;;  %6538 = vmatprep.mubr.msk.bf16.mxu0 %vm9498_vm13, %v4696_v51  ;;  %v4500_v36 = vsel %vm1634_vm12, %v4496_v20, %v7195_v41  ;;  %v4501_v14 = vsel %vm1634_vm12, %v4497_v58, %v7196_v13 }
 0xd18   : > { %v7201_v46 = vunpack.i.h.bf16 %v7199_v34  ;;  %v7200_v24 = vunpack.i.l.bf16 %v7199_v34  ;;  %v4698_v44 = vpack.c.bf16 %v4501_v14, %v4500_v36 }
 0xd19   : > { %v7229_v45 = vpop.permute.xlu1 %7228 }
 0xd1a   : > { %6563 = vmatmul.mubr.msk.bf16.gmra.mxu1 %vm9498_vm13, %v4709_v59  ;;  %v4651_v37 = vsel %vm918_vm4, %v7201_v46, %v7206_v52  ;;  %v4650_v57 = vsel %vm918_vm4, %v7200_v24, %v7205_v12  ;;  %v7231_v31 = vunpack.i.h.bf16 %v7229_v45  ;;  %v7230_v25 = vunpack.i.l.bf16 %v7229_v45 }
 0xd1b   : > { %v7209_v50 = vpop.permute.xlu0 %7208  ;;  %v4654_v47 = vsel %vm1634_vm12, %v4650_v57, %v7205_v12  ;;  %v4655_v42 = vsel %vm1634_vm12, %v4651_v37, %v7206_v52 }
 0xd1c   : > { %v7211_v61 = vunpack.i.h.bf16 %v7209_v50  ;;  %v7210_v17 = vunpack.i.l.bf16 %v7209_v50  ;;  %v4711_v32 = vpack.c.bf16 %v4655_v42, %v4654_v47  ;;  %v4681_v48 = vsel %vm1634_vm12, %v8744_v16, %v7231_v31 }
 0xd1d   : > { %v4680_v5 = vsel %vm1634_vm12, %v8740_v55, %v7230_v25 }
 0xd1e   : > { %v4649_v4 = vsel %vm918_vm4, %v7211_v61, %v7186_v56  ;;  %v4648_v60 = vsel %vm918_vm4, %v7210_v17, %v7185_v54  ;;  %6539 = vmatmul.mubr.msk.bf16.gmra.mxu0 %vm9498_vm13, %v4697_v23  ;;  %v4713_v43 = vpack.c.bf16 %v4681_v48, %v4680_v5 }
 0xd1f   : > { %v7214_v35 = vpop.permute.xlu0 %7213  ;;  %6542 = vmatprep.mubr.msk.bf16.mxu0 %vm9498_vm13, %v4698_v44  ;;  %v4652_v38 = vsel %vm1634_vm12, %v4648_v60, %v7185_v54  ;;  %v4653_v53 = vsel %vm1634_vm12, %v4649_v4, %v7186_v56 }
 0xd20   : > { %v7216_v7 = vunpack.i.h.bf16 %v7214_v35  ;;  %v7215_v10 = vunpack.i.l.bf16 %v7214_v35  ;;  %v4710_v27 = vpack.c.bf16 %v4653_v53, %v4652_v38 }
 0xd22   : > { %v4499_v19 = vsel %vm918_vm4, %v7216_v7, %v7221_v2  ;;  %v4498_v63 = vsel %vm918_vm4, %v7215_v10, %v7220_v22  ;;  %6566 = vmatprep.mubr.msk.bf16.mxu1 %vm9498_vm13, %v4710_v27 }
 0xd23   : > { %v7224_v49 = vpop.permute.xlu0 %7223  ;;  %6567 = vmatmul.mubr.msk.bf16.gmra.mxu1 %vm9498_vm13, %v4711_v32  ;;  %v4502_v3 = vsel %vm1634_vm12, %v4498_v63, %v7220_v22  ;;  %v4503_v30 = vsel %vm1634_vm12, %v4499_v19, %v7221_v2 }
 0xd24   : > { %v7226_v29 = vunpack.i.h.bf16 %v7224_v49  ;;  %v7225_v21 = vunpack.i.l.bf16 %v7224_v49  ;;  %v4699_v0 = vpack.c.bf16 %v4503_v30, %v4502_v3 }
 0xd26   : > { %v4679_v62 = vsel %vm1634_vm12, %v8746_v9, %v7226_v29  ;;  %v4678_v51 = vsel %vm1634_vm12, %v8738_v40, %v7225_v21  ;;  %6543 = vmatmul.mubr.msk.bf16.gmra.mxu0 %vm9498_vm13, %v4699_v0  ;;  %v9129_v9 = vld [vmem:[#allocation5] ss:$0 sm:$0xff] }
 0xd27   : > { %v4712_v8 = vpack.c.bf16 %v4679_v62, %v4678_v51 }
 0xd29   : > { %6570 = vmatprep.mubr.msk.bf16.mxu1 %vm9498_vm13, %v4712_v8 }
 0xd2b   : > { %6571 = vmatmul.mubr.msk.bf16.gmra.mxu1 %vm9498_vm13, %v4713_v43  ;;  %vm5453_vm13 = vcmask 113664  }
 0xd59   : > { %v1036_v16 = vpop.xlane.xlu0 %1035 }
 0xd5a   : > { %v1038_v1 = vadd.f32 %v1037_v28, %v1036_v16 }
 0xd5c   : > { %v5663_v13 = vmul.f32 -1.442695, %v1038_v1 }
 0xd5e   : > { %7313 = vpow2.f32 %v5663_v13 }
 0xd6b   : > { %v7314_v55 = vpop.eup %7313 }
 0xd6c   : > { %v1042_v41 = vadd.f32 1.0, %v7314_v55 }
 0xd6e   : > { %7315 = vrcp.f32 %v1042_v41 }
 0xd7b   : > { %v7316_v40 = vpop.eup %7315 }
 0xd7c   : > { %1046 = vst.msk [vmem:[%s872_s9] sm:$0x1] %vm1045_vm11, %v7316_v40  ;;  %s7341_s9 = smov 4   ;;  %vm2411_vm11 = vcmask 97280  }
 0xd89   : > { %v6548_v11 = vpop.f32.mrf.mxu1 }
 0xd8a   : > { %v5052_v26 = vadd.f32 %v6548_v11, %v9129_v9 }
 0xd8b   : > { %v5043_v6 = vpop.f32.mrf.mxu1 }
 0xd8c   : > { %5290 = vrot.lane.b32.xlu0 %v5052_v26, %s7335_s3  ;;  %v5044_v20 = vadd.f32 %v9129_v9, %v5043_v6 }
 0xd8d   : > { %v6549_v58 = vpop.f32.mrf.mxu1 }
 0xd8e   : > { %v5055_v34 = vadd.f32 %v6549_v58, %v9129_v9 }
 0xd8f   : > { %v5046_v39 = vpop.f32.mrf.mxu1 }
 0xd90   : > { %5292 = vrot.lane.b32.xlu1 %v5055_v34, %s7335_s3  ;;  %5286 = vrot.lane.b32.xlu0 %v5044_v20, %s7335_s3  ;;  %v5047_v46 = vadd.f32 %v9129_v9, %v5046_v39 }
 0xd94   : > { %5288 = vrot.lane.b32.xlu1 %v5047_v46, %s7335_s3  ;;  %s7342_s3 = smov 13  }
 0xda6   : > { %v9135_v24 = vpop.f32.mrf.mxu0 }
 0xda8   : > { %v9137_v59 = vpop.f32.mrf.mxu0 }
 0xdaa   : > { %v9139_v52 = vpop.f32.mrf.mxu0 }
 0xdac   : > { %v9141_v12 = vpop.f32.mrf.mxu0 }
 0xdae   : > { %v6516_v18 = vpop.f32.mrf.mxu0 }
 0xdaf   : > { %v4924_v45 = vadd.f32 %v6516_v18, %v9129_v9 }
 0xdb0   : > { %v4915_v36 = vpop.f32.mrf.mxu0 }
 0xdb1   : > { %v4916_v53 = vadd.f32 %v9129_v9, %v4915_v36 }
 0xdb2   : > { %v6517_v14 = vpop.f32.mrf.mxu0  ;;  %v6552_v37 = vpop.f32.mrf.mxu1 }
 0xdb3   : > { %v5068_v57 = vadd.f32 %v6552_v37, %v9129_v9  ;;  %v4927_v7 = vadd.f32 %v6517_v14, %v9129_v9 }
 0xdb4   : > { %v4918_v50 = vpop.f32.mrf.mxu0  ;;  %v5059_v23 = vpop.f32.mrf.mxu1 }
 0xdb5   : > { %5306 = vrot.lane.b32.xlu0 %v5068_v57, %s7336_s8  ;;  %v5060_v61 = vadd.f32 %v9129_v9, %v5059_v23  ;;  %v4919_v32 = vadd.f32 %v9129_v9, %v4918_v50 }
 0xdb6   : > { %v6520_v56 = vpop.f32.mrf.mxu0  ;;  %v6553_v54 = vpop.f32.mrf.mxu1 }
 0xdb7   : > { %v5071_v17 = vadd.f32 %v6553_v54, %v9129_v9  ;;  %v4940_v47 = vadd.f32 %v6520_v56, %v9129_v9 }
 0xdb8   : > { %v4931_v44 = vpop.f32.mrf.mxu0  ;;  %v5062_v4 = vpop.f32.mrf.mxu1 }
 0xdb9   : > { %5308 = vrot.lane.b32.xlu1 %v5071_v17, %s7336_s8  ;;  %5302 = vrot.lane.b32.xlu0 %v5060_v61, %s7336_s8  ;;  %v5063_v42 = vadd.f32 %v9129_v9, %v5062_v4  ;;  %v4932_v35 = vadd.f32 %v9129_v9, %v4931_v44 }
 0xdba   : > { %v6521_v60 = vpop.f32.mrf.mxu0 }
 0xdbb   : > { %v4943_v49 = vadd.f32 %v6521_v60, %v9129_v9 }
 0xdbc   : > { %v4934_v2 = vpop.f32.mrf.mxu0 }
 0xdbd   : > { %5304 = vrot.lane.b32.xlu1 %v5063_v42, %s7336_s8  ;;  %5178 = vrot.lane.b32.xlu0 %v4940_v47, %s7337_s0  ;;  %v4935_v21 = vadd.f32 %v9129_v9, %v4934_v2  ;;  %s7343_s8 = smov 5  }
 0xdbe   : > { %v6524_v38 = vpop.f32.mrf.mxu0 }
 0xdbf   : > { %v4956_v0 = vadd.f32 %v6524_v38, %v9129_v9 }
 0xdc0   : > { %v4947_v22 = vpop.f32.mrf.mxu0 }
 0xdc1   : > { %5162 = vrot.lane.b32.xlu1 %v4924_v45, %s7334_s13  ;;  %5174 = vrot.lane.b32.xlu0 %v4932_v35, %s7337_s0  ;;  %v4948_v28 = vadd.f32 %v9129_v9, %v4947_v22 }
 0xdc2   : > { %v6525_v10 = vpop.f32.mrf.mxu0 }
 0xdc3   : > { %v4959_v16 = vadd.f32 %v6525_v10, %v9129_v9 }
 0xdc4   : > { %v4950_v25 = vpop.f32.mrf.mxu0 }
 0xdc5   : > { %5158 = vrot.lane.b32.xlu1 %v4916_v53, %s7334_s13  ;;  %v4951_v26 = vadd.f32 %v9129_v9, %v4950_v25 }
 0xdc6   : > { %v6528_v30 = vpop.f32.mrf.mxu0 }
 0xdc7   : > { %v4972_v36 = vadd.f32 %v6528_v30, %v9129_v9 }
 0xdc8   : > { %v4963_v48 = vpop.f32.mrf.mxu0 }
 0xdc9   : > { %5164 = vrot.lane.b32.xlu1 %v4927_v7, %s7334_s13  ;;  %v4964_v50 = vadd.f32 %v9129_v9, %v4963_v48 }
 0xdca   : > { %v6556_v27 = vpop.f32.mrf.mxu1  ;;  %v6529_v8 = vpop.f32.mrf.mxu0 }
 0xdcb   : > { %v5084_v31 = vadd.f32 %v6556_v27, %v9129_v9  ;;  %v4975_v34 = vadd.f32 %v6529_v8, %v9129_v9 }
 0xdcc   : > { %v5075_v19 = vpop.f32.mrf.mxu1  ;;  %v4966_v1 = vpop.f32.mrf.mxu0 }
 0xdcd   : > { %5160 = vrot.lane.b32.xlu1 %v4919_v32, %s7334_s13  ;;  %5322 = vrot.lane.b32.xlu0 %v5084_v31, %s7338_s12  ;;  %v5076_v3 = vadd.f32 %v9129_v9, %v5075_v19  ;;  %v4967_v23 = vadd.f32 %v9129_v9, %v4966_v1 }
 0xdce   : > { %v6557_v63 = vpop.f32.mrf.mxu1  ;;  %v6532_v40 = vpop.f32.mrf.mxu0 }
 0xdcf   : > { %v5087_v62 = vadd.f32 %v6557_v63, %v9129_v9  ;;  %v4988_v60 = vadd.f32 %v6532_v40, %v9129_v9 }
 0xdd0   : > { %v5078_v29 = vpop.f32.mrf.mxu1  ;;  %v4979_v58 = vpop.f32.mrf.mxu0 }
 0xdd1   : > { %5180 = vrot.lane.b32.xlu1 %v4943_v49, %s7337_s0  ;;  %5318 = vrot.lane.b32.xlu0 %v5076_v3, %s7338_s12  ;;  %v5079_v51 = vadd.f32 %v9129_v9, %v5078_v29  ;;  %v4980_v47 = vadd.f32 %v9129_v9, %v4979_v58 }
 0xdd2   : > { %v6560_v5 = vpop.f32.mrf.mxu1  ;;  %v6533_v46 = vpop.f32.mrf.mxu0 }
 0xdd3   : > { %v5100_v55 = vadd.f32 %v6560_v5, %v9129_v9  ;;  %v4991_v22 = vadd.f32 %v6533_v46, %v9129_v9 }
 0xdd4   : > { %v5091_v43 = vpop.f32.mrf.mxu1  ;;  %v4982_v37 = vpop.f32.mrf.mxu0 }
 0xdd5   : > { %5176 = vrot.lane.b32.xlu1 %v4935_v21, %s7337_s0  ;;  %5194 = vrot.lane.b32.xlu0 %v4956_v0, %s7339_s6  ;;  %v5092_v39 = vadd.f32 %v9129_v9, %v5091_v43  ;;  %v4983_v32 = vadd.f32 %v9129_v9, %v4982_v37 }
 0xdd6   : > { %v6561_v13 = vpop.f32.mrf.mxu1  ;;  %v6536_v56 = vpop.f32.mrf.mxu0 }
 0xdd7   : > { %v5103_v41 = vadd.f32 %v6561_v13, %v9129_v9  ;;  %v5004_v31 = vadd.f32 %v6536_v56, %v9129_v9  ;;  %v9541_v56 = vld [vmem:[#allocation12_spill] sm:$0xff] }
 0xdd8   : > { %v5094_v11 = vpop.f32.mrf.mxu1  ;;  %v4995_v44 = vpop.f32.mrf.mxu0 }
 0xdd9   : > { %5320 = vrot.lane.b32.xlu1 %v5079_v51, %s7338_s12  ;;  %5324 = vrot.lane.b32.xlu0 %v5087_v62, %s7338_s12  ;;  %v5095_v6 = vadd.f32 %v9129_v9, %v5094_v11  ;;  %s7344_s12 = smov 14   ;;  %v4996_v63 = vadd.f32 %v9129_v9, %v4995_v44 }
 0xdda   : > { %v6564_v20 = vpop.f32.mrf.mxu1  ;;  %v6537_v42 = vpop.f32.mrf.mxu0 }
 0xddb   : > { %v5116_v14 = vadd.f32 %v6564_v20, %v9129_v9  ;;  %v5007_v29 = vadd.f32 %v6537_v42, %v9129_v9 }
 0xddc   : > { %v5107_v18 = vpop.f32.mrf.mxu1  ;;  %v4998_v38 = vpop.f32.mrf.mxu0 }
 0xddd   : > { %5196 = vrot.lane.b32.xlu1 %v4959_v16, %s7339_s6  ;;  %5190 = vrot.lane.b32.xlu0 %v4948_v28, %s7339_s6  ;;  %v5108_v61 = vadd.f32 %v9129_v9, %v5107_v18  ;;  %v4999_v48 = vadd.f32 %v9129_v9, %v4998_v38 }
 0xdde   : > { %v6565_v57 = vpop.f32.mrf.mxu1  ;;  %v6540_v10 = vpop.f32.mrf.mxu0 }
 0xddf   : > { %v5119_v17 = vadd.f32 %v6565_v57, %v9129_v9  ;;  %v5020_v5 = vadd.f32 %v6540_v10, %v9129_v9 }
 0xde0   : > { %v5110_v54 = vpop.f32.mrf.mxu1  ;;  %v5011_v25 = vpop.f32.mrf.mxu0 }
 0xde1   : > { %5340 = vrot.lane.b32.xlu1 %v5103_v41, %s9496_s2  ;;  %5338 = vrot.lane.b32.xlu0 %v5100_v55, %s9496_s2  ;;  %v5111_v45 = vadd.f32 %v9129_v9, %v5110_v54  ;;  %v5012_v8 = vadd.f32 %v9129_v9, %v5011_v25  ;;  %v9216_v41 = vpop.permute.xlu0 %2319  ;;  %v9550_v25 = vld [vmem:[#allocation14_spill] sm:$0xff] }
 0xde2   : > { %v6541_v3 = vpop.f32.mrf.mxu0 }
 0xde3   : > { %v6568_v4 = vpop.f32.mrf.mxu1  ;;  %v5023_v43 = vadd.f32 %v6541_v3, %v9129_v9 }
 0xde4   : > { %v5132_v35 = vadd.f32 %v6568_v4, %v9129_v9  ;;  %v5014_v0 = vpop.f32.mrf.mxu0  ;;  %v9544_v4 = vld [vmem:[#allocation18_spill] sm:$0xff] }
 0xde5   : > { %5336 = vrot.lane.b32.xlu1 %v5095_v6, %s9496_s2  ;;  %5192 = vrot.lane.b32.xlu0 %v4951_v26, %s7339_s6  ;;  %v5123_v2 = vpop.f32.mrf.mxu1  ;;  %v5015_v1 = vadd.f32 %v9129_v9, %v5014_v0  ;;  %v9221_v6 = vpop.xlane.xlu1 %1459 }
 0xde6   : > { %v5124_v7 = vadd.f32 %v9129_v9, %v5123_v2  ;;  %v6544_v62 = vpop.f32.mrf.mxu0  ;;  %v9546_v2 = vld [vmem:[#allocation13_spill] sm:$0xff] }
 0xde7   : > { %v6569_v53 = vpop.f32.mrf.mxu1  ;;  %v5036_v40 = vadd.f32 %v6544_v62, %v9129_v9 }
 0xde8   : > { %v5027_v28 = vpop.f32.mrf.mxu0  ;;  %v5135_v46 = vadd.f32 %v6569_v53, %v9129_v9 }
 0xde9   : > { %5212 = vrot.lane.b32.xlu1 %v4975_v34, %s7341_s9  ;;  %5334 = vrot.lane.b32.xlu0 %v5092_v39, %s9496_s2  ;;  %v5126_v27 = vpop.f32.mrf.mxu1  ;;  %s7346_s2 = smov 15   ;;  %v5028_v20 = vadd.f32 %v9129_v9, %v5027_v28 }
 0xdea   : > { %v5127_v49 = vadd.f32 %v9129_v9, %v5126_v27  ;;  %v6545_v55 = vpop.f32.mrf.mxu0  ;;  %v4911_v27 = vadd.f32 %v9139_v52, %v9129_v9 }
 0xdeb   : > { %v6572_v19 = vpop.f32.mrf.mxu1  ;;  %v5039_v11 = vadd.f32 %v6545_v55, %v9129_v9 }
 0xdec   : > { %v5030_v26 = vpop.f32.mrf.mxu0  ;;  %v5148_v18 = vadd.f32 %v6572_v19, %v9129_v9  ;;  %v4903_v19 = vadd.f32 %v9129_v9, %v9141_v12 }
 0xded   : > { %5354 = vrot.lane.b32.xlu1 %v5116_v14, %s7342_s3  ;;  %5210 = vrot.lane.b32.xlu0 %v4972_v36, %s7341_s9  ;;  %v5139_v30 = vpop.f32.mrf.mxu1  ;;  %v5031_v34 = vadd.f32 %v9129_v9, %v5030_v26 }
 0xdee   : > { %v5140_v21 = vadd.f32 %v9129_v9, %v5139_v30 }
 0xdef   : > { %v6573_v51 = vpop.f32.mrf.mxu1 }
 0xdf0   : > { %v5151_v14 = vadd.f32 %v6573_v51, %v9129_v9 }
 0xdf1   : > { %5208 = vrot.lane.b32.xlu1 %v4967_v23, %s7341_s9  ;;  %5206 = vrot.lane.b32.xlu0 %v4964_v50, %s7341_s9  ;;  %v5142_v16 = vpop.f32.mrf.mxu1 }
 0xdf2   : > { %v5143_v13 = vadd.f32 %v9129_v9, %v5142_v16 }
 0xdf5   : > { %5356 = vrot.lane.b32.xlu1 %v5119_v17, %s7342_s3  ;;  %5350 = vrot.lane.b32.xlu0 %v5108_v61, %s7342_s3  ;;  %v9542_v61 = vld [vmem:[#allocation10_spill] sm:$0xff]  ;;  %v9543_v17 = vld [vmem:[#allocation15_spill] sm:$0xff] }
 0xdf9   : > { %5222 = vrot.lane.b32.xlu1 %v4980_v47, %s7343_s8  ;;  %5226 = vrot.lane.b32.xlu0 %v4988_v60, %s7343_s8  ;;  %v9545_v60 = vld [vmem:[#allocation19_spill] sm:$0xff] }
 0xdfa   : > { %v2304_v47 = vadd.f32 %v9545_v60, %v9544_v4 }
 0xdfd   : > { %5352 = vrot.lane.b32.xlu1 %v5111_v45, %s7342_s3  ;;  %5370 = vrot.lane.b32.xlu0 %v5132_v35, %s7344_s12  ;;  %s7345_s3 = smov 6   ;;  %v4900_v35 = vadd.f32 %v9129_v9, %v9137_v59  ;;  %v9549_v59 = vld [vmem:[#allocation17_spill] sm:$0xff] }
 0xdfe   : > { %v9223_v58 = vpop.permute.xlu0 %5290 }
 0xe01   : > { %5228 = vrot.lane.b32.xlu1 %v4991_v22, %s7343_s8  ;;  %5366 = vrot.lane.b32.xlu0 %v5124_v7, %s7344_s12  ;;  %v9547_v22 = vld [vmem:[#allocation16_spill] sm:$0xff]  ;;  %v9548_v7 = vld [vmem:[#allocation11_spill] sm:$0xff] }
 0xe02   : > { %v9229_v39 = vpop.permute.xlu1 %5292  ;;  %v9235_v36 = vpop.permute.xlu0 %5286 }
 0xe05   : > { %5224 = vrot.lane.b32.xlu1 %v4983_v32, %s7343_s8  ;;  %5242 = vrot.lane.b32.xlu0 %v5004_v31, %s7345_s3  ;;  %s7347_s8 = smov 7  }
 0xe06   : > { %v9240_v37 = vpop.permute.xlu1 %5288 }
 0xe09   : > { %5368 = vrot.lane.b32.xlu1 %v5127_v49, %s7344_s12  ;;  %5238 = vrot.lane.b32.xlu0 %v4996_v63, %s7345_s3 }
 0xe0d   : > { %5244 = vrot.lane.b32.xlu1 %v5007_v29, %s7345_s3  ;;  %5382 = vrot.lane.b32.xlu0 %v5140_v21, %s7346_s2 }
 0xe11   : > { %5240 = vrot.lane.b32.xlu1 %v4999_v48, %s7345_s3  ;;  %5258 = vrot.lane.b32.xlu0 %v5020_v5, %s7347_s8  ;;  %s7348_s3 = smov 8  }
 0xe15   : > { %5260 = vrot.lane.b32.xlu1 %v5023_v43, %s7347_s8  ;;  %5254 = vrot.lane.b32.xlu0 %v5012_v8, %s7347_s8 }
 0xe19   : > { %5256 = vrot.lane.b32.xlu1 %v5015_v1, %s7347_s8  ;;  %5384 = vrot.lane.b32.xlu0 %v5143_v13, %s7346_s2 }
 0xe1d   : > { %5276 = vrot.lane.b32.xlu1 %v5039_v11, %s7348_s3  ;;  %5274 = vrot.lane.b32.xlu0 %v5036_v40, %s7348_s3 }
 0xe21   : > { %5272 = vrot.lane.b32.xlu1 %v5031_v34, %s7348_s3  ;;  %5270 = vrot.lane.b32.xlu0 %v5028_v20, %s7348_s3 }
 0xe25   : > { %5372 = vrot.lane.b32.xlu1 %v5135_v46, %s7344_s12  ;;  %5386 = vrot.lane.b32.xlu0 %v5148_v18, %s7346_s2 }
 0xe27   : > { %v9242_v57 = vpop.permute.xlu0 %5306 }
 0xe29   : > { %2335 = vrot.lane.b32.xlu1 %v8109_v15, %s7337_s0  ;;  %5388 = vrot.lane.b32.xlu0 %v5151_v14, %s7346_s2  ;;  %v4908_v15 = vadd.f32 %v9135_v24, %v9129_v9  ;;  %s7354_s2 = smov 24  }
 0xe2b   : > { %v9247_v50 = vpop.permute.xlu1 %5308  ;;  %v9249_v23 = vpop.permute.xlu0 %5302 }
 0xe2d   : > { %2351 = vrot.lane.b32.xlu1 %v8117_v33, %s7339_s6  ;;  %2321 = vrot.lane.b32.xlu0 %v9541_v56, %s7334_s13 }
 0xe2f   : > { %v9255_v54 = vpop.permute.xlu1 %5304  ;;  %v5179_v44 = vpop.permute.xlu0 %5178 }
 0xe31   : > { %2323 = vrot.lane.b32.xlu1 %v9542_v61, %s7334_s13  ;;  %2337 = vrot.lane.b32.xlu0 %v9543_v17, %s7337_s0 }
 0xe33   : > { %v5163_v33 = vpop.permute.xlu1 %5162  ;;  %v5175_v38 = vpop.permute.xlu0 %5174 }
 0xe34   : > { %v5396_v42 = vsel %vm2363_vm10, %v4908_v15, %v5163_v33 }
 0xe35   : > { %2339 = vrot.lane.b32.xlu1 %v9546_v2, %s7337_s0  ;;  %2353 = vrot.lane.b32.xlu0 %v2304_v47, %s7339_s6  ;;  %v5400_v45 = vsel %vm2368_vm9, %v5396_v42, %v5179_v44 }
 0xe37   : > { %v5159_v24 = vpop.permute.xlu1 %5158 }
 0xe38   : > { %v5394_v53 = vsel %vm2363_vm10, %v4900_v35, %v5159_v24 }
 0xe39   : > { %2355 = vrot.lane.b32.xlu1 %v9547_v22, %s7339_s6  ;;  %2325 = vrot.lane.b32.xlu0 %v9548_v7, %s7334_s13  ;;  %v5398_v10 = vsel %vm2368_vm9, %v5394_v53, %v5175_v38  ;;  %s7349_s13 = smov 80  }
 0xe3b   : > { %v5165_v32 = vpop.permute.xlu1 %5164 }
 0xe3c   : > { %v5397_v31 = vsel %vm2363_vm10, %v4911_v27, %v5165_v32 }
 0xe3d   : > { %2357 = vrot.lane.b32.xlu1 %v9549_v59, %s7339_s6  ;;  %2341 = vrot.lane.b32.xlu0 %v9550_v25, %s7337_s0  ;;  %s7352_s0 = smov 112   ;;  %s7353_s6 = smov 20  }
 0xe3f   : > { %v5161_v63 = vpop.permute.xlu1 %5160  ;;  %v9287_v49 = vpop.permute.xlu0 %5322 }
 0xe40   : > { %v5395_v3 = vsel %vm2363_vm10, %v4903_v19, %v5161_v63 }
 0xe43   : > { %v5181_v30 = vpop.permute.xlu1 %5180  ;;  %v9290_v29 = vpop.permute.xlu0 %5318 }
 0xe44   : > { %v5401_v52 = vsel %vm2368_vm9, %v5397_v31, %v5181_v30 }
 0xe47   : > { %v5177_v21 = vpop.permute.xlu1 %5176  ;;  %v5195_v0 = vpop.permute.xlu0 %5194 }
 0xe48   : > { %v5399_v48 = vsel %vm2368_vm9, %v5395_v3, %v5177_v21  ;;  %v5404_v5 = vsel %vm2373_vm14, %v5400_v45, %v5195_v0 }
 0xe4b   : > { %v9295_v62 = vpop.permute.xlu1 %5320  ;;  %v9297_v9 = vpop.permute.xlu0 %5324 }
 0xe4f   : > { %v5197_v12 = vpop.permute.xlu1 %5196  ;;  %v5191_v51 = vpop.permute.xlu0 %5190 }
 0xe50   : > { %v5405_v8 = vsel %vm2373_vm14, %v5401_v52, %v5197_v12  ;;  %v5402_v43 = vsel %vm2373_vm14, %v5398_v10, %v5191_v51 }
 0xe53   : > { %v9301_v28 = vpop.permute.xlu1 %5340  ;;  %v9303_v16 = vpop.permute.xlu0 %5338 }
 0xe57   : > { %v9305_v1 = vpop.permute.xlu1 %5336  ;;  %v5193_v13 = vpop.permute.xlu0 %5192 }
 0xe58   : > { %v5403_v25 = vsel %vm2373_vm14, %v5399_v48, %v5193_v13 }
 0xe5b   : > { %v5213_v55 = vpop.permute.xlu1 %5212  ;;  %v9307_v40 = vpop.permute.xlu0 %5334 }
 0xe5c   : > { %v5409_v7 = vsel %vm2407_vm15, %v5405_v8, %v5213_v55 }
 0xe5f   : > { %v9309_v11 = vpop.permute.xlu1 %5354  ;;  %v5211_v26 = vpop.permute.xlu0 %5210 }
 0xe60   : > { %v5408_v10 = vsel %vm2407_vm15, %v5404_v5, %v5211_v26 }
 0xe63   : > { %v5209_v20 = vpop.permute.xlu1 %5208  ;;  %v5207_v34 = vpop.permute.xlu0 %5206 }
 0xe64   : > { %v5407_v52 = vsel %vm2407_vm15, %v5403_v25, %v5209_v20  ;;  %v5406_v21 = vsel %vm2407_vm15, %v5402_v43, %v5207_v34 }
 0xe67   : > { %v9311_v46 = vpop.permute.xlu1 %5356  ;;  %v9313_v18 = vpop.permute.xlu0 %5350 }
 0xe6b   : > { %v5223_v14 = vpop.permute.xlu1 %5222  ;;  %v5227_v56 = vpop.permute.xlu0 %5226 }
 0xe6c   : > { %v5413_v27 = vsel %vm5410_vm1, %v5408_v10, %v5227_v56  ;;  %v5411_v12 = vsel %vm5410_vm1, %v5406_v21, %v5223_v14 }
 0xe6f   : > { %v9315_v61 = vpop.permute.xlu1 %5352  ;;  %v9317_v17 = vpop.permute.xlu0 %5370 }
 0xe73   : > { %v5229_v15 = vpop.permute.xlu1 %5228  ;;  %v9319_v44 = vpop.permute.xlu0 %5366 }
 0xe74   : > { %v5414_v32 = vsel %vm5410_vm1, %v5409_v7, %v5229_v15 }
 0xe77   : > { %v5225_v4 = vpop.permute.xlu1 %5224  ;;  %v5243_v60 = vpop.permute.xlu0 %5242 }
 0xe78   : > { %v5418_v31 = vsel %vm5415_vm2, %v5413_v27, %v5243_v60  ;;  %v5412_v51 = vsel %vm5410_vm1, %v5407_v52, %v5225_v4  ;;  %vm5458_vm1 = vcmask 121856  }
 0xe7b   : > { %v9321_v47 = vpop.permute.xlu1 %5368  ;;  %v5239_v33 = vpop.permute.xlu0 %5238 }
 0xe7c   : > { %v5416_v13 = vsel %vm5415_vm2, %v5411_v12, %v5239_v33 }
 0xe7f   : > { %v5245_v42 = vpop.permute.xlu1 %5244  ;;  %v9323_v2 = vpop.permute.xlu0 %5382 }
 0xe80   : > { %v5419_v59 = vsel %vm5415_vm2, %v5414_v32, %v5245_v42 }
 0xe83   : > { %v5241_v45 = vpop.permute.xlu1 %5240  ;;  %v5259_v35 = vpop.permute.xlu0 %5258 }
 0xe84   : > { %v5423_v19 = vsel %vm5420_vm3, %v5418_v31, %v5259_v35  ;;  %v5417_v55 = vsel %vm5415_vm2, %v5412_v51, %v5241_v45  ;;  %v9553_v51 = vld [vmem:[#allocation6_spill] sm:$0xff]  ;;  %vm2419_vm2 = vcmask 228352  }
 0xe87   : > { %v5261_v24 = vpop.permute.xlu1 %5260  ;;  %v5255_v38 = vpop.permute.xlu0 %5254 }
 0xe88   : > { %v5424_v63 = vsel %vm5420_vm3, %v5419_v59, %v5261_v24  ;;  %v5421_v20 = vsel %vm5420_vm3, %v5416_v13, %v5255_v38 }
 0xe8b   : > { %v5257_v53 = vpop.permute.xlu1 %5256  ;;  %v9325_v22 = vpop.permute.xlu0 %5384 }
 0xe8c   : > { %v5422_v34 = vsel %vm5420_vm3, %v5417_v55, %v5257_v53 }
 0xe8f   : > { %v5277_v3 = vpop.permute.xlu1 %5276  ;;  %v5275_v30 = vpop.permute.xlu0 %5274 }
 0xe90   : > { %v5428_v0 = vsel %vm2409_vm5, %v5424_v63, %v5277_v3  ;;  %v5427_v5 = vsel %vm2409_vm5, %v5423_v19, %v5275_v30  ;;  %v9552_v3 = vld [vmem:[#allocation9_spill] sm:$0xff] }
 0xe91   : > { %v5433_v48 = vsel %vm5429_vm6, %v5428_v0, %v9229_v39  ;;  %v5432_v8 = vsel %vm5429_vm6, %v5427_v5, %v9223_v58 }
 0xe92   : > { %v5438_v43 = vsel %vm5434_vm7, %v5433_v48, %v9247_v50  ;;  %v5437_v26 = vsel %vm5434_vm7, %v5432_v8, %v9242_v57 }
 0xe93   : > { %v5442_v39 = vsel %vm5439_vm8, %v5437_v26, %v9287_v49  ;;  %v5273_v14 = vpop.permute.xlu1 %5272  ;;  %v5271_v56 = vpop.permute.xlu0 %5270  ;;  %v5443_v58 = vsel %vm5439_vm8, %v5438_v43, %v9297_v9 }
 0xe94   : > { %v5426_v15 = vsel %vm2409_vm5, %v5422_v34, %v5273_v14  ;;  %v5425_v4 = vsel %vm2409_vm5, %v5421_v20, %v5271_v56  ;;  %v5447_v50 = vsel %vm2411_vm11, %v5443_v58, %v9301_v28  ;;  %v5446_v57 = vsel %vm2411_vm11, %v5442_v39, %v9303_v16  ;;  %v9555_v20 = vld [vmem:[#allocation8_spill] sm:$0xff] }
 0xe95   : > { %v5431_v60 = vsel %vm5429_vm6, %v5426_v15, %v9240_v37  ;;  %v5430_v49 = vsel %vm5429_vm6, %v5425_v4, %v9235_v36  ;;  %v5451_v33 = vsel %vm5448_vm0, %v5446_v57, %v9309_v11 }
 0xe96   : > { %v5436_v9 = vsel %vm5434_vm7, %v5431_v60, %v9255_v54  ;;  %v5435_v42 = vsel %vm5434_vm7, %v5430_v49, %v9249_v23  ;;  %v5456_v28 = vsel %vm5453_vm13, %v5451_v33, %v9317_v17 }
 0xe97   : > { %v5441_v16 = vsel %vm5439_vm8, %v5436_v9, %v9295_v62  ;;  %v5440_v37 = vsel %vm5439_vm8, %v5435_v42, %v9290_v29  ;;  %v5373_v36 = vpop.permute.xlu1 %5372  ;;  %v5387_v45 = vpop.permute.xlu0 %5386 }
 0xe98   : > { %v5444_v11 = vsel %vm2411_vm11, %v5440_v37, %v9307_v40  ;;  %v5461_v35 = vsel %vm5458_vm1, %v5456_v28, %v5387_v45  ;;  %v5445_v54 = vsel %vm2411_vm11, %v5441_v16, %v9305_v1 }
 0xe99   : > { %v5449_v23 = vsel %vm5448_vm0, %v5444_v11, %v9313_v18  ;;  %v5480_v17 = vrot.slane %v5461_v35, 4  ;;  %5477 = vrot.lane.b32.xlu1 %v5461_v35, %s9524_s1  ;;  %v5450_v62 = vsel %vm5448_vm0, %v5445_v54, %v9315_v61  ;;  %v9551_v61 = vld [vmem:[#allocation7_spill] sm:$0xff]  ;;  %s7350_s1 = smov 16  }
 0xe9a   : > { %v5454_v29 = vsel %vm5453_vm13, %v5449_v23, %v9319_v44  ;;  %v5455_v40 = vsel %vm5453_vm13, %v5450_v62, %v9321_v47  ;;  %v2364_v44 = vsel %vm2363_vm10, %v9551_v61, %v9216_v41  ;;  %v5452_v47 = vsel %vm5448_vm0, %v5447_v50, %v9311_v46  ;;  %v5701_v41 = vld [vmem:[#allocation2] ss:$0 sm:$0xff] }
 0xe9b   : > { %v2336_v24 = vpop.permute.xlu1 %2335  ;;  %5481 = vrot.lane.b32.xlu0 %v5480_v17, %s7349_s13  ;;  %v5389_v38 = vpop.permute.xlu0 %5388  ;;  %v5460_v1 = vsel %vm5458_vm1, %v5455_v40, %v9325_v22  ;;  %v5459_v18 = vsel %vm5458_vm1, %v5454_v29, %v9323_v2  ;;  %v5457_v7 = vsel %vm5453_vm13, %v5452_v47, %v5373_v36  ;;  %v1468_v19 = vadd.f32 %v5701_v41, %v9221_v6 }
 0xe9c   : > { %v5464_v53 = vrot.slane %v5459_v18, 4  ;;  %v2369_v10 = vsel %vm2368_vm9, %v2364_v44, %v2336_v24  ;;  %v5462_v2 = vsel %vm5458_vm1, %v5457_v7, %v5389_v38  ;;  %v5472_v31 = vrot.slane %v5460_v1, 4 }
 0xe9d   : > { %5469 = vrot.lane.b32.xlu1 %v5460_v1, %s7333_s5  ;;  %s7351_s5 = smov 48   ;;  %v5488_v63 = vrot.slane %v5462_v2, 4  ;;  %v1469_v12 = vmul.f32 %v1468_v19, %v1468_v19  ;;  %vm2413_vm0 = vcmask 130048   ;;  %vm5494_vm13 = vcmask 392192  }
 0xe9f   : > { %v2352_v27 = vpop.permute.xlu1 %2351  ;;  %5465 = vrot.lane.b32.xlu0 %v5464_v53, %s7350_s1  ;;  %v2322_v22 = vpop.permute.xlu0 %2321 }
 0xea0   : > { %v9409_v32 = vsel %vm2373_vm14, %v2369_v10, %v2352_v27  ;;  %v2365_v30 = vsel %vm2363_vm10, %v9552_v3, %v2322_v22 }
 0xea1   : > { %5485 = vrot.lane.b32.xlu1 %v5462_v2, %s9523_s24  ;;  %v2379_v46 = vrot.slane %v9409_v32, 4  ;;  %s9554_s24 = smov 12  }
 0xea3   : > { %v2324_v59 = vpop.permute.xlu1 %2323  ;;  %5473 = vrot.lane.b32.xlu0 %v5472_v31, %s7351_s5  ;;  %v2338_v25 = vpop.permute.xlu0 %2337  ;;  %s865_s5 = scalar_lea.vmem %s9473_s25, %s7524_s18 }
 0xea4   : > { %v2370_v52 = vsel %vm2368_vm9, %v2365_v30, %v2338_v25  ;;  %v2366_v6 = vsel %vm2363_vm10, %v9553_v51, %v2324_v59 }
 0xea5   : > { %2380 = vrot.lane.b32.xlu1 %v2379_v46, %s7341_s9  ;;  %s7355_s9 = smov 28  }
 0xea7   : > { %v2340_v21 = vpop.permute.xlu1 %2339  ;;  %5489 = vrot.lane.b32.xlu0 %v5488_v63, %s7352_s0  ;;  %v2354_v0 = vpop.permute.xlu0 %2353 }
 0xea8   : > { %v2375_v5 = vsel %vm2373_vm14, %v2370_v52, %v2354_v0  ;;  %v2371_v48 = vsel %vm2368_vm9, %v2366_v6, %v2340_v21 }
 0xea9   : > { %2384 = vrot.lane.b32.xlu1 %v2375_v5, %s7348_s3  ;;  %v2387_v8 = vrot.slane %v2375_v5, 4  ;;  %s869_s3 = scalar_lea.vmem %s9474_s26, %s7524_s18 }
 0xeab   : > { %v2356_v13 = vpop.permute.xlu1 %2355  ;;  %5505 = vperm.xlu0 %7232, %v1469_v12   ;;  %v2326_v55 = vpop.permute.xlu0 %2325 }
 0xeac   : > { %v2376_v43 = vsel %vm2373_vm14, %v2371_v48, %v2356_v13  ;;  %v2367_v34 = vsel %vm2363_vm10, %v9555_v20, %v2326_v55  ;;  %vm5500_vm10 = vcmask 916480  }
 0xead   : > { %2388 = vrot.lane.b32.xlu1 %v2387_v8, %s9554_s24  ;;  %v2395_v26 = vrot.slane %v2376_v43, 4 }
 0xeaf   : > { %v2358_v39 = vpop.permute.xlu1 %2357  ;;  %2392 = vrot.lane.b32.xlu0 %v2376_v43, %s7350_s1  ;;  %v2342_v14 = vpop.permute.xlu0 %2341 }
 0xeb0   : > { %v2372_v56 = vsel %vm2368_vm9, %v2367_v34, %v2342_v14  ;;  %vm5497_vm9 = vcmask 654336  }
 0xeb1   : > { %2396 = vrot.lane.b32.xlu1 %v2395_v26, %s7353_s6  ;;  %v2377_v58 = vsel %vm2373_vm14, %v2372_v56, %v2358_v39  ;;  %vm9556_vm14 = vcmask 785408  }
 0xeb2   : > { %v2403_v15 = vrot.slane %v2377_v58, 4 }
 0xeb3   : > { %2400 = vrot.lane.b32.xlu0 %v2377_v58, %s7354_s2 }
 0xeb5   : > { %2404 = vrot.lane.b32.xlu1 %v2403_v15, %s7355_s9 }
 0xf0b   : > { %v5478_v4 = vpop.permute.xlu1 %5477 }
 0xf0d   : > { %v5482_v50 = vpop.permute.xlu0 %5481 }
 0xf0f   : > { %v5470_v57 = vpop.permute.xlu1 %5469 }
 0xf11   : > { %v5466_v60 = vpop.permute.xlu0 %5465 }
 0xf12   : > { %v5492_v49 = vsel %vm2413_vm0, %v5459_v18, %v5466_v60 }
 0xf13   : > { %v5486_v33 = vpop.permute.xlu1 %5485  ;;  %v5493_v9 = vsel %vm918_vm4, %v5492_v49, %v5470_v57  ;;  %vm2415_vm4 = vcmask 162816  }
 0xf15   : > { %v5474_v42 = vpop.permute.xlu0 %5473 }
 0xf16   : > { %v5495_v28 = vsel %vm5494_vm13, %v5493_v9, %v5474_v42 }
 0xf17   : > { %v5496_v16 = vsel %vm1634_vm12, %v5495_v28, %v5478_v4  ;;  %v2381_v37 = vpop.permute.xlu1 %2380  ;;  %vm2417_vm12 = vcmask 195584  }
 0xf18   : > { %v5498_v36 = vsel %vm5497_vm9, %v5496_v16, %v5482_v50  ;;  %v2408_v29 = vsel %vm2407_vm15, %v9409_v32, %v2381_v37  ;;  %vm9557_vm15 = vcmask 257024  }
 0xf19   : > { %v5499_v45 = vsel %vm9556_vm14, %v5498_v36, %v5486_v33  ;;  %v5490_v11 = vpop.permute.xlu0 %5489 }
 0xf1a   : > { %v5501_v35 = vsel %vm5500_vm10, %v5499_v45, %v5490_v11 }
 0xf1b   : > { %7317 = vtanh.f32 %v5501_v35  ;;  %v2385_v54 = vpop.permute.xlu1 %2384 }
 0xf1c   : > { %v2410_v40 = vsel %vm2409_vm5, %v2408_v29, %v2385_v54 }
 0xf1f   : > { %v2389_v23 = vpop.permute.xlu1 %2388 }
 0xf20   : > { %v2412_v1 = vsel %vm2411_vm11, %v2410_v40, %v2389_v23 }
 0xf23   : > { %v2397_v24 = vpop.permute.xlu1 %2396 }
 0xf26   : > { %v5506_v17 = vpop.permute.xlu0 %5505 }
 0xf27   : > { %v2405_v47 = vpop.permute.xlu1 %2404 }
 0xf28   : > { %v7318_v62 = vpop.eup %7317 }
 0xf29   : > { %v5508_v38 = vmul.f32 %v7318_v62, %v5506_v17 }
 0xf2a   : > { %v2393_v18 = vpop.permute.xlu0 %2392 }
 0xf2b   : > { %5509 = vst [vmem:[%s869_s3] sm:$0xf] %v5508_v38  ;;  %v2414_v53 = vsel %vm2413_vm0, %v2412_v1, %v2393_v18 }
 0xf2c   : > { %v2416_v44 = vsel %vm2415_vm4, %v2414_v53, %v2397_v24 }
 0xf2e   : > { %v2401_v61 = vpop.permute.xlu0 %2400 }
 0xf2f   : > { %v2418_v7 = vsel %vm2417_vm12, %v2416_v44, %v2401_v61 }
 0xf30   : > { %v2420_v10 = vsel %vm2419_vm2, %v2418_v7, %v2405_v47 }
 0xf31   : > { %2421 = vst.msk [vmem:[%s865_s5] sm:$0xf] %vm9557_vm15, %v2420_v10 }
 0xf32 PF: > { %s47_s29 = sadd.s32 1, %s7326_s29  }
 0xf33   : > { %p44_p4 = scmp.ge.s32.totalorder %s47_s29, 4  }
 0xf35   :  { %46 = sbr.rel (!%p44_p4) target bundleno = 22 (0x16), region = 202 }

// kernel: reverse.5
= control target key start
LH: loop header
LB: loop body
LE: loop exit
PB: predicated region body
PF: predicated region fallthrough
CT: control target
= control target key end

     0   :  { %v2_v0 = vlaneseq  ;;  %s302_s0 = inlined_call_operand.vmem [shape: f32[8,1024], index: 0, kind: input, shape index: {}]   ;;  %s303_s1 = inlined_call_operand.vmem [shape: f32[8,1024], index: 1, kind: output, shape index: {}]  }
   0x2   :  { %v3_v1 = vsub.s32 127, %v2_v0 }
   0x4   :  { %4 = vset.pattern.permute.xlu0 %v3_v1 }
   0x5   :  { %s265_s6 = smov 0   ;;  %s267_s7 = smov 0  }
   0x6   :  { %s269_s8 = smov 0  }
   0x7 LB: > { %s195_s9 = sadd.s32 4294967295, %s253_s8   ;;  %s19_s10 = sadd.s32 1, %s249_s7  ;;  %s253_s8 = sphi %s269_s8, %s10_s8   ;;  %s249_s7 = sphi %s267_s7, %s305_s7   ;;  %s245_s6 = sphi %s265_s6, %s304_s6  }
   0x8   : > { %p20_p0 = scmp.ge.s32.totalorder %s19_s10, 8  ;;  %p197_p1 = scmp.ge.s32.totalorder %s253_s8, 8 }
   0x9   : > { %s38_s11 = sand.u32 (!%p197_p1), 1, %s253_s8   ;;  %s41_s12 = ssub.s32 (!%p197_p1), 7, %s249_s7 }
   0xa   : > { %s307_s10 = smov (%p20_p0, %s19_s10), 0  ;;  %36 = sbr.rel (%p197_p1) target bundleno = 17 (0x11), region = 16 }
   0xb   : > { %s198_s13 = sshll.u32 (!%p197_p1), %s38_s11, 3  ;;  %s199_s14 = sshll.u32 (!%p197_p1), %s41_s12, 3 }
   0xc   : > { %s45_s17 = scalar_lea.vmem (!%p197_p1), %s302_s0, %s199_s14  ;;  %s40_s18 = scalar_lea.vmem (!%p197_p1), [#allocation0], %s198_s13 }
   0xf   : > { %v74_v2 = vld [vmem:[%s45_s17] sm:$0xff] }
  0x10   : > { %75 = vst [vmem:[%s40_s18] sm:$0xff] %v74_v2 }
  0x11 PF: > { %p200_p2 = scmp.ge.s32.totalorder %s253_s8, 1  ;;  %p80_p3 = scmp.lt.s32.totalorder %s253_s8, 9 }
  0x13   : > { %p81_p4 = pnand %p200_p2, %p80_p3 }
  0x14   : > { %s87_s19 = sand.u32 (!%p81_p4), 1, %s195_s9   ;;  %s204_s22 = sshll.u32 (!%p81_p4), %s245_s6, 3 }
  0x15   : > { %84 = sbr.rel (%p81_p4) target bundleno = 152 (0x98), region = 54  ;;  %s201_s20 = sshll.u32 (!%p81_p4), %s87_s19, 3 }
  0x16   : > { %s89_s21 = scalar_lea.vmem (!%p81_p4), [#allocation0], %s201_s20  ;;  %s110_s25 = scalar_lea.vmem (!%p81_p4), %s303_s1, %s204_s22 }
  0x1a   : > { %v99_v3 = vld [vmem:[%s89_s21] sm:$0xff] }
  0x1b   : > { %100 = vperm.xlu0 %4, %v99_v3  }
  0x96   : > { %v101_v4 = vpop.permute.xlu0 %100 }
  0x97   : > { %140 = vst [vmem:[%s110_s25] sm:$0xff] %v101_v4 }
  0x98 PF: > { %s10_s8 = sadd.s32 1, %s253_s8   ;;  %s304_s6 = smov %s249_s7 }
  0x99   : > { %p7_p5 = scmp.ge.s32.totalorder %s10_s8, 10   ;;  %s305_s7 = smov %s307_s10 }
  0x9b   :  { %9 = sbr.rel (!%p7_p5) target bundleno = 7 (0x7), region = 118 }

// kernel: reverse.7
= control target key start
LH: loop header
LB: loop body
LE: loop exit
PB: predicated region body
PF: predicated region fallthrough
CT: control target
= control target key end

     0   :  { %v2_v0 = vlaneseq  ;;  %s318_s0 = inlined_call_operand.vmem [shape: f32[2,1024], index: 0, kind: input, shape index: {}]   ;;  %s319_s1 = inlined_call_operand.vmem [shape: f32[2,1024], index: 1, kind: output, shape index: {}]  }
   0x2   :  { %v3_v1 = vsub.s32 127, %v2_v0 }
   0x4   :  { %4 = vset.pattern.permute.xlu0 %v3_v1 }
   0x5   :  { %s278_s6 = smov 0   ;;  %s280_s7 = smov 0  }
   0x6   :  { %s282_s8 = smov 0  }
   0x7 LB: > { %s208_s9 = sadd.s32 4294967295, %s266_s8   ;;  %s19_s10 = sadd.s32 1, %s262_s7  ;;  %s266_s8 = sphi %s282_s8, %s10_s8   ;;  %s262_s7 = sphi %s280_s7, %s321_s7   ;;  %s258_s6 = sphi %s278_s6, %s320_s6  }
   0x8   : > { %p20_p0 = scmp.ge.s32.totalorder %s19_s10, 8  ;;  %p210_p1 = scmp.ge.s32.totalorder %s266_s8, 8 }
   0x9   : > { %s38_s11 = sand.u32 (!%p210_p1), 1, %s266_s8   ;;  %s41_s12 = ssub.s32 (!%p210_p1), 7, %s262_s7 }
   0xa   : > { %s323_s10 = smov (%p20_p0, %s19_s10), 0  ;;  %36 = sbr.rel (%p210_p1) target bundleno = 17 (0x11), region = 16 }
   0xb   : > { %s211_s13 = sshll.u32 (!%p210_p1), %s38_s11, 1  ;;  %s212_s14 = sshll.u32 (!%p210_p1), %s41_s12, 1 }
   0xc   : > { %s45_s17 = scalar_lea.vmem (!%p210_p1), %s318_s0, %s212_s14  ;;  %s40_s18 = scalar_lea.vmem (!%p210_p1), [#allocation1], %s211_s13 }
   0xf   : > { %v62_v2 = vld [vmem:[%s45_s17] sm:$0x3] }
  0x10   : > { %63 = vst [vmem:[%s40_s18] sm:$0x3] %v62_v2 }
  0x11 PF: > { %p213_p2 = scmp.ge.s32.totalorder %s266_s8, 1  ;;  %p80_p3 = scmp.lt.s32.totalorder %s266_s8, 9 }
  0x13   : > { %p81_p4 = pnand %p213_p2, %p80_p3 }
  0x14   : > { %s91_s19 = sand.u32 (!%p81_p4), 1, %s208_s9   ;;  %s217_s23 = sshll.u32 (!%p81_p4), %s258_s6, 1 }
  0x15   : > { %84 = sbr.rel (%p81_p4) target bundleno = 176 (0xb0), region = 50  ;;  %s214_s20 = sshll.u32 (!%p81_p4), %s91_s19, 1 }
  0x16   : > { %s93_s21 = scalar_lea.vmem (!%p81_p4), [#allocation1], %s214_s20  ;;  %s97_s22 = scalar_lea.vmem (!%p81_p4), [#allocation3], %s214_s20 }
  0x17   : > { %s123_s26 = scalar_lea.vmem (!%p81_p4), %s319_s1, %s217_s23 }
  0x1a   : > { %v101_v3 = vld [vmem:[%s93_s21] sm:$0x3] }
  0x1b   : > { %102 = vst [vmem:[#allocation0] sm:$0x3] %v101_v3 }
  0x22   : > { %v104_v4 = vld [vmem:[#allocation0] sm:$0xff] }
  0x23   : > { %105 = vperm.xlu0 %4, %v104_v4  }
  0x9e   : > { %v106_v5 = vpop.permute.xlu0 %105 }
  0x9f   : > { %107 = vst [vmem:[#allocation2] sm:$0xff] %v106_v5 }
  0xa6   : > { %v112_v6 = vld [vmem:[#allocation2] sm:$0x3] }
  0xa7   : > { %115 = vst [vmem:[%s97_s22] sm:$0x3] %v112_v6 }
  0xae   : > { %v140_v7 = vld [vmem:[%s97_s22] sm:$0x3] }
  0xaf   : > { %141 = vst [vmem:[%s123_s26] sm:$0x3] %v140_v7 }
  0xb0 PF: > { %s10_s8 = sadd.s32 1, %s266_s8   ;;  %s320_s6 = smov %s262_s7 }
  0xb1   : > { %p7_p5 = scmp.ge.s32.totalorder %s10_s8, 10   ;;  %s321_s7 = smov %s323_s10 }
  0xb3   :  { %9 = sbr.rel (!%p7_p5) target bundleno = 7 (0x7), region = 110 }

</bundles_post_ra>
